<compile_context>
chip_gen: v7x
topology: tpu7x:2x2x1
jax: 0.10.0
libtpu: 0.0.40
codegen_flags: <defaults>
</compile_context>

<pallas_src>
import numpy as np

import jax
import jax.numpy as jnp
from jax import lax
from jax.experimental import pallas as pl
from jax.experimental.pallas import tpu as pltpu

NEG_SLOPE = 0.01  # nn.LeakyReLU() default negative_slope


# ----------------------------------------------------------------------------
# In-kernel helpers (all plain 2-D elementwise / iota / MXU matmul ops)
# ----------------------------------------------------------------------------
def _lrelu(v):
    return jnp.where(v >= 0, v, v * NEG_SLOPE)


def _select_rows(v, start, n_rows):
    """Rows [start, start+n_rows) of v, extracted with an exact 0/1 selection matmul."""
    n_in = v.shape[0]
    r = lax.broadcasted_iota(jnp.int32, (n_rows, n_in), 0)
    c = lax.broadcasted_iota(jnp.int32, (n_rows, n_in), 1)
    sel = (c == r + start).astype(jnp.float32)
    return jnp.dot(sel, v, preferred_element_type=jnp.float32)


def _pool_rows(v):
    """(2R, C) -> (R, C): max over adjacent row pairs via two selection matmuls."""
    n_in = v.shape[0]
    n_out = n_in // 2
    r = lax.broadcasted_iota(jnp.int32, (n_out, n_in), 0)
    c = lax.broadcasted_iota(jnp.int32, (n_out, n_in), 1)
    p_even = (c == 2 * r).astype(jnp.float32)
    p_odd = (c == 2 * r + 1).astype(jnp.float32)
    return jnp.maximum(
        jnp.dot(p_even, v, preferred_element_type=jnp.float32),
        jnp.dot(p_odd, v, preferred_element_type=jnp.float32),
    )


# ----------------------------------------------------------------------------
# Fused kernel: one MNIST sample per grid step, everything in VMEM
# ----------------------------------------------------------------------------
def _fused_kernel(x_ref, m1_ref, b1_ref, m2_ref, b2_ref,
                  wfc1_ref, bfc1_ref, wfc2_ref, bfc2_ref, out_ref):
    x2d = x_ref[0]  # (28, 28)

    # ---- Conv2d(1, 32, 5) + LeakyReLU: width-lowered matmuls, output (24, 768) ----
    # columns = (wo parity half)*384 + (wo//2)*32 + c  -> lane-dense, pool-friendly
    y1 = jnp.dot(_select_rows(x2d, 0, 24), m1_ref[0],
                 preferred_element_type=jnp.float32)
    for ki in range(1, 5):
        y1 = y1 + jnp.dot(_select_rows(x2d, ki, 24), m1_ref[ki],
                          preferred_element_type=jnp.float32)
    y1 = _lrelu(y1 + b1_ref[...])

    # ---- MaxPool(2,2): width pool = max of the two aligned lane halves ----
    h1 = _pool_rows(jnp.maximum(y1[:, :384], y1[:, 384:]))  # (12, 12*32)

    # ---- Conv2d(32, 64, 5) + LeakyReLU: output (8, 512) ----
    y2 = jnp.dot(_select_rows(h1, 0, 8), m2_ref[0],
                 preferred_element_type=jnp.float32)
    for ki in range(1, 5):
        y2 = y2 + jnp.dot(_select_rows(h1, ki, 8), m2_ref[ki],
                          preferred_element_type=jnp.float32)
    y2 = _lrelu(y2 + b2_ref[...])

    # ---- MaxPool(2,2) ----
    h2 = _pool_rows(jnp.maximum(y2[:, :256], y2[:, 256:]))  # (4, 4*64)

    # ---- Flatten (NCHW order folded into wfc1 layout) + fc1 + LeakyReLU ----
    f1 = bfc1_ref[...]  # (1, 1024)
    for h in range(4):
        row = _select_rows(h2, h, 1)  # (1, 256), columns = w*64 + c
        f1 = f1 + jnp.dot(row, wfc1_ref[h], preferred_element_type=jnp.float32)
    f1 = _lrelu(f1)

    # ---- fc2: (1,1024) . (1,1024) -> scalar ----
    out = jnp.sum(f1 * wfc2_ref[...], axis=1, keepdims=True) + bfc2_ref[...]  # (1,1)
    out_ref[0] = out


# ----------------------------------------------------------------------------
# One-time weight lowering (pure XLA/numpy, done once outside the hot path)
# ----------------------------------------------------------------------------
def prepare_params(params):
    w1 = params["w1"].reshape(5, 5, 32)       # [ki, kj, c]
    w2 = params["w2"].reshape(5, 5, 32, 64)   # [ki, kj, ci, co]

    # 0/1 Toeplitz selectors: S[j, wo, kj] = 1 iff j == wo + kj
    s1 = np.zeros((28, 24, 5), np.float32)
    for wo in range(24):
        for kj in range(5):
            s1[wo + kj, wo, kj] = 1.0
    s2 = np.zeros((12, 8, 5), np.float32)
    for wo in range(8):
        for kj in range(5):
            s2[wo + kj, wo, kj] = 1.0

    # even output columns first, odd second -> width pooling is max(left, right half)
    perm1 = np.concatenate([np.arange(0, 24, 2), np.arange(1, 24, 2)])
    perm2 = np.concatenate([np.arange(0, 8, 2), np.arange(1, 8, 2)])

    m1 = jnp.einsum("jwk,ikc->ijwc", jnp.asarray(s1), w1)        # (5,28,24,32)
    m1 = m1[:, :, perm1, :].reshape(5, 28, 768)
    m2 = jnp.einsum("pwk,ikcd->ipcwd", jnp.asarray(s2), w2)      # (5,12,32,8,64)
    m2 = m2[:, :, :, perm2, :].reshape(5, 384, 512)

    # w_fc1[c*16 + h*4 + w, o]  ->  wfc1[h, w*64 + c, o]
    wfc1 = params["w_fc1"].reshape(64, 4, 4, 1024).transpose(1, 2, 0, 3)
    wfc1 = wfc1.reshape(4, 256, 1024)

    return {
        "m1": m1,
        "b1t": jnp.tile(params["b1"], 24).reshape(1, 768),
        "m2": m2,
        "b2t": jnp.tile(params["b2"], 8).reshape(1, 512),
        "wfc1": wfc1,
        "bfc1": params["b_fc1"].reshape(1, 1024),
        "wfc2": params["w_fc2"].reshape(1, 1024),
        "bfc2": params["b_fc2"].reshape(1, 1),
    }


# ----------------------------------------------------------------------------
# Forward pass: a single pallas_call
# ----------------------------------------------------------------------------
def dcgan_mnist_d_forward(x_flat, prep):
    n = x_flat.shape[0]
    x3 = x_flat.reshape(n, 28, 28)  # Unflatten(-1,1,28,28) with C=1

    out3 = pl.pallas_call(
        _fused_kernel,
        out_shape=jax.ShapeDtypeStruct((n, 1, 1), jnp.float32),
        grid=(n,),
        in_specs=[
            pl.BlockSpec((1, 28, 28), lambda i: (i, 0, 0)),      # x: one sample/step
            pl.BlockSpec((5, 28, 768), lambda i: (0, 0, 0)),     # lowered conv1 weight
            pl.BlockSpec((1, 768), lambda i: (0, 0)),            # conv1 bias (tiled)
            pl.BlockSpec((5, 384, 512), lambda i: (0, 0, 0)),    # lowered conv2 weight
            pl.BlockSpec((1, 512), lambda i: (0, 0)),            # conv2 bias (tiled)
            pl.BlockSpec((4, 256, 1024), lambda i: (0, 0, 0)),   # fc1 weight (permuted)
            pl.BlockSpec((1, 1024), lambda i: (0, 0)),           # fc1 bias
            pl.BlockSpec((1, 1024), lambda i: (0, 0)),           # fc2 weight (row)
            pl.BlockSpec((1, 1), lambda i: (0, 0)),              # fc2 bias
        ],
        out_specs=pl.BlockSpec((1, 1, 1), lambda i: (i, 0, 0)),
        compiler_params=pltpu.CompilerParams(
            dimension_semantics=("parallel",),
            vmem_limit_bytes=48 * 1024 * 1024,
        ),
    )(x3, prep["m1"], prep["b1t"], prep["m2"], prep["b2t"],
      prep["wfc1"], prep["bfc1"], prep["wfc2"], prep["bfc2"])

    return out3.reshape(n, 1)


# ----------------------------------------------------------------------------
# Pure-JAX reference (faithful f32 im2col implementation of the PyTorch module)
# ----------------------------------------------------------------------------
def im2col(x, k):
    """x: (N, H, W, C) -> (N, Ho, Wo, k*k*C); flat patch index = (kh*k + kw)*C + c."""
    n, h, w, c = x.shape
    ho, wo = h - k + 1, w - k + 1
    cols = []
    for ki in range(k):
        for kj in range(k):
            cols.append(x[:, ki:ki + ho, kj:kj + wo, :])
    return jnp.concatenate(cols, axis=-1)


def reference_forward(x_flat, params):
    n = x_flat.shape[0]
    x = x_flat.reshape(n, 1, 28, 28).transpose(0, 2, 3, 1)
    lrelu = lambda v: jnp.where(v >= 0, v, v * NEG_SLOPE)

    def pool(v):
        nn_, h, w, c = v.shape
        return v.reshape(nn_, h // 2, 2, w // 2, 2, c).max(axis=(2, 4))

    h = lrelu(im2col(x, 5).reshape(n * 576, 25) @ params["w1"] + params["b1"])
    h = pool(h.reshape(n, 24, 24, 32))
    h = lrelu(im2col(h, 5).reshape(n * 64, 800) @ params["w2"] + params["b2"])
    h = pool(h.reshape(n, 8, 8, 64))
    flat = h.transpose(0, 3, 1, 2).reshape(n, 1024)
    f1 = lrelu(flat @ params["w_fc1"] + params["b_fc1"])
    return f1 @ params["w_fc2"] + params["b_fc2"]


# ----------------------------------------------------------------------------
# Deterministic synthetic parameters + run
# ----------------------------------------------------------------------------
def init_params(key):
    ks = jax.random.split(key, 8)
    s = 0.05
    return {
        # conv1 weight as (kh*kw*cin, cout) = (25, 32); conv2 as (800, 64)
        "w1": jax.random.normal(ks[0], (25, 32), jnp.float32) * s,
        "b1": jax.random.normal(ks[1], (32,), jnp.float32) * s,
        "w2": jax.random.normal(ks[2], (800, 64), jnp.float32) * s,
        "b2": jax.random.normal(ks[3], (64,), jnp.float32) * s,
        # linear weights stored as (in, out)
        "w_fc1": jax.random.normal(ks[4], (1024, 1024), jnp.float32) * s,
        "b_fc1": jax.random.normal(ks[5], (1024,), jnp.float32) * s,
        "w_fc2": jax.random.normal(ks[6], (1024, 1), jnp.float32) * s,
        "b_fc2": jax.random.normal(ks[7], (1,), jnp.float32) * s,
    }


if __name__ == "__main__":
    key = jax.random.PRNGKey(0)
    k_params, k_x = jax.random.split(key)
    params = init_params(k_params)
    prep = prepare_params(params)          # one-time weight lowering

    batch = 2
    x = jax.random.normal(k_x, (batch, 28 * 28), jnp.float32)  # module expects (N, 784)

    out = jax.jit(dcgan_mnist_d_forward)(x, prep)
    out = jax.block_until_ready(out)

    ref = reference_forward(x, params)
    assert out.shape == (batch, 1), out.shape
    assert jnp.allclose(out, ref, atol=2e-3, rtol=2e-3), (out, ref)

    print("KERNEL_OK")
</pallas_src>

<mosaic_0001>
module attributes {stable_mosaic.version = 11 : i64} {
  func.func @_fused_kernel(%arg0: i32, %arg1: memref<1x28x28xf32, #tpu.memory_space<vmem>>, %arg2: memref<5x28x768xf32, #tpu.memory_space<vmem>>, %arg3: memref<1x768xf32, #tpu.memory_space<vmem>>, %arg4: memref<5x384x512xf32, #tpu.memory_space<vmem>>, %arg5: memref<1x512xf32, #tpu.memory_space<vmem>>, %arg6: memref<4x256x1024xf32, #tpu.memory_space<vmem>>, %arg7: memref<1x1024xf32, #tpu.memory_space<vmem>>, %arg8: memref<1x1024xf32, #tpu.memory_space<vmem>>, %arg9: memref<1x1xf32, #tpu.memory_space<vmem>>, %arg10: memref<1x1x1xf32, #tpu.memory_space<vmem>>) attributes {dimension_semantics = [#tpu.dimension_semantics<parallel>], iteration_bounds = array<i64: 2>, scalar_prefetch = 0 : i64, scratch_operands = 0 : i64, tpu.core_type = #tpu.core_type<tc>, window_params = [{transform_indices = @transform_0, window_bounds = array<i64: 1, 28, 28>}, {pipeline_mode = #tpu.pipeline_mode<synchronous>, transform_indices = @transform_1, window_bounds = array<i64: 5, 28, 768>}, {pipeline_mode = #tpu.pipeline_mode<synchronous>, transform_indices = @transform_2, window_bounds = array<i64: 1, 768>}, {pipeline_mode = #tpu.pipeline_mode<synchronous>, transform_indices = @transform_3, window_bounds = array<i64: 5, 384, 512>}, {pipeline_mode = #tpu.pipeline_mode<synchronous>, transform_indices = @transform_4, window_bounds = array<i64: 1, 512>}, {pipeline_mode = #tpu.pipeline_mode<synchronous>, transform_indices = @transform_5, window_bounds = array<i64: 4, 256, 1024>}, {pipeline_mode = #tpu.pipeline_mode<synchronous>, transform_indices = @transform_6, window_bounds = array<i64: 1, 1024>}, {pipeline_mode = #tpu.pipeline_mode<synchronous>, transform_indices = @transform_7, window_bounds = array<i64: 1, 1024>}, {pipeline_mode = #tpu.pipeline_mode<synchronous>, transform_indices = @transform_8, window_bounds = array<i64: 1, 1>}, {transform_indices = @transform_9, window_bounds = array<i64: 1, 1, 1>}]} {
    %c0 = arith.constant 0 : index
    %c0_0 = arith.constant 0 : index
    %c0_1 = arith.constant 0 : index
    %0 = vector.load %arg1[%c0, %c0_0, %c0_1] : memref<1x28x28xf32, #tpu.memory_space<vmem>>, vector<1x28x28xf32>
    %1 = vector.shape_cast %0 : vector<1x28x28xf32> to vector<28x28xf32>
    %2 = tpu.iota {dimensions = array<i32: 0>} : vector<24x28xi32>
    %3 = tpu.iota {dimensions = array<i32: 1>} : vector<24x28xi32>
    %c0_i32 = arith.constant 0 : i32
    %4 = vector.broadcast %c0_i32 : i32 to vector<24x28xi32>
    %5 = arith.addi %2, %4 : vector<24x28xi32>
    %6 = arith.cmpi eq, %3, %5 : vector<24x28xi32>
    %7 = arith.extui %6 : vector<24x28xi1> to vector<24x28xi32>
    %8 = arith.sitofp %7 : vector<24x28xi32> to vector<24x28xf32>
    %cst = arith.constant dense<0.000000e+00> : vector<24x28xf32>
    %9 = tpu.matmul %8, %1, %cst {dimension_numbers = #tpu.dot_dimension_numbers<[1], [0], [0], [1], [0, 0, 1, 1], [], []>} : vector<24x28xf32>, vector<28x28xf32>, vector<24x28xf32> -> vector<24x28xf32>
    %c0_2 = arith.constant 0 : index
    %c0_3 = arith.constant 0 : index
    %c0_4 = arith.constant 0 : index
    %10 = vector.load %arg2[%c0_2, %c0_3, %c0_4] : memref<5x28x768xf32, #tpu.memory_space<vmem>>, vector<1x28x768xf32>
    %11 = vector.shape_cast %10 : vector<1x28x768xf32> to vector<28x768xf32>
    %cst_5 = arith.constant dense<0.000000e+00> : vector<24x768xf32>
    %12 = tpu.matmul %9, %11, %cst_5 {dimension_numbers = #tpu.dot_dimension_numbers<[1], [0], [0], [1], [0, 0, 1, 1], [], []>} : vector<24x28xf32>, vector<28x768xf32>, vector<24x768xf32> -> vector<24x768xf32>
    %13 = tpu.iota {dimensions = array<i32: 0>} : vector<24x28xi32>
    %14 = tpu.iota {dimensions = array<i32: 1>} : vector<24x28xi32>
    %c1_i32 = arith.constant 1 : i32
    %15 = vector.broadcast %c1_i32 : i32 to vector<24x28xi32>
    %16 = arith.addi %13, %15 : vector<24x28xi32>
    %17 = arith.cmpi eq, %14, %16 : vector<24x28xi32>
    %18 = arith.extui %17 : vector<24x28xi1> to vector<24x28xi32>
    %19 = arith.sitofp %18 : vector<24x28xi32> to vector<24x28xf32>
    %cst_6 = arith.constant dense<0.000000e+00> : vector<24x28xf32>
    %20 = tpu.matmul %19, %1, %cst_6 {dimension_numbers = #tpu.dot_dimension_numbers<[1], [0], [0], [1], [0, 0, 1, 1], [], []>} : vector<24x28xf32>, vector<28x28xf32>, vector<24x28xf32> -> vector<24x28xf32>
    %c1 = arith.constant 1 : index
    %c0_7 = arith.constant 0 : index
    %c0_8 = arith.constant 0 : index
    %21 = vector.load %arg2[%c1, %c0_7, %c0_8] : memref<5x28x768xf32, #tpu.memory_space<vmem>>, vector<1x28x768xf32>
    %22 = vector.shape_cast %21 : vector<1x28x768xf32> to vector<28x768xf32>
    %cst_9 = arith.constant dense<0.000000e+00> : vector<24x768xf32>
    %23 = tpu.matmul %20, %22, %cst_9 {dimension_numbers = #tpu.dot_dimension_numbers<[1], [0], [0], [1], [0, 0, 1, 1], [], []>} : vector<24x28xf32>, vector<28x768xf32>, vector<24x768xf32> -> vector<24x768xf32>
    %24 = arith.addf %12, %23 : vector<24x768xf32>
    %25 = tpu.iota {dimensions = array<i32: 0>} : vector<24x28xi32>
    %26 = tpu.iota {dimensions = array<i32: 1>} : vector<24x28xi32>
    %c2_i32 = arith.constant 2 : i32
    %27 = vector.broadcast %c2_i32 : i32 to vector<24x28xi32>
    %28 = arith.addi %25, %27 : vector<24x28xi32>
    %29 = arith.cmpi eq, %26, %28 : vector<24x28xi32>
    %30 = arith.extui %29 : vector<24x28xi1> to vector<24x28xi32>
    %31 = arith.sitofp %30 : vector<24x28xi32> to vector<24x28xf32>
    %cst_10 = arith.constant dense<0.000000e+00> : vector<24x28xf32>
    %32 = tpu.matmul %31, %1, %cst_10 {dimension_numbers = #tpu.dot_dimension_numbers<[1], [0], [0], [1], [0, 0, 1, 1], [], []>} : vector<24x28xf32>, vector<28x28xf32>, vector<24x28xf32> -> vector<24x28xf32>
    %c2 = arith.constant 2 : index
    %c0_11 = arith.constant 0 : index
    %c0_12 = arith.constant 0 : index
    %33 = vector.load %arg2[%c2, %c0_11, %c0_12] : memref<5x28x768xf32, #tpu.memory_space<vmem>>, vector<1x28x768xf32>
    %34 = vector.shape_cast %33 : vector<1x28x768xf32> to vector<28x768xf32>
    %cst_13 = arith.constant dense<0.000000e+00> : vector<24x768xf32>
    %35 = tpu.matmul %32, %34, %cst_13 {dimension_numbers = #tpu.dot_dimension_numbers<[1], [0], [0], [1], [0, 0, 1, 1], [], []>} : vector<24x28xf32>, vector<28x768xf32>, vector<24x768xf32> -> vector<24x768xf32>
    %36 = arith.addf %24, %35 : vector<24x768xf32>
    %37 = tpu.iota {dimensions = array<i32: 0>} : vector<24x28xi32>
    %38 = tpu.iota {dimensions = array<i32: 1>} : vector<24x28xi32>
    %c3_i32 = arith.constant 3 : i32
    %39 = vector.broadcast %c3_i32 : i32 to vector<24x28xi32>
    %40 = arith.addi %37, %39 : vector<24x28xi32>
    %41 = arith.cmpi eq, %38, %40 : vector<24x28xi32>
    %42 = arith.extui %41 : vector<24x28xi1> to vector<24x28xi32>
    %43 = arith.sitofp %42 : vector<24x28xi32> to vector<24x28xf32>
    %cst_14 = arith.constant dense<0.000000e+00> : vector<24x28xf32>
    %44 = tpu.matmul %43, %1, %cst_14 {dimension_numbers = #tpu.dot_dimension_numbers<[1], [0], [0], [1], [0, 0, 1, 1], [], []>} : vector<24x28xf32>, vector<28x28xf32>, vector<24x28xf32> -> vector<24x28xf32>
    %c3 = arith.constant 3 : index
    %c0_15 = arith.constant 0 : index
    %c0_16 = arith.constant 0 : index
    %45 = vector.load %arg2[%c3, %c0_15, %c0_16] : memref<5x28x768xf32, #tpu.memory_space<vmem>>, vector<1x28x768xf32>
    %46 = vector.shape_cast %45 : vector<1x28x768xf32> to vector<28x768xf32>
    %cst_17 = arith.constant dense<0.000000e+00> : vector<24x768xf32>
    %47 = tpu.matmul %44, %46, %cst_17 {dimension_numbers = #tpu.dot_dimension_numbers<[1], [0], [0], [1], [0, 0, 1, 1], [], []>} : vector<24x28xf32>, vector<28x768xf32>, vector<24x768xf32> -> vector<24x768xf32>
    %48 = arith.addf %36, %47 : vector<24x768xf32>
    %49 = tpu.iota {dimensions = array<i32: 0>} : vector<24x28xi32>
    %50 = tpu.iota {dimensions = array<i32: 1>} : vector<24x28xi32>
    %c4_i32 = arith.constant 4 : i32
    %51 = vector.broadcast %c4_i32 : i32 to vector<24x28xi32>
    %52 = arith.addi %49, %51 : vector<24x28xi32>
    %53 = arith.cmpi eq, %50, %52 : vector<24x28xi32>
    %54 = arith.extui %53 : vector<24x28xi1> to vector<24x28xi32>
    %55 = arith.sitofp %54 : vector<24x28xi32> to vector<24x28xf32>
    %cst_18 = arith.constant dense<0.000000e+00> : vector<24x28xf32>
    %56 = tpu.matmul %55, %1, %cst_18 {dimension_numbers = #tpu.dot_dimension_numbers<[1], [0], [0], [1], [0, 0, 1, 1], [], []>} : vector<24x28xf32>, vector<28x28xf32>, vector<24x28xf32> -> vector<24x28xf32>
    %c4 = arith.constant 4 : index
    %c0_19 = arith.constant 0 : index
    %c0_20 = arith.constant 0 : index
    %57 = vector.load %arg2[%c4, %c0_19, %c0_20] : memref<5x28x768xf32, #tpu.memory_space<vmem>>, vector<1x28x768xf32>
    %58 = vector.shape_cast %57 : vector<1x28x768xf32> to vector<28x768xf32>
    %cst_21 = arith.constant dense<0.000000e+00> : vector<24x768xf32>
    %59 = tpu.matmul %56, %58, %cst_21 {dimension_numbers = #tpu.dot_dimension_numbers<[1], [0], [0], [1], [0, 0, 1, 1], [], []>} : vector<24x28xf32>, vector<28x768xf32>, vector<24x768xf32> -> vector<24x768xf32>
    %60 = arith.addf %48, %59 : vector<24x768xf32>
    %c0_22 = arith.constant 0 : index
    %c0_23 = arith.constant 0 : index
    %61 = vector.load %arg3[%c0_22, %c0_23] : memref<1x768xf32, #tpu.memory_space<vmem>>, vector<1x768xf32>
    %62 = vector.broadcast %61 : vector<1x768xf32> to vector<24x768xf32>
    %63 = arith.addf %60, %62 : vector<24x768xf32>
    %cst_24 = arith.constant 0.000000e+00 : f32
    %64 = vector.broadcast %cst_24 : f32 to vector<24x768xf32>
    %65 = arith.cmpf oge, %63, %64 : vector<24x768xf32>
    %cst_25 = arith.constant 0.00999999977 : f32
    %66 = vector.broadcast %cst_25 : f32 to vector<24x768xf32>
    %67 = arith.mulf %63, %66 : vector<24x768xf32>
    %68 = arith.select %65, %63, %67 : vector<24x768xi1>, vector<24x768xf32>
    %69 = vector.extract_strided_slice %68 {offsets = [0, 0], sizes = [24, 384], strides = [1, 1]} : vector<24x768xf32> to vector<24x384xf32>
    %70 = vector.extract_strided_slice %68 {offsets = [0, 384], sizes = [24, 384], strides = [1, 1]} : vector<24x768xf32> to vector<24x384xf32>
    %71 = arith.maximumf %69, %70 : vector<24x384xf32>
    %72 = tpu.iota {dimensions = array<i32: 0>} : vector<12x24xi32>
    %73 = tpu.iota {dimensions = array<i32: 1>} : vector<12x24xi32>
    %c2_i32_26 = arith.constant 2 : i32
    %74 = vector.broadcast %c2_i32_26 : i32 to vector<12x24xi32>
    %75 = arith.muli %74, %72 : vector<12x24xi32>
    %76 = arith.cmpi eq, %73, %75 : vector<12x24xi32>
    %77 = arith.extui %76 : vector<12x24xi1> to vector<12x24xi32>
    %78 = arith.sitofp %77 : vector<12x24xi32> to vector<12x24xf32>
    %c2_i32_27 = arith.constant 2 : i32
    %79 = vector.broadcast %c2_i32_27 : i32 to vector<12x24xi32>
    %80 = arith.muli %79, %72 : vector<12x24xi32>
    %c1_i32_28 = arith.constant 1 : i32
    %81 = vector.broadcast %c1_i32_28 : i32 to vector<12x24xi32>
    %82 = arith.addi %80, %81 : vector<12x24xi32>
    %83 = arith.cmpi eq, %73, %82 : vector<12x24xi32>
    %84 = arith.extui %83 : vector<12x24xi1> to vector<12x24xi32>
    %85 = arith.sitofp %84 : vector<12x24xi32> to vector<12x24xf32>
    %cst_29 = arith.constant dense<0.000000e+00> : vector<12x384xf32>
    %86 = tpu.matmul %78, %71, %cst_29 {dimension_numbers = #tpu.dot_dimension_numbers<[1], [0], [0], [1], [0, 0, 1, 1], [], []>} : vector<12x24xf32>, vector<24x384xf32>, vector<12x384xf32> -> vector<12x384xf32>
    %cst_30 = arith.constant dense<0.000000e+00> : vector<12x384xf32>
    %87 = tpu.matmul %85, %71, %cst_30 {dimension_numbers = #tpu.dot_dimension_numbers<[1], [0], [0], [1], [0, 0, 1, 1], [], []>} : vector<12x24xf32>, vector<24x384xf32>, vector<12x384xf32> -> vector<12x384xf32>
    %88 = arith.maximumf %86, %87 : vector<12x384xf32>
    %89 = tpu.iota {dimensions = array<i32: 0>} : vector<8x12xi32>
    %90 = tpu.iota {dimensions = array<i32: 1>} : vector<8x12xi32>
    %c0_i32_31 = arith.constant 0 : i32
    %91 = vector.broadcast %c0_i32_31 : i32 to vector<8x12xi32>
    %92 = arith.addi %89, %91 : vector<8x12xi32>
    %93 = arith.cmpi eq, %90, %92 : vector<8x12xi32>
    %94 = arith.extui %93 : vector<8x12xi1> to vector<8x12xi32>
    %95 = arith.sitofp %94 : vector<8x12xi32> to vector<8x12xf32>
    %cst_32 = arith.constant dense<0.000000e+00> : vector<8x384xf32>
    %96 = tpu.matmul %95, %88, %cst_32 {dimension_numbers = #tpu.dot_dimension_numbers<[1], [0], [0], [1], [0, 0, 1, 1], [], []>} : vector<8x12xf32>, vector<12x384xf32>, vector<8x384xf32> -> vector<8x384xf32>
    %c0_33 = arith.constant 0 : index
    %c0_34 = arith.constant 0 : index
    %c0_35 = arith.constant 0 : index
    %97 = vector.load %arg4[%c0_33, %c0_34, %c0_35] : memref<5x384x512xf32, #tpu.memory_space<vmem>>, vector<1x384x512xf32>
    %98 = vector.shape_cast %97 : vector<1x384x512xf32> to vector<384x512xf32>
    %cst_36 = arith.constant dense<0.000000e+00> : vector<8x512xf32>
    %99 = tpu.matmul %96, %98, %cst_36 {dimension_numbers = #tpu.dot_dimension_numbers<[1], [0], [0], [1], [0, 0, 1, 1], [], []>} : vector<8x384xf32>, vector<384x512xf32>, vector<8x512xf32> -> vector<8x512xf32>
    %100 = tpu.iota {dimensions = array<i32: 0>} : vector<8x12xi32>
    %101 = tpu.iota {dimensions = array<i32: 1>} : vector<8x12xi32>
    %c1_i32_37 = arith.constant 1 : i32
    %102 = vector.broadcast %c1_i32_37 : i32 to vector<8x12xi32>
    %103 = arith.addi %100, %102 : vector<8x12xi32>
    %104 = arith.cmpi eq, %101, %103 : vector<8x12xi32>
    %105 = arith.extui %104 : vector<8x12xi1> to vector<8x12xi32>
    %106 = arith.sitofp %105 : vector<8x12xi32> to vector<8x12xf32>
    %cst_38 = arith.constant dense<0.000000e+00> : vector<8x384xf32>
    %107 = tpu.matmul %106, %88, %cst_38 {dimension_numbers = #tpu.dot_dimension_numbers<[1], [0], [0], [1], [0, 0, 1, 1], [], []>} : vector<8x12xf32>, vector<12x384xf32>, vector<8x384xf32> -> vector<8x384xf32>
    %c1_39 = arith.constant 1 : index
    %c0_40 = arith.constant 0 : index
    %c0_41 = arith.constant 0 : index
    %108 = vector.load %arg4[%c1_39, %c0_40, %c0_41] : memref<5x384x512xf32, #tpu.memory_space<vmem>>, vector<1x384x512xf32>
    %109 = vector.shape_cast %108 : vector<1x384x512xf32> to vector<384x512xf32>
    %cst_42 = arith.constant dense<0.000000e+00> : vector<8x512xf32>
    %110 = tpu.matmul %107, %109, %cst_42 {dimension_numbers = #tpu.dot_dimension_numbers<[1], [0], [0], [1], [0, 0, 1, 1], [], []>} : vector<8x384xf32>, vector<384x512xf32>, vector<8x512xf32> -> vector<8x512xf32>
    %111 = arith.addf %99, %110 : vector<8x512xf32>
    %112 = tpu.iota {dimensions = array<i32: 0>} : vector<8x12xi32>
    %113 = tpu.iota {dimensions = array<i32: 1>} : vector<8x12xi32>
    %c2_i32_43 = arith.constant 2 : i32
    %114 = vector.broadcast %c2_i32_43 : i32 to vector<8x12xi32>
    %115 = arith.addi %112, %114 : vector<8x12xi32>
    %116 = arith.cmpi eq, %113, %115 : vector<8x12xi32>
    %117 = arith.extui %116 : vector<8x12xi1> to vector<8x12xi32>
    %118 = arith.sitofp %117 : vector<8x12xi32> to vector<8x12xf32>
    %cst_44 = arith.constant dense<0.000000e+00> : vector<8x384xf32>
    %119 = tpu.matmul %118, %88, %cst_44 {dimension_numbers = #tpu.dot_dimension_numbers<[1], [0], [0], [1], [0, 0, 1, 1], [], []>} : vector<8x12xf32>, vector<12x384xf32>, vector<8x384xf32> -> vector<8x384xf32>
    %c2_45 = arith.constant 2 : index
    %c0_46 = arith.constant 0 : index
    %c0_47 = arith.constant 0 : index
    %120 = vector.load %arg4[%c2_45, %c0_46, %c0_47] : memref<5x384x512xf32, #tpu.memory_space<vmem>>, vector<1x384x512xf32>
    %121 = vector.shape_cast %120 : vector<1x384x512xf32> to vector<384x512xf32>
    %cst_48 = arith.constant dense<0.000000e+00> : vector<8x512xf32>
    %122 = tpu.matmul %119, %121, %cst_48 {dimension_numbers = #tpu.dot_dimension_numbers<[1], [0], [0], [1], [0, 0, 1, 1], [], []>} : vector<8x384xf32>, vector<384x512xf32>, vector<8x512xf32> -> vector<8x512xf32>
    %123 = arith.addf %111, %122 : vector<8x512xf32>
    %124 = tpu.iota {dimensions = array<i32: 0>} : vector<8x12xi32>
    %125 = tpu.iota {dimensions = array<i32: 1>} : vector<8x12xi32>
    %c3_i32_49 = arith.constant 3 : i32
    %126 = vector.broadcast %c3_i32_49 : i32 to vector<8x12xi32>
    %127 = arith.addi %124, %126 : vector<8x12xi32>
    %128 = arith.cmpi eq, %125, %127 : vector<8x12xi32>
    %129 = arith.extui %128 : vector<8x12xi1> to vector<8x12xi32>
    %130 = arith.sitofp %129 : vector<8x12xi32> to vector<8x12xf32>
    %cst_50 = arith.constant dense<0.000000e+00> : vector<8x384xf32>
    %131 = tpu.matmul %130, %88, %cst_50 {dimension_numbers = #tpu.dot_dimension_numbers<[1], [0], [0], [1], [0, 0, 1, 1], [], []>} : vector<8x12xf32>, vector<12x384xf32>, vector<8x384xf32> -> vector<8x384xf32>
    %c3_51 = arith.constant 3 : index
    %c0_52 = arith.constant 0 : index
    %c0_53 = arith.constant 0 : index
    %132 = vector.load %arg4[%c3_51, %c0_52, %c0_53] : memref<5x384x512xf32, #tpu.memory_space<vmem>>, vector<1x384x512xf32>
    %133 = vector.shape_cast %132 : vector<1x384x512xf32> to vector<384x512xf32>
    %cst_54 = arith.constant dense<0.000000e+00> : vector<8x512xf32>
    %134 = tpu.matmul %131, %133, %cst_54 {dimension_numbers = #tpu.dot_dimension_numbers<[1], [0], [0], [1], [0, 0, 1, 1], [], []>} : vector<8x384xf32>, vector<384x512xf32>, vector<8x512xf32> -> vector<8x512xf32>
    %135 = arith.addf %123, %134 : vector<8x512xf32>
    %136 = tpu.iota {dimensions = array<i32: 0>} : vector<8x12xi32>
    %137 = tpu.iota {dimensions = array<i32: 1>} : vector<8x12xi32>
    %c4_i32_55 = arith.constant 4 : i32
    %138 = vector.broadcast %c4_i32_55 : i32 to vector<8x12xi32>
    %139 = arith.addi %136, %138 : vector<8x12xi32>
    %140 = arith.cmpi eq, %137, %139 : vector<8x12xi32>
    %141 = arith.extui %140 : vector<8x12xi1> to vector<8x12xi32>
    %142 = arith.sitofp %141 : vector<8x12xi32> to vector<8x12xf32>
    %cst_56 = arith.constant dense<0.000000e+00> : vector<8x384xf32>
    %143 = tpu.matmul %142, %88, %cst_56 {dimension_numbers = #tpu.dot_dimension_numbers<[1], [0], [0], [1], [0, 0, 1, 1], [], []>} : vector<8x12xf32>, vector<12x384xf32>, vector<8x384xf32> -> vector<8x384xf32>
    %c4_57 = arith.constant 4 : index
    %c0_58 = arith.constant 0 : index
    %c0_59 = arith.constant 0 : index
    %144 = vector.load %arg4[%c4_57, %c0_58, %c0_59] : memref<5x384x512xf32, #tpu.memory_space<vmem>>, vector<1x384x512xf32>
    %145 = vector.shape_cast %144 : vector<1x384x512xf32> to vector<384x512xf32>
    %cst_60 = arith.constant dense<0.000000e+00> : vector<8x512xf32>
    %146 = tpu.matmul %143, %145, %cst_60 {dimension_numbers = #tpu.dot_dimension_numbers<[1], [0], [0], [1], [0, 0, 1, 1], [], []>} : vector<8x384xf32>, vector<384x512xf32>, vector<8x512xf32> -> vector<8x512xf32>
    %147 = arith.addf %135, %146 : vector<8x512xf32>
    %c0_61 = arith.constant 0 : index
    %c0_62 = arith.constant 0 : index
    %148 = vector.load %arg5[%c0_61, %c0_62] : memref<1x512xf32, #tpu.memory_space<vmem>>, vector<1x512xf32>
    %149 = vector.broadcast %148 : vector<1x512xf32> to vector<8x512xf32>
    %150 = arith.addf %147, %149 : vector<8x512xf32>
    %cst_63 = arith.constant 0.000000e+00 : f32
    %151 = vector.broadcast %cst_63 : f32 to vector<8x512xf32>
    %152 = arith.cmpf oge, %150, %151 : vector<8x512xf32>
    %cst_64 = arith.constant 0.00999999977 : f32
    %153 = vector.broadcast %cst_64 : f32 to vector<8x512xf32>
    %154 = arith.mulf %150, %153 : vector<8x512xf32>
    %155 = arith.select %152, %150, %154 : vector<8x512xi1>, vector<8x512xf32>
    %156 = vector.extract_strided_slice %155 {offsets = [0, 0], sizes = [8, 256], strides = [1, 1]} : vector<8x512xf32> to vector<8x256xf32>
    %157 = vector.extract_strided_slice %155 {offsets = [0, 256], sizes = [8, 256], strides = [1, 1]} : vector<8x512xf32> to vector<8x256xf32>
    %158 = arith.maximumf %156, %157 : vector<8x256xf32>
    %159 = tpu.iota {dimensions = array<i32: 0>} : vector<4x8xi32>
    %160 = tpu.iota {dimensions = array<i32: 1>} : vector<4x8xi32>
    %c2_i32_65 = arith.constant 2 : i32
    %161 = vector.broadcast %c2_i32_65 : i32 to vector<4x8xi32>
    %162 = arith.muli %161, %159 : vector<4x8xi32>
    %163 = arith.cmpi eq, %160, %162 : vector<4x8xi32>
    %164 = arith.extui %163 : vector<4x8xi1> to vector<4x8xi32>
    %165 = arith.sitofp %164 : vector<4x8xi32> to vector<4x8xf32>
    %c2_i32_66 = arith.constant 2 : i32
    %166 = vector.broadcast %c2_i32_66 : i32 to vector<4x8xi32>
    %167 = arith.muli %166, %159 : vector<4x8xi32>
    %c1_i32_67 = arith.constant 1 : i32
    %168 = vector.broadcast %c1_i32_67 : i32 to vector<4x8xi32>
    %169 = arith.addi %167, %168 : vector<4x8xi32>
    %170 = arith.cmpi eq, %160, %169 : vector<4x8xi32>
    %171 = arith.extui %170 : vector<4x8xi1> to vector<4x8xi32>
    %172 = arith.sitofp %171 : vector<4x8xi32> to vector<4x8xf32>
    %cst_68 = arith.constant dense<0.000000e+00> : vector<4x256xf32>
    %173 = tpu.matmul %165, %158, %cst_68 {dimension_numbers = #tpu.dot_dimension_numbers<[1], [0], [0], [1], [0, 0, 1, 1], [], []>} : vector<4x8xf32>, vector<8x256xf32>, vector<4x256xf32> -> vector<4x256xf32>
    %cst_69 = arith.constant dense<0.000000e+00> : vector<4x256xf32>
    %174 = tpu.matmul %172, %158, %cst_69 {dimension_numbers = #tpu.dot_dimension_numbers<[1], [0], [0], [1], [0, 0, 1, 1], [], []>} : vector<4x8xf32>, vector<8x256xf32>, vector<4x256xf32> -> vector<4x256xf32>
    %175 = arith.maximumf %173, %174 : vector<4x256xf32>
    %c0_70 = arith.constant 0 : index
    %c0_71 = arith.constant 0 : index
    %176 = vector.load %arg7[%c0_70, %c0_71] : memref<1x1024xf32, #tpu.memory_space<vmem>>, vector<1x1024xf32>
    %177 = tpu.iota {dimensions = array<i32: 0>} : vector<1x4xi32>
    %178 = tpu.iota {dimensions = array<i32: 1>} : vector<1x4xi32>
    %c0_i32_72 = arith.constant 0 : i32
    %179 = vector.broadcast %c0_i32_72 : i32 to vector<1x4xi32>
    %180 = arith.addi %177, %179 : vector<1x4xi32>
    %181 = arith.cmpi eq, %178, %180 : vector<1x4xi32>
    %182 = arith.extui %181 : vector<1x4xi1> to vector<1x4xi32>
    %183 = arith.sitofp %182 : vector<1x4xi32> to vector<1x4xf32>
    %cst_73 = arith.constant dense<0.000000e+00> : vector<1x256xf32>
    %184 = tpu.matmul %183, %175, %cst_73 {dimension_numbers = #tpu.dot_dimension_numbers<[1], [0], [0], [1], [0, 0, 1, 1], [], []>} : vector<1x4xf32>, vector<4x256xf32>, vector<1x256xf32> -> vector<1x256xf32>
    %c0_74 = arith.constant 0 : index
    %c0_75 = arith.constant 0 : index
    %c0_76 = arith.constant 0 : index
    %185 = vector.load %arg6[%c0_74, %c0_75, %c0_76] : memref<4x256x1024xf32, #tpu.memory_space<vmem>>, vector<1x256x1024xf32>
    %186 = vector.shape_cast %185 : vector<1x256x1024xf32> to vector<256x1024xf32>
    %cst_77 = arith.constant dense<0.000000e+00> : vector<1x1024xf32>
    %187 = tpu.matmul %184, %186, %cst_77 {dimension_numbers = #tpu.dot_dimension_numbers<[1], [0], [0], [1], [0, 0, 1, 1], [], []>} : vector<1x256xf32>, vector<256x1024xf32>, vector<1x1024xf32> -> vector<1x1024xf32>
    %188 = arith.addf %176, %187 : vector<1x1024xf32>
    %189 = tpu.iota {dimensions = array<i32: 0>} : vector<1x4xi32>
    %190 = tpu.iota {dimensions = array<i32: 1>} : vector<1x4xi32>
    %c1_i32_78 = arith.constant 1 : i32
    %191 = vector.broadcast %c1_i32_78 : i32 to vector<1x4xi32>
    %192 = arith.addi %189, %191 : vector<1x4xi32>
    %193 = arith.cmpi eq, %190, %192 : vector<1x4xi32>
    %194 = arith.extui %193 : vector<1x4xi1> to vector<1x4xi32>
    %195 = arith.sitofp %194 : vector<1x4xi32> to vector<1x4xf32>
    %cst_79 = arith.constant dense<0.000000e+00> : vector<1x256xf32>
    %196 = tpu.matmul %195, %175, %cst_79 {dimension_numbers = #tpu.dot_dimension_numbers<[1], [0], [0], [1], [0, 0, 1, 1], [], []>} : vector<1x4xf32>, vector<4x256xf32>, vector<1x256xf32> -> vector<1x256xf32>
    %c1_80 = arith.constant 1 : index
    %c0_81 = arith.constant 0 : index
    %c0_82 = arith.constant 0 : index
    %197 = vector.load %arg6[%c1_80, %c0_81, %c0_82] : memref<4x256x1024xf32, #tpu.memory_space<vmem>>, vector<1x256x1024xf32>
    %198 = vector.shape_cast %197 : vector<1x256x1024xf32> to vector<256x1024xf32>
    %cst_83 = arith.constant dense<0.000000e+00> : vector<1x1024xf32>
    %199 = tpu.matmul %196, %198, %cst_83 {dimension_numbers = #tpu.dot_dimension_numbers<[1], [0], [0], [1], [0, 0, 1, 1], [], []>} : vector<1x256xf32>, vector<256x1024xf32>, vector<1x1024xf32> -> vector<1x1024xf32>
    %200 = arith.addf %188, %199 : vector<1x1024xf32>
    %201 = tpu.iota {dimensions = array<i32: 0>} : vector<1x4xi32>
    %202 = tpu.iota {dimensions = array<i32: 1>} : vector<1x4xi32>
    %c2_i32_84 = arith.constant 2 : i32
    %203 = vector.broadcast %c2_i32_84 : i32 to vector<1x4xi32>
    %204 = arith.addi %201, %203 : vector<1x4xi32>
    %205 = arith.cmpi eq, %202, %204 : vector<1x4xi32>
    %206 = arith.extui %205 : vector<1x4xi1> to vector<1x4xi32>
    %207 = arith.sitofp %206 : vector<1x4xi32> to vector<1x4xf32>
    %cst_85 = arith.constant dense<0.000000e+00> : vector<1x256xf32>
    %208 = tpu.matmul %207, %175, %cst_85 {dimension_numbers = #tpu.dot_dimension_numbers<[1], [0], [0], [1], [0, 0, 1, 1], [], []>} : vector<1x4xf32>, vector<4x256xf32>, vector<1x256xf32> -> vector<1x256xf32>
    %c2_86 = arith.constant 2 : index
    %c0_87 = arith.constant 0 : index
    %c0_88 = arith.constant 0 : index
    %209 = vector.load %arg6[%c2_86, %c0_87, %c0_88] : memref<4x256x1024xf32, #tpu.memory_space<vmem>>, vector<1x256x1024xf32>
    %210 = vector.shape_cast %209 : vector<1x256x1024xf32> to vector<256x1024xf32>
    %cst_89 = arith.constant dense<0.000000e+00> : vector<1x1024xf32>
    %211 = tpu.matmul %208, %210, %cst_89 {dimension_numbers = #tpu.dot_dimension_numbers<[1], [0], [0], [1], [0, 0, 1, 1], [], []>} : vector<1x256xf32>, vector<256x1024xf32>, vector<1x1024xf32> -> vector<1x1024xf32>
    %212 = arith.addf %200, %211 : vector<1x1024xf32>
    %213 = tpu.iota {dimensions = array<i32: 0>} : vector<1x4xi32>
    %214 = tpu.iota {dimensions = array<i32: 1>} : vector<1x4xi32>
    %c3_i32_90 = arith.constant 3 : i32
    %215 = vector.broadcast %c3_i32_90 : i32 to vector<1x4xi32>
    %216 = arith.addi %213, %215 : vector<1x4xi32>
    %217 = arith.cmpi eq, %214, %216 : vector<1x4xi32>
    %218 = arith.extui %217 : vector<1x4xi1> to vector<1x4xi32>
    %219 = arith.sitofp %218 : vector<1x4xi32> to vector<1x4xf32>
    %cst_91 = arith.constant dense<0.000000e+00> : vector<1x256xf32>
    %220 = tpu.matmul %219, %175, %cst_91 {dimension_numbers = #tpu.dot_dimension_numbers<[1], [0], [0], [1], [0, 0, 1, 1], [], []>} : vector<1x4xf32>, vector<4x256xf32>, vector<1x256xf32> -> vector<1x256xf32>
    %c3_92 = arith.constant 3 : index
    %c0_93 = arith.constant 0 : index
    %c0_94 = arith.constant 0 : index
    %221 = vector.load %arg6[%c3_92, %c0_93, %c0_94] : memref<4x256x1024xf32, #tpu.memory_space<vmem>>, vector<1x256x1024xf32>
    %222 = vector.shape_cast %221 : vector<1x256x1024xf32> to vector<256x1024xf32>
    %cst_95 = arith.constant dense<0.000000e+00> : vector<1x1024xf32>
    %223 = tpu.matmul %220, %222, %cst_95 {dimension_numbers = #tpu.dot_dimension_numbers<[1], [0], [0], [1], [0, 0, 1, 1], [], []>} : vector<1x256xf32>, vector<256x1024xf32>, vector<1x1024xf32> -> vector<1x1024xf32>
    %224 = arith.addf %212, %223 : vector<1x1024xf32>
    %cst_96 = arith.constant 0.000000e+00 : f32
    %225 = vector.broadcast %cst_96 : f32 to vector<1x1024xf32>
    %226 = arith.cmpf oge, %224, %225 : vector<1x1024xf32>
    %cst_97 = arith.constant 0.00999999977 : f32
    %227 = vector.broadcast %cst_97 : f32 to vector<1x1024xf32>
    %228 = arith.mulf %224, %227 : vector<1x1024xf32>
    %229 = arith.select %226, %224, %228 : vector<1x1024xi1>, vector<1x1024xf32>
    %c0_98 = arith.constant 0 : index
    %c0_99 = arith.constant 0 : index
    %230 = vector.load %arg8[%c0_98, %c0_99] : memref<1x1024xf32, #tpu.memory_space<vmem>>, vector<1x1024xf32>
    %231 = arith.mulf %229, %230 : vector<1x1024xf32>
    %cst_100 = arith.constant dense<0.000000e+00> : vector<1xf32>
    %232 = vector.multi_reduction <add>, %231, %cst_100 [1] : vector<1x1024xf32> to vector<1xf32>
    %233 = vector.shape_cast %232 : vector<1xf32> to vector<1x1xf32>
    %c0_101 = arith.constant 0 : index
    %c0_102 = arith.constant 0 : index
    %234 = vector.load %arg9[%c0_101, %c0_102] : memref<1x1xf32, #tpu.memory_space<vmem>>, vector<1x1xf32>
    %235 = arith.addf %233, %234 : vector<1x1xf32>
    %c0_103 = arith.constant 0 : index
    %c0_104 = arith.constant 0 : index
    %c0_105 = arith.constant 0 : index
    %236 = vector.load %arg10[%c0_103, %c0_104, %c0_105] : memref<1x1x1xf32, #tpu.memory_space<vmem>>, vector<1x1x1xf32>
    %237 = vector.shape_cast %236 : vector<1x1x1xf32> to vector<1x1xf32>
    %238 = vector.shape_cast %235 : vector<1x1xf32> to vector<1x1x1xf32>
    tpu.vector_store %arg10[%c0_103, %c0_104, %c0_105], %238 {strides = array<i32>} : memref<1x1x1xf32, #tpu.memory_space<vmem>>, vector<1x1x1xf32>,
    return
  }
  func.func @transform_0(%arg0: i32) -> (i32, i32, i32) {
    %c0_i32 = arith.constant 0 : i32
    %c0_i32_0 = arith.constant 0 : i32
    %c0_i32_1 = arith.constant 0 : i32
    return %arg0, %c0_i32, %c0_i32_0 : i32, i32, i32
  }
  func.func @transform_1(%arg0: i32) -> (i32, i32, i32) {
    %c0_i32 = arith.constant 0 : i32
    %c0_i32_0 = arith.constant 0 : i32
    %c0_i32_1 = arith.constant 0 : i32
    %c0_i32_2 = arith.constant 0 : i32
    return %c0_i32, %c0_i32_0, %c0_i32_1 : i32, i32, i32
  }
  func.func @transform_2(%arg0: i32) -> (i32, i32) {
    %c0_i32 = arith.constant 0 : i32
    %c0_i32_0 = arith.constant 0 : i32
    %c0_i32_1 = arith.constant 0 : i32
    return %c0_i32, %c0_i32_0 : i32, i32
  }
  func.func @transform_3(%arg0: i32) -> (i32, i32, i32) {
    %c0_i32 = arith.constant 0 : i32
    %c0_i32_0 = arith.constant 0 : i32
    %c0_i32_1 = arith.constant 0 : i32
    %c0_i32_2 = arith.constant 0 : i32
    return %c0_i32, %c0_i32_0, %c0_i32_1 : i32, i32, i32
  }
  func.func @transform_4(%arg0: i32) -> (i32, i32) {
    %c0_i32 = arith.constant 0 : i32
    %c0_i32_0 = arith.constant 0 : i32
    %c0_i32_1 = arith.constant 0 : i32
    return %c0_i32, %c0_i32_0 : i32, i32
  }
  func.func @transform_5(%arg0: i32) -> (i32, i32, i32) {
    %c0_i32 = arith.constant 0 : i32
    %c0_i32_0 = arith.constant 0 : i32
    %c0_i32_1 = arith.constant 0 : i32
    %c0_i32_2 = arith.constant 0 : i32
    return %c0_i32, %c0_i32_0, %c0_i32_1 : i32, i32, i32
  }
  func.func @transform_6(%arg0: i32) -> (i32, i32) {
    %c0_i32 = arith.constant 0 : i32
    %c0_i32_0 = arith.constant 0 : i32
    %c0_i32_1 = arith.constant 0 : i32
    return %c0_i32, %c0_i32_0 : i32, i32
  }
  func.func @transform_7(%arg0: i32) -> (i32, i32) {
    %c0_i32 = arith.constant 0 : i32
    %c0_i32_0 = arith.constant 0 : i32
    %c0_i32_1 = arith.constant 0 : i32
    return %c0_i32, %c0_i32_0 : i32, i32
  }
  func.func @transform_8(%arg0: i32) -> (i32, i32) {
    %c0_i32 = arith.constant 0 : i32
    %c0_i32_0 = arith.constant 0 : i32
    %c0_i32_1 = arith.constant 0 : i32
    return %c0_i32, %c0_i32_0 : i32, i32
  }
  func.func @transform_9(%arg0: i32) -> (i32, i32, i32) {
    %c0_i32 = arith.constant 0 : i32
    %c0_i32_0 = arith.constant 0 : i32
    %c0_i32_1 = arith.constant 0 : i32
    return %arg0, %c0_i32, %c0_i32_0 : i32, i32, i32
  }
}

</mosaic_0001>

<bundles_post_ra>
// kernel: dcgan_mnist_d_forward.1
= control target key start
LH: loop header
LB: loop body
LE: loop exit
PB: predicated region body
PF: predicated region fallthrough
CT: control target
= control target key end

     0   :  { %s13121_s0 = inlined_call_operand.vmem [shape: f32[2,28,28], index: 0, kind: input, shape index: {}]   ;;  %s13122_s1 = inlined_call_operand.hbm [shape: f32[5,28,768], index: 1, kind: input, shape index: {}]   ;;  %s13123_s2 = inlined_call_operand.hbm [shape: f32[1,768], index: 2, kind: input, shape index: {}]   ;;  %s13124_s3 = inlined_call_operand.hbm [shape: f32[5,384,512], index: 3, kind: input, shape index: {}]   ;;  %s13125_s4 = inlined_call_operand.hbm [shape: f32[1,512], index: 4, kind: input, shape index: {}]   ;;  %s13126_s5 = inlined_call_operand.hbm [shape: f32[4,256,1024], index: 5, kind: input, shape index: {}]   ;;  %s13127_s6 = inlined_call_operand.hbm [shape: f32[1,1024], index: 6, kind: input, shape index: {}]   ;;  %s13128_s7 = inlined_call_operand.hbm [shape: f32[1,1024], index: 7, kind: input, shape index: {}]   ;;  %s13129_s8 = inlined_call_operand.<no memory space> [shape: f32[1,1], index: 8, kind: input, shape index: {}]   ;;  %s13130_s9 = inlined_call_operand.vmem [shape: f32[2,1,1], index: 9, kind: output, shape index: {}]  }
   0x1   :  { %v14_v0 = vstv %s13129_s8 }
   0x2   :  { %15 = vst [vmem:[#allocation2] sm:$0x1] %v14_v0 }
   0x3   :  { %16 = vsyncpa [#allocation4], 0 }
   0x4   :  { %17 = vsyncpa [#allocation6], 0 }
   0x5   :  { %18 = vsyncpa [#allocation9], 0 }
   0x6   :  { %19 = vsyncpa [#allocation12], 0  ;;  %s12252_s11 = smov 0  }
   0x7 LB: > { %s12181_s12 = smov [#allocation5]   ;;  %s12258_s14 = sadd.s32 4294967295, %s12179_s11   ;;  %s12179_s11 = sphi %s12252_s11, %s25_s11  }
   0x8   : > { %s276_s13 = sshll.u32 %s12181_s12, 4  ;;  %p9147_p0 = scmp.ge.s32.totalorder %s12179_s11, 1  ;;  %s12263_s13 = int_to_ptr.vmem [resolvable:$true] %s276_s13 }
   0x9   : > { %p250_p1 = scmp.lt.s32.totalorder %s12179_s11, 3  ;;  %p13131_p2 = scmp.eq.s32.totalorder %s12258_s14, 0 }
   0xa   : > { %s12182_s15 = smov [#allocation8]   ;;  %s12183_s17 = smov [#allocation11]  }
   0xb   : > { %p12265_p3 = pnand %p9147_p0, %p250_p1  ;;  %s300_s16 = sshll.u32 %s12182_s15, 4  ;;  %s12271_s16 = int_to_ptr.vmem [resolvable:$true] %s300_s16 }
   0xc   : > { %s324_s18 = sshll.u32 %s12183_s17, 4  ;;  %s12184_s20 = smov [#allocation3]   ;;  %s12279_s18 = int_to_ptr.vmem [resolvable:$true] %s324_s18 }
   0xd   : > { %s13133_s8 = scalar_select %p12265_p3, 1, 0 }
   0xe   : > { %p11899_p4 = pneg %p12265_p3  ;;  %s262_s21 = sshll.u32 %s12184_s20, 4  ;;  %s12281_s21 = int_to_ptr.vmem [resolvable:$true] %s262_s21 }
   0xf   : > { %s11961_s24 = scalar_lea.hbm %s13123_s2, 96 }
  0x10   : > { %p12275_p5 = pnand %p13131_p2, %p11899_p4  ;;  %p11962_p6 = scmp.ne.s32.totalorder %s13123_s2, %s11961_s24 }
  0x11   : > { %p11968_p10 = scmp.lt.u32.totalorder %s11961_s24, %s13123_s2 }
  0x12   : > { %p12291_p7 = pneg %p12275_p5 }
  0x14   : > { %p11964_p8 = pnand %p12291_p7, %p11962_p6 }
  0x16   : > { %p11965_p9 = pneg %p11964_p8 }
  0x18   : > { %p11970_p11 = pnand %p11968_p10, %p11965_p9 }
  0x1a   : > { %11973 = shalt.err (!%p11970_p11)
}
  0x1b   : > { %s11974_s30 = scalar_lea.vmem %s12263_s13, 96  ;;  %p11982_p1 = scmp.lt.s32.totalorder %s12263_s13, %s12263_s13 }
  0x1c   : > { %p11975_p12 = scmp.ne.s32.totalorder %s12263_s13, %s11974_s30  ;;  %p11983_p4 = scmp.lt.s32.totalorder %s11974_s30, %s11974_s30 }
  0x1e   : > { %p11977_p13 = pnand %p11975_p12, %p12291_p7  ;;  %p11984_p6 = por %p11983_p4, %p11982_p1 }
  0x20   : > { %p11978_p0 = pneg %p11977_p13 }
  0x22   : > { %p11985_p8 = pnand %p11984_p6, %p11978_p0 }
  0x24   : > { %11988 = shalt.err (!%p11985_p8)
}
  0x25   : > { %11905 = dma.hbm_to_vmem [thread:$0]  (!%p12275_p5), %s13123_s2, 96, %s12263_s13, [#allocation6]  }
  0x26   : > { %s11989_s20 = scalar_lea.hbm %s13125_s4, 64 }
  0x27   : > { %p11990_p9 = scmp.ne.s32.totalorder %s13125_s4, %s11989_s20  ;;  %p11996_p12 = scmp.lt.u32.totalorder %s11989_s20, %s13125_s4 }
  0x29   : > { %p11992_p10 = pnand %p11990_p9, %p12291_p7 }
  0x2b   : > { %p11993_p11 = pneg %p11992_p10 }
  0x2d   : > { %p11998_p13 = pnand %p11996_p12, %p11993_p11 }
  0x2f   : > { %12001 = shalt.err (!%p11998_p13)
}
  0x30   : > { %s12002_s13 = scalar_lea.vmem %s12271_s16, 64  ;;  %p12010_p6 = scmp.lt.s32.totalorder %s12271_s16, %s12271_s16 }
  0x31   : > { %p12003_p0 = scmp.ne.s32.totalorder %s12271_s16, %s12002_s13  ;;  %p12011_p8 = scmp.lt.s32.totalorder %s12002_s13, %s12002_s13 }
  0x33   : > { %p12005_p1 = pnand %p12003_p0, %p12291_p7  ;;  %p12012_p9 = por %p12011_p8, %p12010_p6 }
  0x35   : > { %p12006_p4 = pneg %p12005_p1 }
  0x37   : > { %p12013_p10 = pnand %p12012_p9, %p12006_p4 }
  0x39   : > { %12016 = shalt.err (!%p12013_p10)
}
  0x3a   : > { %11911 = dma.hbm_to_vmem [thread:$0]  (!%p12275_p5), %s13125_s4, 64, %s12271_s16, [#allocation9]  }
  0x3b   : > { %s12017_s10 = scalar_lea.hbm %s13127_s6, 128 }
  0x3c   : > { %p12018_p11 = scmp.ne.s32.totalorder %s13127_s6, %s12017_s10  ;;  %p12024_p0 = scmp.lt.u32.totalorder %s12017_s10, %s13127_s6 }
  0x3e   : > { %p12020_p12 = pnand %p12018_p11, %p12291_p7 }
  0x40   : > { %p12021_p13 = pneg %p12020_p12 }
  0x42   : > { %p12026_p1 = pnand %p12024_p0, %p12021_p13 }
  0x44   : > { %12029 = shalt.err (!%p12026_p1)
}
  0x45   : > { %s12030_s16 = scalar_lea.vmem %s12279_s18, 128  ;;  %p12038_p9 = scmp.lt.s32.totalorder %s12279_s18, %s12279_s18 }
  0x46   : > { %p12031_p4 = scmp.ne.s32.totalorder %s12279_s18, %s12030_s16  ;;  %p12039_p10 = scmp.lt.s32.totalorder %s12030_s16, %s12030_s16 }
  0x48   : > { %p12033_p6 = pnand %p12031_p4, %p12291_p7  ;;  %p12040_p11 = por %p12039_p10, %p12038_p9 }
  0x4a   : > { %p12034_p8 = pneg %p12033_p6 }
  0x4c   : > { %p12041_p12 = pnand %p12040_p11, %p12034_p8 }
  0x4e   : > { %12044 = shalt.err (!%p12041_p12)
}
  0x4f   : > { %11917 = dma.hbm_to_vmem [thread:$0]  (!%p12275_p5), %s13127_s6, 128, %s12279_s18, [#allocation12]  }
  0x50   : > { %s12045_s13 = scalar_lea.hbm %s13122_s1, 15360 }
  0x51   : > { %p12046_p13 = scmp.ne.s32.totalorder %s13122_s1, %s12045_s13  ;;  %p12052_p4 = scmp.lt.u32.totalorder %s12045_s13, %s13122_s1 }
  0x53   : > { %p12048_p0 = pnand %p12046_p13, %p12291_p7 }
  0x55   : > { %p12049_p1 = pneg %p12048_p0 }
  0x57   : > { %p12054_p6 = pnand %p12052_p4, %p12049_p1 }
  0x59   : > { %12057 = shalt.err (!%p12054_p6)
}
  0x5a   : > { %s12058_s18 = scalar_lea.vmem %s12281_s21, 15360  ;;  %p12066_p11 = scmp.lt.s32.totalorder %s12281_s21, %s12281_s21 }
  0x5b   : > { %p12059_p8 = scmp.ne.s32.totalorder %s12281_s21, %s12058_s18  ;;  %p12067_p12 = scmp.lt.s32.totalorder %s12058_s18, %s12058_s18 }
  0x5d   : > { %p12061_p9 = pnand %p12059_p8, %p12291_p7  ;;  %p12068_p13 = por %p12067_p12, %p12066_p11 }
  0x5f   : > { %p12062_p10 = pneg %p12061_p9 }
  0x61   : > { %p12069_p0 = pnand %p12068_p13, %p12062_p10 }
  0x63   : > { %12072 = shalt.err (!%p12069_p0)
}
  0x64   : > { %s12185_s10 = smov 768   ;;  %s12186_s12 = smov 48  }
  0x65   : > { %11902 = dma.hbm_to_vmem [thread:$0]  (!%p12275_p5), %s13122_s1, 15360, %s12281_s21, [#allocation4], %s12185_s10, %s12185_s10, %s12186_s12  }
  0x66   : > { %s12187_s20 = smov [#allocation7]   ;;  %s12073_s24 = scalar_lea.hbm %s13124_s3, 122880 }
  0x67   : > { %s286_s16 = sshll.u32 %s12187_s20, 4  ;;  %p12074_p1 = scmp.ne.s32.totalorder %s13124_s3, %s12073_s24  ;;  %s287_s16 = int_to_ptr.vmem [resolvable:$true] %s286_s16 }
  0x68   : > { %p12080_p8 = scmp.lt.u32.totalorder %s12073_s24, %s13124_s3 }
  0x69   : > { %p12076_p4 = pnand %p12074_p1, %p12291_p7 }
  0x6b   : > { %p12077_p6 = pneg %p12076_p4 }
  0x6d   : > { %p12082_p9 = pnand %p12080_p8, %p12077_p6 }
  0x6f   : > { %12085 = shalt.err (!%p12082_p9)
}
  0x70   : > { %s12086_s21 = scalar_lea.vmem %s287_s16, 122880  ;;  %p12094_p13 = scmp.lt.s32.totalorder %s287_s16, %s287_s16 }
  0x71   : > { %p12087_p10 = scmp.ne.s32.totalorder %s287_s16, %s12086_s21  ;;  %p12095_p0 = scmp.lt.s32.totalorder %s12086_s21, %s12086_s21 }
  0x73   : > { %p12089_p11 = pnand %p12087_p10, %p12291_p7  ;;  %p12096_p2 = por %p12095_p0, %p12094_p13 }
  0x75   : > { %p12090_p12 = pneg %p12089_p11 }
  0x77   : > { %p12097_p3 = pnand %p12096_p2, %p12090_p12 }
  0x79   : > { %12100 = shalt.err (!%p12097_p3)
}
  0x7a   : > { %s12188_s29 = smov 512   ;;  %s12189_s30 = smov 32  }
  0x7b   : > { %11908 = dma.hbm_to_vmem [thread:$0]  (!%p12275_p5), %s13124_s3, 122880, %s287_s16, [#allocation6], %s12188_s29, %s12188_s29, %s12189_s30  }
  0x7c   : > { %s12190_s12 = smov [#allocation10]   ;;  %s12101_s22 = scalar_lea.hbm %s13126_s5, 131072 }
  0x7d   : > { %s310_s15 = sshll.u32 %s12190_s12, 4  ;;  %p12102_p2 = scmp.ne.s32.totalorder %s13126_s5, %s12101_s22  ;;  %s311_s15 = int_to_ptr.vmem [resolvable:$true] %s310_s15 }
  0x7e   : > { %p12108_p4 = scmp.lt.u32.totalorder %s12101_s22, %s13126_s5 }
  0x7f   : > { %p12104_p3 = pnand %p12102_p2, %p12291_p7 }
  0x81   : > { %p12105_p1 = pneg %p12104_p3 }
  0x83   : > { %p12110_p6 = pnand %p12108_p4, %p12105_p1 }
  0x85   : > { %12113 = shalt.err (!%p12110_p6)
}
  0x86   : > { %s12114_s16 = scalar_lea.vmem %s311_s15, 131072  ;;  %p12122_p11 = scmp.lt.s32.totalorder %s311_s15, %s311_s15 }
  0x87   : > { %p12115_p8 = scmp.ne.s32.totalorder %s311_s15, %s12114_s16  ;;  %p12123_p12 = scmp.lt.s32.totalorder %s12114_s16, %s12114_s16 }
  0x89   : > { %p12117_p9 = pnand %p12115_p8, %p12291_p7  ;;  %p12124_p13 = por %p12123_p12, %p12122_p11 }
  0x8b   : > { %p12118_p10 = pneg %p12117_p9 }
  0x8d   : > { %p12125_p0 = pnand %p12124_p13, %p12118_p10 }
  0x8f   : > { %12128 = shalt.err (!%p12125_p0)
}
  0x90   : > { %s12191_s26 = smov 1024   ;;  %s12192_s28 = smov 64  }
  0x91   : > { %11914 = dma.hbm_to_vmem [thread:$0]  (!%p12275_p5), %s13126_s5, 131072, %s311_s15, [#allocation9], %s12191_s26, %s12191_s26, %s12192_s28  }
  0x92   : > { %s12193_s30 = smov [#allocation13]   ;;  %s12129_s17 = scalar_lea.hbm %s13128_s7, 128 }
  0x93   : > { %s335_s18 = sshll.u32 %s12193_s30, 4  ;;  %p12130_p2 = scmp.ne.s32.totalorder %s13128_s7, %s12129_s17  ;;  %s336_s18 = int_to_ptr.vmem [resolvable:$true] %s335_s18 }
  0x94   : > { %p12136_p4 = scmp.lt.u32.totalorder %s12129_s17, %s13128_s7 }
  0x95   : > { %p12132_p3 = pnand %p12130_p2, %p12291_p7 }
  0x97   : > { %p12133_p1 = pneg %p12132_p3 }
  0x99   : > { %p12138_p6 = pnand %p12136_p4, %p12133_p1 }
  0x9b   : > { %12141 = shalt.err (!%p12138_p6)
}
  0x9c   : > { %s12142_s15 = scalar_lea.vmem %s336_s18, 128  ;;  %p12150_p11 = scmp.lt.s32.totalorder %s336_s18, %s336_s18 }
  0x9d   : > { %p12143_p8 = scmp.ne.s32.totalorder %s336_s18, %s12142_s15  ;;  %p12151_p12 = scmp.lt.s32.totalorder %s12142_s15, %s12142_s15 }
  0x9f   : > { %p12145_p9 = pnand %p12143_p8, %p12291_p7  ;;  %p12152_p13 = por %p12151_p12, %p12150_p11 }
  0xa1   : > { %p12146_p10 = pneg %p12145_p9 }
  0xa3   : > { %p12153_p0 = pnand %p12152_p13, %p12146_p10 }
  0xa5   : > { %12156 = shalt.err (!%p12153_p0)
}
  0xa6   : > { %11920 = dma.hbm_to_vmem [thread:$0]  (!%p12275_p5), %s13128_s7, 128, %s336_s18, [#allocation12]  }
  0xa7   : > { %p13136_p2 = scmp.ne.s32.totalorder %s13133_s8, 0 }
  0xa8   : > { %p13137_p3 = scmp.eq.s32.totalorder (!%p13136_p2), %s12258_s14, 0 }
  0xa9   : > { %359 = sbr.rel (%p13136_p2) target bundleno = 4630 (0x1216), region = 56 }
  0xb0   : > { %12162 = dma.done.wait (%p13137_p3), [#allocation4], 15360   ;;  %p13138_p7 = pmov %p13137_p3 }
  0xb1   : > { %p13139_p1 = pmov %p13137_p3 }
  0xb2   : > { %12164 = vsyncadd (%p13138_p7), [#allocation4], 4294951936 }
  0xb3   : > { %12166 = dma.done.wait (%p13139_p1), [#allocation6], 122976   ;;  %p13140_p4 = pmov %p13139_p1 }
  0xb4   : > { %p13141_p6 = pmov %p13139_p1 }
  0xb5   : > { %12168 = vsyncadd (%p13140_p4), [#allocation6], 4294844320 }
  0xb6   : > { %12170 = dma.done.wait (%p13141_p6), [#allocation9], 131136   ;;  %p13142_p5 = pmov %p13139_p1 }
  0xb7   : > { %p13143_p8 = pmov %p13139_p1 }
  0xb8   : > { %12172 = vsyncadd (%p13142_p5), [#allocation9], 4294836160 }
  0xb9   : > { %12174 = dma.done.wait (%p13143_p8), [#allocation12], 256   ;;  %p13144_p9 = pmov %p13139_p1 }
  0xba   : > { %p417_p10 = scmp.lt.s32.totalorder %s12258_s14, 1  ;;  %v429_v1 = vlaneseq  ;;  %v12194_v2 = vmov 0.0|0.0   ;;  %vm12195_vm0 = vmmov 0   ;;  %v12196_v3 = vmov 0.0   ;;  %v665_v13 = vld [vmem:[#allocation3 + $0xc8] sm:$0xff]  ;;  %v671_v14 = vld [vmem:[#allocation3 + $0xf8] sm:$0xff] }
  0xbb   : > { %12176 = vsyncadd (%p13144_p9), [#allocation12], 4294967040  ;;  %9535 = vmatprep.subr.bf16.mxu1 %v12194_v2  ;;  %9528 = vmatprep.subr.bf16.mxu0 %v12194_v2  ;;  %vm454_vm1 = vcmask 1043456   ;;  %v667_v15 = vld [vmem:[#allocation3 + $0xd8] sm:$0xff]  ;;  %v673_v16 = vld [vmem:[#allocation3 + $0x108] sm:$0xff]  ;;  %vm12197_vm3 = vmmov 1   ;;  %v9542_v21 = vpack.c.bf16 %v671_v14, %v665_v13 }
  0xbc   : > { %s13148_s14 = smov (!%p417_p10, %s12258_s14), 1  ;;  %9415 = vmatprep.mubr.msk.f32.mxu1 %vm12195_vm0, %v12196_v3  ;;  %9398 = vmatprep.mubr.msk.f32.mxu0 %vm12195_vm0, %v12196_v3  ;;  %v12463_v4 = vshrl.u32 %v429_v1, 7  ;;  %v12469_v8 = vand.u32 127, %v429_v1  ;;  %vm12488_vm4 = vmpackc.low %vm454_vm1, %vm12197_vm3  ;;  %v9552_v22 = vpack.c.bf16 %v673_v16, %v667_v15  ;;  %v664_v23 = vld [vmem:[#allocation3 + $0xc0] sm:$0xff]  ;;  %v670_v24 = vld [vmem:[#allocation3 + $0xf0] sm:$0xff]  ;;  %vm444_vm6 = vcmask 228352  }
  0xbd   : > { %s9329_s8 = sshll.u32 %s13148_s14, 5  ;;  %v666_v25 = vld [vmem:[#allocation3 + $0xd0] sm:$0xff]  ;;  %v672_v26 = vld [vmem:[#allocation3 + $0x100] sm:$0xff]  ;;  %v677_v27 = vld [vmem:[#allocation3 + $0x128] sm:$0xff]  ;;  %v9544_v34 = vpack.c.bf16 %v670_v24, %v664_v23  ;;  %s424_s21 = scalar_lea.vmem %s13130_s9, %s13148_s14 }
  0xbe   : > { %s421_s16 = scalar_lea.vmem %s13121_s0, %s9329_s8  ;;  %v562_v9 = vadd.s32 1, %v12463_v4  ;;  %v12473_v10 = vadd.s32 8, %v12463_v4  ;;  %v12482_v18 = vadd.s32 16, %v12463_v4  ;;  %vm435_vm2 = vcmp.eq.s32.totalorder %v12469_v8, %v12463_v4  ;;  %v683_v28 = vld [vmem:[#allocation3 + $0x158] sm:$0xf]  ;;  %v676_v36 = vld [vmem:[#allocation3 + $0x120] sm:$0xff] }
  0xbf   : > { %v425_v5 = vld [vmem:[%s421_s16] sm:$0xff]  ;;  %v426_v6 = vld [vmem:[%s421_s16 + $0x8] sm:$0xff]  ;;  %v427_v7 = vld [vmem:[%s421_s16 + $0x10] sm:$0xff]  ;;  %v12508_v32 = vsel %vm435_vm2, 1.0, %v12196_v3  ;;  %v9554_v35 = vpack.c.bf16 %v672_v26, %v666_v25  ;;  %v9546_v37 = vpack.c.bf16 %v683_v28, %v677_v27 }
  0xc0   : > { %v12475_v11 = vpack.c.bf16 %v426_v6, %v425_v5  ;;  %v428_v12 = vld [vmem:[%s421_s16 + $0x18] sm:$0xf]  ;;  %vm565_vm5 = vcmp.eq.s32.totalorder %v12469_v8, %v562_v9  ;;  %v563_v20 = vadd.s32 1, %v12473_v10  ;;  %v685_v30 = vld [vmem:[#allocation3 + $0x168] sm:$0xf]  ;;  %vm436_vm7 = vcmp.eq.s32.totalorder %v12469_v8, %v12473_v10  ;;  %v668_v54 = vld [vmem:[#allocation3 + $0xe0] sm:$0xff] }
  0xc1   : > { %v12478_v17 = vpack.c.bf16 %v428_v12, %v427_v7  ;;  %v679_v29 = vld [vmem:[#allocation3 + $0x138] sm:$0xff]  ;;  %v12499_v31 = vsel %vm565_vm5, 1.0, %v12196_v3  ;;  %v564_v33 = vadd.s32 1, %v12482_v18  ;;  %v682_v39 = vld [vmem:[#allocation3 + $0x150] sm:$0xf]  ;;  %v9167_v43 = vsel %vm436_vm7, 1.0, %v12196_v3 }
  0xc2   : > { %9537 = vmatpush3.bf16.msra.mxu1 %v12475_v11  ;;  %9530 = vmatpush3.bf16.msra.mxu0 %v12475_v11  ;;  %vm566_vm8 = vcmp.eq.s32.totalorder %v12469_v8, %v563_v20  ;;  %v9556_v38 = vpack.c.bf16 %v685_v30, %v679_v29  ;;  %v678_v40 = vld [vmem:[#allocation3 + $0x130] sm:$0xff]  ;;  %v684_v41 = vld [vmem:[#allocation3 + $0x160] sm:$0xf]  ;;  %vm437_vm9 = vcmp.eq.s32.totalorder %v12469_v8, %v12482_v18  ;;  %v669_v48 = vld [vmem:[#allocation3 + $0xe8] sm:$0xff] }
  0xc3   : > { %9538 = vmatprep.subr.bf16.mxu1 %v12194_v2  ;;  %9531 = vmatprep.subr.bf16.mxu0 %v12194_v2  ;;  %v9174_v42 = vsel %vm566_vm8, 1.0, %v12196_v3  ;;  %vm567_vm10 = vcmp.eq.s32.totalorder %v12469_v8, %v564_v33  ;;  %v9549_v44 = vpack.c.bf16 %v682_v39, %v676_v36  ;;  %v9559_v45 = vpack.c.bf16 %v684_v41, %v678_v40  ;;  %v675_v49 = vld [vmem:[#allocation3 + $0x118] sm:$0xff]  ;;  %v547_v52 = vld [vmem:[#allocation3 + $0x48] sm:$0xff]  ;;  %v674_v55 = vld [vmem:[#allocation3 + $0x110] sm:$0xff] }
  0xc4   : > { %v9175_v46 = vsel %vm567_vm10, 1.0, %v12196_v3  ;;  %v9168_v47 = vsel %vm437_vm9, 1.0, %v12196_v3  ;;  %v541_v50 = vld [vmem:[#allocation3 + $0x18] sm:$0xff]  ;;  %v9562_v51 = vpack.c.bf16 %v675_v49, %v669_v48  ;;  %v540_v56 = vld [vmem:[#allocation3 + $0x10] sm:$0xff]  ;;  %v546_v57 = vld [vmem:[#allocation3 + $0x40] sm:$0xff]  ;;  %v9564_v62 = vpack.c.bf16 %v674_v55, %v668_v54 }
  0xc5   : > { %v9582_v53 = vpack.c.bf16 %v547_v52, %v541_v50  ;;  %v681_v58 = vld [vmem:[#allocation3 + $0x148] sm:$0xff]  ;;  %v687_v59 = vld [vmem:[#allocation3 + $0x178] sm:$0xf]  ;;  %v9584_v63 = vpack.c.bf16 %v546_v57, %v540_v56  ;;  %v686_v0 = vld [vmem:[#allocation3 + $0x170] sm:$0xf]  ;;  %v1241_v50 = vadd.s32 2, %v12473_v10 }
  0xc6   : > { %9541 = vmatpush3.bf16.msk.msra.mxu1 %vm12488_vm4, %v12478_v17  ;;  %9534 = vmatpush3.bf16.msk.msra.mxu0 %vm12488_vm4, %v12478_v17  ;;  %v553_v60 = vld [vmem:[#allocation3 + $0x78] sm:$0xff]  ;;  %v559_v61 = vld [vmem:[#allocation3 + $0xa8] sm:$0xf]  ;;  %v9566_v5 = vpack.c.bf16 %v687_v59, %v681_v58  ;;  %v680_v7 = vld [vmem:[#allocation3 + $0x140] sm:$0xff] }
  0xc7   : > { %9543 = vmatprep.subr.bf16.mxu0 %v9542_v21  ;;  %9553 = vmatprep.subr.bf16.mxu1 %v9552_v22  ;;  %v9586_v6 = vpack.c.bf16 %v559_v61, %v553_v60  ;;  %v552_v9 = vld [vmem:[#allocation3 + $0x70] sm:$0xff]  ;;  %v558_v12 = vld [vmem:[#allocation3 + $0xa0] sm:$0xf]  ;;  %v539_v16 = vld [vmem:[#allocation3 + $0x8] sm:$0xff]  ;;  %v9569_v21 = vpack.c.bf16 %v686_v0, %v680_v7  ;;  %vm1244_vm12 = vcmp.eq.s32.totalorder %v12469_v8, %v1241_v50  ;;  %v1242_v61 = vadd.s32 2, %v12482_v18 }
  0xc8   : > { %v545_v20 = vld [vmem:[#allocation3 + $0x38] sm:$0xff]  ;;  %v9589_v22 = vpack.c.bf16 %v558_v12, %v552_v9  ;;  %v538_v29 = vld [vmem:[#allocation3] sm:$0xff]  ;;  %v544_v30 = vld [vmem:[#allocation3 + $0x30] sm:$0xff]  ;;  %v1660_v50 = vadd.s32 3, %v12463_v4 }
  0xc9   : > { %9416 = vmatmul.mubr.msk.f32.vlgmr.msra.gmra.mrb[0].mxu1 %vm444_vm6, %v12499_v31  ;;  %9399 = vmatmul.mubr.msk.f32.vlgmr.msra.gmra.mrb[0].mxu0 %vm444_vm6, %v12508_v32  ;;  %v9572_v25 = vpack.c.bf16 %v545_v20, %v539_v16  ;;  %v551_v36 = vld [vmem:[#allocation3 + $0x68] sm:$0xff]  ;;  %v550_v40 = vld [vmem:[#allocation3 + $0x60] sm:$0xff]  ;;  %v556_v41 = vld [vmem:[#allocation3 + $0x90] sm:$0xf]  ;;  %vm1245_vm13 = vcmp.eq.s32.totalorder %v12469_v8, %v1242_v61 }
  0xca   : > { %9418 = vmatprep.mubr.msk.f32.mxu1 %vm12195_vm0, %v12196_v3  ;;  %9401 = vmatprep.mubr.msk.f32.mxu0 %vm12195_vm0, %v12196_v3  ;;  %v548_v52 = vld [vmem:[#allocation3 + $0x50] sm:$0xff]  ;;  %v1350_v55 = vld [vmem:[#allocation3 + $0x1c0] sm:$0xff]  ;;  %v561_v56 = vld [vmem:[#allocation3 + $0xb8] sm:$0xf]  ;;  %vm1663_vm14 = vcmp.eq.s32.totalorder %v12469_v8, %v1660_v50 }
  0xcb   : > { %9545 = vmatpush1.bf16.msra.mxu0 %v9544_v34  ;;  %9555 = vmatpush1.bf16.msra.mxu1 %v9554_v35  ;;  %v1344_v54 = vld [vmem:[#allocation3 + $0x190] sm:$0xff]  ;;  %v1357_v57 = vld [vmem:[#allocation3 + $0x1f8] sm:$0xff]  ;;  %v1363_v58 = vld [vmem:[#allocation3 + $0x228] sm:$0xf] }
  0xcc   : > { %9548 = vmatprep.subr.msk.bf16.mxu0 %vm12488_vm4, %v9546_v37  ;;  %9558 = vmatprep.subr.msk.bf16.mxu1 %vm12488_vm4, %v9556_v38  ;;  %v557_v37 = vld [vmem:[#allocation3 + $0x98] sm:$0xf]  ;;  %v9574_v38 = vpack.c.bf16 %v544_v30, %v538_v29  ;;  %v1362_v7 = vld [vmem:[#allocation3 + $0x220] sm:$0xf]  ;;  %v1343_v9 = vld [vmem:[#allocation3 + $0x188] sm:$0xff] }
  0xcd   : > { %9419 = vmatmul.mubr.msk.f32.gmra.mrb[2].mxu1 %vm444_vm6, %v9174_v42  ;;  %9402 = vmatmul.mubr.msk.f32.gmra.mrb[2].mxu0 %vm444_vm6, %v9167_v43  ;;  %v9576_v39 = vpack.c.bf16 %v557_v37, %v551_v36  ;;  %v543_v42 = vld [vmem:[#allocation3 + $0x28] sm:$0xff]  ;;  %v549_v43 = vld [vmem:[#allocation3 + $0x58] sm:$0xff]  ;;  %v1354_v29 = vld [vmem:[#allocation3 + $0x1e0] sm:$0xff] }
  0xce   : > { %9421 = vmatprep.mubr.msk.f32.mxu1 %vm12195_vm0, %v12196_v3  ;;  %9404 = vmatprep.mubr.msk.f32.mxu0 %vm12195_vm0, %v12196_v3  ;;  %v9592_v48 = vpack.c.bf16 %v549_v43, %v543_v42  ;;  %v1349_v12 = vld [vmem:[#allocation3 + $0x1b8] sm:$0xff]  ;;  %v1360_v30 = vld [vmem:[#allocation3 + $0x210] sm:$0xf]  ;;  %v1346_v37 = vld [vmem:[#allocation3 + $0x1a0] sm:$0xff] }
  0xcf   : > { %9551 = vmatpush1.bf16.msk.msra.mxu0 %vm12488_vm4, %v9549_v44  ;;  %9561 = vmatpush1.bf16.msk.msra.mxu1 %vm12488_vm4, %v9559_v45  ;;  %v1345_v44 = vld [vmem:[#allocation3 + $0x198] sm:$0xff]  ;;  %v1351_v45 = vld [vmem:[#allocation3 + $0x1c8] sm:$0xff]  ;;  %v9609_v20 = vpack.c.bf16 %v1349_v12, %v1343_v9  ;;  %v1358_v43 = vld [vmem:[#allocation3 + $0x200] sm:$0xff] }
  0xd0   : > { %9563 = vmatprep.subr.bf16.mxu0 %v9562_v51  ;;  %9583 = vmatprep.subr.bf16.mxu1 %v9582_v53  ;;  %v9619_v49 = vpack.c.bf16 %v1351_v45, %v1345_v44  ;;  %v542_v51 = vld [vmem:[#allocation3 + $0x20] sm:$0xff]  ;;  %v555_v53 = vld [vmem:[#allocation3 + $0x88] sm:$0xff]  ;;  %v1364_v44 = vld [vmem:[#allocation3 + $0x230] sm:$0xf] }
  0xd1   : > { %9422 = vmatmul.mubr.msk.f32.gmra.mrb[4].mxu1 %vm444_vm6, %v9175_v46  ;;  %9405 = vmatmul.mubr.msk.f32.gmra.mrb[4].mxu0 %vm444_vm6, %v9168_v47  ;;  %v9579_v46 = vpack.c.bf16 %v556_v41, %v550_v40  ;;  %v1240_v47 = vadd.s32 2, %v12463_v4  ;;  %v9594_v60 = vpack.c.bf16 %v548_v52, %v542_v51  ;;  %v9596_v0 = vpack.c.bf16 %v561_v56, %v555_v53  ;;  %v1365_v40 = vld [vmem:[#allocation3 + $0x238] sm:$0xf]  ;;  %v1763_v45 = vld [vmem:[#allocation3 + $0x248] sm:$0xff]  ;;  %v1762_v56 = vld [vmem:[#allocation3 + $0x240] sm:$0xff] }
  0xd2   : > { %779 = vmatprep.mubr.f32.mxu0 %v12196_v3  ;;  %862 = vmatprep.mubr.f32.mxu1 %v12196_v3  ;;  %v1770_v61 = vld [vmem:[#allocation3 + $0x280] sm:$0xff] }
  0xd3   : > { %vm1243_vm11 = vcmp.eq.s32.totalorder %v12469_v8, %v1240_v47  ;;  %v1765_v47 = vld [vmem:[#allocation3 + $0x258] sm:$0xff] }
  0xd4   : > { %v12608_v59 = vsel %vm1243_vm11, 1.0, %v12196_v3  ;;  %v5616_v19 = vld [vmem:[#allocation7 + $0x18b8] sm:$0xff] }
 0x19c   : > { %v649_v1 = vpop.f32.mrb[0].mxu1  ;;  %v12550_v13 = vpop.f32.mrb[0].mxu0 }
 0x19d   : > { %v9417_v14 = vpop.f32.mrb[1].mxu1  ;;  %9182 = vmatmul.mubr.msk.f32.vlgmr.msra.gmra.mrb[6].mxu0 %vm444_vm6, %v649_v1  ;;  %9187 = vmatmul.mubr.msk.f32.vlgmr.msra.gmra.mrb[6].mxu1 %vm444_vm6, %v649_v1  ;;  %v9400_v15 = vpop.f32.mrb[1].mxu0 }
 0x19e   : > { %785 = vmatprep.mubr.f32.mxu0 %v12196_v3  ;;  %868 = vmatprep.mubr.f32.mxu1 %v12196_v3  ;;  %v9211_v14 = vsel %vm1244_vm12, 1.0, %v12196_v3 }
 0x19f   : > { %9565 = vmatpush1.bf16.msra.mxu0 %v9564_v62  ;;  %9585 = vmatpush1.bf16.msra.mxu1 %v9584_v63  ;;  %v554_v62 = vld [vmem:[#allocation3 + $0x80] sm:$0xff]  ;;  %v9621_v63 = vpack.c.bf16 %v1350_v55, %v1344_v54  ;;  %v1661_v55 = vadd.s32 3, %v12473_v10 }
 0x1a0   : > { %v654_v23 = vpop.f32.mrb[2].mxu1  ;;  %9568 = vmatprep.subr.msk.bf16.mxu0 %vm12488_vm4, %v9566_v5  ;;  %9588 = vmatprep.subr.msk.bf16.mxu1 %vm12488_vm4, %v9586_v6  ;;  %v12560_v24 = vpop.f32.mrb[2].mxu0  ;;  %v9623_v5 = vpack.c.bf16 %v1363_v58, %v1357_v57  ;;  %v1356_v6 = vld [vmem:[#allocation3 + $0x1f0] sm:$0xff] }
 0x1a1   : > { %v9420_v26 = vpop.f32.mrb[3].mxu1  ;;  %9183 = vmatmul.mubr.msk.f32.gmra.mrb[8].mxu0 %vm444_vm6, %v654_v23  ;;  %9188 = vmatmul.mubr.msk.f32.gmra.mrb[8].mxu1 %vm444_vm6, %v654_v23  ;;  %v9403_v27 = vpop.f32.mrb[3].mxu0  ;;  %v9626_v16 = vpack.c.bf16 %v1362_v7, %v1356_v6  ;;  %v1768_v57 = vld [vmem:[#allocation3 + $0x270] sm:$0xff]  ;;  %v12685_v6 = vsel %vm1663_vm14, 1.0, %v12196_v3  ;;  %vm1664_vm15 = vcmp.eq.s32.totalorder %v12469_v8, %v1661_v55  ;;  %v1662_v7 = vadd.s32 3, %v12482_v18  ;;  %v2190_v55 = vld [vmem:[#allocation3 + $0x340] sm:$0xff] }
 0x1a2   : > { %791 = vmatprep.mubr.f32.mxu0 %v12196_v3  ;;  %874 = vmatprep.mubr.f32.mxu1 %v12196_v3  ;;  %v1361_v26 = vld [vmem:[#allocation3 + $0x218] sm:$0xf]  ;;  %v9648_v9 = vpack.c.bf16 %v1768_v57, %v1762_v56  ;;  %v2195_v56 = vld [vmem:[#allocation3 + $0x368] sm:$0xff] }
 0x1a3   : > { %9571 = vmatpush1.bf16.msk.msra.mxu0 %vm12488_vm4, %v9569_v21  ;;  %9591 = vmatpush1.bf16.msk.msra.mxu1 %vm12488_vm4, %v9589_v22  ;;  %v9212_v21 = vsel %vm1245_vm13, 1.0, %v12196_v3  ;;  %v1342_v22 = vld [vmem:[#allocation3 + $0x180] sm:$0xff]  ;;  %vm1665_vm2 = vcmp.eq.s32.totalorder %v12469_v8, %v1662_v7 }
 0x1a4   : > { %v659_v28 = vpop.f32.mrb[4].mxu1  ;;  %9573 = vmatprep.subr.bf16.mxu0 %v9572_v25  ;;  %9602 = vmatprep.subr.bf16.mxu1 %v12194_v2  ;;  %v12571_v33 = vpop.f32.mrb[4].mxu0  ;;  %v1355_v25 = vld [vmem:[#allocation3 + $0x1e8] sm:$0xff] }
 0x1a5   : > { %v9423_v34 = vpop.f32.mrb[5].mxu1  ;;  %9184 = vmatmul.mubr.msk.f32.gmra.mrb[10].mxu0 %vm444_vm6, %v659_v28  ;;  %9189 = vmatmul.mubr.msk.f32.gmra.mrb[10].mxu1 %vm444_vm6, %v659_v28  ;;  %v9406_v35 = vpop.f32.mrb[5].mxu0 }
 0x1a6   : > { %945 = vmatprep.mubr.f32.mxu0 %v12196_v3  ;;  %1138 = vmatprep.mubr.f32.mxu1 %v12196_v3  ;;  %v9616_v34 = vpack.c.bf16 %v1360_v30, %v1354_v29  ;;  %v1353_v35 = vld [vmem:[#allocation3 + $0x1d8] sm:$0xff] }
 0x1a7   : > { %v1773_v29 = vld [vmem:[#allocation3 + $0x298] sm:$0xff] }
 0x1a9   : > { %9192 = vmatmul.mubr.msk.f32.vlgmr.msra.gmra.mrb[12].mxu0 %vm444_vm6, %v649_v1  ;;  %9202 = vmatmul.mubr.msk.f32.vlgmr.msra.gmra.mrb[6].mxu1 %vm444_vm6, %v12550_v13  ;;  %v560_v1 = vld [vmem:[#allocation3 + $0xb0] sm:$0xf] }
 0x1aa   : > { %951 = vmatprep.mubr.f32.mxu0 %v12196_v3  ;;  %1144 = vmatprep.mubr.f32.mxu1 %v12196_v3  ;;  %v9599_v15 = vpack.c.bf16 %v560_v1, %v554_v62  ;;  %v1775_v62 = vld [vmem:[#allocation3 + $0x2a8] sm:$0xff]  ;;  %v1777_v1 = vld [vmem:[#allocation3 + $0x2b8] sm:$0xff] }
 0x1ab   : > { %9575 = vmatpush1.bf16.msra.mxu0 %v9574_v38  ;;  %9604 = vmatpush3.bf16.msra.mxu1 %v12475_v11  ;;  %v1352_v38 = vld [vmem:[#allocation3 + $0x1d0] sm:$0xff] }
 0x1ac   : > { %9578 = vmatprep.subr.msk.bf16.mxu0 %vm12488_vm4, %v9576_v39  ;;  %9605 = vmatprep.subr.bf16.mxu1 %v12194_v2  ;;  %v1359_v39 = vld [vmem:[#allocation3 + $0x208] sm:$0xff]  ;;  %v9631_v41 = vpack.c.bf16 %v1352_v38, %v1346_v37 }
 0x1ad   : > { %9193 = vmatmul.mubr.msk.f32.gmra.mrb[14].mxu0 %vm444_vm6, %v654_v23  ;;  %9203 = vmatmul.mubr.msk.f32.gmra.mrb[8].mxu1 %vm444_vm6, %v12560_v24  ;;  %v1348_v23 = vld [vmem:[#allocation3 + $0x1b0] sm:$0xff]  ;;  %v9633_v42 = vpack.c.bf16 %v1365_v40, %v1359_v39  ;;  %v1778_v40 = vld [vmem:[#allocation3 + $0x2c0] sm:$0xff] }
 0x1ae   : > { %957 = vmatprep.mubr.f32.mxu0 %v12196_v3  ;;  %1150 = vmatprep.mubr.f32.mxu1 %v12196_v3  ;;  %v9611_v27 = vpack.c.bf16 %v1348_v23, %v1342_v22  ;;  %v1782_v22 = vld [vmem:[#allocation3 + $0x2e0] sm:$0xf]  ;;  %v9233_v23 = vsel %vm1664_vm15, 1.0, %v12196_v3 }
 0x1af   : > { %9581 = vmatpush1.bf16.msk.msra.mxu0 %vm12488_vm4, %v9579_v46  ;;  %9608 = vmatpush3.bf16.msk.msra.mxu1 %vm12488_vm4, %v12478_v17 }
 0x1b0   : > { %9593 = vmatprep.subr.bf16.mxu0 %v9592_v48  ;;  %9620 = vmatprep.subr.bf16.mxu1 %v9619_v49  ;;  %v1771_v48 = vld [vmem:[#allocation3 + $0x288] sm:$0xff]  ;;  %v9636_v49 = vpack.c.bf16 %v1364_v44, %v1358_v43  ;;  %v2189_v43 = vld [vmem:[#allocation3 + $0x338] sm:$0xff] }
 0x1b1   : > { %9194 = vmatmul.mubr.msk.f32.gmra.mrb[16].mxu0 %vm444_vm6, %v659_v28  ;;  %9204 = vmatmul.mubr.msk.f32.gmra.mrb[10].mxu1 %vm444_vm6, %v12571_v33  ;;  %v9613_v28 = vpack.c.bf16 %v1361_v26, %v1355_v25  ;;  %v9656_v53 = vpack.c.bf16 %v1771_v48, %v1765_v47  ;;  %v2185_v44 = vld [vmem:[#allocation3 + $0x318] sm:$0xff] }
 0x1b2   : > { %1055 = vmatprep.mubr.f32.mxu0 %v12196_v3  ;;  %9432 = vmatprep.mubr.msk.f32.mxu1 %vm12195_vm0, %v12196_v3 }
 0x1b5   : > { %9197 = vmatmul.mubr.msk.f32.vlgmr.msra.gmra.mrb[6].mxu0 %vm444_vm6, %v12550_v13  ;;  %9433 = vmatmul.mubr.msk.f32.vlgmr.msra.gmra.mrb[12].mxu1 %vm444_vm6, %v12608_v59 }
 0x1b6   : > { %1061 = vmatprep.mubr.f32.mxu0 %v12196_v3  ;;  %9435 = vmatprep.mubr.msk.f32.mxu1 %vm12195_vm0, %v12196_v3 }
 0x1b7   : > { %9595 = vmatpush1.bf16.msra.mxu0 %v9594_v60  ;;  %9622 = vmatpush1.bf16.msra.mxu1 %v9621_v63  ;;  %v1764_v60 = vld [vmem:[#allocation3 + $0x250] sm:$0xff] }
 0x1b8   : > { %9598 = vmatprep.subr.msk.bf16.mxu0 %vm12488_vm4, %v9596_v0  ;;  %9625 = vmatprep.subr.msk.bf16.mxu1 %vm12488_vm4, %v9623_v5  ;;  %v1781_v0 = vld [vmem:[#allocation3 + $0x2d8] sm:$0xf]  ;;  %v1783_v5 = vld [vmem:[#allocation3 + $0x2e8] sm:$0xf]  ;;  %v9658_v12 = vpack.c.bf16 %v1770_v61, %v1764_v60 }
 0x1b9   : > { %9198 = vmatmul.mubr.msk.f32.gmra.mrb[8].mxu0 %vm444_vm6, %v12560_v24  ;;  %9436 = vmatmul.mubr.msk.f32.gmra.mrb[14].mxu1 %vm444_vm6, %v9211_v14  ;;  %v1774_v14 = vld [vmem:[#allocation3 + $0x2a0] sm:$0xff]  ;;  %v2197_v60 = vld [vmem:[#allocation3 + $0x378] sm:$0xff] }
 0x1ba   : > { %1067 = vmatprep.mubr.f32.mxu0 %v12196_v3  ;;  %9438 = vmatprep.mubr.msk.f32.mxu1 %vm12195_vm0, %v12196_v3 }
 0x1bb   : > { %9601 = vmatpush1.bf16.msk.msra.mxu0 %vm12488_vm4, %v9599_v15  ;;  %9628 = vmatpush1.bf16.msk.msra.mxu1 %vm12488_vm4, %v9626_v16  ;;  %v9650_v15 = vpack.c.bf16 %v1781_v0, %v1775_v62  ;;  %v9660_v16 = vpack.c.bf16 %v1783_v5, %v1777_v1  ;;  %v2082_v62 = vadd.s32 4, %v12482_v18  ;;  %v2194_v1 = vld [vmem:[#allocation3 + $0x360] sm:$0xff] }
 0x1bc   : > { %9610 = vmatprep.subr.bf16.mxu0 %v9609_v20  ;;  %9639 = vmatprep.subr.bf16.mxu1 %v12194_v2  ;;  %v1780_v20 = vld [vmem:[#allocation3 + $0x2d0] sm:$0xf] }
 0x1bd   : > { %9199 = vmatmul.mubr.msk.f32.gmra.mrb[10].mxu0 %vm444_vm6, %v12571_v33  ;;  %9439 = vmatmul.mubr.msk.f32.gmra.mrb[16].mxu1 %vm444_vm6, %v9212_v21  ;;  %v1776_v21 = vld [vmem:[#allocation3 + $0x2b0] sm:$0xff]  ;;  %v9653_v25 = vpack.c.bf16 %v1780_v20, %v1774_v14  ;;  %v2202_v14 = vld [vmem:[#allocation3 + $0x3a0] sm:$0xf]  ;;  %vm2085_vm7 = vcmp.eq.s32.totalorder %v12469_v8, %v2082_v62 }
 0x1be   : > { %1221 = vmatprep.mubr.f32.mxu0 %v12196_v3  ;;  %1540 = vmatprep.mubr.f32.mxu1 %v12196_v3  ;;  %v9663_v26 = vpack.c.bf16 %v1782_v22, %v1776_v21  ;;  %v9256_v20 = vsel %vm2085_vm7, 1.0, %v12196_v3  ;;  %v2187_v21 = vld [vmem:[#allocation3 + $0x328] sm:$0xff]  ;;  %v2193_v22 = vld [vmem:[#allocation3 + $0x358] sm:$0xff] }
 0x1c1   : > { %9207 = vmatmul.mubr.msk.f32.vlgmr.msra.gmra.mrb[12].mxu0 %vm444_vm6, %v12550_v13  ;;  %v1347_v13 = vld [vmem:[#allocation3 + $0x1a8] sm:$0xff] }
 0x1c2   : > { %1227 = vmatprep.mubr.f32.mxu0 %v12196_v3  ;;  %9612 = vmatpush1.bf16.msra.mxu0 %v9611_v27  ;;  %v9629_v36 = vpack.c.bf16 %v1353_v35, %v1347_v13  ;;  %v9234_v27 = vsel %vm1665_vm2, 1.0, %v12196_v3  ;;  %v1772_v13 = vld [vmem:[#allocation3 + $0x290] sm:$0xff]  ;;  %v1779_v35 = vld [vmem:[#allocation3 + $0x2c8] sm:$0xff] }
 0x1c3   : > { %9615 = vmatprep.subr.msk.bf16.mxu0 %vm12488_vm4, %v9613_v28  ;;  %v1767_v28 = vld [vmem:[#allocation3 + $0x268] sm:$0xff] }
 0x1c4   : > { %v9666_v30 = vpack.c.bf16 %v1773_v29, %v1767_v28  ;;  %v2205_v28 = vld [vmem:[#allocation3 + $0x3b8] sm:$0xf] }
 0x1c5   : > { %9208 = vmatmul.mubr.msk.f32.gmra.mrb[14].mxu0 %vm444_vm6, %v12560_v24 }
 0x1c6   : > { %1233 = vmatprep.mubr.f32.mxu0 %v12196_v3  ;;  %9618 = vmatpush1.bf16.msk.msra.mxu0 %vm12488_vm4, %v9616_v34  ;;  %v1766_v34 = vld [vmem:[#allocation3 + $0x260] sm:$0xff] }
 0x1c7   : > { %9630 = vmatprep.subr.bf16.mxu0 %v9629_v36  ;;  %v1785_v36 = vld [vmem:[#allocation3 + $0x2f8] sm:$0xf]  ;;  %v9668_v37 = vpack.c.bf16 %v1772_v13, %v1766_v34  ;;  %v2198_v13 = vld [vmem:[#allocation3 + $0x380] sm:$0xff] }
 0x1c8   : > { %v9670_v39 = vpack.c.bf16 %v1785_v36, %v1779_v35  ;;  %v2204_v35 = vld [vmem:[#allocation3 + $0x3b0] sm:$0xf] }
 0x1c9   : > { %9209 = vmatmul.mubr.msk.f32.gmra.mrb[16].mxu0 %vm444_vm6, %v12571_v33  ;;  %v1769_v33 = vld [vmem:[#allocation3 + $0x278] sm:$0xff] }
 0x1ca   : > { %1457 = vmatprep.mubr.f32.mxu0 %v12196_v3  ;;  %v9646_v52 = vpack.c.bf16 %v1769_v33, %v1763_v45  ;;  %v2191_v45 = vld [vmem:[#allocation3 + $0x348] sm:$0xff]  ;;  %v2080_v33 = vadd.s32 4, %v12463_v4 }
 0x1cc   : > { %vm2083_vm3 = vcmp.eq.s32.totalorder %v12469_v8, %v2080_v33 }
 0x1cd   : > { %v12744_v61 = vsel %vm2083_vm3, 1.0, %v12196_v3 }
 0x288   : > { %v1327_v24 = vpop.f32.mrb[12].mxu1 }
 0x289   : > { %v9434_v46 = vpop.f32.mrb[13].mxu1  ;;  %9219 = vmatmul.mubr.msk.f32.vlgmr.msra.gmra.mrb[6].mxu0 %vm444_vm6, %v1327_v24  ;;  %9224 = vmatmul.mubr.msk.f32.vlgmr.msra.gmra.mrb[6].mxu1 %vm444_vm6, %v1327_v24 }
 0x28a   : > { %1463 = vmatprep.mubr.f32.mxu0 %v12196_v3  ;;  %1546 = vmatprep.mubr.f32.mxu1 %v12196_v3 }
 0x28b   : > { %9632 = vmatpush1.bf16.msra.mxu0 %v9631_v41  ;;  %9641 = vmatpush3.bf16.msra.mxu1 %v12475_v11  ;;  %v1784_v41 = vld [vmem:[#allocation3 + $0x2f0] sm:$0xf] }
 0x28c   : > { %v1332_v51 = vpop.f32.mrb[14].mxu1  ;;  %9635 = vmatprep.subr.msk.bf16.mxu0 %vm12488_vm4, %v9633_v42  ;;  %9642 = vmatprep.subr.bf16.mxu1 %v12194_v2  ;;  %v9673_v46 = vpack.c.bf16 %v1784_v41, %v1778_v40 }
 0x28d   : > { %v9437_v54 = vpop.f32.mrb[15].mxu1  ;;  %9220 = vmatmul.mubr.msk.f32.gmra.mrb[8].mxu0 %vm444_vm6, %v1332_v51  ;;  %9225 = vmatmul.mubr.msk.f32.gmra.mrb[8].mxu1 %vm444_vm6, %v1332_v51 }
 0x28e   : > { %1469 = vmatprep.mubr.f32.mxu0 %v12196_v3  ;;  %1552 = vmatprep.mubr.f32.mxu1 %v12196_v3  ;;  %v2184_v54 = vld [vmem:[#allocation3 + $0x310] sm:$0xff] }
 0x28f   : > { %9638 = vmatpush1.bf16.msk.msra.mxu0 %vm12488_vm4, %v9636_v49  ;;  %9645 = vmatpush3.bf16.msk.msra.mxu1 %vm12488_vm4, %v12478_v17  ;;  %v9693_v49 = vpack.c.bf16 %v2191_v45, %v2185_v44  ;;  %v9695_v0 = vpack.c.bf16 %v2190_v55, %v2184_v54  ;;  %v12803_v44 = vsub.s32 2, %v12463_v4 }
 0x290   : > { %v1337_v58 = vpop.f32.mrb[16].mxu1  ;;  %9647 = vmatprep.subr.bf16.mxu0 %v9646_v52  ;;  %9657 = vmatprep.subr.bf16.mxu1 %v9656_v53  ;;  %v2188_v52 = vld [vmem:[#allocation3 + $0x330] sm:$0xff] }
 0x291   : > { %v9440_v63 = vpop.f32.mrb[17].mxu1  ;;  %9221 = vmatmul.mubr.msk.f32.gmra.mrb[10].mxu0 %vm444_vm6, %v1337_v58  ;;  %9226 = vmatmul.mubr.msk.f32.gmra.mrb[10].mxu1 %vm444_vm6, %v1337_v58 }
 0x292   : > { %1623 = vmatprep.mubr.f32.mxu0 %v12196_v3  ;;  %9449 = vmatprep.mubr.msk.f32.mxu1 %vm12195_vm0, %v12196_v3 }
 0x295   : > { %9229 = vmatmul.mubr.msk.f32.vlgmr.msra.gmra.mrb[12].mxu0 %vm444_vm6, %v1327_v24  ;;  %9450 = vmatmul.mubr.msk.f32.vlgmr.msra.gmra.mrb[18].mxu1 %vm444_vm6, %v12685_v6  ;;  %v2183_v24 = vld [vmem:[#allocation3 + $0x308] sm:$0xff] }
 0x296   : > { %1629 = vmatprep.mubr.f32.mxu0 %v12196_v3  ;;  %9452 = vmatprep.mubr.msk.f32.mxu1 %vm12195_vm0, %v12196_v3  ;;  %v9683_v48 = vpack.c.bf16 %v2189_v43, %v2183_v24  ;;  %v12797_v24 = vsub.s32 0, %v12463_v4  ;;  %v12800_v43 = vsub.s32 3, %v12463_v4 }
 0x297   : > { %9649 = vmatpush1.bf16.msra.mxu0 %v9648_v9  ;;  %9659 = vmatpush1.bf16.msra.mxu1 %v9658_v12  ;;  %v2200_v9 = vld [vmem:[#allocation3 + $0x390] sm:$0xf] }
 0x298   : > { %9652 = vmatprep.subr.msk.bf16.mxu0 %vm12488_vm4, %v9650_v15  ;;  %9662 = vmatprep.subr.msk.bf16.mxu1 %vm12488_vm4, %v9660_v16  ;;  %v2196_v12 = vld [vmem:[#allocation3 + $0x370] sm:$0xff]  ;;  %v9690_v15 = vpack.c.bf16 %v2200_v9, %v2194_v1 }
 0x299   : > { %9230 = vmatmul.mubr.msk.f32.gmra.mrb[14].mxu0 %vm444_vm6, %v1332_v51  ;;  %9453 = vmatmul.mubr.msk.f32.gmra.mrb[20].mxu1 %vm444_vm6, %v9233_v23  ;;  %v2182_v51 = vld [vmem:[#allocation3 + $0x300] sm:$0xff]  ;;  %v9700_v16 = vpack.c.bf16 %v2202_v14, %v2196_v12  ;;  %v9703_v23 = vpack.c.bf16 %v2193_v22, %v2187_v21  ;;  %v2524_v12 = vsub.s32 5, %v12463_v4 }
 0x29a   : > { %1635 = vmatprep.mubr.f32.mxu0 %v12196_v3  ;;  %9455 = vmatprep.mubr.msk.f32.mxu1 %vm12195_vm0, %v12196_v3  ;;  %v9685_v63 = vpack.c.bf16 %v2188_v52, %v2182_v51 }
 0x29b   : > { %9655 = vmatpush1.bf16.msk.msra.mxu0 %vm12488_vm4, %v9653_v25  ;;  %9665 = vmatpush1.bf16.msk.msra.mxu1 %vm12488_vm4, %v9663_v26  ;;  %v2186_v25 = vld [vmem:[#allocation3 + $0x320] sm:$0xff]  ;;  %v2192_v26 = vld [vmem:[#allocation3 + $0x350] sm:$0xff] }
 0x29c   : > { %9676 = vmatprep.subr.bf16.mxu1 %v12194_v2  ;;  %9667 = vmatprep.subr.bf16.mxu0 %v9666_v30  ;;  %v9705_v29 = vpack.c.bf16 %v2192_v26, %v2186_v25 }
 0x29d   : > { %9231 = vmatmul.mubr.msk.f32.gmra.mrb[16].mxu0 %vm444_vm6, %v1337_v58  ;;  %9456 = vmatmul.mubr.msk.f32.gmra.mrb[22].mxu1 %vm444_vm6, %v9234_v27  ;;  %v2201_v58 = vld [vmem:[#allocation3 + $0x398] sm:$0xf]  ;;  %v2199_v27 = vld [vmem:[#allocation3 + $0x388] sm:$0xff] }
 0x29e   : > { %1877 = vmatprep.mubr.f32.mxu0 %v12196_v3  ;;  %1960 = vmatprep.mubr.f32.mxu1 %v12196_v3  ;;  %v9687_v5 = vpack.c.bf16 %v2201_v58, %v2195_v56  ;;  %v9707_v34 = vpack.c.bf16 %v2205_v28, %v2199_v27 }
 0x368   : > { %v1747_v38 = vpop.f32.mrb[18].mxu1 }
 0x369   : > { %v9451_v42 = vpop.f32.mrb[19].mxu1  ;;  %9241 = vmatmul.mubr.msk.f32.vlgmr.msra.gmra.mrb[6].mxu0 %vm444_vm6, %v1747_v38  ;;  %9246 = vmatmul.mubr.msk.f32.vlgmr.msra.gmra.mrb[6].mxu1 %vm444_vm6, %v1747_v38 }
 0x36a   : > { %1883 = vmatprep.mubr.f32.mxu0 %v12196_v3  ;;  %1966 = vmatprep.mubr.f32.mxu1 %v12196_v3  ;;  %v2500_v42 = vld [vmem:[#allocation5] sm:$0x3f] }
 0x36b   : > { %9669 = vmatpush1.bf16.msra.mxu0 %v9668_v37  ;;  %9678 = vmatpush3.bf16.msra.mxu1 %v12475_v11  ;;  %v2081_v11 = vadd.s32 4, %v12473_v10  ;;  %v9710_v37 = vpack.c.bf16 %v2204_v35, %v2198_v13  ;;  %v2505_v45 = vrot.slane %v2500_v42, %v12797_v24  ;;  %v2517_v33 = vrot.slane %v2500_v42, %v12800_v43 }
 0x36c   : > { %v1752_v47 = vpop.f32.mrb[20].mxu1  ;;  %9672 = vmatprep.subr.msk.bf16.mxu0 %vm12488_vm4, %v9670_v39  ;;  %9679 = vmatprep.subr.bf16.mxu1 %v12194_v2  ;;  %v2613_v13 = vmul.u32 2, %v12463_v4 }
 0x36d   : > { %v9454_v50 = vpop.f32.mrb[21].mxu1  ;;  %9242 = vmatmul.mubr.msk.f32.gmra.mrb[8].mxu0 %vm444_vm6, %v1752_v47  ;;  %9247 = vmatmul.mubr.msk.f32.gmra.mrb[8].mxu1 %vm444_vm6, %v1752_v47  ;;  %vm2084_vm5 = vcmp.eq.s32.totalorder %v12469_v8, %v2081_v11 }
 0x36e   : > { %1889 = vmatprep.mubr.f32.mxu0 %v12196_v3  ;;  %1972 = vmatprep.mubr.f32.mxu1 %v12196_v3  ;;  %v9255_v18 = vsel %vm2084_vm5, 1.0, %v12196_v3 }
 0x36f   : > { %9675 = vmatpush1.bf16.msk.msra.mxu0 %vm12488_vm4, %v9673_v46  ;;  %9682 = vmatpush3.bf16.msk.msra.mxu1 %vm12488_vm4, %v12478_v17  ;;  %v2203_v17 = vld [vmem:[#allocation3 + $0x3a8] sm:$0xf]  ;;  %v12807_v46 = vsub.s32 1, %v12463_v4 }
 0x370   : > { %v1757_v53 = vpop.f32.mrb[22].mxu1  ;;  %9684 = vmatprep.subr.bf16.mxu0 %v9683_v48  ;;  %9694 = vmatprep.subr.bf16.mxu1 %v9693_v49  ;;  %v9697_v7 = vpack.c.bf16 %v2203_v17, %v2197_v60  ;;  %v2513_v49 = vrot.slane %v2500_v42, %v12803_v44 }
 0x371   : > { %v9457_v57 = vpop.f32.mrb[23].mxu1  ;;  %9243 = vmatmul.mubr.msk.f32.gmra.mrb[10].mxu0 %vm444_vm6, %v1757_v53  ;;  %9248 = vmatmul.mubr.msk.f32.gmra.mrb[10].mxu1 %vm444_vm6, %v1757_v53  ;;  %v2509_v51 = vrot.slane %v2500_v42, %v12807_v46 }
 0x372   : > { %2043 = vmatprep.mubr.f32.mxu0 %v12196_v3  ;;  %9466 = vmatprep.mubr.msk.f32.mxu1 %vm12195_vm0, %v12196_v3 }
 0x375   : > { %9251 = vmatmul.mubr.msk.f32.vlgmr.msra.gmra.mrb[12].mxu0 %vm444_vm6, %v1747_v38  ;;  %9467 = vmatmul.mubr.msk.f32.vlgmr.msra.gmra.mrb[24].mxu1 %vm444_vm6, %v12744_v61 }
 0x376   : > { %2049 = vmatprep.mubr.f32.mxu0 %v12196_v3  ;;  %9469 = vmatprep.mubr.msk.f32.mxu1 %vm12195_vm0, %v12196_v3 }
 0x377   : > { %9686 = vmatpush1.bf16.msra.mxu0 %v9685_v63  ;;  %9696 = vmatpush1.bf16.msra.mxu1 %v9695_v0 }
 0x378   : > { %9689 = vmatprep.subr.msk.bf16.mxu0 %vm12488_vm4, %v9687_v5  ;;  %9699 = vmatprep.subr.msk.bf16.mxu1 %vm12488_vm4, %v9697_v7  ;;  %v2520_v5 = vsub.s32 4, %v12463_v4 }
 0x379   : > { %9252 = vmatmul.mubr.msk.f32.gmra.mrb[14].mxu0 %vm444_vm6, %v1752_v47  ;;  %9470 = vmatmul.mubr.msk.f32.gmra.mrb[26].mxu1 %vm444_vm6, %v9255_v18 }
 0x37a   : > { %2055 = vmatprep.mubr.f32.mxu0 %v12196_v3  ;;  %9472 = vmatprep.mubr.msk.f32.mxu1 %vm12195_vm0, %v12196_v3  ;;  %v2521_v26 = vrot.slane %v2500_v42, %v2520_v5 }
 0x37b   : > { %9692 = vmatpush1.bf16.msk.msra.mxu0 %vm12488_vm4, %v9690_v15  ;;  %9702 = vmatpush1.bf16.msk.msra.mxu1 %vm12488_vm4, %v9700_v16 }
 0x37c   : > { %9704 = vmatprep.subr.bf16.mxu0 %v9703_v23 }
 0x37d   : > { %9253 = vmatmul.mubr.msk.f32.gmra.mrb[16].mxu0 %vm444_vm6, %v1757_v53  ;;  %9473 = vmatmul.mubr.msk.f32.gmra.mrb[28].mxu1 %vm444_vm6, %v9256_v20 }
 0x37e   : > { %2297 = vmatprep.mubr.f32.mxu0 %v12196_v3  ;;  %2380 = vmatprep.mubr.f32.mxu1 %v12196_v3 }
 0x448   : > { %v2167_v30 = vpop.f32.mrb[24].mxu1 }
 0x449   : > { %v9468_v36 = vpop.f32.mrb[25].mxu1  ;;  %9263 = vmatmul.mubr.msk.f32.vlgmr.msra.gmra.mrb[6].mxu0 %vm444_vm6, %v2167_v30  ;;  %9268 = vmatmul.mubr.msk.f32.vlgmr.msra.gmra.mrb[6].mxu1 %vm444_vm6, %v2167_v30 }
 0x44a   : > { %2303 = vmatprep.mubr.f32.mxu0 %v12196_v3  ;;  %2386 = vmatprep.mubr.f32.mxu1 %v12196_v3 }
 0x44b   : > { %9706 = vmatpush1.bf16.msra.mxu0 %v9705_v29 }
 0x44c   : > { %v2172_v38 = vpop.f32.mrb[26].mxu1  ;;  %9709 = vmatprep.subr.msk.bf16.mxu0 %vm12488_vm4, %v9707_v34  ;;  %v2525_v34 = vrot.slane %v2500_v42, %v2524_v12 }
 0x44d   : > { %v9471_v39 = vpop.f32.mrb[27].mxu1  ;;  %9264 = vmatmul.mubr.msk.f32.gmra.mrb[8].mxu0 %vm444_vm6, %v2172_v38  ;;  %9269 = vmatmul.mubr.msk.f32.gmra.mrb[8].mxu1 %vm444_vm6, %v2172_v38 }
 0x44e   : > { %2309 = vmatprep.mubr.f32.mxu0 %v12196_v3  ;;  %2392 = vmatprep.mubr.f32.mxu1 %v12196_v3 }
 0x44f   : > { %9712 = vmatpush1.bf16.msk.msra.mxu0 %vm12488_vm4, %v9710_v37 }
 0x450   : > { %v2177_v40 = vpop.f32.mrb[28].mxu1 }
 0x451   : > { %v9474_v41 = vpop.f32.mrb[29].mxu1  ;;  %9265 = vmatmul.mubr.msk.f32.gmra.mrb[10].mxu0 %vm444_vm6, %v2177_v40  ;;  %9270 = vmatmul.mubr.msk.f32.gmra.mrb[10].mxu1 %vm444_vm6, %v2177_v40 }
 0x452   : > { %2463 = vmatprep.mubr.f32.mxu0 %v12196_v3  ;;  %2700 = vmatprep.mubr.f32.mxu1 %v12196_v3 }
 0x455   : > { %9273 = vmatmul.mubr.msk.f32.vlgmr.msra.gmra.mrb[12].mxu0 %vm444_vm6, %v2167_v30 }
 0x456   : > { %2469 = vmatprep.mubr.f32.mxu0 %v12196_v3 }
 0x459   : > { %9274 = vmatmul.mubr.msk.f32.gmra.mrb[14].mxu0 %vm444_vm6, %v2172_v38 }
 0x45a   : > { %2475 = vmatprep.mubr.f32.mxu0 %v12196_v3 }
 0x45d   : > { %9275 = vmatmul.mubr.msk.f32.gmra.mrb[16].mxu0 %vm444_vm6, %v2177_v40 }
 0x45e   : > { %3028 = vmatprep.mubr.f32.mxu0 %v12196_v3 }
 0x51c   : > { %v2299_v47 = vpop.f32.mrb[6].mxu0  ;;  %v2382_v48 = vpop.f32.mrb[6].mxu1 }
 0x51d   : > { %v2532_v50 = vadd.f32 %v2505_v45, %v2299_v47  ;;  %v2301_v11 = vpop.f32.mrb[7].mxu0  ;;  %v2384_v52 = vpop.f32.mrb[7].mxu1  ;;  %v2534_v55 = vadd.f32 %v2513_v49, %v2382_v48 }
 0x51e   : > { %v2535_v53 = vadd.f32 %v2517_v33, %v2384_v52  ;;  %v2533_v58 = vadd.f32 %v2509_v51, %v2301_v11 }
 0x51f   : > { %vm2550_vm6 = vcmp.ge.f32.partialorder %v2532_v50, 0.0  ;;  %v2568_v54 = vmul.f32 0.01, %v2532_v50  ;;  %v2570_v14 = vmul.f32 0.01, %v2534_v55  ;;  %vm2552_vm10 = vcmp.ge.f32.partialorder %v2534_v55, 0.0 }
 0x520   : > { %vm2553_vm8 = vcmp.ge.f32.partialorder %v2535_v53, 0.0  ;;  %v2571_v56 = vmul.f32 0.01, %v2535_v53  ;;  %v2305_v60 = vpop.f32.mrb[8].mxu0  ;;  %v2388_v17 = vpop.f32.mrb[8].mxu1  ;;  %vm2551_vm12 = vcmp.ge.f32.partialorder %v2533_v58, 0.0 }
 0x521   : > { %v2586_v57 = vsel %vm2550_vm6, %v2532_v50, %v2568_v54  ;;  %v2538_v63 = vadd.f32 %v2505_v45, %v2305_v60  ;;  %v2307_v0 = vpop.f32.mrb[9].mxu0  ;;  %v2390_v1 = vpop.f32.mrb[9].mxu1  ;;  %v2540_v15 = vadd.f32 %v2513_v49, %v2388_v17  ;;  %v2569_v16 = vmul.f32 0.01, %v2533_v58 }
 0x522   : > { %v2589_v62 = vsel %vm2553_vm8, %v2535_v53, %v2571_v56  ;;  %v2541_v9 = vadd.f32 %v2517_v33, %v2390_v1  ;;  %v2539_v22 = vadd.f32 %v2509_v51, %v2307_v0  ;;  %v2588_v35 = vsel %vm2552_vm10, %v2534_v55, %v2570_v14 }
 0x523   : > { %v2604_v7 = vmax.f32 %v2586_v57, %v2589_v62  ;;  %vm2556_vm9 = vcmp.ge.f32.partialorder %v2538_v63, 0.0  ;;  %v2574_v18 = vmul.f32 0.01, %v2538_v63  ;;  %v2576_v36 = vmul.f32 0.01, %v2540_v15 }
 0x524   : > { %vm2559_vm11 = vcmp.ge.f32.partialorder %v2541_v9, 0.0  ;;  %v2577_v20 = vmul.f32 0.01, %v2541_v9  ;;  %v2311_v23 = vpop.f32.mrb[10].mxu0  ;;  %v2394_v25 = vpop.f32.mrb[10].mxu1  ;;  %v2587_v40 = vsel %vm2551_vm12, %v2533_v58, %v2569_v16  ;;  %vm2558_vm13 = vcmp.ge.f32.partialorder %v2540_v15, 0.0 }
 0x525   : > { %v2592_v21 = vsel %vm2556_vm9, %v2538_v63, %v2574_v18  ;;  %v2544_v28 = vadd.f32 %v2505_v45, %v2311_v23  ;;  %v2313_v29 = vpop.f32.mrb[11].mxu0  ;;  %v2396_v30 = vpop.f32.mrb[11].mxu1  ;;  %vm2557_vm15 = vcmp.ge.f32.partialorder %v2539_v22, 0.0  ;;  %v2575_v45 = vmul.f32 0.01, %v2539_v22 }
 0x526   : > { %v2595_v27 = vsel %vm2559_vm11, %v2541_v9, %v2577_v20  ;;  %v2547_v38 = vadd.f32 %v2517_v33, %v2396_v30  ;;  %v2546_v50 = vadd.f32 %v2513_v49, %v2394_v25  ;;  %v2594_v53 = vsel %vm2558_vm13, %v2540_v15, %v2576_v36 }
 0x527   : > { %v2607_v37 = vmax.f32 %v2592_v21, %v2595_v27  ;;  %vm2562_vm14 = vcmp.ge.f32.partialorder %v2544_v28, 0.0  ;;  %v2580_v41 = vmul.f32 0.01, %v2544_v28  ;;  %v2545_v54 = vadd.f32 %v2509_v51, %v2313_v29 }
 0x528   : > { %v2465_v39 = vpop.f32.mrb[12].mxu0  ;;  %vm2565_vm2 = vcmp.ge.f32.partialorder %v2547_v38, 0.0  ;;  %v2583_v47 = vmul.f32 0.01, %v2547_v38  ;;  %v2593_v62 = vsel %vm2557_vm15, %v2539_v22, %v2575_v45  ;;  %v2582_v0 = vmul.f32 0.01, %v2546_v50 }
 0x529   : > { %v2598_v48 = vsel %vm2562_vm14, %v2544_v28, %v2580_v41  ;;  %v2536_v42 = vadd.f32 %v2521_v26, %v2465_v39  ;;  %v2467_v11 = vpop.f32.mrb[13].mxu0  ;;  %v12821_v52 = vpack.c.bf16 %v2607_v37, %v2604_v7  ;;  %v2581_v15 = vmul.f32 0.01, %v2545_v54 }
 0x52a   : > { %v2601_v55 = vsel %vm2565_vm2, %v2547_v38, %v2583_v47  ;;  %v2537_v33 = vadd.f32 %v2525_v34, %v2467_v11  ;;  %vm2563_vm8 = vcmp.ge.f32.partialorder %v2545_v54, 0.0  ;;  %vm2564_vm9 = vcmp.ge.f32.partialorder %v2546_v50, 0.0 }
 0x52b   : > { %v12823_v57 = vmax.f32 %v2598_v48, %v2601_v55  ;;  %vm2554_vm3 = vcmp.ge.f32.partialorder %v2536_v42, 0.0  ;;  %v2572_v58 = vmul.f32 0.01, %v2536_v42  ;;  %v2599_v37 = vsel %vm2563_vm8, %v2545_v54, %v2581_v15 }
 0x52c   : > { %v2471_v56 = vpop.f32.mrb[14].mxu0  ;;  %vm2555_vm5 = vcmp.ge.f32.partialorder %v2537_v33, 0.0  ;;  %v2573_v63 = vmul.f32 0.01, %v2537_v33  ;;  %vm2615_vm12 = vcmp.eq.s32.totalorder %v12469_v8, %v2613_v13  ;;  %vm2629_vm13 = vcmask 195584  }
 0x52d   : > { %v2542_v60 = vadd.f32 %v2521_v26, %v2471_v56  ;;  %v2473_v17 = vpop.f32.mrb[15].mxu0  ;;  %v2590_v1 = vsel %vm2554_vm3, %v2536_v42, %v2572_v58  ;;  %v12832_v45 = vsel %vm2615_vm12, 1.0, %v12196_v3  ;;  %v2621_v47 = vadd.s32 1, %v2613_v13 }
 0x52e   : > { %v2543_v49 = vadd.f32 %v2525_v34, %v2473_v17  ;;  %v2591_v9 = vsel %vm2555_vm5, %v2537_v33, %v2573_v63  ;;  %v2605_v18 = vmax.f32 %v2587_v40, %v2590_v1  ;;  %vm2952_vm3 = vcmask 97280  }
 0x52f   : > { %vm2560_vm7 = vcmp.ge.f32.partialorder %v2542_v60, 0.0  ;;  %v2578_v7 = vmul.f32 0.01, %v2542_v60  ;;  %v2606_v16 = vmax.f32 %v2588_v35, %v2591_v9  ;;  %vm2623_vm15 = vcmp.eq.s32.totalorder %v12469_v8, %v2621_v47  ;;  %v3442_v9 = vld [vmem:[#allocation7 + $0x608] sm:$0xff]  ;;  %v3455_v47 = vld [vmem:[#allocation7 + $0x670] sm:$0xff] }
 0x530   : > { %vm2561_vm6 = vcmp.ge.f32.partialorder %v2543_v49, 0.0  ;;  %v2579_v51 = vmul.f32 0.01, %v2543_v49  ;;  %v2477_v14 = vpop.f32.mrb[16].mxu0  ;;  %vm6263_vm8 = vcmask 31744  }
 0x531   : > { %v2596_v20 = vsel %vm2560_vm7, %v2542_v60, %v2578_v7  ;;  %v2548_v21 = vadd.f32 %v2521_v26, %v2477_v14  ;;  %v2479_v23 = vpop.f32.mrb[17].mxu0  ;;  %v2600_v26 = vsel %vm2564_vm9, %v2546_v50, %v2582_v0  ;;  %v12850_v50 = vsel %vm2623_vm15, 1.0, %v12196_v3 }
 0x532   : > { %v2597_v25 = vsel %vm2561_vm6, %v2543_v49, %v2579_v51  ;;  %v2549_v22 = vadd.f32 %v2525_v34, %v2479_v23  ;;  %v2608_v27 = vmax.f32 %v2593_v62, %v2596_v20  ;;  %v2614_v34 = vmul.u32 2, %v12473_v10  ;;  %v3446_v51 = vld [vmem:[#allocation7 + $0x628] sm:$0xff]  ;;  %v3448_v20 = vld [vmem:[#allocation7 + $0x638] sm:$0xff]  ;;  %v3445_v23 = vld [vmem:[#allocation7 + $0x620] sm:$0xff] }
 0x533   : > { %v2609_v28 = vmax.f32 %v2594_v53, %v2597_v25  ;;  %vm2566_vm10 = vcmp.ge.f32.partialorder %v2548_v21, 0.0  ;;  %v2584_v29 = vmul.f32 0.01, %v2548_v21  ;;  %v9749_v15 = vpack.c.bf16 %v3446_v51, %v3442_v9  ;;  %v3450_v25 = vld [vmem:[#allocation7 + $0x648] sm:$0xff] }
 0x534   : > { %vm2567_vm11 = vcmp.ge.f32.partialorder %v2549_v22, 0.0  ;;  %v2585_v30 = vmul.f32 0.01, %v2549_v22  ;;  %v9713_v36 = vpack.c.bf16 %v2608_v27, %v2605_v18  ;;  %vm2616_vm14 = vcmp.eq.s32.totalorder %v12469_v8, %v2614_v34  ;;  %v3474_v9 = vld [vmem:[#allocation7 + $0x708] sm:$0xff] }
 0x535   : > { %v2602_v38 = vsel %vm2566_vm10, %v2548_v21, %v2584_v29  ;;  %v9717_v35 = vpack.c.bf16 %v2609_v28, %v2606_v16  ;;  %v9277_v10 = vsel %vm2616_vm14, 1.0, %v12196_v3  ;;  %v2622_v48 = vadd.s32 1, %v2614_v34  ;;  %v3444_v16 = vld [vmem:[#allocation7 + $0x618] sm:$0xff]  ;;  %v3441_v21 = vld [vmem:[#allocation7 + $0x600] sm:$0xff]  ;;  %v3443_v28 = vld [vmem:[#allocation7 + $0x610] sm:$0xff] }
 0x536   : > { %v2603_v39 = vsel %vm2567_vm11, %v2549_v22, %v2585_v30  ;;  %9714 = vmatprep.subr.bf16.mxu1 %v9713_v36  ;;  %v2611_v40 = vmax.f32 %v2599_v37, %v2602_v38  ;;  %v3454_v22 = vld [vmem:[#allocation7 + $0x668] sm:$0xff]  ;;  %v9845_v27 = vpack.c.bf16 %v3448_v20, %v3444_v16  ;;  %v3447_v29 = vld [vmem:[#allocation7 + $0x630] sm:$0xff]  ;;  %v9751_v30 = vpack.c.bf16 %v3445_v23, %v3441_v21  ;;  %v3456_v37 = vld [vmem:[#allocation7 + $0x678] sm:$0xff] }
 0x537   : > { %v2612_v41 = vmax.f32 %v2600_v26, %v2603_v39  ;;  %9716 = vmatpush1.bf16.msra.mxu1 %v12821_v52  ;;  %vm2624_vm2 = vcmp.eq.s32.totalorder %v12469_v8, %v2622_v48  ;;  %v9753_v38 = vpack.c.bf16 %v3454_v22, %v3450_v25  ;;  %v3453_v26 = vld [vmem:[#allocation7 + $0x660] sm:$0xff]  ;;  %v9847_v39 = vpack.c.bf16 %v3447_v29, %v3443_v28  ;;  %v3462_v34 = vld [vmem:[#allocation7 + $0x6a8] sm:$0xff]  ;;  %v3471_v16 = vld [vmem:[#allocation7 + $0x6f0] sm:$0xff] }
 0x538   : > { %2640 = vmatprep.subr.mxu1 %v2611_v40  ;;  %v9279_v13 = vsel %vm2624_vm2, 1.0, %v12196_v3  ;;  %v3478_v51 = vld [vmem:[#allocation7 + $0x728] sm:$0xff]  ;;  %v3476_v21 = vld [vmem:[#allocation7 + $0x718] sm:$0xff]  ;;  %v3473_v22 = vld [vmem:[#allocation7 + $0x700] sm:$0xff]  ;;  %vm6113_vm6 = vcmask 64512   ;;  %vm9007_vm9 = vcmask 1040384  }
 0x539   : > { %v3480_v23 = vld [vmem:[#allocation7 + $0x738] sm:$0xff]  ;;  %v9765_v25 = vpack.c.bf16 %v3478_v51, %v3474_v9  ;;  %v3482_v29 = vld [vmem:[#allocation7 + $0x748] sm:$0xff]  ;;  %v3497_v51 = vld [vmem:[#allocation7 + $0x7c0] sm:$0xff]  ;;  %vm9027_vm10 = vcmask 0  }
 0x53b   : > { %2641 = vmatpush1.msra.mxu1 %v12823_v57 }
 0x53c   : > { %9280 = vmatmul.mubr.msk.f32.vlgmr.msra.gmra.mrb[30].mxu1 %vm2629_vm13, %v12832_v45  ;;  %9718 = vmatprep.subr.bf16.mxu1 %v9717_v35 }
 0x53d   : > { %9720 = vmatpush3.bf16.msra.mxu1 %v9717_v35  ;;  %2706 = vmatprep.mubr.f32.mxu1 %v12196_v3 }
 0x53e   : > { %9479 = vmatprep.subr.mxu1 %v2612_v41 }
 0x540   : > { %9281 = vmatmul.mubr.msk.f32.gmra.mrb[32].mxu1 %vm2629_vm13, %v9277_v10 }
 0x541   : > { %9480 = vmatpush3.msra.mxu1 %v2612_v41  ;;  %9481 = vmatprep.mubr.msk.f32.mxu1 %vm2629_vm13, %v12832_v45 }
 0x542   : > { %9722 = vmatprep.subr.bf16.mxu1 %v9713_v36  ;;  %v3452_v36 = vld [vmem:[#allocation7 + $0x658] sm:$0xff] }
 0x544   : > { %9482 = vmatmul.mubr.msk.f32.vlgmr.msra.gmra.mrb[34].mxu1 %vm2629_vm13, %v9277_v10  ;;  %v3451_v10 = vld [vmem:[#allocation7 + $0x650] sm:$0xff] }
 0x545   : > { %9724 = vmatpush1.bf16.msra.mxu1 %v12821_v52  ;;  %2858 = vmatprep.mubr.f32.mxu1 %v12196_v3 }
 0x546   : > { %2798 = vmatprep.subr.mxu1 %v2611_v40  ;;  %v3458_v40 = vld [vmem:[#allocation7 + $0x688] sm:$0xff] }
 0x549   : > { %2799 = vmatpush1.msra.mxu1 %v12823_v57 }
 0x54a   : > { %9284 = vmatmul.mubr.msk.f32.vlgmr.msra.gmra.mrb[36].mxu1 %vm2629_vm13, %v12850_v50  ;;  %9726 = vmatprep.subr.bf16.mxu1 %v9717_v35 }
 0x54b   : > { %9728 = vmatpush3.bf16.msra.mxu1 %v9717_v35  ;;  %2864 = vmatprep.mubr.f32.mxu1 %v12196_v3  ;;  %v3449_v35 = vld [vmem:[#allocation7 + $0x640] sm:$0xff] }
 0x54c   : > { %9488 = vmatprep.subr.mxu1 %v2612_v41  ;;  %v9755_v48 = vpack.c.bf16 %v3453_v26, %v3449_v35  ;;  %v3484_v26 = vld [vmem:[#allocation7 + $0x758] sm:$0xff] }
 0x54e   : > { %9285 = vmatmul.mubr.msk.f32.gmra.mrb[38].mxu1 %vm2629_vm13, %v9279_v13 }
 0x54f   : > { %9489 = vmatpush3.msra.mxu1 %v2612_v41  ;;  %9490 = vmatprep.mubr.msk.f32.mxu1 %vm2629_vm13, %v12850_v50  ;;  %v9849_v41 = vpack.c.bf16 %v3456_v37, %v3452_v36  ;;  %v9861_v36 = vpack.c.bf16 %v3480_v23, %v3476_v21  ;;  %v3475_v37 = vld [vmem:[#allocation7 + $0x710] sm:$0xff] }
 0x550   : > { %9735 = vmatprep.subr.bf16.mxu1 %v12194_v2  ;;  %v3499_v23 = vld [vmem:[#allocation7 + $0x7d0] sm:$0xff] }
 0x552   : > { %9491 = vmatmul.mubr.msk.f32.vlgmr.msra.gmra.mrb[40].mxu1 %vm2629_vm13, %v9279_v13  ;;  %v3460_v13 = vld [vmem:[#allocation7 + $0x698] sm:$0xff] }
 0x553   : > { %9497 = vmatprep.mubr.msk.f32.mxu1 %vm12195_vm0, %v12196_v3 }
 0x60f   : > { %v2702_v8 = vpop.f32.mrb[30].mxu1 }
 0x610   : > { %v2704_v42 = vpop.f32.mrb[31].mxu1 }
 0x613   : > { %v2708_v11 = vpop.f32.mrb[32].mxu1 }
 0x614   : > { %v2710_v52 = vpop.f32.mrb[33].mxu1 }
 0x617   : > { %v9483_v53 = vpop.f32.mrb[34].mxu1 }
 0x618   : > { %v2779_v54 = vpop.f32.mrb[35].mxu1 }
 0x61d   : > { %v2860_v55 = vpop.f32.mrb[36].mxu1 }
 0x61e   : > { %v2946_v33 = vmax.f32 %v2702_v8, %v2860_v55  ;;  %v2862_v56 = vpop.f32.mrb[37].mxu1  ;;  %v3464_v8 = vld [vmem:[#allocation7 + $0x6b8] sm:$0xff]  ;;  %v3470_v55 = vld [vmem:[#allocation7 + $0x6e8] sm:$0xff] }
 0x61f   : > { %v2947_v57 = vmax.f32 %v2704_v42, %v2862_v56  ;;  %v9757_v42 = vpack.c.bf16 %v3462_v34, %v3458_v40  ;;  %v3459_v56 = vld [vmem:[#allocation7 + $0x690] sm:$0xff]  ;;  %v3481_v34 = vld [vmem:[#allocation7 + $0x740] sm:$0xff] }
 0x621   : > { %v2866_v58 = vpop.f32.mrb[38].mxu1 }
 0x622   : > { %v2949_v60 = vmax.f32 %v2708_v11, %v2866_v58  ;;  %v2868_v17 = vpop.f32.mrb[39].mxu1  ;;  %v3457_v11 = vld [vmem:[#allocation7 + $0x680] sm:$0xff] }
 0x623   : > { %v2950_v62 = vmax.f32 %v2710_v52, %v2868_v17  ;;  %v3461_v52 = vld [vmem:[#allocation7 + $0x6a0] sm:$0xff]  ;;  %v3472_v17 = vld [vmem:[#allocation7 + $0x6f8] sm:$0xff] }
 0x624   : > { %v12865_v63 = vpack.c.bf16 %v2949_v60, %v2946_v33  ;;  %v9853_v33 = vpack.c.bf16 %v3464_v8, %v3460_v13  ;;  %v9759_v58 = vpack.c.bf16 %v3461_v52, %v3457_v11  ;;  %v3468_v60 = vld [vmem:[#allocation7 + $0x6d8] sm:$0xff]  ;;  %v3483_v8 = vld [vmem:[#allocation7 + $0x750] sm:$0xff] }
 0x625   : > { %v12867_v49 = vpack.c.bf16 %v2950_v62, %v2947_v57  ;;  %v9492_v0 = vpop.f32.mrb[40].mxu1  ;;  %v3463_v57 = vld [vmem:[#allocation7 + $0x6b0] sm:$0xff]  ;;  %v3492_v52 = vld [vmem:[#allocation7 + $0x798] sm:$0xff] }
 0x626   : > { %v2951_v1 = vmax.f32 %v9483_v53, %v9492_v0  ;;  %v2937_v7 = vpop.f32.mrb[41].mxu1  ;;  %v9851_v53 = vpack.c.bf16 %v3455_v47, %v3451_v10  ;;  %v3465_v0 = vld [vmem:[#allocation7 + $0x6c0] sm:$0xff]  ;;  %v3490_v47 = vld [vmem:[#allocation7 + $0x788] sm:$0xff] }
 0x627   : > { %v2948_v14 = vmax.f32 %v2779_v54, %v2937_v7  ;;  %9731 = vmatprep.subr.msk.bf16.mxu0 %vm12488_vm4, %v12867_v49  ;;  %v3466_v54 = vld [vmem:[#allocation7 + $0x6c8] sm:$0xff]  ;;  %v9855_v7 = vpack.c.bf16 %v3463_v57, %v3459_v56 }
 0x628   : > { %9734 = vmatpush1.bf16.msk.msra.mxu0 %vm12488_vm4, %v12865_v63  ;;  %v9761_v62 = vpack.c.bf16 %v3470_v55, %v3466_v54  ;;  %v3489_v55 = vld [vmem:[#allocation7 + $0x780] sm:$0xff]  ;;  %v3498_v57 = vld [vmem:[#allocation7 + $0x7c8] sm:$0xff] }
 0x629   : > { %v12875_v18 = vpack.c.bf16 %v2951_v1, %v2948_v14  ;;  %9741 = vmatprep.subr.msk.bf16.mxu0 %vm12488_vm4, %v12867_v49  ;;  %v3469_v1 = vld [vmem:[#allocation7 + $0x6e0] sm:$0xff]  ;;  %v9857_v14 = vpack.c.bf16 %v3472_v17, %v3468_v60  ;;  %v3491_v17 = vld [vmem:[#allocation7 + $0x790] sm:$0xff] }
 0x62a   : > { %v9763_v20 = vpack.c.bf16 %v3469_v1, %v3465_v0  ;;  %v3500_v1 = vld [vmem:[#allocation7 + $0x7d8] sm:$0xff] }
 0x62b   : > { %9290 = vmatmul.mubr.msk.f32.vlgmr.msra.gmra.mrb[18].mxu0 %vm2952_vm3, %v12508_v32  ;;  %9738 = vmatpush3.bf16.msk.msra.mxu1 %vm12488_vm4, %v12875_v18 }
 0x62c   : > { %9744 = vmatpush1.bf16.msk.msra.mxu0 %vm12488_vm4, %v12865_v63  ;;  %3363 = vmatprep.mubr.f32.mxu0 %v12196_v3 }
 0x62d   : > { %9745 = vmatprep.subr.bf16.mxu1 %v12194_v2  ;;  %9750 = vmatprep.subr.bf16.mxu0 %v9749_v15  ;;  %v3467_v15 = vld [vmem:[#allocation7 + $0x6d0] sm:$0xff] }
 0x62e   : > { %9498 = vmatmul.mubr.msk.f32.vlgmr.msra.gmra.mrb[42].mxu1 %vm2952_vm3, %v12508_v32  ;;  %v9859_v28 = vpack.c.bf16 %v3471_v16, %v3467_v15  ;;  %v3506_v16 = vld [vmem:[#allocation7 + $0x808] sm:$0xff] }
 0x62f   : > { %9295 = vmatmul.mubr.msk.f32.vlgmr.msra.gmra.mrb[20].mxu0 %vm2952_vm3, %v12499_v31  ;;  %9748 = vmatpush3.bf16.msk.msra.mxu1 %vm12488_vm4, %v12875_v18 }
 0x630   : > { %9504 = vmatprep.mubr.msk.f32.mxu1 %vm12195_vm0, %v12196_v3  ;;  %9846 = vmatprep.subr.bf16.mxu1 %v9845_v27  ;;  %v3477_v27 = vld [vmem:[#allocation7 + $0x720] sm:$0xff] }
 0x631   : > { %9752 = vmatpush1.bf16.msra.mxu0 %v9751_v30  ;;  %v3486_v30 = vld [vmem:[#allocation7 + $0x768] sm:$0xff]  ;;  %v9767_v35 = vpack.c.bf16 %v3477_v27, %v3473_v22  ;;  %v3508_v27 = vld [vmem:[#allocation7 + $0x818] sm:$0xff] }
 0x632   : > { %9505 = vmatmul.mubr.msk.f32.vlgmr.msra.gmra.mrb[44].mxu1 %vm2952_vm3, %v12499_v31  ;;  %9754 = vmatprep.subr.bf16.mxu0 %v9753_v38  ;;  %v3479_v38 = vld [vmem:[#allocation7 + $0x730] sm:$0xff]  ;;  %v9769_v40 = vpack.c.bf16 %v3486_v30, %v3482_v29  ;;  %v3505_v30 = vld [vmem:[#allocation7 + $0x800] sm:$0xff] }
 0x633   : > { %9848 = vmatpush1.bf16.msra.mxu1 %v9847_v39  ;;  %v3488_v39 = vld [vmem:[#allocation7 + $0x778] sm:$0xff]  ;;  %v9863_v10 = vpack.c.bf16 %v3479_v38, %v3475_v37  ;;  %v3514_v38 = vld [vmem:[#allocation7 + $0x848] sm:$0xff] }
 0x634   : > { %9850 = vmatprep.subr.bf16.mxu1 %v9849_v41  ;;  %v3485_v41 = vld [vmem:[#allocation7 + $0x760] sm:$0xff]  ;;  %v9865_v13 = vpack.c.bf16 %v3488_v39, %v3484_v26  ;;  %v3507_v39 = vld [vmem:[#allocation7 + $0x810] sm:$0xff] }
 0x635   : > { %9756 = vmatpush1.bf16.msra.mxu0 %v9755_v48  ;;  %v3494_v48 = vld [vmem:[#allocation7 + $0x7a8] sm:$0xff]  ;;  %v9771_v11 = vpack.c.bf16 %v3485_v41, %v3481_v34  ;;  %v3516_v41 = vld [vmem:[#allocation7 + $0x858] sm:$0xff] }
 0x636   : > { %9758 = vmatprep.subr.bf16.mxu0 %v9757_v42  ;;  %v3487_v42 = vld [vmem:[#allocation7 + $0x770] sm:$0xff]  ;;  %v9773_v54 = vpack.c.bf16 %v3494_v48, %v3490_v47  ;;  %v3513_v48 = vld [vmem:[#allocation7 + $0x840] sm:$0xff] }
 0x637   : > { %9852 = vmatpush1.bf16.msra.mxu1 %v9851_v53  ;;  %v3496_v53 = vld [vmem:[#allocation7 + $0x7b8] sm:$0xff]  ;;  %v9867_v56 = vpack.c.bf16 %v3487_v42, %v3483_v8  ;;  %v3522_v42 = vld [vmem:[#allocation7 + $0x888] sm:$0xff] }
 0x638   : > { %9854 = vmatprep.subr.bf16.mxu1 %v9853_v33  ;;  %v3493_v33 = vld [vmem:[#allocation7 + $0x7a0] sm:$0xff]  ;;  %v9869_v60 = vpack.c.bf16 %v3496_v53, %v3492_v52  ;;  %v3515_v53 = vld [vmem:[#allocation7 + $0x850] sm:$0xff] }
 0x639   : > { %9760 = vmatpush1.bf16.msra.mxu0 %v9759_v58  ;;  %v3502_v58 = vld [vmem:[#allocation7 + $0x7e8] sm:$0xff]  ;;  %v9775_v0 = vpack.c.bf16 %v3493_v33, %v3489_v55  ;;  %v3524_v33 = vld [vmem:[#allocation7 + $0x898] sm:$0xff] }
 0x63a   : > { %9762 = vmatprep.subr.bf16.mxu0 %v9761_v62  ;;  %v3495_v62 = vld [vmem:[#allocation7 + $0x7b0] sm:$0xff]  ;;  %v9777_v9 = vpack.c.bf16 %v3502_v58, %v3498_v57  ;;  %v3521_v58 = vld [vmem:[#allocation7 + $0x880] sm:$0xff] }
 0x63b   : > { %9856 = vmatpush1.bf16.msra.mxu1 %v9855_v7  ;;  %v3504_v7 = vld [vmem:[#allocation7 + $0x7f8] sm:$0xff]  ;;  %v9871_v15 = vpack.c.bf16 %v3495_v62, %v3491_v17  ;;  %v3530_v62 = vld [vmem:[#allocation7 + $0x8c8] sm:$0xff] }
 0x63c   : > { %9858 = vmatprep.subr.bf16.mxu1 %v9857_v14  ;;  %v3501_v14 = vld [vmem:[#allocation7 + $0x7e0] sm:$0xff]  ;;  %v9873_v21 = vpack.c.bf16 %v3504_v7, %v3500_v1  ;;  %v3523_v7 = vld [vmem:[#allocation7 + $0x890] sm:$0xff] }
 0x63d   : > { %9764 = vmatpush1.bf16.msra.mxu0 %v9763_v20  ;;  %v3510_v20 = vld [vmem:[#allocation7 + $0x828] sm:$0xff]  ;;  %v9779_v22 = vpack.c.bf16 %v3501_v14, %v3497_v51  ;;  %v3532_v14 = vld [vmem:[#allocation7 + $0x8d8] sm:$0xff] }
 0x63e   : > { %9766 = vmatprep.subr.bf16.mxu0 %v9765_v25  ;;  %v3503_v25 = vld [vmem:[#allocation7 + $0x7f0] sm:$0xff]  ;;  %v9781_v29 = vpack.c.bf16 %v3510_v20, %v3506_v16  ;;  %v3529_v20 = vld [vmem:[#allocation7 + $0x8c0] sm:$0xff] }
 0x63f   : > { %9860 = vmatpush1.bf16.msra.mxu1 %v9859_v28  ;;  %v3512_v28 = vld [vmem:[#allocation7 + $0x838] sm:$0xff]  ;;  %v9875_v37 = vpack.c.bf16 %v3503_v25, %v3499_v23  ;;  %v3538_v25 = vld [vmem:[#allocation7 + $0x908] sm:$0xff] }
 0x640   : > { %9862 = vmatprep.subr.bf16.mxu1 %v9861_v36  ;;  %v3509_v36 = vld [vmem:[#allocation7 + $0x820] sm:$0xff]  ;;  %v9877_v26 = vpack.c.bf16 %v3512_v28, %v3508_v27  ;;  %v3531_v28 = vld [vmem:[#allocation7 + $0x8d0] sm:$0xff] }
 0x641   : > { %9768 = vmatpush1.bf16.msra.mxu0 %v9767_v35  ;;  %v3518_v35 = vld [vmem:[#allocation7 + $0x868] sm:$0xff]  ;;  %v9783_v34 = vpack.c.bf16 %v3509_v36, %v3505_v30  ;;  %v3540_v36 = vld [vmem:[#allocation7 + $0x918] sm:$0xff] }
 0x642   : > { %9770 = vmatprep.subr.bf16.mxu0 %v9769_v40  ;;  %v3511_v40 = vld [vmem:[#allocation7 + $0x830] sm:$0xff]  ;;  %v9785_v47 = vpack.c.bf16 %v3518_v35, %v3514_v38  ;;  %v3537_v35 = vld [vmem:[#allocation7 + $0x900] sm:$0xff] }
 0x643   : > { %9864 = vmatpush1.bf16.msra.mxu1 %v9863_v10  ;;  %v3520_v10 = vld [vmem:[#allocation7 + $0x878] sm:$0xff]  ;;  %v9879_v8 = vpack.c.bf16 %v3511_v40, %v3507_v39  ;;  %v3546_v40 = vld [vmem:[#allocation7 + $0x948] sm:$0xff] }
 0x644   : > { %9866 = vmatprep.subr.bf16.mxu1 %v9865_v13  ;;  %v3517_v13 = vld [vmem:[#allocation7 + $0x860] sm:$0xff]  ;;  %v9881_v52 = vpack.c.bf16 %v3520_v10, %v3516_v41  ;;  %v3539_v10 = vld [vmem:[#allocation7 + $0x910] sm:$0xff] }
 0x645   : > { %9772 = vmatpush1.bf16.msra.mxu0 %v9771_v11  ;;  %v3526_v11 = vld [vmem:[#allocation7 + $0x8a8] sm:$0xff]  ;;  %v9787_v55 = vpack.c.bf16 %v3517_v13, %v3513_v48  ;;  %v3548_v13 = vld [vmem:[#allocation7 + $0x958] sm:$0xff] }
 0x646   : > { %9774 = vmatprep.subr.bf16.mxu0 %v9773_v54  ;;  %v3519_v54 = vld [vmem:[#allocation7 + $0x870] sm:$0xff]  ;;  %v9789_v57 = vpack.c.bf16 %v3526_v11, %v3522_v42  ;;  %v3545_v11 = vld [vmem:[#allocation7 + $0x940] sm:$0xff] }
 0x647   : > { %9868 = vmatpush1.bf16.msra.mxu1 %v9867_v56  ;;  %v3528_v56 = vld [vmem:[#allocation7 + $0x8b8] sm:$0xff]  ;;  %v9883_v17 = vpack.c.bf16 %v3519_v54, %v3515_v53  ;;  %v3554_v54 = vld [vmem:[#allocation7 + $0x988] sm:$0xff] }
 0x648   : > { %9870 = vmatprep.subr.bf16.mxu1 %v9869_v60  ;;  %v3525_v60 = vld [vmem:[#allocation7 + $0x8a0] sm:$0xff]  ;;  %v9885_v1 = vpack.c.bf16 %v3528_v56, %v3524_v33  ;;  %v3547_v56 = vld [vmem:[#allocation7 + $0x950] sm:$0xff] }
 0x649   : > { %9776 = vmatpush1.bf16.msra.mxu0 %v9775_v0  ;;  %v3534_v0 = vld [vmem:[#allocation7 + $0x8e8] sm:$0xff]  ;;  %v9791_v51 = vpack.c.bf16 %v3525_v60, %v3521_v58  ;;  %v3556_v60 = vld [vmem:[#allocation7 + $0x998] sm:$0xff] }
 0x64a   : > { %9778 = vmatprep.subr.bf16.mxu0 %v9777_v9  ;;  %v3527_v9 = vld [vmem:[#allocation7 + $0x8b0] sm:$0xff]  ;;  %v9793_v16 = vpack.c.bf16 %v3534_v0, %v3530_v62  ;;  %v3553_v0 = vld [vmem:[#allocation7 + $0x980] sm:$0xff] }
 0x64b   : > { %9872 = vmatpush1.bf16.msra.mxu1 %v9871_v15  ;;  %v3536_v15 = vld [vmem:[#allocation7 + $0x8f8] sm:$0xff]  ;;  %v9887_v23 = vpack.c.bf16 %v3527_v9, %v3523_v7 }
 0x64c   : > { %9874 = vmatprep.subr.bf16.mxu1 %v9873_v21  ;;  %v3533_v21 = vld [vmem:[#allocation7 + $0x8e0] sm:$0xff]  ;;  %v9889_v27 = vpack.c.bf16 %v3536_v15, %v3532_v14  ;;  %v3559_v14 = vld [vmem:[#allocation7 + $0x9b0] sm:$0xff] }
 0x64d   : > { %9780 = vmatpush1.bf16.msra.mxu0 %v9779_v22  ;;  %v3542_v22 = vld [vmem:[#allocation7 + $0x928] sm:$0xff]  ;;  %v9795_v30 = vpack.c.bf16 %v3533_v21, %v3529_v20 }
 0x64e   : > { %9782 = vmatprep.subr.bf16.mxu0 %v9781_v29  ;;  %v3535_v29 = vld [vmem:[#allocation7 + $0x8f0] sm:$0xff]  ;;  %v9797_v38 = vpack.c.bf16 %v3542_v22, %v3538_v25  ;;  %v3562_v20 = vld [vmem:[#allocation7 + $0x9c8] sm:$0xff]  ;;  %v3568_v22 = vld [vmem:[#allocation7 + $0x9f8] sm:$0xff] }
 0x64f   : > { %9876 = vmatpush1.bf16.msra.mxu1 %v9875_v37  ;;  %v3544_v37 = vld [vmem:[#allocation7 + $0x938] sm:$0xff]  ;;  %v9891_v39 = vpack.c.bf16 %v3535_v29, %v3531_v28  ;;  %v3566_v21 = vld [vmem:[#allocation7 + $0x9e8] sm:$0xff]  ;;  %v3565_v28 = vld [vmem:[#allocation7 + $0x9e0] sm:$0xff] }
 0x650   : > { %9878 = vmatprep.subr.bf16.mxu1 %v9877_v26  ;;  %v3541_v26 = vld [vmem:[#allocation7 + $0x920] sm:$0xff]  ;;  %v9893_v41 = vpack.c.bf16 %v3544_v37, %v3540_v36  ;;  %v9809_v25 = vpack.c.bf16 %v3566_v21, %v3562_v20  ;;  %v3563_v36 = vld [vmem:[#allocation7 + $0x9d0] sm:$0xff] }
 0x651   : > { %9784 = vmatpush1.bf16.msra.mxu0 %v9783_v34  ;;  %v3550_v34 = vld [vmem:[#allocation7 + $0x968] sm:$0xff]  ;;  %v9799_v48 = vpack.c.bf16 %v3541_v26, %v3537_v35  ;;  %v3567_v37 = vld [vmem:[#allocation7 + $0x9f0] sm:$0xff] }
 0x652   : > { %9786 = vmatprep.subr.bf16.mxu0 %v9785_v47  ;;  %v3543_v47 = vld [vmem:[#allocation7 + $0x930] sm:$0xff]  ;;  %v9801_v42 = vpack.c.bf16 %v3550_v34, %v3546_v40  ;;  %v3570_v35 = vld [vmem:[#allocation7 + $0xa08] sm:$0xff]  ;;  %v3576_v34 = vld [vmem:[#allocation7 + $0xa38] sm:$0xff] }
 0x653   : > { %9880 = vmatpush1.bf16.msra.mxu1 %v9879_v8  ;;  %v3552_v8 = vld [vmem:[#allocation7 + $0x978] sm:$0xff]  ;;  %v9895_v53 = vpack.c.bf16 %v3543_v47, %v3539_v10  ;;  %v3574_v26 = vld [vmem:[#allocation7 + $0xa28] sm:$0xff]  ;;  %v3569_v47 = vld [vmem:[#allocation7 + $0xa00] sm:$0xff] }
 0x654   : > { %9882 = vmatprep.subr.bf16.mxu1 %v9881_v52  ;;  %v3549_v52 = vld [vmem:[#allocation7 + $0x960] sm:$0xff]  ;;  %v9897_v33 = vpack.c.bf16 %v3552_v8, %v3548_v13  ;;  %v9813_v40 = vpack.c.bf16 %v3574_v26, %v3570_v35  ;;  %v3571_v8 = vld [vmem:[#allocation7 + $0xa10] sm:$0xff]  ;;  %v3596_v35 = vld [vmem:[#allocation7 + $0xad8] sm:$0xff] }
 0x655   : > { %9788 = vmatpush1.bf16.msra.mxu0 %v9787_v55  ;;  %v3558_v55 = vld [vmem:[#allocation7 + $0x9a8] sm:$0xff]  ;;  %v9803_v58 = vpack.c.bf16 %v3549_v52, %v3545_v11  ;;  %v3600_v26 = vld [vmem:[#allocation7 + $0xaf8] sm:$0xff] }
 0x656   : > { %9790 = vmatprep.subr.bf16.mxu0 %v9789_v57  ;;  %v3551_v57 = vld [vmem:[#allocation7 + $0x970] sm:$0xff]  ;;  %v9805_v62 = vpack.c.bf16 %v3558_v55, %v3554_v54  ;;  %v3578_v11 = vld [vmem:[#allocation7 + $0xa48] sm:$0xff]  ;;  %v3584_v54 = vld [vmem:[#allocation7 + $0xa78] sm:$0xff] }
 0x657   : > { %9884 = vmatpush1.bf16.msra.mxu1 %v9883_v17  ;;  %v3560_v17 = vld [vmem:[#allocation7 + $0x9b8] sm:$0xff]  ;;  %v9899_v7 = vpack.c.bf16 %v3551_v57, %v3547_v56  ;;  %v3582_v52 = vld [vmem:[#allocation7 + $0xa68] sm:$0xff] }
 0x658   : > { %9886 = vmatprep.subr.bf16.mxu1 %v9885_v1  ;;  %v3557_v1 = vld [vmem:[#allocation7 + $0x9a0] sm:$0xff]  ;;  %v9901_v9 = vpack.c.bf16 %v3560_v17, %v3556_v60 }
 0x659   : > { %9792 = vmatpush1.bf16.msra.mxu0 %v9791_v51  ;;  %v3555_v51 = vld [vmem:[#allocation7 + $0x990] sm:$0xff]  ;;  %v9807_v15 = vpack.c.bf16 %v3557_v1, %v3553_v0  ;;  %v3581_v60 = vld [vmem:[#allocation7 + $0xa60] sm:$0xff]  ;;  %v9817_v0 = vpack.c.bf16 %v3582_v52, %v3578_v11  ;;  %v3602_v11 = vld [vmem:[#allocation7 + $0xb08] sm:$0xff] }
 0x65a   : > { %9794 = vmatprep.subr.bf16.mxu0 %v9793_v16  ;;  %v9903_v16 = vpack.c.bf16 %v3559_v14, %v3555_v51  ;;  %v3586_v51 = vld [vmem:[#allocation7 + $0xa88] sm:$0xff] }
 0x65b   : > { %9888 = vmatpush1.bf16.msra.mxu1 %v9887_v23  ;;  %v3564_v23 = vld [vmem:[#allocation7 + $0x9d8] sm:$0xff]  ;;  %v3590_v14 = vld [vmem:[#allocation7 + $0xaa8] sm:$0xff] }
 0x65c   : > { %9890 = vmatprep.subr.bf16.mxu1 %v9889_v27  ;;  %v3561_v27 = vld [vmem:[#allocation7 + $0x9c0] sm:$0xff]  ;;  %v9905_v29 = vpack.c.bf16 %v3568_v22, %v3564_v23  ;;  %v3606_v52 = vld [vmem:[#allocation7 + $0xb28] sm:$0xff] }
 0x65d   : > { %9796 = vmatpush1.bf16.msra.mxu0 %v9795_v30  ;;  %v9811_v30 = vpack.c.bf16 %v3565_v28, %v3561_v27  ;;  %v3589_v22 = vld [vmem:[#allocation7 + $0xaa0] sm:$0xff]  ;;  %v9821_v28 = vpack.c.bf16 %v3590_v14, %v3586_v51  ;;  %v3616_v51 = vld [vmem:[#allocation7 + $0xb78] sm:$0xff] }
 0x65e   : > { %9798 = vmatprep.subr.bf16.mxu0 %v9797_v38  ;;  %v9907_v38 = vpack.c.bf16 %v3567_v37, %v3563_v36  ;;  %v3591_v36 = vld [vmem:[#allocation7 + $0xab0] sm:$0xff]  ;;  %v3594_v37 = vld [vmem:[#allocation7 + $0xac8] sm:$0xff] }
 0x65f   : > { %9892 = vmatpush1.bf16.msra.mxu1 %v9891_v39  ;;  %v3572_v39 = vld [vmem:[#allocation7 + $0xa18] sm:$0xff] }
 0x660   : > { %9894 = vmatprep.subr.bf16.mxu1 %v9893_v41  ;;  %v9909_v41 = vpack.c.bf16 %v3576_v34, %v3572_v39  ;;  %v3593_v34 = vld [vmem:[#allocation7 + $0xac0] sm:$0xff] }
 0x661   : > { %9800 = vmatpush1.bf16.msra.mxu0 %v9799_v48  ;;  %v3573_v48 = vld [vmem:[#allocation7 + $0xa20] sm:$0xff] }
 0x662   : > { %9802 = vmatprep.subr.bf16.mxu0 %v9801_v42  ;;  %v3575_v42 = vld [vmem:[#allocation7 + $0xa30] sm:$0xff]  ;;  %v9815_v56 = vpack.c.bf16 %v3573_v48, %v3569_v47  ;;  %v9921_v48 = vpack.c.bf16 %v3600_v26, %v3596_v35  ;;  %v3617_v35 = vld [vmem:[#allocation7 + $0xb80] sm:$0xff] }
 0x663   : > { %9896 = vmatpush1.bf16.msra.mxu1 %v9895_v53  ;;  %v3580_v53 = vld [vmem:[#allocation7 + $0xa58] sm:$0xff]  ;;  %v9911_v57 = vpack.c.bf16 %v3575_v42, %v3571_v8  ;;  %v3595_v8 = vld [vmem:[#allocation7 + $0xad0] sm:$0xff]  ;;  %v3621_v26 = vld [vmem:[#allocation7 + $0xba0] sm:$0xff] }
 0x664   : > { %9898 = vmatprep.subr.bf16.mxu1 %v9897_v33  ;;  %v9913_v1 = vpack.c.bf16 %v3584_v54, %v3580_v53  ;;  %v3599_v42 = vld [vmem:[#allocation7 + $0xaf0] sm:$0xff]  ;;  %v3604_v53 = vld [vmem:[#allocation7 + $0xb18] sm:$0xff] }
 0x665   : > { %9804 = vmatpush1.bf16.msra.mxu0 %v9803_v58  ;;  %v3577_v58 = vld [vmem:[#allocation7 + $0xa40] sm:$0xff]  ;;  %v3608_v54 = vld [vmem:[#allocation7 + $0xb38] sm:$0xff] }
 0x666   : > { %9806 = vmatprep.subr.bf16.mxu0 %v9805_v62  ;;  %v9819_v21 = vpack.c.bf16 %v3581_v60, %v3577_v58  ;;  %v3605_v58 = vld [vmem:[#allocation7 + $0xb20] sm:$0xff]  ;;  %v9829_v60 = vpack.c.bf16 %v3606_v52, %v3602_v11  ;;  %v9839_v11 = vpack.c.bf16 %v3621_v26, %v3617_v35  ;;  %v3119_v26 = vld [vmem:[#allocation7 + $0x70] sm:$0xff] }
 0x667   : > { %9900 = vmatpush1.bf16.msra.mxu1 %v9899_v7  ;;  %v3579_v7 = vld [vmem:[#allocation7 + $0xa50] sm:$0xff] }
 0x668   : > { %9902 = vmatprep.subr.bf16.mxu1 %v9901_v9  ;;  %v3583_v9 = vld [vmem:[#allocation7 + $0xa70] sm:$0xff] }
 0x669   : > { %9808 = vmatpush1.bf16.msra.mxu0 %v9807_v15  ;;  %v3588_v15 = vld [vmem:[#allocation7 + $0xa98] sm:$0xff]  ;;  %v9915_v23 = vpack.c.bf16 %v3583_v9, %v3579_v7  ;;  %v3614_v7 = vld [vmem:[#allocation7 + $0xb68] sm:$0xff] }
 0x66a   : > { %9810 = vmatprep.subr.bf16.mxu0 %v9809_v25  ;;  %v3585_v25 = vld [vmem:[#allocation7 + $0xa80] sm:$0xff]  ;;  %v3612_v9 = vld [vmem:[#allocation7 + $0xb58] sm:$0xff] }
 0x66b   : > { %9904 = vmatpush1.bf16.msra.mxu1 %v9903_v16  ;;  %v3592_v16 = vld [vmem:[#allocation7 + $0xab8] sm:$0xff]  ;;  %v9823_v39 = vpack.c.bf16 %v3589_v22, %v3585_v25  ;;  %v9929_v25 = vpack.c.bf16 %v3616_v51, %v3612_v9  ;;  %v3611_v22 = vld [vmem:[#allocation7 + $0xb50] sm:$0xff] }
 0x66c   : > { %9906 = vmatprep.subr.bf16.mxu1 %v9905_v29  ;;  %v9917_v29 = vpack.c.bf16 %v3592_v16, %v3588_v15  ;;  %v3609_v16 = vld [vmem:[#allocation7 + $0xb40] sm:$0xff] }
 0x66d   : > { %9812 = vmatpush1.bf16.msra.mxu0 %v9811_v30  ;;  %v3587_v30 = vld [vmem:[#allocation7 + $0xa90] sm:$0xff] }
 0x66e   : > { %9814 = vmatprep.subr.bf16.mxu0 %v9813_v40  ;;  %v9919_v40 = vpack.c.bf16 %v3591_v36, %v3587_v30  ;;  %v3620_v30 = vld [vmem:[#allocation7 + $0xb98] sm:$0xff] }
 0x66f   : > { %9908 = vmatpush1.bf16.msra.mxu1 %v9907_v38  ;;  %v3598_v38 = vld [vmem:[#allocation7 + $0xae8] sm:$0xff]  ;;  %v3624_v36 = vld [vmem:[#allocation7 + $0xbb8] sm:$0xff] }
 0x670   : > { %9910 = vmatprep.subr.bf16.mxu1 %v9909_v41  ;;  %v3597_v41 = vld [vmem:[#allocation7 + $0xae0] sm:$0xff]  ;;  %v9825_v47 = vpack.c.bf16 %v3598_v38, %v3594_v37 }
 0x6fe   : > { %v12901_v10 = vpop.f32.mrb[18].mxu0 }
 0x6ff   : > { %v12903_v13 = vpop.f32.mrb[19].mxu0 }
 0x701   : > { %v12905_v55 = vpop.f32.mrb[42].mxu1 }
 0x702   : > { %v3365_v33 = vpop.f32.mrb[20].mxu0  ;;  %v9499_v17 = vpop.f32.mrb[43].mxu1 }
 0x703   : > { %v3367_v62 = vpop.f32.mrb[21].mxu0  ;;  %v9925_v17 = vpack.c.bf16 %v3608_v54, %v3604_v53  ;;  %v3625_v53 = vld [vmem:[#allocation7 + $0xbc0] sm:$0xff] }
 0x704   : > { %3697 = vmatprep.mubr.f32.mxu0 %v3367_v62  ;;  %3839 = vmatprep.mubr.f32.mxu1 %v3367_v62  ;;  %v3603_v62 = vld [vmem:[#allocation7 + $0xb10] sm:$0xff]  ;;  %v3629_v54 = vld [vmem:[#allocation7 + $0xbe0] sm:$0xff] }
 0x705   : > { %3698 = vmatmul.mubr.f32.vlgmr.msra.gmra.mrb[22].mxu0 %v3365_v33  ;;  %3840 = vmatmul.mubr.f32.vlgmr.msra.gmra.mrb[46].mxu1 %v3365_v33  ;;  %v12907_v20 = vpop.f32.mrb[44].mxu1  ;;  %v9827_v33 = vpack.c.bf16 %v3597_v41, %v3593_v34  ;;  %v3619_v34 = vld [vmem:[#allocation7 + $0xb90] sm:$0xff] }
 0x706   : > { %9816 = vmatpush1.bf16.msra.mxu0 %v9815_v56  ;;  %9912 = vmatpush1.bf16.msra.mxu1 %v9911_v57  ;;  %v9506_v27 = vpop.f32.mrb[45].mxu1  ;;  %v9923_v56 = vpack.c.bf16 %v3599_v42, %v3595_v8  ;;  %v3601_v57 = vld [vmem:[#allocation7 + $0xb00] sm:$0xff]  ;;  %v3623_v41 = vld [vmem:[#allocation7 + $0xbb0] sm:$0xff]  ;;  %v3628_v8 = vld [vmem:[#allocation7 + $0xbd8] sm:$0xff] }
 0x707   : > { %9818 = vmatprep.subr.bf16.mxu0 %v9817_v0  ;;  %9914 = vmatprep.subr.bf16.mxu1 %v9913_v1  ;;  %v3607_v0 = vld [vmem:[#allocation7 + $0xb30] sm:$0xff]  ;;  %v3610_v1 = vld [vmem:[#allocation7 + $0xb48] sm:$0xff]  ;;  %v9831_v14 = vpack.c.bf16 %v3605_v58, %v3601_v57  ;;  %v3632_v42 = vld [vmem:[#allocation7 + $0xbf8] sm:$0xff]  ;;  %v9935_v52 = vpack.c.bf16 %v3623_v41, %v3619_v34 }
 0x708   : > { %3768 = vmatprep.mubr.f32.mxu0 %v12196_v3  ;;  %3910 = vmatprep.mubr.f32.mxu1 %v12196_v3  ;;  %v9927_v15 = vpack.c.bf16 %v3607_v0, %v3603_v62  ;;  %v3615_v27 = vld [vmem:[#allocation7 + $0xb70] sm:$0xff]  ;;  %v3108_v62 = vld [vmem:[#allocation7 + $0x18] sm:$0xff] }
 0x709   : > { %v9931_v38 = vpack.c.bf16 %v3615_v27, %v3611_v22  ;;  %v3627_v57 = vld [vmem:[#allocation7 + $0xbd0] sm:$0xff]  ;;  %v3112_v0 = vld [vmem:[#allocation7 + $0x38] sm:$0xff] }
 0x70a   : > { %9820 = vmatpush1.bf16.msra.mxu0 %v9819_v21  ;;  %9916 = vmatpush1.bf16.msra.mxu1 %v9915_v23  ;;  %v3613_v21 = vld [vmem:[#allocation7 + $0xb60] sm:$0xff]  ;;  %v9833_v23 = vpack.c.bf16 %v3614_v7, %v3610_v1  ;;  %v3631_v58 = vld [vmem:[#allocation7 + $0xbf0] sm:$0xff]  ;;  %v9843_v1 = vpack.c.bf16 %v3629_v54, %v3625_v53  ;;  %v10037_v51 = vpack.c.bf16 %v3112_v0, %v3108_v62  ;;  %v3116_v22 = vld [vmem:[#allocation7 + $0x58] sm:$0xff] }
 0x70b   : > { %9822 = vmatprep.subr.bf16.mxu0 %v9821_v28  ;;  %9918 = vmatprep.subr.bf16.mxu1 %v9917_v29  ;;  %v3618_v28 = vld [vmem:[#allocation7 + $0xb88] sm:$0xff]  ;;  %v9835_v37 = vpack.c.bf16 %v3613_v21, %v3609_v16  ;;  %v9939_v7 = vpack.c.bf16 %v3631_v58, %v3627_v57  ;;  %v3107_v16 = vld [vmem:[#allocation7 + $0x10] sm:$0xff]  ;;  %v3120_v27 = vld [vmem:[#allocation7 + $0x78] sm:$0xff] }
 0x70c   : > { %v3622_v29 = vld [vmem:[#allocation7 + $0xba8] sm:$0xff]  ;;  %v3111_v21 = vld [vmem:[#allocation7 + $0x30] sm:$0xff]  ;;  %v10041_v35 = vpack.c.bf16 %v3120_v27, %v3116_v22  ;;  %v3124_v34 = vld [vmem:[#allocation7 + $0x98] sm:$0xff] }
 0x70d   : > { %v3128_v41 = vld [vmem:[#allocation7 + $0xb8] sm:$0xff]  ;;  %v3127_v54 = vld [vmem:[#allocation7 + $0xb0] sm:$0xff]  ;;  %v3133_v62 = vld [vmem:[#allocation7 + $0xe0] sm:$0xff] }
 0x70e   : > { %9824 = vmatpush1.bf16.msra.mxu0 %v9823_v39  ;;  %9920 = vmatpush1.bf16.msra.mxu1 %v9919_v40  ;;  %v9837_v39 = vpack.c.bf16 %v3622_v29, %v3618_v28  ;;  %v9933_v40 = vpack.c.bf16 %v3624_v36, %v3620_v30  ;;  %v10039_v29 = vpack.c.bf16 %v3111_v21, %v3107_v16  ;;  %v3113_v30 = vld [vmem:[#allocation7 + $0x40] sm:$0xff]  ;;  %v3136_v57 = vld [vmem:[#allocation7 + $0xf8] sm:$0xff]  ;;  %v3131_v0 = vld [vmem:[#allocation7 + $0xd0] sm:$0xff] }
 0x70f   : > { %9826 = vmatprep.subr.bf16.mxu0 %v9825_v47  ;;  %9922 = vmatprep.subr.bf16.mxu1 %v9921_v48  ;;  %v3626_v47 = vld [vmem:[#allocation7 + $0xbc8] sm:$0xff]  ;;  %v3117_v36 = vld [vmem:[#allocation7 + $0x60] sm:$0xff]  ;;  %v10045_v53 = vpack.c.bf16 %v3128_v41, %v3124_v34  ;;  %v3139_v27 = vld [vmem:[#allocation7 + $0x110] sm:$0xff] }
 0x710   : > { %v3630_v48 = vld [vmem:[#allocation7 + $0xbe8] sm:$0xff]  ;;  %v3141_v22 = vld [vmem:[#allocation7 + $0x120] sm:$0xff]  ;;  %v3147_v41 = vld [vmem:[#allocation7 + $0x150] sm:$0xff] }
 0x711   : > { %v3149_v34 = vld [vmem:[#allocation7 + $0x160] sm:$0xff] }
 0x712   : > { %9828 = vmatpush1.bf16.msra.mxu0 %v9827_v33  ;;  %9924 = vmatpush1.bf16.msra.mxu1 %v9923_v56  ;;  %v9841_v33 = vpack.c.bf16 %v3630_v48, %v3626_v47  ;;  %v9937_v56 = vpack.c.bf16 %v3632_v42, %v3628_v8  ;;  %v9947_v47 = vpack.c.bf16 %v3117_v36, %v3113_v30  ;;  %v3121_v42 = vld [vmem:[#allocation7 + $0x80] sm:$0xff]  ;;  %v3146_v30 = vld [vmem:[#allocation7 + $0x148] sm:$0xff] }
 0x713   : > { %9830 = vmatprep.subr.bf16.mxu0 %v9829_v60  ;;  %9926 = vmatprep.subr.bf16.mxu1 %v9925_v17  ;;  %v3106_v60 = vld [vmem:[#allocation7 + $0x8] sm:$0xff] }
 0x714   : > { %v3110_v17 = vld [vmem:[#allocation7 + $0x28] sm:$0xff] }
 0x715   : > { %v9941_v9 = vpack.c.bf16 %v3110_v17, %v3106_v60  ;;  %v3150_v36 = vld [vmem:[#allocation7 + $0x168] sm:$0xff] }
 0x716   : > { %9832 = vmatpush1.bf16.msra.mxu0 %v9831_v14  ;;  %9928 = vmatpush1.bf16.msra.mxu1 %v9927_v15  ;;  %v3105_v14 = vld [vmem:[#allocation7] sm:$0xff] }
 0x717   : > { %9834 = vmatprep.subr.bf16.mxu0 %v9833_v23  ;;  %9930 = vmatprep.subr.bf16.mxu1 %v9929_v25  ;;  %v3109_v15 = vld [vmem:[#allocation7 + $0x20] sm:$0xff]  ;;  %v3114_v23 = vld [vmem:[#allocation7 + $0x48] sm:$0xff] }
 0x718   : > { %v3118_v25 = vld [vmem:[#allocation7 + $0x68] sm:$0xff]  ;;  %v9943_v28 = vpack.c.bf16 %v3109_v15, %v3105_v14  ;;  %v3140_v14 = vld [vmem:[#allocation7 + $0x118] sm:$0xff] }
 0x719   : > { %v3144_v15 = vld [vmem:[#allocation7 + $0x138] sm:$0xff] }
 0x71a   : > { %9836 = vmatpush1.bf16.msra.mxu0 %v9835_v37  ;;  %9932 = vmatpush1.bf16.msra.mxu1 %v9931_v38  ;;  %v3115_v37 = vld [vmem:[#allocation7 + $0x50] sm:$0xff]  ;;  %v9945_v38 = vpack.c.bf16 %v3118_v25, %v3114_v23  ;;  %v3137_v25 = vld [vmem:[#allocation7 + $0x100] sm:$0xff] }
 0x71b   : > { %9838 = vmatprep.subr.bf16.mxu0 %v9837_v39  ;;  %9934 = vmatprep.subr.bf16.mxu1 %v9933_v40  ;;  %v3122_v39 = vld [vmem:[#allocation7 + $0x88] sm:$0xff]  ;;  %v10043_v48 = vpack.c.bf16 %v3119_v26, %v3115_v37  ;;  %v3148_v37 = vld [vmem:[#allocation7 + $0x158] sm:$0xff] }
 0x71c   : > { %v3126_v40 = vld [vmem:[#allocation7 + $0xa8] sm:$0xff] }
 0x71d   : > { %v9949_v8 = vpack.c.bf16 %v3126_v40, %v3122_v39  ;;  %v9961_v39 = vpack.c.bf16 %v3150_v36, %v3146_v30  ;;  %v3145_v40 = vld [vmem:[#allocation7 + $0x140] sm:$0xff] }
 0x71e   : > { %9840 = vmatpush1.bf16.msra.mxu0 %v9839_v11  ;;  %9936 = vmatpush1.bf16.msra.mxu1 %v9935_v52  ;;  %v3125_v11 = vld [vmem:[#allocation7 + $0xa0] sm:$0xff]  ;;  %v3123_v52 = vld [vmem:[#allocation7 + $0x90] sm:$0xff] }
 0x71f   : > { %9842 = vmatprep.subr.bf16.mxu0 %v9841_v33  ;;  %9938 = vmatprep.subr.bf16.mxu1 %v9937_v56  ;;  %v3130_v33 = vld [vmem:[#allocation7 + $0xc8] sm:$0xff]  ;;  %v3132_v56 = vld [vmem:[#allocation7 + $0xd8] sm:$0xff]  ;;  %v9951_v58 = vpack.c.bf16 %v3125_v11, %v3121_v42  ;;  %v10047_v60 = vpack.c.bf16 %v3127_v54, %v3123_v52  ;;  %v3169_v36 = vld [vmem:[#allocation7 + $0x200] sm:$0xff] }
 0x720   : > { %v3158_v42 = vld [vmem:[#allocation7 + $0x1a8] sm:$0xff]  ;;  %v3156_v11 = vld [vmem:[#allocation7 + $0x198] sm:$0xff] }
 0x721   : > { %v3160_v52 = vld [vmem:[#allocation7 + $0x1b8] sm:$0xff] }
 0x722   : > { %9844 = vmatpush1.bf16.msra.mxu0 %v9843_v1  ;;  %9940 = vmatpush1.bf16.msra.mxu1 %v9939_v7  ;;  %v10049_v1 = vpack.c.bf16 %v3136_v57, %v3132_v56  ;;  %v3135_v7 = vld [vmem:[#allocation7 + $0xf0] sm:$0xff]  ;;  %v3157_v56 = vld [vmem:[#allocation7 + $0x1a0] sm:$0xff] }
 0x723   : > { %9942 = vmatprep.subr.bf16.mxu0 %v9941_v9  ;;  %10038 = vmatprep.subr.bf16.mxu1 %v10037_v51  ;;  %v3138_v9 = vld [vmem:[#allocation7 + $0x108] sm:$0xff]  ;;  %v10051_v21 = vpack.c.bf16 %v3135_v7, %v3131_v0  ;;  %v3155_v57 = vld [vmem:[#allocation7 + $0x190] sm:$0xff]  ;;  %v3168_v0 = vld [vmem:[#allocation7 + $0x1f8] sm:$0xff] }
 0x724   : > { %v3142_v51 = vld [vmem:[#allocation7 + $0x128] sm:$0xff] }
 0x725   : > { %3769 = vmatmul.mubr.f32.vlgmr.msra.gmra.mrb[22].mxu0 %v12907_v20  ;;  %3911 = vmatmul.mubr.f32.vlgmr.msra.gmra.mrb[46].mxu1 %v12907_v20  ;;  %v3134_v20 = vld [vmem:[#allocation7 + $0xe8] sm:$0xff]  ;;  %v9957_v23 = vpack.c.bf16 %v3142_v51, %v3138_v9  ;;  %v3161_v51 = vld [vmem:[#allocation7 + $0x1c0] sm:$0xff] }
 0x726   : > { %9944 = vmatpush1.bf16.msra.mxu0 %v9943_v28  ;;  %3981 = vmatprep.mubr.f32.mxu0 %v12903_v13  ;;  %v9953_v17 = vpack.c.bf16 %v3134_v20, %v3130_v33  ;;  %v10053_v28 = vpack.c.bf16 %v3144_v15, %v3140_v14  ;;  %v3153_v20 = vld [vmem:[#allocation7 + $0x180] sm:$0xff]  ;;  %v3163_v15 = vld [vmem:[#allocation7 + $0x1d0] sm:$0xff] }
 0x727   : > { %10040 = vmatpush1.bf16.msra.mxu1 %v10039_v29  ;;  %4123 = vmatprep.mubr.f32.mxu1 %v12903_v13  ;;  %v3129_v13 = vld [vmem:[#allocation7 + $0xc0] sm:$0xff]  ;;  %v3143_v29 = vld [vmem:[#allocation7 + $0x130] sm:$0xff] }
 0x728   : > { %9946 = vmatprep.subr.bf16.mxu0 %v9945_v38  ;;  %10042 = vmatprep.subr.bf16.mxu1 %v10041_v35  ;;  %v9955_v16 = vpack.c.bf16 %v3133_v62, %v3129_v13  ;;  %v3152_v38 = vld [vmem:[#allocation7 + $0x178] sm:$0xff]  ;;  %v9959_v35 = vpack.c.bf16 %v3141_v22, %v3137_v25  ;;  %v10055_v26 = vpack.c.bf16 %v3143_v29, %v3139_v27  ;;  %v3166_v13 = vld [vmem:[#allocation7 + $0x1e8] sm:$0xff]  ;;  %v3165_v14 = vld [vmem:[#allocation7 + $0x1e0] sm:$0xff] }
 0x729   : > { %v3164_v62 = vld [vmem:[#allocation7 + $0x1d8] sm:$0xff]  ;;  %v3174_v25 = vld [vmem:[#allocation7 + $0x228] sm:$0xff] }
 0x72a   : > { %9948 = vmatpush1.bf16.msra.mxu0 %v9947_v47  ;;  %v10057_v47 = vpack.c.bf16 %v3152_v38, %v3148_v37  ;;  %v3172_v22 = vld [vmem:[#allocation7 + $0x218] sm:$0xff]  ;;  %v3173_v37 = vld [vmem:[#allocation7 + $0x220] sm:$0xff]  ;;  %v3171_v38 = vld [vmem:[#allocation7 + $0x210] sm:$0xff] }
 0x72b   : > { %10044 = vmatpush1.bf16.msra.mxu1 %v10043_v48  ;;  %9950 = vmatprep.subr.bf16.mxu0 %v9949_v8  ;;  %v3151_v48 = vld [vmem:[#allocation7 + $0x170] sm:$0xff]  ;;  %v3154_v8 = vld [vmem:[#allocation7 + $0x188] sm:$0xff]  ;;  %v3176_v27 = vld [vmem:[#allocation7 + $0x238] sm:$0xff] }
 0x72c   : > { %10046 = vmatprep.subr.bf16.mxu1 %v10045_v53  ;;  %v9963_v53 = vpack.c.bf16 %v3149_v34, %v3145_v40  ;;  %v10059_v54 = vpack.c.bf16 %v3151_v48, %v3147_v41  ;;  %v9965_v33 = vpack.c.bf16 %v3158_v42, %v3154_v8  ;;  %v3182_v40 = vld [vmem:[#allocation7 + $0x268] sm:$0xff]  ;;  %v3180_v34 = vld [vmem:[#allocation7 + $0x258] sm:$0xff]  ;;  %v3177_v42 = vld [vmem:[#allocation7 + $0x240] sm:$0xff] }
 0x72d   : > { %v3184_v41 = vld [vmem:[#allocation7 + $0x278] sm:$0xff] }
 0x72e   : > { %9952 = vmatpush1.bf16.msra.mxu0 %v9951_v58  ;;  %v10061_v58 = vpack.c.bf16 %v3160_v52, %v3156_v11  ;;  %v3181_v11 = vld [vmem:[#allocation7 + $0x260] sm:$0xff]  ;;  %v3179_v52 = vld [vmem:[#allocation7 + $0x250] sm:$0xff] }
 0x72f   : > { %10048 = vmatpush1.bf16.msra.mxu1 %v10047_v60  ;;  %9954 = vmatprep.subr.bf16.mxu0 %v9953_v17  ;;  %v3159_v60 = vld [vmem:[#allocation7 + $0x1b0] sm:$0xff]  ;;  %v3162_v17 = vld [vmem:[#allocation7 + $0x1c8] sm:$0xff] }
 0x730   : > { %10050 = vmatprep.subr.bf16.mxu1 %v10049_v1  ;;  %v9967_v1 = vpack.c.bf16 %v3157_v56, %v3153_v20  ;;  %v10063_v7 = vpack.c.bf16 %v3159_v60, %v3155_v57  ;;  %v9969_v9 = vpack.c.bf16 %v3166_v13, %v3162_v17  ;;  %v3190_v20 = vld [vmem:[#allocation7 + $0x2a8] sm:$0xff]  ;;  %v3188_v56 = vld [vmem:[#allocation7 + $0x298] sm:$0xff]  ;;  %v3185_v13 = vld [vmem:[#allocation7 + $0x280] sm:$0xff] }
 0x731   : > { %v3192_v57 = vld [vmem:[#allocation7 + $0x2b8] sm:$0xff] }
 0x732   : > { %9956 = vmatpush1.bf16.msra.mxu0 %v9955_v16  ;;  %v10065_v16 = vpack.c.bf16 %v3168_v0, %v3164_v62  ;;  %v3189_v62 = vld [vmem:[#allocation7 + $0x2a0] sm:$0xff]  ;;  %v3187_v0 = vld [vmem:[#allocation7 + $0x290] sm:$0xff] }
 0x733   : > { %10052 = vmatpush1.bf16.msra.mxu1 %v10051_v21  ;;  %9958 = vmatprep.subr.bf16.mxu0 %v9957_v23  ;;  %v3167_v21 = vld [vmem:[#allocation7 + $0x1f0] sm:$0xff]  ;;  %v3170_v23 = vld [vmem:[#allocation7 + $0x208] sm:$0xff] }
 0x734   : > { %10054 = vmatprep.subr.bf16.mxu1 %v10053_v28  ;;  %v9971_v28 = vpack.c.bf16 %v3165_v14, %v3161_v51  ;;  %v10067_v29 = vpack.c.bf16 %v3167_v21, %v3163_v15  ;;  %v9973_v30 = vpack.c.bf16 %v3174_v25, %v3170_v23  ;;  %v3198_v51 = vld [vmem:[#allocation7 + $0x2e8] sm:$0xff]  ;;  %v3196_v14 = vld [vmem:[#allocation7 + $0x2d8] sm:$0xff]  ;;  %v3193_v25 = vld [vmem:[#allocation7 + $0x2c0] sm:$0xff] }
 0x735   : > { %v3200_v15 = vld [vmem:[#allocation7 + $0x2f8] sm:$0xff] }
 0x736   : > { %9960 = vmatpush1.bf16.msra.mxu0 %v9959_v35  ;;  %v10069_v35 = vpack.c.bf16 %v3176_v27, %v3172_v22  ;;  %v3197_v22 = vld [vmem:[#allocation7 + $0x2e0] sm:$0xff]  ;;  %v3195_v27 = vld [vmem:[#allocation7 + $0x2d0] sm:$0xff] }
 0x737   : > { %10056 = vmatpush1.bf16.msra.mxu1 %v10055_v26  ;;  %9962 = vmatprep.subr.bf16.mxu0 %v9961_v39  ;;  %v3175_v26 = vld [vmem:[#allocation7 + $0x230] sm:$0xff]  ;;  %v3178_v39 = vld [vmem:[#allocation7 + $0x248] sm:$0xff] }
 0x738   : > { %10058 = vmatprep.subr.bf16.mxu1 %v10057_v47  ;;  %v9975_v47 = vpack.c.bf16 %v3173_v37, %v3169_v36  ;;  %v10071_v48 = vpack.c.bf16 %v3175_v26, %v3171_v38  ;;  %v9977_v8 = vpack.c.bf16 %v3182_v40, %v3178_v39  ;;  %v3206_v36 = vld [vmem:[#allocation7 + $0x328] sm:$0xff]  ;;  %v3204_v37 = vld [vmem:[#allocation7 + $0x318] sm:$0xff]  ;;  %v3201_v40 = vld [vmem:[#allocation7 + $0x300] sm:$0xff] }
 0x739   : > { %v3208_v38 = vld [vmem:[#allocation7 + $0x338] sm:$0xff] }
 0x73a   : > { %9964 = vmatpush1.bf16.msra.mxu0 %v9963_v53  ;;  %v10073_v53 = vpack.c.bf16 %v3184_v41, %v3180_v34  ;;  %v3205_v34 = vld [vmem:[#allocation7 + $0x320] sm:$0xff]  ;;  %v3203_v41 = vld [vmem:[#allocation7 + $0x310] sm:$0xff] }
 0x73b   : > { %10060 = vmatpush1.bf16.msra.mxu1 %v10059_v54  ;;  %9966 = vmatprep.subr.bf16.mxu0 %v9965_v33  ;;  %v3183_v54 = vld [vmem:[#allocation7 + $0x270] sm:$0xff]  ;;  %v3186_v33 = vld [vmem:[#allocation7 + $0x288] sm:$0xff] }
 0x73c   : > { %10062 = vmatprep.subr.bf16.mxu1 %v10061_v58  ;;  %v9979_v58 = vpack.c.bf16 %v3181_v11, %v3177_v42  ;;  %v10075_v60 = vpack.c.bf16 %v3183_v54, %v3179_v52  ;;  %v9981_v17 = vpack.c.bf16 %v3190_v20, %v3186_v33  ;;  %v3214_v42 = vld [vmem:[#allocation7 + $0x368] sm:$0xff]  ;;  %v3212_v11 = vld [vmem:[#allocation7 + $0x358] sm:$0xff]  ;;  %v3209_v20 = vld [vmem:[#allocation7 + $0x340] sm:$0xff] }
 0x73d   : > { %v3216_v52 = vld [vmem:[#allocation7 + $0x378] sm:$0xff] }
 0x73e   : > { %9968 = vmatpush1.bf16.msra.mxu0 %v9967_v1  ;;  %v10077_v1 = vpack.c.bf16 %v3192_v57, %v3188_v56  ;;  %v3213_v56 = vld [vmem:[#allocation7 + $0x360] sm:$0xff]  ;;  %v3211_v57 = vld [vmem:[#allocation7 + $0x350] sm:$0xff] }
 0x73f   : > { %10064 = vmatpush1.bf16.msra.mxu1 %v10063_v7  ;;  %9970 = vmatprep.subr.bf16.mxu0 %v9969_v9  ;;  %v3191_v7 = vld [vmem:[#allocation7 + $0x2b0] sm:$0xff]  ;;  %v3194_v9 = vld [vmem:[#allocation7 + $0x2c8] sm:$0xff] }
 0x740   : > { %10066 = vmatprep.subr.bf16.mxu1 %v10065_v16  ;;  %v9983_v16 = vpack.c.bf16 %v3189_v62, %v3185_v13  ;;  %v10079_v21 = vpack.c.bf16 %v3191_v7, %v3187_v0  ;;  %v9985_v23 = vpack.c.bf16 %v3198_v51, %v3194_v9  ;;  %v3222_v13 = vld [vmem:[#allocation7 + $0x3a8] sm:$0xff]  ;;  %v3220_v62 = vld [vmem:[#allocation7 + $0x398] sm:$0xff]  ;;  %v3217_v51 = vld [vmem:[#allocation7 + $0x380] sm:$0xff] }
 0x741   : > { %v3224_v0 = vld [vmem:[#allocation7 + $0x3b8] sm:$0xff] }
 0x742   : > { %9972 = vmatpush1.bf16.msra.mxu0 %v9971_v28  ;;  %v10081_v28 = vpack.c.bf16 %v3200_v15, %v3196_v14  ;;  %v3221_v14 = vld [vmem:[#allocation7 + $0x3a0] sm:$0xff]  ;;  %v3219_v15 = vld [vmem:[#allocation7 + $0x390] sm:$0xff] }
 0x743   : > { %10068 = vmatpush1.bf16.msra.mxu1 %v10067_v29  ;;  %9974 = vmatprep.subr.bf16.mxu0 %v9973_v30  ;;  %v3199_v29 = vld [vmem:[#allocation7 + $0x2f0] sm:$0xff]  ;;  %v3202_v30 = vld [vmem:[#allocation7 + $0x308] sm:$0xff] }
 0x744   : > { %10070 = vmatprep.subr.bf16.mxu1 %v10069_v35  ;;  %v9987_v35 = vpack.c.bf16 %v3197_v22, %v3193_v25  ;;  %v10083_v26 = vpack.c.bf16 %v3199_v29, %v3195_v27  ;;  %v9989_v39 = vpack.c.bf16 %v3206_v36, %v3202_v30  ;;  %v3230_v25 = vld [vmem:[#allocation7 + $0x3e8] sm:$0xff]  ;;  %v3228_v22 = vld [vmem:[#allocation7 + $0x3d8] sm:$0xff]  ;;  %v3225_v36 = vld [vmem:[#allocation7 + $0x3c0] sm:$0xff] }
 0x745   : > { %v3232_v27 = vld [vmem:[#allocation7 + $0x3f8] sm:$0xff] }
 0x746   : > { %9976 = vmatpush1.bf16.msra.mxu0 %v9975_v47  ;;  %v10085_v47 = vpack.c.bf16 %v3208_v38, %v3204_v37  ;;  %v3229_v37 = vld [vmem:[#allocation7 + $0x3e0] sm:$0xff]  ;;  %v3227_v38 = vld [vmem:[#allocation7 + $0x3d0] sm:$0xff] }
 0x747   : > { %10072 = vmatpush1.bf16.msra.mxu1 %v10071_v48  ;;  %9978 = vmatprep.subr.bf16.mxu0 %v9977_v8  ;;  %v3207_v48 = vld [vmem:[#allocation7 + $0x330] sm:$0xff]  ;;  %v3210_v8 = vld [vmem:[#allocation7 + $0x348] sm:$0xff] }
 0x748   : > { %10074 = vmatprep.subr.bf16.mxu1 %v10073_v53  ;;  %v9991_v53 = vpack.c.bf16 %v3205_v34, %v3201_v40  ;;  %v10087_v54 = vpack.c.bf16 %v3207_v48, %v3203_v41  ;;  %v9993_v33 = vpack.c.bf16 %v3214_v42, %v3210_v8  ;;  %v3238_v40 = vld [vmem:[#allocation7 + $0x428] sm:$0xff]  ;;  %v3236_v34 = vld [vmem:[#allocation7 + $0x418] sm:$0xff]  ;;  %v3233_v42 = vld [vmem:[#allocation7 + $0x400] sm:$0xff] }
 0x749   : > { %v3240_v41 = vld [vmem:[#allocation7 + $0x438] sm:$0xff] }
 0x74a   : > { %9980 = vmatpush1.bf16.msra.mxu0 %v9979_v58  ;;  %v10089_v58 = vpack.c.bf16 %v3216_v52, %v3212_v11  ;;  %v3237_v11 = vld [vmem:[#allocation7 + $0x420] sm:$0xff]  ;;  %v3235_v52 = vld [vmem:[#allocation7 + $0x410] sm:$0xff] }
 0x74b   : > { %10076 = vmatpush1.bf16.msra.mxu1 %v10075_v60  ;;  %9982 = vmatprep.subr.bf16.mxu0 %v9981_v17  ;;  %v3215_v60 = vld [vmem:[#allocation7 + $0x370] sm:$0xff]  ;;  %v3218_v17 = vld [vmem:[#allocation7 + $0x388] sm:$0xff] }
 0x74c   : > { %10078 = vmatprep.subr.bf16.mxu1 %v10077_v1  ;;  %v9995_v1 = vpack.c.bf16 %v3213_v56, %v3209_v20  ;;  %v10091_v7 = vpack.c.bf16 %v3215_v60, %v3211_v57  ;;  %v9997_v9 = vpack.c.bf16 %v3222_v13, %v3218_v17  ;;  %v3246_v20 = vld [vmem:[#allocation7 + $0x468] sm:$0xff]  ;;  %v3244_v56 = vld [vmem:[#allocation7 + $0x458] sm:$0xff]  ;;  %v3241_v13 = vld [vmem:[#allocation7 + $0x440] sm:$0xff] }
 0x74d   : > { %v3248_v57 = vld [vmem:[#allocation7 + $0x478] sm:$0xff] }
 0x74e   : > { %9984 = vmatpush1.bf16.msra.mxu0 %v9983_v16  ;;  %v10093_v16 = vpack.c.bf16 %v3224_v0, %v3220_v62  ;;  %v3245_v62 = vld [vmem:[#allocation7 + $0x460] sm:$0xff]  ;;  %v3243_v0 = vld [vmem:[#allocation7 + $0x450] sm:$0xff] }
 0x74f   : > { %10080 = vmatpush1.bf16.msra.mxu1 %v10079_v21  ;;  %9986 = vmatprep.subr.bf16.mxu0 %v9985_v23  ;;  %v3223_v21 = vld [vmem:[#allocation7 + $0x3b0] sm:$0xff]  ;;  %v3226_v23 = vld [vmem:[#allocation7 + $0x3c8] sm:$0xff] }
 0x750   : > { %10082 = vmatprep.subr.bf16.mxu1 %v10081_v28  ;;  %v9999_v28 = vpack.c.bf16 %v3221_v14, %v3217_v51  ;;  %v10095_v29 = vpack.c.bf16 %v3223_v21, %v3219_v15  ;;  %v10001_v30 = vpack.c.bf16 %v3230_v25, %v3226_v23  ;;  %v3254_v51 = vld [vmem:[#allocation7 + $0x4a8] sm:$0xff]  ;;  %v3252_v14 = vld [vmem:[#allocation7 + $0x498] sm:$0xff]  ;;  %v3249_v25 = vld [vmem:[#allocation7 + $0x480] sm:$0xff] }
 0x751   : > { %v3256_v15 = vld [vmem:[#allocation7 + $0x4b8] sm:$0xff] }
 0x752   : > { %9988 = vmatpush1.bf16.msra.mxu0 %v9987_v35  ;;  %v10097_v35 = vpack.c.bf16 %v3232_v27, %v3228_v22  ;;  %v3253_v22 = vld [vmem:[#allocation7 + $0x4a0] sm:$0xff]  ;;  %v3251_v27 = vld [vmem:[#allocation7 + $0x490] sm:$0xff] }
 0x753   : > { %10084 = vmatpush1.bf16.msra.mxu1 %v10083_v26  ;;  %9990 = vmatprep.subr.bf16.mxu0 %v9989_v39  ;;  %v3231_v26 = vld [vmem:[#allocation7 + $0x3f0] sm:$0xff]  ;;  %v3234_v39 = vld [vmem:[#allocation7 + $0x408] sm:$0xff] }
 0x754   : > { %10086 = vmatprep.subr.bf16.mxu1 %v10085_v47  ;;  %v10003_v47 = vpack.c.bf16 %v3229_v37, %v3225_v36  ;;  %v10099_v48 = vpack.c.bf16 %v3231_v26, %v3227_v38  ;;  %v10005_v8 = vpack.c.bf16 %v3238_v40, %v3234_v39  ;;  %v3262_v36 = vld [vmem:[#allocation7 + $0x4e8] sm:$0xff]  ;;  %v3260_v37 = vld [vmem:[#allocation7 + $0x4d8] sm:$0xff]  ;;  %v3257_v39 = vld [vmem:[#allocation7 + $0x4c0] sm:$0xff] }
 0x755   : > { %v3264_v38 = vld [vmem:[#allocation7 + $0x4f8] sm:$0xff]  ;;  %v3261_v40 = vld [vmem:[#allocation7 + $0x4e0] sm:$0xff] }
 0x756   : > { %9992 = vmatpush1.bf16.msra.mxu0 %v9991_v53  ;;  %v10101_v53 = vpack.c.bf16 %v3240_v41, %v3236_v34  ;;  %v3259_v34 = vld [vmem:[#allocation7 + $0x4d0] sm:$0xff]  ;;  %v10113_v41 = vpack.c.bf16 %v3264_v38, %v3260_v37 }
 0x757   : > { %10088 = vmatpush1.bf16.msra.mxu1 %v10087_v54  ;;  %9994 = vmatprep.subr.bf16.mxu0 %v9993_v33  ;;  %v3239_v54 = vld [vmem:[#allocation7 + $0x430] sm:$0xff]  ;;  %v3242_v33 = vld [vmem:[#allocation7 + $0x448] sm:$0xff] }
 0x758   : > { %10090 = vmatprep.subr.bf16.mxu1 %v10089_v58  ;;  %v10007_v58 = vpack.c.bf16 %v3237_v11, %v3233_v42  ;;  %v10103_v60 = vpack.c.bf16 %v3239_v54, %v3235_v52  ;;  %v10009_v17 = vpack.c.bf16 %v3246_v20, %v3242_v33  ;;  %v3268_v42 = vld [vmem:[#allocation7 + $0x518] sm:$0xff]  ;;  %v10019_v52 = vpack.c.bf16 %v3261_v40, %v3257_v39  ;;  %v3265_v33 = vld [vmem:[#allocation7 + $0x500] sm:$0xff]  ;;  %v3283_v37 = vld [vmem:[#allocation7 + $0x590] sm:$0xff] }
 0x759   : > { %v3272_v11 = vld [vmem:[#allocation7 + $0x538] sm:$0xff]  ;;  %v3269_v20 = vld [vmem:[#allocation7 + $0x520] sm:$0xff] }
 0x75a   : > { %9996 = vmatpush1.bf16.msra.mxu0 %v9995_v1  ;;  %v10105_v1 = vpack.c.bf16 %v3248_v57, %v3244_v56  ;;  %v3267_v56 = vld [vmem:[#allocation7 + $0x510] sm:$0xff]  ;;  %v10117_v57 = vpack.c.bf16 %v3272_v11, %v3268_v42  ;;  %v3292_v39 = vld [vmem:[#allocation7 + $0x5d8] sm:$0xff] }
 0x75b   : > { %10092 = vmatpush1.bf16.msra.mxu1 %v10091_v7  ;;  %9998 = vmatprep.subr.bf16.mxu0 %v9997_v9  ;;  %v3247_v7 = vld [vmem:[#allocation7 + $0x470] sm:$0xff]  ;;  %v3250_v9 = vld [vmem:[#allocation7 + $0x488] sm:$0xff]  ;;  %v3296_v40 = vld [vmem:[#allocation7 + $0x5f8] sm:$0xff] }
 0x75c   : > { %10094 = vmatprep.subr.bf16.mxu1 %v10093_v16  ;;  %v10011_v16 = vpack.c.bf16 %v3245_v62, %v3241_v13  ;;  %v10107_v21 = vpack.c.bf16 %v3247_v7, %v3243_v0  ;;  %v10013_v23 = vpack.c.bf16 %v3254_v51, %v3250_v9  ;;  %v3276_v13 = vld [vmem:[#allocation7 + $0x558] sm:$0xff]  ;;  %v10023_v0 = vpack.c.bf16 %v3269_v20, %v3265_v33  ;;  %v3273_v9 = vld [vmem:[#allocation7 + $0x540] sm:$0xff]  ;;  %v3291_v11 = vld [vmem:[#allocation7 + $0x5d0] sm:$0xff] }
 0x75d   : > { %v3280_v62 = vld [vmem:[#allocation7 + $0x578] sm:$0xff]  ;;  %v3277_v51 = vld [vmem:[#allocation7 + $0x560] sm:$0xff]  ;;  %v10129_v42 = vpack.c.bf16 %v3296_v40, %v3292_v39  ;;  %v4346_v33 = vld [vmem:[#allocation7 + $0xc08] sm:$0xff] }
 0x75e   : > { %10000 = vmatpush1.bf16.msra.mxu0 %v9999_v28  ;;  %v10109_v28 = vpack.c.bf16 %v3256_v15, %v3252_v14  ;;  %v3275_v14 = vld [vmem:[#allocation7 + $0x550] sm:$0xff]  ;;  %v10121_v15 = vpack.c.bf16 %v3280_v62, %v3276_v13  ;;  %v4350_v20 = vld [vmem:[#allocation7 + $0xc28] sm:$0xff] }
 0x75f   : > { %10096 = vmatpush1.bf16.msra.mxu1 %v10095_v29  ;;  %10002 = vmatprep.subr.bf16.mxu0 %v10001_v30  ;;  %v3255_v29 = vld [vmem:[#allocation7 + $0x4b0] sm:$0xff]  ;;  %v3258_v30 = vld [vmem:[#allocation7 + $0x4c8] sm:$0xff]  ;;  %v10143_v13 = vpack.c.bf16 %v4350_v20, %v4346_v33 }
 0x760   : > { %10098 = vmatprep.subr.bf16.mxu1 %v10097_v35  ;;  %v10111_v35 = vpack.c.bf16 %v3255_v29, %v3251_v27  ;;  %v10017_v26 = vpack.c.bf16 %v3262_v36, %v3258_v30  ;;  %v10027_v27 = vpack.c.bf16 %v3277_v51, %v3273_v9  ;;  %v3281_v30 = vld [vmem:[#allocation7 + $0x580] sm:$0xff]  ;;  %v4351_v62 = vld [vmem:[#allocation7 + $0xc30] sm:$0xff]  ;;  %v4356_v9 = vld [vmem:[#allocation7 + $0xc58] sm:$0xff] }
 0x761   : > { %v3285_v36 = vld [vmem:[#allocation7 + $0x5a0] sm:$0xff]  ;;  %v4360_v51 = vld [vmem:[#allocation7 + $0xc78] sm:$0xff]  ;;  %v4367_v40 = vld [vmem:[#allocation7 + $0xcb0] sm:$0xff] }
 0x762   : > { %10004 = vmatpush1.bf16.msra.mxu0 %v10003_v47  ;;  %v3263_v47 = vld [vmem:[#allocation7 + $0x4f0] sm:$0xff] }
 0x763   : > { %10100 = vmatpush1.bf16.msra.mxu1 %v10099_v48  ;;  %10006 = vmatprep.subr.bf16.mxu0 %v10005_v8  ;;  %v3266_v48 = vld [vmem:[#allocation7 + $0x508] sm:$0xff]  ;;  %v4375_v20 = vld [vmem:[#allocation7 + $0xcf0] sm:$0xff] }
 0x764   : > { %10102 = vmatprep.subr.bf16.mxu1 %v10101_v53  ;;  %v3270_v8 = vld [vmem:[#allocation7 + $0x528] sm:$0xff]  ;;  %v10115_v53 = vpack.c.bf16 %v3263_v47, %v3259_v34  ;;  %v10031_v34 = vpack.c.bf16 %v3285_v36, %v3281_v30  ;;  %v4368_v30 = vld [vmem:[#allocation7 + $0xcb8] sm:$0xff] }
 0x765   : > { %3982 = vmatmul.mubr.f32.vlgmr.msra.gmra.mrb[22].mxu0 %v12901_v10  ;;  %v10021_v54 = vpack.c.bf16 %v3270_v8, %v3266_v48  ;;  %v3289_v48 = vld [vmem:[#allocation7 + $0x5c0] sm:$0xff] }
 0x766   : > { %4124 = vmatmul.mubr.f32.vlgmr.msra.gmra.mrb[46].mxu1 %v12901_v10  ;;  %10008 = vmatpush1.bf16.msra.mxu0 %v10007_v58  ;;  %v10015_v10 = vpack.c.bf16 %v3253_v22, %v3249_v25  ;;  %v3271_v58 = vld [vmem:[#allocation7 + $0x530] sm:$0xff]  ;;  %v3284_v25 = vld [vmem:[#allocation7 + $0x598] sm:$0xff]  ;;  %v3293_v8 = vld [vmem:[#allocation7 + $0x5e0] sm:$0xff] }
 0x767   : > { %10104 = vmatpush1.bf16.msra.mxu1 %v10103_v60  ;;  %10010 = vmatprep.subr.bf16.mxu0 %v10009_v17  ;;  %v3274_v60 = vld [vmem:[#allocation7 + $0x548] sm:$0xff]  ;;  %v3288_v22 = vld [vmem:[#allocation7 + $0x5b8] sm:$0xff] }
 0x768   : > { %10106 = vmatprep.subr.bf16.mxu1 %v10105_v1  ;;  %4052 = vmatprep.mubr.f32.mxu0 %v12196_v3  ;;  %v3278_v17 = vld [vmem:[#allocation7 + $0x568] sm:$0xff]  ;;  %v10119_v1 = vpack.c.bf16 %v3271_v58, %v3267_v56  ;;  %v10125_v38 = vpack.c.bf16 %v3288_v22, %v3284_v25  ;;  %v4348_v56 = vld [vmem:[#allocation7 + $0xc18] sm:$0xff]  ;;  %v4345_v58 = vld [vmem:[#allocation7 + $0xc00] sm:$0xff] }
 0x769   : > { %4194 = vmatprep.mubr.f32.mxu1 %v12196_v3  ;;  %v10025_v7 = vpack.c.bf16 %v3278_v17, %v3274_v60  ;;  %v4349_v60 = vld [vmem:[#allocation7 + $0xc20] sm:$0xff]  ;;  %v4347_v17 = vld [vmem:[#allocation7 + $0xc10] sm:$0xff] }
 0x76a   : > { %10012 = vmatpush1.bf16.msra.mxu0 %v10011_v16  ;;  %v3279_v16 = vld [vmem:[#allocation7 + $0x570] sm:$0xff] }
 0x76b   : > { %10108 = vmatpush1.bf16.msra.mxu1 %v10107_v21  ;;  %10014 = vmatprep.subr.bf16.mxu0 %v10013_v23  ;;  %v3282_v21 = vld [vmem:[#allocation7 + $0x588] sm:$0xff]  ;;  %v4355_v25 = vld [vmem:[#allocation7 + $0xc50] sm:$0xff] }
 0x76c   : > { %10110 = vmatprep.subr.bf16.mxu1 %v10109_v28  ;;  %v3286_v23 = vld [vmem:[#allocation7 + $0x5a8] sm:$0xff]  ;;  %v10123_v28 = vpack.c.bf16 %v3279_v16, %v3275_v14  ;;  %v10145_v14 = vpack.c.bf16 %v4349_v60, %v4345_v58  ;;  %v4359_v22 = vld [vmem:[#allocation7 + $0xc70] sm:$0xff]  ;;  %v4380_v58 = vld [vmem:[#allocation7 + $0xd18] sm:$0xff] }
 0x76d   : > { %v10029_v29 = vpack.c.bf16 %v3286_v23, %v3282_v21  ;;  %v4353_v21 = vld [vmem:[#allocation7 + $0xc40] sm:$0xff]  ;;  %v4384_v60 = vld [vmem:[#allocation7 + $0xd38] sm:$0xff] }
 0x76e   : > { %10016 = vmatpush1.bf16.msra.mxu0 %v10015_v10  ;;  %v3287_v10 = vld [vmem:[#allocation7 + $0x5b0] sm:$0xff]  ;;  %v4357_v23 = vld [vmem:[#allocation7 + $0xc60] sm:$0xff] }
 0x76f   : > { %10112 = vmatpush1.bf16.msra.mxu1 %v10111_v35  ;;  %10018 = vmatprep.subr.bf16.mxu0 %v10017_v26  ;;  %v3290_v35 = vld [vmem:[#allocation7 + $0x5c8] sm:$0xff]  ;;  %v10149_v36 = vpack.c.bf16 %v4357_v23, %v4353_v21  ;;  %v4392_v21 = vld [vmem:[#allocation7 + $0xd78] sm:$0xff] }
 0x770   : > { %10114 = vmatprep.subr.bf16.mxu1 %v10113_v41  ;;  %v3294_v26 = vld [vmem:[#allocation7 + $0x5e8] sm:$0xff]  ;;  %v10127_v41 = vpack.c.bf16 %v3287_v10, %v3283_v37  ;;  %v10245_v37 = vpack.c.bf16 %v4359_v22, %v4355_v25  ;;  %v4361_v10 = vld [vmem:[#allocation7 + $0xc80] sm:$0xff] }
 0x771   : > { %v10033_v47 = vpack.c.bf16 %v3294_v26, %v3290_v35  ;;  %v4365_v35 = vld [vmem:[#allocation7 + $0xca0] sm:$0xff]  ;;  %v4363_v26 = vld [vmem:[#allocation7 + $0xc90] sm:$0xff] }
 0x772   : > { %10020 = vmatpush1.bf16.msra.mxu0 %v10019_v52  ;;  %v3295_v52 = vld [vmem:[#allocation7 + $0x5f0] sm:$0xff]  ;;  %v4385_v22 = vld [vmem:[#allocation7 + $0xd40] sm:$0xff] }
 0x773   : > { %10116 = vmatpush1.bf16.msra.mxu1 %v10115_v53  ;;  %10022 = vmatprep.subr.bf16.mxu0 %v10021_v54  ;;  %v10035_v53 = vpack.c.bf16 %v3293_v8, %v3289_v48  ;;  %v10131_v54 = vpack.c.bf16 %v3295_v52, %v3291_v11  ;;  %v4376_v48 = vld [vmem:[#allocation7 + $0xcf8] sm:$0xff]  ;;  %v10153_v8 = vpack.c.bf16 %v4365_v35, %v4361_v10  ;;  %v4369_v52 = vld [vmem:[#allocation7 + $0xcc0] sm:$0xff] }
 0x774   : > { %10118 = vmatprep.subr.bf16.mxu1 %v10117_v57  ;;  %v4352_v57 = vld [vmem:[#allocation7 + $0xc38] sm:$0xff] }
 0x775   : > { %v4400_v10 = vld [vmem:[#allocation7 + $0xdb8] sm:$0xff] }
 0x776   : > { %10024 = vmatpush1.bf16.msra.mxu0 %v10023_v0  ;;  %v4354_v0 = vld [vmem:[#allocation7 + $0xc48] sm:$0xff] }
 0x777   : > { %10120 = vmatpush1.bf16.msra.mxu1 %v10119_v1  ;;  %10026 = vmatprep.subr.bf16.mxu0 %v10025_v7  ;;  %v4358_v1 = vld [vmem:[#allocation7 + $0xc68] sm:$0xff]  ;;  %v10239_v7 = vpack.c.bf16 %v4352_v57, %v4348_v56 }
 0x778   : > { %10122 = vmatprep.subr.bf16.mxu1 %v10121_v15  ;;  %v10241_v15 = vpack.c.bf16 %v4351_v62, %v4347_v17  ;;  %v10147_v16 = vpack.c.bf16 %v4358_v1, %v4354_v0  ;;  %v4378_v56 = vld [vmem:[#allocation7 + $0xd08] sm:$0xff]  ;;  %v4377_v0 = vld [vmem:[#allocation7 + $0xd00] sm:$0xff] }
 0x779   : > { %v4382_v57 = vld [vmem:[#allocation7 + $0xd28] sm:$0xff]  ;;  %v4381_v1 = vld [vmem:[#allocation7 + $0xd20] sm:$0xff] }
 0x77a   : > { %10028 = vmatpush1.bf16.msra.mxu0 %v10027_v27  ;;  %v4362_v27 = vld [vmem:[#allocation7 + $0xc88] sm:$0xff]  ;;  %v10159_v62 = vpack.c.bf16 %v4382_v57, %v4378_v56  ;;  %v10161_v23 = vpack.c.bf16 %v4381_v1, %v4377_v0  ;;  %v4405_v56 = vld [vmem:[#allocation7 + $0xde0] sm:$0xff]  ;;  %v4403_v57 = vld [vmem:[#allocation7 + $0xdd0] sm:$0xff] }
 0x77b   : > { %10124 = vmatpush1.bf16.msra.mxu1 %v10123_v28  ;;  %10030 = vmatprep.subr.bf16.mxu0 %v10029_v29  ;;  %v4366_v28 = vld [vmem:[#allocation7 + $0xca8] sm:$0xff]  ;;  %v4364_v29 = vld [vmem:[#allocation7 + $0xc98] sm:$0xff] }
 0x77c   : > { %10126 = vmatprep.subr.bf16.mxu1 %v10125_v38  ;;  %v10151_v38 = vpack.c.bf16 %v4366_v28, %v4362_v27  ;;  %v10247_v39 = vpack.c.bf16 %v4368_v30, %v4364_v29  ;;  %v4389_v27 = vld [vmem:[#allocation7 + $0xd60] sm:$0xff]  ;;  %v4387_v28 = vld [vmem:[#allocation7 + $0xd50] sm:$0xff]  ;;  %v4416_v0 = vld [vmem:[#allocation7 + $0xe38] sm:$0xff] }
 0x77d   : > { %v4391_v30 = vld [vmem:[#allocation7 + $0xd70] sm:$0xff]  ;;  %v10165_v35 = vpack.c.bf16 %v4389_v27, %v4385_v22  ;;  %v4424_v22 = vld [vmem:[#allocation7 + $0xe78] sm:$0xff] }
 0x77e   : > { %10032 = vmatpush1.bf16.msra.mxu0 %v10031_v34  ;;  %v4370_v34 = vld [vmem:[#allocation7 + $0xcc8] sm:$0xff] }
 0x77f   : > { %10128 = vmatpush1.bf16.msra.mxu1 %v10127_v41  ;;  %10034 = vmatprep.subr.bf16.mxu0 %v10033_v47  ;;  %v4374_v41 = vld [vmem:[#allocation7 + $0xce8] sm:$0xff]  ;;  %v4372_v47 = vld [vmem:[#allocation7 + $0xcd8] sm:$0xff] }
 0x780   : > { %10130 = vmatprep.subr.bf16.mxu1 %v10129_v42  ;;  %v10249_v42 = vpack.c.bf16 %v4367_v40, %v4363_v26  ;;  %v10155_v11 = vpack.c.bf16 %v4374_v41, %v4370_v34  ;;  %v10251_v33 = vpack.c.bf16 %v4376_v48, %v4372_v47  ;;  %v10261_v26 = vpack.c.bf16 %v4391_v30, %v4387_v28  ;;  %v4393_v40 = vld [vmem:[#allocation7 + $0xd80] sm:$0xff]  ;;  %v4395_v41 = vld [vmem:[#allocation7 + $0xd90] sm:$0xff] }
 0x781   : > { %v4397_v34 = vld [vmem:[#allocation7 + $0xda0] sm:$0xff]  ;;  %v4399_v48 = vld [vmem:[#allocation7 + $0xdb0] sm:$0xff] }
 0x782   : > { %10036 = vmatpush1.bf16.msra.mxu0 %v10035_v53  ;;  %v4373_v53 = vld [vmem:[#allocation7 + $0xce0] sm:$0xff] }
 0x783   : > { %10132 = vmatpush1.bf16.msra.mxu1 %v10131_v54  ;;  %10135 = vmatprep.subr.msk.bf16.mxu0 %vm12488_vm4, %v12867_v49  ;;  %v4371_v54 = vld [vmem:[#allocation7 + $0xcd0] sm:$0xff]  ;;  %v10157_v17 = vpack.c.bf16 %v4373_v53, %v4369_v52  ;;  %v4408_v52 = vld [vmem:[#allocation7 + $0xdf8] sm:$0xff]  ;;  %v10169_v53 = vpack.c.bf16 %v4397_v34, %v4393_v40  ;;  %v4417_v30 = vld [vmem:[#allocation7 + $0xe40] sm:$0xff] }
 0x784   : > { %10139 = vmatprep.subr.bf16.mxu1 %v12194_v2  ;;  %v4432_v40 = vld [vmem:[#allocation7 + $0xeb8] sm:$0xff] }
 0x785   : > { %4053 = vmatmul.mubr.f32.vlgmr.msra.gmra.mrb[22].mxu0 %v12905_v55 }
 0x786   : > { %4195 = vmatmul.mubr.f32.vlgmr.msra.gmra.mrb[46].mxu1 %v12905_v55  ;;  %10138 = vmatpush1.bf16.msk.msra.mxu0 %vm12488_vm4, %v12865_v63  ;;  %v10243_v55 = vpack.c.bf16 %v4360_v51, %v4356_v9  ;;  %v10255_v9 = vpack.c.bf16 %v4384_v60, %v4380_v58  ;;  %v4383_v51 = vld [vmem:[#allocation7 + $0xd30] sm:$0xff] }
 0x787   : > { %10142 = vmatpush3.bf16.msk.msra.mxu1 %vm12488_vm4, %v12875_v18  ;;  %4267 = vmatprep.mubr.f32.mxu0 %v12196_v3  ;;  %v4407_v60 = vld [vmem:[#allocation7 + $0xdf0] sm:$0xff] }
 0x788   : > { %9511 = vmatprep.mubr.msk.f32.mxu1 %vm12195_vm0, %v12196_v3  ;;  %10144 = vmatprep.subr.bf16.mxu0 %v10143_v13  ;;  %v10253_v13 = vpack.c.bf16 %v4375_v20, %v4371_v54  ;;  %v10265_v54 = vpack.c.bf16 %v4399_v48, %v4395_v41  ;;  %v4401_v20 = vld [vmem:[#allocation7 + $0xdc0] sm:$0xff] }
 0x789   : > { %9300 = vmatmul.mubr.msk.f32.vlgmr.msra.gmra.mrb[24].mxu0 %vm2952_vm3, %v12608_v59  ;;  %10240 = vmatprep.subr.bf16.mxu1 %v10239_v7  ;;  %v4379_v7 = vld [vmem:[#allocation7 + $0xd10] sm:$0xff]  ;;  %v10173_v1 = vpack.c.bf16 %v4405_v56, %v4401_v20  ;;  %v4425_v48 = vld [vmem:[#allocation7 + $0xe80] sm:$0xff]  ;;  %v4440_v20 = vld [vmem:[#allocation7 + $0xef8] sm:$0xff] }
 0x78a   : > { %9512 = vmatmul.mubr.msk.f32.vlgmr.msra.gmra.mrb[48].mxu1 %vm2952_vm3, %v12608_v59  ;;  %10146 = vmatpush1.bf16.msra.mxu0 %v10145_v14  ;;  %v4386_v14 = vld [vmem:[#allocation7 + $0xd48] sm:$0xff]  ;;  %v10257_v25 = vpack.c.bf16 %v4383_v51, %v4379_v7  ;;  %v10269_v7 = vpack.c.bf16 %v4407_v60, %v4403_v57  ;;  %v4409_v51 = vld [vmem:[#allocation7 + $0xe00] sm:$0xff] }
 0x78b   : > { %10242 = vmatpush1.bf16.msra.mxu1 %v10241_v15  ;;  %10148 = vmatprep.subr.bf16.mxu0 %v10147_v16  ;;  %v4390_v15 = vld [vmem:[#allocation7 + $0xd68] sm:$0xff]  ;;  %v4388_v16 = vld [vmem:[#allocation7 + $0xd58] sm:$0xff]  ;;  %v4433_v60 = vld [vmem:[#allocation7 + $0xec0] sm:$0xff] }
 0x78c   : > { %10244 = vmatprep.subr.bf16.mxu1 %v10243_v55  ;;  %v10163_v55 = vpack.c.bf16 %v4390_v15, %v4386_v14  ;;  %v10259_v29 = vpack.c.bf16 %v4392_v21, %v4388_v16  ;;  %v4413_v14 = vld [vmem:[#allocation7 + $0xe20] sm:$0xff]  ;;  %v4411_v15 = vld [vmem:[#allocation7 + $0xe10] sm:$0xff] }
 0x78d   : > { %v4415_v21 = vld [vmem:[#allocation7 + $0xe30] sm:$0xff]  ;;  %v10177_v27 = vpack.c.bf16 %v4413_v14, %v4409_v51  ;;  %v4448_v51 = vld [vmem:[#allocation7 + $0xf38] sm:$0xff] }
 0x78e   : > { %10150 = vmatpush1.bf16.msra.mxu0 %v10149_v36  ;;  %v4394_v36 = vld [vmem:[#allocation7 + $0xd88] sm:$0xff]  ;;  %v10273_v28 = vpack.c.bf16 %v4415_v21, %v4411_v15  ;;  %v4441_v21 = vld [vmem:[#allocation7 + $0xf00] sm:$0xff] }
 0x78f   : > { %10246 = vmatpush1.bf16.msra.mxu1 %v10245_v37  ;;  %10152 = vmatprep.subr.bf16.mxu0 %v10151_v38  ;;  %v4398_v37 = vld [vmem:[#allocation7 + $0xda8] sm:$0xff]  ;;  %v4396_v38 = vld [vmem:[#allocation7 + $0xd98] sm:$0xff] }
 0x790   : > { %10248 = vmatprep.subr.bf16.mxu1 %v10247_v39  ;;  %v10167_v39 = vpack.c.bf16 %v4398_v37, %v4394_v36  ;;  %v10263_v47 = vpack.c.bf16 %v4400_v10, %v4396_v38  ;;  %v4421_v36 = vld [vmem:[#allocation7 + $0xe60] sm:$0xff]  ;;  %v4419_v37 = vld [vmem:[#allocation7 + $0xe50] sm:$0xff] }
 0x791   : > { %v4423_v10 = vld [vmem:[#allocation7 + $0xe70] sm:$0xff]  ;;  %v10181_v34 = vpack.c.bf16 %v4421_v36, %v4417_v30  ;;  %v4456_v30 = vld [vmem:[#allocation7 + $0xf78] sm:$0xff] }
 0x792   : > { %10154 = vmatpush1.bf16.msra.mxu0 %v10153_v8  ;;  %v4402_v8 = vld [vmem:[#allocation7 + $0xdc8] sm:$0xff]  ;;  %v10277_v41 = vpack.c.bf16 %v4423_v10, %v4419_v37  ;;  %v4449_v10 = vld [vmem:[#allocation7 + $0xf40] sm:$0xff] }
 0x793   : > { %10250 = vmatpush1.bf16.msra.mxu1 %v10249_v42  ;;  %10156 = vmatprep.subr.bf16.mxu0 %v10155_v11  ;;  %v4406_v42 = vld [vmem:[#allocation7 + $0xde8] sm:$0xff]  ;;  %v4404_v11 = vld [vmem:[#allocation7 + $0xdd8] sm:$0xff] }
 0x794   : > { %10252 = vmatprep.subr.bf16.mxu1 %v10251_v33  ;;  %v10171_v33 = vpack.c.bf16 %v4406_v42, %v4402_v8  ;;  %v10267_v58 = vpack.c.bf16 %v4408_v52, %v4404_v11  ;;  %v4429_v8 = vld [vmem:[#allocation7 + $0xea0] sm:$0xff]  ;;  %v4427_v42 = vld [vmem:[#allocation7 + $0xe90] sm:$0xff] }
 0x795   : > { %v4431_v52 = vld [vmem:[#allocation7 + $0xeb0] sm:$0xff]  ;;  %v10185_v56 = vpack.c.bf16 %v4429_v8, %v4425_v48  ;;  %v4464_v48 = vld [vmem:[#allocation7 + $0xfb8] sm:$0xff] }
 0x796   : > { %10158 = vmatpush1.bf16.msra.mxu0 %v10157_v17  ;;  %v4410_v17 = vld [vmem:[#allocation7 + $0xe08] sm:$0xff]  ;;  %v10281_v57 = vpack.c.bf16 %v4431_v52, %v4427_v42  ;;  %v4457_v52 = vld [vmem:[#allocation7 + $0xf80] sm:$0xff] }
 0x797   : > { %10254 = vmatpush1.bf16.msra.mxu1 %v10253_v13  ;;  %10160 = vmatprep.subr.bf16.mxu0 %v10159_v62  ;;  %v4414_v13 = vld [vmem:[#allocation7 + $0xe28] sm:$0xff]  ;;  %v4412_v62 = vld [vmem:[#allocation7 + $0xe18] sm:$0xff] }
 0x798   : > { %10256 = vmatprep.subr.bf16.mxu1 %v10255_v9  ;;  %v10175_v9 = vpack.c.bf16 %v4414_v13, %v4410_v17  ;;  %v10271_v16 = vpack.c.bf16 %v4416_v0, %v4412_v62  ;;  %v4437_v17 = vld [vmem:[#allocation7 + $0xee0] sm:$0xff]  ;;  %v4435_v13 = vld [vmem:[#allocation7 + $0xed0] sm:$0xff] }
 0x799   : > { %v4439_v0 = vld [vmem:[#allocation7 + $0xef0] sm:$0xff]  ;;  %v10189_v14 = vpack.c.bf16 %v4437_v17, %v4433_v60  ;;  %v4472_v60 = vld [vmem:[#allocation7 + $0xff8] sm:$0xff] }
 0x79a   : > { %10162 = vmatpush1.bf16.msra.mxu0 %v10161_v23  ;;  %v4418_v23 = vld [vmem:[#allocation7 + $0xe48] sm:$0xff]  ;;  %v10285_v15 = vpack.c.bf16 %v4439_v0, %v4435_v13  ;;  %v4465_v0 = vld [vmem:[#allocation7 + $0xfc0] sm:$0xff] }
 0x79b   : > { %10258 = vmatpush1.bf16.msra.mxu1 %v10257_v25  ;;  %10164 = vmatprep.subr.bf16.mxu0 %v10163_v55  ;;  %v4422_v25 = vld [vmem:[#allocation7 + $0xe68] sm:$0xff]  ;;  %v4420_v55 = vld [vmem:[#allocation7 + $0xe58] sm:$0xff] }
 0x79c   : > { %10260 = vmatprep.subr.bf16.mxu1 %v10259_v29  ;;  %v10179_v29 = vpack.c.bf16 %v4422_v25, %v4418_v23  ;;  %v10275_v38 = vpack.c.bf16 %v4424_v22, %v4420_v55  ;;  %v4445_v23 = vld [vmem:[#allocation7 + $0xf20] sm:$0xff]  ;;  %v4443_v25 = vld [vmem:[#allocation7 + $0xf10] sm:$0xff] }
 0x79d   : > { %v4447_v22 = vld [vmem:[#allocation7 + $0xf30] sm:$0xff]  ;;  %v10193_v36 = vpack.c.bf16 %v4445_v23, %v4441_v21  ;;  %v4478_v21 = vld [vmem:[#allocation7 + $0x1028] sm:$0xff]  ;;  %v4476_v23 = vld [vmem:[#allocation7 + $0x1018] sm:$0xff] }
 0x79e   : > { %10166 = vmatpush1.bf16.msra.mxu0 %v10165_v35  ;;  %v4426_v35 = vld [vmem:[#allocation7 + $0xe88] sm:$0xff]  ;;  %v10289_v37 = vpack.c.bf16 %v4447_v22, %v4443_v25 }
 0x79f   : > { %10262 = vmatpush1.bf16.msra.mxu1 %v10261_v26  ;;  %10168 = vmatprep.subr.bf16.mxu0 %v10167_v39  ;;  %v4430_v26 = vld [vmem:[#allocation7 + $0xea8] sm:$0xff]  ;;  %v4428_v39 = vld [vmem:[#allocation7 + $0xe98] sm:$0xff] }
 0x7a0   : > { %10264 = vmatprep.subr.bf16.mxu1 %v10263_v47  ;;  %v10183_v47 = vpack.c.bf16 %v4430_v26, %v4426_v35  ;;  %v10279_v11 = vpack.c.bf16 %v4432_v40, %v4428_v39  ;;  %v4453_v35 = vld [vmem:[#allocation7 + $0xf60] sm:$0xff]  ;;  %v4451_v26 = vld [vmem:[#allocation7 + $0xf50] sm:$0xff] }
 0x7a1   : > { %v4455_v40 = vld [vmem:[#allocation7 + $0xf70] sm:$0xff]  ;;  %v10197_v8 = vpack.c.bf16 %v4453_v35, %v4449_v10  ;;  %v4488_v10 = vld [vmem:[#allocation7 + $0x1078] sm:$0xff] }
 0x7a2   : > { %10170 = vmatpush1.bf16.msra.mxu0 %v10169_v53  ;;  %v4434_v53 = vld [vmem:[#allocation7 + $0xec8] sm:$0xff]  ;;  %v10293_v42 = vpack.c.bf16 %v4455_v40, %v4451_v26  ;;  %v4481_v40 = vld [vmem:[#allocation7 + $0x1040] sm:$0xff] }
 0x7a3   : > { %10266 = vmatpush1.bf16.msra.mxu1 %v10265_v54  ;;  %10172 = vmatprep.subr.bf16.mxu0 %v10171_v33  ;;  %v4438_v54 = vld [vmem:[#allocation7 + $0xee8] sm:$0xff]  ;;  %v4436_v33 = vld [vmem:[#allocation7 + $0xed8] sm:$0xff] }
 0x7a4   : > { %10268 = vmatprep.subr.bf16.mxu1 %v10267_v58  ;;  %v10187_v58 = vpack.c.bf16 %v4438_v54, %v4434_v53  ;;  %v10283_v62 = vpack.c.bf16 %v4440_v20, %v4436_v33  ;;  %v4461_v53 = vld [vmem:[#allocation7 + $0xfa0] sm:$0xff]  ;;  %v4459_v54 = vld [vmem:[#allocation7 + $0xf90] sm:$0xff] }
 0x7a5   : > { %v4463_v20 = vld [vmem:[#allocation7 + $0xfb0] sm:$0xff]  ;;  %v10201_v17 = vpack.c.bf16 %v4461_v53, %v4457_v52  ;;  %v4494_v53 = vld [vmem:[#allocation7 + $0x10a8] sm:$0xff] }
 0x7a6   : > { %10174 = vmatpush1.bf16.msra.mxu0 %v10173_v1  ;;  %v4442_v1 = vld [vmem:[#allocation7 + $0xf08] sm:$0xff]  ;;  %v10297_v13 = vpack.c.bf16 %v4463_v20, %v4459_v54  ;;  %v4492_v54 = vld [vmem:[#allocation7 + $0x1098] sm:$0xff] }
 0x7a7   : > { %10270 = vmatpush1.bf16.msra.mxu1 %v10269_v7  ;;  %10176 = vmatprep.subr.bf16.mxu0 %v10175_v9  ;;  %v4446_v7 = vld [vmem:[#allocation7 + $0xf28] sm:$0xff]  ;;  %v4444_v9 = vld [vmem:[#allocation7 + $0xf18] sm:$0xff] }
 0x7a8   : > { %10272 = vmatprep.subr.bf16.mxu1 %v10271_v16  ;;  %v10191_v16 = vpack.c.bf16 %v4446_v7, %v4442_v1  ;;  %v10287_v55 = vpack.c.bf16 %v4448_v51, %v4444_v9  ;;  %v4469_v1 = vld [vmem:[#allocation7 + $0xfe0] sm:$0xff]  ;;  %v4467_v9 = vld [vmem:[#allocation7 + $0xfd0] sm:$0xff] }
 0x7a9   : > { %v4471_v51 = vld [vmem:[#allocation7 + $0xff0] sm:$0xff] }
 0x7aa   : > { %10178 = vmatpush1.bf16.msra.mxu0 %v10177_v27  ;;  %v4450_v27 = vld [vmem:[#allocation7 + $0xf48] sm:$0xff] }
 0x7ab   : > { %10274 = vmatpush1.bf16.msra.mxu1 %v10273_v28  ;;  %10180 = vmatprep.subr.bf16.mxu0 %v10179_v29  ;;  %v4454_v28 = vld [vmem:[#allocation7 + $0xf68] sm:$0xff]  ;;  %v4452_v29 = vld [vmem:[#allocation7 + $0xf58] sm:$0xff] }
 0x7ac   : > { %10276 = vmatprep.subr.bf16.mxu1 %v10275_v38  ;;  %v10195_v38 = vpack.c.bf16 %v4454_v28, %v4450_v27  ;;  %v10291_v39 = vpack.c.bf16 %v4456_v30, %v4452_v29  ;;  %v4473_v27 = vld [vmem:[#allocation7 + $0x1000] sm:$0xff]  ;;  %v4475_v29 = vld [vmem:[#allocation7 + $0x1010] sm:$0xff] }
 0x7ad   : > { %v4477_v28 = vld [vmem:[#allocation7 + $0x1020] sm:$0xff]  ;;  %v4479_v30 = vld [vmem:[#allocation7 + $0x1030] sm:$0xff] }
 0x7ae   : > { %10182 = vmatpush1.bf16.msra.mxu0 %v10181_v34  ;;  %v4458_v34 = vld [vmem:[#allocation7 + $0xf88] sm:$0xff]  ;;  %v10209_v26 = vpack.c.bf16 %v4477_v28, %v4473_v27 }
 0x7af   : > { %10278 = vmatpush1.bf16.msra.mxu1 %v10277_v41  ;;  %10184 = vmatprep.subr.bf16.mxu0 %v10183_v47  ;;  %v4462_v41 = vld [vmem:[#allocation7 + $0xfa8] sm:$0xff]  ;;  %v4460_v47 = vld [vmem:[#allocation7 + $0xf98] sm:$0xff] }
 0x7b0   : > { %10280 = vmatprep.subr.bf16.mxu1 %v10279_v11  ;;  %v10199_v11 = vpack.c.bf16 %v4462_v41, %v4458_v34  ;;  %v10295_v33 = vpack.c.bf16 %v4464_v48, %v4460_v47  ;;  %v4485_v34 = vld [vmem:[#allocation7 + $0x1060] sm:$0xff]  ;;  %v4506_v27 = vld [vmem:[#allocation7 + $0x1108] sm:$0xff] }
 0x7b1   : > { %v4510_v28 = vld [vmem:[#allocation7 + $0x1128] sm:$0xff] }
 0x7b2   : > { %10186 = vmatpush1.bf16.msra.mxu0 %v10185_v56  ;;  %v4466_v56 = vld [vmem:[#allocation7 + $0xfc8] sm:$0xff] }
 0x7b3   : > { %10282 = vmatpush1.bf16.msra.mxu1 %v10281_v57  ;;  %10188 = vmatprep.subr.bf16.mxu0 %v10187_v58  ;;  %v4470_v57 = vld [vmem:[#allocation7 + $0xfe8] sm:$0xff]  ;;  %v4468_v58 = vld [vmem:[#allocation7 + $0xfd8] sm:$0xff] }
 0x7b4   : > { %10284 = vmatprep.subr.bf16.mxu1 %v10283_v62  ;;  %v10203_v62 = vpack.c.bf16 %v4470_v57, %v4466_v56  ;;  %v10299_v7 = vpack.c.bf16 %v4472_v60, %v4468_v58  ;;  %v10213_v56 = vpack.c.bf16 %v4485_v34, %v4481_v40  ;;  %v4489_v58 = vld [vmem:[#allocation7 + $0x1080] sm:$0xff]  ;;  %v4511_v40 = vld [vmem:[#allocation7 + $0x1130] sm:$0xff]  ;;  %v4514_v34 = vld [vmem:[#allocation7 + $0x1148] sm:$0xff] }
 0x7b5   : > { %v4493_v60 = vld [vmem:[#allocation7 + $0x10a0] sm:$0xff] }
 0x7b6   : > { %10190 = vmatpush1.bf16.msra.mxu0 %v10189_v14  ;;  %v10205_v14 = vpack.c.bf16 %v4469_v1, %v4465_v0  ;;  %v4495_v0 = vld [vmem:[#allocation7 + $0x10b0] sm:$0xff]  ;;  %v4498_v1 = vld [vmem:[#allocation7 + $0x10c8] sm:$0xff] }
 0x7b7   : > { %10286 = vmatpush1.bf16.msra.mxu1 %v10285_v15  ;;  %10192 = vmatprep.subr.bf16.mxu0 %v10191_v16  ;;  %v10301_v15 = vpack.c.bf16 %v4471_v51, %v4467_v9  ;;  %v4474_v16 = vld [vmem:[#allocation7 + $0x1008] sm:$0xff]  ;;  %v4500_v9 = vld [vmem:[#allocation7 + $0x10d8] sm:$0xff] }
 0x7b8   : > { %10288 = vmatprep.subr.bf16.mxu1 %v10287_v55  ;;  %v10207_v25 = vpack.c.bf16 %v4478_v21, %v4474_v16  ;;  %v4480_v55 = vld [vmem:[#allocation7 + $0x1038] sm:$0xff]  ;;  %v4497_v16 = vld [vmem:[#allocation7 + $0x10c0] sm:$0xff] }
 0x7b9   : > { %v10303_v22 = vpack.c.bf16 %v4480_v55, %v4476_v23  ;;  %v4504_v51 = vld [vmem:[#allocation7 + $0x10f8] sm:$0xff]  ;;  %v4501_v21 = vld [vmem:[#allocation7 + $0x10e0] sm:$0xff]  ;;  %v4499_v55 = vld [vmem:[#allocation7 + $0x10d0] sm:$0xff] }
 0x7ba   : > { %10194 = vmatpush1.bf16.msra.mxu0 %v10193_v36  ;;  %v4482_v36 = vld [vmem:[#allocation7 + $0x1048] sm:$0xff] }
 0x7bb   : > { %10290 = vmatpush1.bf16.msra.mxu1 %v10289_v37  ;;  %10196 = vmatprep.subr.bf16.mxu0 %v10195_v38  ;;  %v4486_v37 = vld [vmem:[#allocation7 + $0x1068] sm:$0xff]  ;;  %v4484_v38 = vld [vmem:[#allocation7 + $0x1058] sm:$0xff] }
 0x7bc   : > { %10292 = vmatprep.subr.bf16.mxu1 %v10291_v39  ;;  %v10305_v39 = vpack.c.bf16 %v4479_v30, %v4475_v29  ;;  %v10211_v47 = vpack.c.bf16 %v4486_v37, %v4482_v36  ;;  %v10307_v48 = vpack.c.bf16 %v4488_v10, %v4484_v38  ;;  %v4508_v29 = vld [vmem:[#allocation7 + $0x1118] sm:$0xff]  ;;  %v10221_v36 = vpack.c.bf16 %v4501_v21, %v4497_v16  ;;  %v4505_v38 = vld [vmem:[#allocation7 + $0x1100] sm:$0xff]  ;;  %v4534_v16 = vld [vmem:[#allocation7 + $0x11e8] sm:$0xff] }
 0x7bd   : > { %v4512_v30 = vld [vmem:[#allocation7 + $0x1138] sm:$0xff]  ;;  %v4509_v10 = vld [vmem:[#allocation7 + $0x1120] sm:$0xff] }
 0x7be   : > { %10198 = vmatpush1.bf16.msra.mxu0 %v10197_v8  ;;  %v4483_v8 = vld [vmem:[#allocation7 + $0x1050] sm:$0xff]  ;;  %v4532_v21 = vld [vmem:[#allocation7 + $0x11d8] sm:$0xff] }
 0x7bf   : > { %10294 = vmatpush1.bf16.msra.mxu1 %v10293_v42  ;;  %10200 = vmatprep.subr.bf16.mxu0 %v10199_v11  ;;  %v4487_v42 = vld [vmem:[#allocation7 + $0x1070] sm:$0xff]  ;;  %v4490_v11 = vld [vmem:[#allocation7 + $0x1088] sm:$0xff] }
 0x7c0   : > { %10296 = vmatprep.subr.bf16.mxu1 %v10295_v33  ;;  %v4496_v33 = vld [vmem:[#allocation7 + $0x10b8] sm:$0xff]  ;;  %v10309_v57 = vpack.c.bf16 %v4487_v42, %v4483_v8  ;;  %v10225_v8 = vpack.c.bf16 %v4509_v10, %v4505_v38  ;;  %v4970_v10 = vld [vmem:[#allocation7 + $0x1208] sm:$0xff] }
 0x7c2   : > { %10202 = vmatpush1.bf16.msra.mxu0 %v10201_v17  ;;  %v10215_v17 = vpack.c.bf16 %v4494_v53, %v4490_v11  ;;  %v4513_v11 = vld [vmem:[#allocation7 + $0x1140] sm:$0xff] }
 0x7c3   : > { %10298 = vmatpush1.bf16.msra.mxu1 %v10297_v13  ;;  %10204 = vmatprep.subr.bf16.mxu0 %v10203_v62  ;;  %v10311_v13 = vpack.c.bf16 %v4496_v33, %v4492_v54  ;;  %v4491_v62 = vld [vmem:[#allocation7 + $0x1090] sm:$0xff]  ;;  %v4517_v53 = vld [vmem:[#allocation7 + $0x1160] sm:$0xff] }
 0x7c4   : > { %10300 = vmatprep.subr.bf16.mxu1 %v10299_v7  ;;  %v4502_v7 = vld [vmem:[#allocation7 + $0x10e8] sm:$0xff] }
 0x7c5   : > { %v10219_v23 = vpack.c.bf16 %v4502_v7, %v4498_v1  ;;  %v4525_v1 = vld [vmem:[#allocation7 + $0x11a0] sm:$0xff] }
 0x7c6   : > { %10206 = vmatpush1.bf16.msra.mxu0 %v10205_v14  ;;  %v10217_v14 = vpack.c.bf16 %v4493_v60, %v4489_v58  ;;  %v4526_v58 = vld [vmem:[#allocation7 + $0x11a8] sm:$0xff]  ;;  %v4524_v60 = vld [vmem:[#allocation7 + $0x1198] sm:$0xff] }
 0x7c7   : > { %10302 = vmatpush1.bf16.msra.mxu1 %v10301_v15  ;;  %10208 = vmatprep.subr.bf16.mxu0 %v10207_v25  ;;  %v10313_v15 = vpack.c.bf16 %v4495_v0, %v4491_v62  ;;  %v10315_v25 = vpack.c.bf16 %v4504_v51, %v4500_v9  ;;  %v4521_v0 = vld [vmem:[#allocation7 + $0x1180] sm:$0xff]  ;;  %v4523_v51 = vld [vmem:[#allocation7 + $0x1190] sm:$0xff] }
 0x7c8   : > { %10304 = vmatprep.subr.bf16.mxu1 %v10303_v22  ;;  %v4503_v22 = vld [vmem:[#allocation7 + $0x10f0] sm:$0xff] }
 0x7c9   : > { %v10317_v37 = vpack.c.bf16 %v4503_v22, %v4499_v55  ;;  %v4529_v22 = vld [vmem:[#allocation7 + $0x11c0] sm:$0xff] }
 0x85c   : > { %v4269_v35 = vpop.f32.mrb[24].mxu0 }
 0x85d   : > { %v4271_v41 = vpop.f32.mrb[25].mxu0  ;;  %v12938_v52 = vpop.f32.mrb[48].mxu1 }
 0x85e   : > { %4601 = vmatprep.mubr.f32.mxu0 %v4271_v41  ;;  %4743 = vmatprep.mubr.f32.mxu1 %v4271_v41  ;;  %v9513_v20 = vpop.f32.mrb[49].mxu1  ;;  %v4518_v41 = vld [vmem:[#allocation7 + $0x1168] sm:$0xff] }
 0x85f   : > { %4602 = vmatmul.mubr.f32.vlgmr.msra.gmra.mrb[22].mxu0 %v4269_v35  ;;  %4744 = vmatmul.mubr.f32.vlgmr.msra.gmra.mrb[46].mxu1 %v4269_v35  ;;  %v10223_v35 = vpack.c.bf16 %v4510_v28, %v4506_v27  ;;  %v10227_v54 = vpack.c.bf16 %v4518_v41, %v4514_v34  ;;  %v4515_v20 = vld [vmem:[#allocation7 + $0x1150] sm:$0xff]  ;;  %v4973_v34 = vld [vmem:[#allocation7 + $0x1220] sm:$0xff] }
 0x860   : > { %10210 = vmatpush1.bf16.msra.mxu0 %v10209_v26  ;;  %10306 = vmatpush1.bf16.msra.mxu1 %v10305_v39  ;;  %v10319_v26 = vpack.c.bf16 %v4512_v30, %v4508_v29  ;;  %v4507_v39 = vld [vmem:[#allocation7 + $0x1110] sm:$0xff]  ;;  %v4533_v29 = vld [vmem:[#allocation7 + $0x11e0] sm:$0xff] }
 0x861   : > { %10212 = vmatprep.subr.bf16.mxu0 %v10211_v47  ;;  %10308 = vmatprep.subr.bf16.mxu1 %v10307_v48  ;;  %v4516_v47 = vld [vmem:[#allocation7 + $0x1158] sm:$0xff]  ;;  %v10321_v42 = vpack.c.bf16 %v4511_v40, %v4507_v39  ;;  %v4531_v30 = vld [vmem:[#allocation7 + $0x11d0] sm:$0xff]  ;;  %v4969_v40 = vld [vmem:[#allocation7 + $0x1200] sm:$0xff] }
 0x862   : > { %4672 = vmatprep.mubr.f32.mxu0 %v12196_v3  ;;  %4814 = vmatprep.mubr.f32.mxu1 %v12196_v3  ;;  %v4520_v48 = vld [vmem:[#allocation7 + $0x1178] sm:$0xff]  ;;  %v4971_v41 = vld [vmem:[#allocation7 + $0x1210] sm:$0xff] }
 0x863   : > { %v10323_v33 = vpack.c.bf16 %v4520_v48, %v4516_v47  ;;  %v4976_v39 = vld [vmem:[#allocation7 + $0x1238] sm:$0xff]  ;;  %v4975_v47 = vld [vmem:[#allocation7 + $0x1230] sm:$0xff]  ;;  %v4978_v48 = vld [vmem:[#allocation7 + $0x1248] sm:$0xff] }
 0x864   : > { %10214 = vmatpush1.bf16.msra.mxu0 %v10213_v56  ;;  %10310 = vmatpush1.bf16.msra.mxu1 %v10309_v57  ;;  %v4519_v56 = vld [vmem:[#allocation7 + $0x1170] sm:$0xff]  ;;  %v4522_v57 = vld [vmem:[#allocation7 + $0x1188] sm:$0xff] }
 0x865   : > { %10216 = vmatprep.subr.bf16.mxu0 %v10215_v17  ;;  %10312 = vmatprep.subr.bf16.mxu1 %v10311_v13  ;;  %v4528_v17 = vld [vmem:[#allocation7 + $0x11b8] sm:$0xff]  ;;  %v10229_v13 = vpack.c.bf16 %v4517_v53, %v4513_v11  ;;  %v10325_v62 = vpack.c.bf16 %v4519_v56, %v4515_v20  ;;  %v10231_v7 = vpack.c.bf16 %v4526_v58, %v4522_v57  ;;  %v4982_v11 = vld [vmem:[#allocation7 + $0x1268] sm:$0xff]  ;;  %v4977_v56 = vld [vmem:[#allocation7 + $0x1240] sm:$0xff] }
 0x866   : > { %v10327_v9 = vpack.c.bf16 %v4528_v17, %v4524_v60  ;;  %v4980_v53 = vld [vmem:[#allocation7 + $0x1258] sm:$0xff]  ;;  %v10443_v20 = vpack.c.bf16 %v4975_v47, %v4971_v41  ;;  %v4981_v57 = vld [vmem:[#allocation7 + $0x1260] sm:$0xff]  ;;  %v10349_v58 = vpack.c.bf16 %v4982_v11, %v4978_v48  ;;  %v4983_v17 = vld [vmem:[#allocation7 + $0x1270] sm:$0xff] }
 0x867   : > { %v5001_v48 = vld [vmem:[#allocation7 + $0x1300] sm:$0xff] }
 0x868   : > { %10218 = vmatpush1.bf16.msra.mxu0 %v10217_v14  ;;  %10314 = vmatpush1.bf16.msra.mxu1 %v10313_v15  ;;  %v4527_v14 = vld [vmem:[#allocation7 + $0x11b0] sm:$0xff]  ;;  %v4530_v15 = vld [vmem:[#allocation7 + $0x11c8] sm:$0xff] }
 0x869   : > { %10220 = vmatprep.subr.bf16.mxu0 %v10219_v23  ;;  %10316 = vmatprep.subr.bf16.mxu1 %v10315_v25  ;;  %v4536_v23 = vld [vmem:[#allocation7 + $0x11f8] sm:$0xff]  ;;  %v10233_v25 = vpack.c.bf16 %v4525_v1, %v4521_v0  ;;  %v10329_v55 = vpack.c.bf16 %v4527_v14, %v4523_v51  ;;  %v10235_v27 = vpack.c.bf16 %v4534_v16, %v4530_v15  ;;  %v4985_v51 = vld [vmem:[#allocation7 + $0x1280] sm:$0xff] }
 0x86a   : > { %v10331_v28 = vpack.c.bf16 %v4536_v23, %v4532_v21  ;;  %v4988_v0 = vld [vmem:[#allocation7 + $0x1298] sm:$0xff]  ;;  %v4989_v14 = vld [vmem:[#allocation7 + $0x12a0] sm:$0xff]  ;;  %v4987_v21 = vld [vmem:[#allocation7 + $0x1290] sm:$0xff] }
 0x86b   : > { %v4992_v1 = vld [vmem:[#allocation7 + $0x12b8] sm:$0xff]  ;;  %v4991_v23 = vld [vmem:[#allocation7 + $0x12b0] sm:$0xff] }
 0x86c   : > { %10222 = vmatpush1.bf16.msra.mxu0 %v10221_v36  ;;  %10318 = vmatpush1.bf16.msra.mxu1 %v10317_v37  ;;  %v4535_v36 = vld [vmem:[#allocation7 + $0x11f0] sm:$0xff]  ;;  %v10237_v37 = vpack.c.bf16 %v4533_v29, %v4529_v22  ;;  %v10449_v16 = vpack.c.bf16 %v4992_v1, %v4988_v0  ;;  %v4996_v22 = vld [vmem:[#allocation7 + $0x12d8] sm:$0xff]  ;;  %v10451_v29 = vpack.c.bf16 %v4991_v23, %v4987_v21  ;;  %v5017_v21 = vld [vmem:[#allocation7 + $0x1380] sm:$0xff] }
 0x86d   : > { %10224 = vmatprep.subr.bf16.mxu0 %v10223_v35  ;;  %10320 = vmatprep.subr.bf16.mxu1 %v10319_v26  ;;  %v10333_v38 = vpack.c.bf16 %v4535_v36, %v4531_v30  ;;  %v4974_v35 = vld [vmem:[#allocation7 + $0x1228] sm:$0xff]  ;;  %v4972_v26 = vld [vmem:[#allocation7 + $0x1218] sm:$0xff]  ;;  %v4993_v30 = vld [vmem:[#allocation7 + $0x12c0] sm:$0xff] }
 0x86e   : > { %v4997_v36 = vld [vmem:[#allocation7 + $0x12e0] sm:$0xff]  ;;  %v5011_v0 = vld [vmem:[#allocation7 + $0x1350] sm:$0xff] }
 0x86f   : > { %v10359_v41 = vpack.c.bf16 %v4997_v36, %v4993_v30  ;;  %v5015_v1 = vld [vmem:[#allocation7 + $0x1370] sm:$0xff]  ;;  %v5021_v23 = vld [vmem:[#allocation7 + $0x13a0] sm:$0xff]  ;;  %v5028_v30 = vld [vmem:[#allocation7 + $0x13d8] sm:$0xff] }
 0x870   : > { %10226 = vmatpush1.bf16.msra.mxu0 %v10225_v8  ;;  %10322 = vmatpush1.bf16.msra.mxu1 %v10321_v42  ;;  %v10345_v8 = vpack.c.bf16 %v4974_v35, %v4970_v10  ;;  %v10441_v42 = vpack.c.bf16 %v4976_v39, %v4972_v26  ;;  %v4995_v10 = vld [vmem:[#allocation7 + $0x12d0] sm:$0xff]  ;;  %v5002_v26 = vld [vmem:[#allocation7 + $0x1308] sm:$0xff]  ;;  %v5032_v36 = vld [vmem:[#allocation7 + $0x13f8] sm:$0xff] }
 0x871   : > { %10228 = vmatprep.subr.bf16.mxu0 %v10227_v54  ;;  %10324 = vmatprep.subr.bf16.mxu1 %v10323_v33  ;;  %v4984_v54 = vld [vmem:[#allocation7 + $0x1278] sm:$0xff]  ;;  %v10347_v33 = vpack.c.bf16 %v4973_v34, %v4969_v40  ;;  %v4999_v35 = vld [vmem:[#allocation7 + $0x12f0] sm:$0xff]  ;;  %v5006_v39 = vld [vmem:[#allocation7 + $0x1328] sm:$0xff] }
 0x872   : > { %v10445_v60 = vpack.c.bf16 %v4984_v54, %v4980_v53  ;;  %v5004_v40 = vld [vmem:[#allocation7 + $0x1318] sm:$0xff]  ;;  %v10455_v47 = vpack.c.bf16 %v4999_v35, %v4995_v10  ;;  %v5003_v53 = vld [vmem:[#allocation7 + $0x1310] sm:$0xff]  ;;  %v5025_v10 = vld [vmem:[#allocation7 + $0x13c0] sm:$0xff] }
 0x873   : > { %v5008_v34 = vld [vmem:[#allocation7 + $0x1338] sm:$0xff]  ;;  %v5007_v54 = vld [vmem:[#allocation7 + $0x1330] sm:$0xff]  ;;  %v5029_v35 = vld [vmem:[#allocation7 + $0x13e0] sm:$0xff] }
 0x874   : > { %10230 = vmatpush1.bf16.msra.mxu0 %v10229_v13  ;;  %10326 = vmatpush1.bf16.msra.mxu1 %v10325_v62  ;;  %v4986_v13 = vld [vmem:[#allocation7 + $0x1288] sm:$0xff]  ;;  %v10457_v11 = vpack.c.bf16 %v5008_v34, %v5004_v40  ;;  %v5027_v40 = vld [vmem:[#allocation7 + $0x13d0] sm:$0xff] }
 0x875   : > { %10232 = vmatprep.subr.bf16.mxu0 %v10231_v7  ;;  %10328 = vmatprep.subr.bf16.mxu1 %v10327_v9  ;;  %v4990_v62 = vld [vmem:[#allocation7 + $0x12a8] sm:$0xff]  ;;  %v10351_v7 = vpack.c.bf16 %v4981_v57, %v4977_v56  ;;  %v5012_v56 = vld [vmem:[#allocation7 + $0x1358] sm:$0xff]  ;;  %v5031_v34 = vld [vmem:[#allocation7 + $0x13f0] sm:$0xff] }
 0x876   : > { %v10353_v15 = vpack.c.bf16 %v4990_v62, %v4986_v13  ;;  %v5016_v57 = vld [vmem:[#allocation7 + $0x1378] sm:$0xff] }
 0x877   : > { %v10461_v62 = vpack.c.bf16 %v5016_v57, %v5012_v56  ;;  %v5035_v56 = vld [vmem:[#allocation7 + $0x1410] sm:$0xff] }
 0x878   : > { %10234 = vmatpush1.bf16.msra.mxu0 %v10233_v25  ;;  %10330 = vmatpush1.bf16.msra.mxu1 %v10329_v55  ;;  %v4994_v25 = vld [vmem:[#allocation7 + $0x12c8] sm:$0xff]  ;;  %v5039_v57 = vld [vmem:[#allocation7 + $0x1430] sm:$0xff] }
 0x879   : > { %10236 = vmatprep.subr.bf16.mxu0 %v10235_v27  ;;  %10332 = vmatprep.subr.bf16.mxu1 %v10331_v28  ;;  %v4998_v55 = vld [vmem:[#allocation7 + $0x12e8] sm:$0xff]  ;;  %v5000_v27 = vld [vmem:[#allocation7 + $0x12f8] sm:$0xff]  ;;  %v10355_v28 = vpack.c.bf16 %v4989_v14, %v4985_v51 }
 0x87a   : > { %v5020_v51 = vld [vmem:[#allocation7 + $0x1398] sm:$0xff] }
 0x87b   : > { %v5024_v14 = vld [vmem:[#allocation7 + $0x13b8] sm:$0xff] }
 0x87c   : > { %10238 = vmatpush1.bf16.msra.mxu0 %v10237_v37  ;;  %10334 = vmatpush1.bf16.msra.mxu1 %v10333_v38  ;;  %v10357_v37 = vpack.c.bf16 %v4998_v55, %v4994_v25  ;;  %v10453_v38 = vpack.c.bf16 %v5000_v27, %v4996_v22  ;;  %v10465_v55 = vpack.c.bf16 %v5024_v14, %v5020_v51  ;;  %v5019_v22 = vld [vmem:[#allocation7 + $0x1390] sm:$0xff] }
 0x87d   : > { %10337 = vmatprep.subr.msk.bf16.mxu0 %vm12488_vm4, %v12867_v49  ;;  %10341 = vmatprep.subr.bf16.mxu1 %v12194_v2  ;;  %v5023_v27 = vld [vmem:[#allocation7 + $0x13b0] sm:$0xff] }
 0x87e   : > { %v5043_v51 = vld [vmem:[#allocation7 + $0x1450] sm:$0xff] }
 0x87f   : > { %4673 = vmatmul.mubr.f32.vlgmr.msra.gmra.mrb[22].mxu0 %v12938_v52  ;;  %4815 = vmatmul.mubr.f32.vlgmr.msra.gmra.mrb[46].mxu1 %v12938_v52  ;;  %v4979_v52 = vld [vmem:[#allocation7 + $0x1250] sm:$0xff] }
 0x880   : > { %10340 = vmatpush1.bf16.msk.msra.mxu0 %vm12488_vm4, %v12865_v63  ;;  %10344 = vmatpush3.bf16.msk.msra.mxu1 %vm12488_vm4, %v12875_v18  ;;  %v10447_v9 = vpack.c.bf16 %v4983_v17, %v4979_v52  ;;  %v5009_v52 = vld [vmem:[#allocation7 + $0x1340] sm:$0xff]  ;;  %v5047_v14 = vld [vmem:[#allocation7 + $0x1470] sm:$0xff] }
 0x881   : > { %4891 = vmatprep.mubr.f32.mxu0 %v12196_v3  ;;  %9518 = vmatprep.mubr.msk.f32.mxu1 %vm12195_vm0, %v12196_v3  ;;  %v5013_v17 = vld [vmem:[#allocation7 + $0x1360] sm:$0xff] }
 0x882   : > { %10346 = vmatprep.subr.bf16.mxu0 %v10345_v8  ;;  %10442 = vmatprep.subr.bf16.mxu1 %v10441_v42  ;;  %v5005_v8 = vld [vmem:[#allocation7 + $0x1320] sm:$0xff]  ;;  %v10361_v42 = vpack.c.bf16 %v5006_v39, %v5002_v26  ;;  %v10469_v39 = vpack.c.bf16 %v5032_v36, %v5028_v30  ;;  %v5051_v30 = vld [vmem:[#allocation7 + $0x1490] sm:$0xff] }
 0x883   : > { %9305 = vmatmul.mubr.msk.f32.vlgmr.msra.gmra.mrb[26].mxu0 %vm2952_vm3, %v12685_v6  ;;  %9519 = vmatmul.mubr.msk.f32.vlgmr.msra.gmra.mrb[50].mxu1 %vm2952_vm3, %v12685_v6  ;;  %v5055_v36 = vld [vmem:[#allocation7 + $0x14b0] sm:$0xff] }
 0x884   : > { %10348 = vmatpush1.bf16.msra.mxu0 %v10347_v33  ;;  %10444 = vmatpush1.bf16.msra.mxu1 %v10443_v20  ;;  %v5010_v33 = vld [vmem:[#allocation7 + $0x1348] sm:$0xff] }
 0x885   : > { %10350 = vmatprep.subr.bf16.mxu0 %v10349_v58  ;;  %10446 = vmatprep.subr.bf16.mxu1 %v10445_v60  ;;  %v5014_v20 = vld [vmem:[#allocation7 + $0x1368] sm:$0xff]  ;;  %v10363_v58 = vpack.c.bf16 %v5005_v8, %v5001_v48  ;;  %v10459_v60 = vpack.c.bf16 %v5007_v54, %v5003_v53  ;;  %v5036_v48 = vld [vmem:[#allocation7 + $0x1418] sm:$0xff]  ;;  %v5033_v53 = vld [vmem:[#allocation7 + $0x1400] sm:$0xff] }
 0x886   : > { %v10365_v13 = vpack.c.bf16 %v5014_v20, %v5010_v33  ;;  %v5040_v8 = vld [vmem:[#allocation7 + $0x1438] sm:$0xff]  ;;  %v5037_v54 = vld [vmem:[#allocation7 + $0x1420] sm:$0xff] }
 0x887   : > { %v10473_v20 = vpack.c.bf16 %v5040_v8, %v5036_v48  ;;  %v5059_v48 = vld [vmem:[#allocation7 + $0x14d0] sm:$0xff] }
 0x888   : > { %10352 = vmatpush1.bf16.msra.mxu0 %v10351_v7  ;;  %10448 = vmatpush1.bf16.msra.mxu1 %v10447_v9  ;;  %v5018_v7 = vld [vmem:[#allocation7 + $0x1388] sm:$0xff]  ;;  %v5063_v8 = vld [vmem:[#allocation7 + $0x14f0] sm:$0xff] }
 0x889   : > { %10354 = vmatprep.subr.bf16.mxu0 %v10353_v15  ;;  %10450 = vmatprep.subr.bf16.mxu1 %v10449_v16  ;;  %v5022_v9 = vld [vmem:[#allocation7 + $0x13a8] sm:$0xff]  ;;  %v10367_v15 = vpack.c.bf16 %v5013_v17, %v5009_v52  ;;  %v10463_v16 = vpack.c.bf16 %v5015_v1, %v5011_v0  ;;  %v5044_v52 = vld [vmem:[#allocation7 + $0x1458] sm:$0xff]  ;;  %v5041_v0 = vld [vmem:[#allocation7 + $0x1440] sm:$0xff] }
 0x88a   : > { %v10369_v25 = vpack.c.bf16 %v5022_v9, %v5018_v7  ;;  %v5048_v17 = vld [vmem:[#allocation7 + $0x1478] sm:$0xff]  ;;  %v5045_v1 = vld [vmem:[#allocation7 + $0x1460] sm:$0xff] }
 0x88b   : > { %v10477_v9 = vpack.c.bf16 %v5048_v17, %v5044_v52  ;;  %v5067_v52 = vld [vmem:[#allocation7 + $0x1510] sm:$0xff] }
 0x88c   : > { %10356 = vmatpush1.bf16.msra.mxu0 %v10355_v28  ;;  %10452 = vmatpush1.bf16.msra.mxu1 %v10451_v29  ;;  %v5026_v28 = vld [vmem:[#allocation7 + $0x13c8] sm:$0xff]  ;;  %v5071_v17 = vld [vmem:[#allocation7 + $0x1530] sm:$0xff] }
 0x88d   : > { %10358 = vmatprep.subr.bf16.mxu0 %v10357_v37  ;;  %10454 = vmatprep.subr.bf16.mxu1 %v10453_v38  ;;  %v5030_v29 = vld [vmem:[#allocation7 + $0x13e8] sm:$0xff]  ;;  %v10371_v37 = vpack.c.bf16 %v5021_v23, %v5017_v21  ;;  %v10467_v38 = vpack.c.bf16 %v5023_v27, %v5019_v22  ;;  %v5052_v21 = vld [vmem:[#allocation7 + $0x1498] sm:$0xff]  ;;  %v5049_v22 = vld [vmem:[#allocation7 + $0x1480] sm:$0xff] }
 0x88e   : > { %v10373_v26 = vpack.c.bf16 %v5030_v29, %v5026_v28  ;;  %v5056_v23 = vld [vmem:[#allocation7 + $0x14b8] sm:$0xff]  ;;  %v5053_v27 = vld [vmem:[#allocation7 + $0x14a0] sm:$0xff] }
 0x88f   : > { %v10481_v29 = vpack.c.bf16 %v5056_v23, %v5052_v21  ;;  %v5075_v21 = vld [vmem:[#allocation7 + $0x1550] sm:$0xff] }
 0x890   : > { %10360 = vmatpush1.bf16.msra.mxu0 %v10359_v41  ;;  %10456 = vmatpush1.bf16.msra.mxu1 %v10455_v47  ;;  %v5034_v41 = vld [vmem:[#allocation7 + $0x1408] sm:$0xff]  ;;  %v5079_v23 = vld [vmem:[#allocation7 + $0x1570] sm:$0xff] }
 0x891   : > { %10362 = vmatprep.subr.bf16.mxu0 %v10361_v42  ;;  %10458 = vmatprep.subr.bf16.mxu1 %v10457_v11  ;;  %v5038_v47 = vld [vmem:[#allocation7 + $0x1428] sm:$0xff]  ;;  %v10375_v42 = vpack.c.bf16 %v5029_v35, %v5025_v10  ;;  %v10471_v11 = vpack.c.bf16 %v5031_v34, %v5027_v40  ;;  %v5060_v10 = vld [vmem:[#allocation7 + $0x14d8] sm:$0xff]  ;;  %v5057_v40 = vld [vmem:[#allocation7 + $0x14c0] sm:$0xff] }
 0x892   : > { %v10377_v33 = vpack.c.bf16 %v5038_v47, %v5034_v41  ;;  %v5064_v35 = vld [vmem:[#allocation7 + $0x14f8] sm:$0xff]  ;;  %v5061_v34 = vld [vmem:[#allocation7 + $0x14e0] sm:$0xff] }
 0x893   : > { %v10485_v47 = vpack.c.bf16 %v5064_v35, %v5060_v10  ;;  %v5083_v10 = vld [vmem:[#allocation7 + $0x1590] sm:$0xff] }
 0x894   : > { %10364 = vmatpush1.bf16.msra.mxu0 %v10363_v58  ;;  %10460 = vmatpush1.bf16.msra.mxu1 %v10459_v60  ;;  %v5042_v58 = vld [vmem:[#allocation7 + $0x1448] sm:$0xff]  ;;  %v5087_v35 = vld [vmem:[#allocation7 + $0x15b0] sm:$0xff] }
 0x895   : > { %10366 = vmatprep.subr.bf16.mxu0 %v10365_v13  ;;  %10462 = vmatprep.subr.bf16.mxu1 %v10461_v62  ;;  %v5046_v60 = vld [vmem:[#allocation7 + $0x1468] sm:$0xff]  ;;  %v10379_v13 = vpack.c.bf16 %v5037_v54, %v5033_v53  ;;  %v10475_v62 = vpack.c.bf16 %v5039_v57, %v5035_v56  ;;  %v5068_v53 = vld [vmem:[#allocation7 + $0x1518] sm:$0xff]  ;;  %v5065_v56 = vld [vmem:[#allocation7 + $0x1500] sm:$0xff] }
 0x896   : > { %v10381_v7 = vpack.c.bf16 %v5046_v60, %v5042_v58  ;;  %v5072_v54 = vld [vmem:[#allocation7 + $0x1538] sm:$0xff]  ;;  %v5069_v57 = vld [vmem:[#allocation7 + $0x1520] sm:$0xff] }
 0x897   : > { %v10489_v60 = vpack.c.bf16 %v5072_v54, %v5068_v53  ;;  %v5091_v53 = vld [vmem:[#allocation7 + $0x15d0] sm:$0xff] }
 0x898   : > { %10368 = vmatpush1.bf16.msra.mxu0 %v10367_v15  ;;  %10464 = vmatpush1.bf16.msra.mxu1 %v10463_v16  ;;  %v5050_v15 = vld [vmem:[#allocation7 + $0x1488] sm:$0xff]  ;;  %v5095_v54 = vld [vmem:[#allocation7 + $0x15f0] sm:$0xff] }
 0x899   : > { %10370 = vmatprep.subr.bf16.mxu0 %v10369_v25  ;;  %10466 = vmatprep.subr.bf16.mxu1 %v10465_v55  ;;  %v5054_v16 = vld [vmem:[#allocation7 + $0x14a8] sm:$0xff]  ;;  %v10383_v25 = vpack.c.bf16 %v5045_v1, %v5041_v0  ;;  %v10479_v55 = vpack.c.bf16 %v5047_v14, %v5043_v51  ;;  %v5076_v0 = vld [vmem:[#allocation7 + $0x1558] sm:$0xff]  ;;  %v5073_v51 = vld [vmem:[#allocation7 + $0x1540] sm:$0xff] }
 0x89a   : > { %v10385_v28 = vpack.c.bf16 %v5054_v16, %v5050_v15  ;;  %v5080_v1 = vld [vmem:[#allocation7 + $0x1578] sm:$0xff]  ;;  %v5077_v14 = vld [vmem:[#allocation7 + $0x1560] sm:$0xff] }
 0x89b   : > { %v10493_v16 = vpack.c.bf16 %v5080_v1, %v5076_v0  ;;  %v5099_v0 = vld [vmem:[#allocation7 + $0x1610] sm:$0xff] }
 0x89c   : > { %10372 = vmatpush1.bf16.msra.mxu0 %v10371_v37  ;;  %10468 = vmatpush1.bf16.msra.mxu1 %v10467_v38  ;;  %v5058_v37 = vld [vmem:[#allocation7 + $0x14c8] sm:$0xff]  ;;  %v5103_v1 = vld [vmem:[#allocation7 + $0x1630] sm:$0xff] }
 0x89d   : > { %10374 = vmatprep.subr.bf16.mxu0 %v10373_v26  ;;  %10470 = vmatprep.subr.bf16.mxu1 %v10469_v39  ;;  %v5062_v38 = vld [vmem:[#allocation7 + $0x14e8] sm:$0xff]  ;;  %v10387_v26 = vpack.c.bf16 %v5053_v27, %v5049_v22  ;;  %v10483_v39 = vpack.c.bf16 %v5055_v36, %v5051_v30  ;;  %v5084_v22 = vld [vmem:[#allocation7 + $0x1598] sm:$0xff]  ;;  %v5081_v30 = vld [vmem:[#allocation7 + $0x1580] sm:$0xff] }
 0x89e   : > { %v10389_v41 = vpack.c.bf16 %v5062_v38, %v5058_v37  ;;  %v5088_v27 = vld [vmem:[#allocation7 + $0x15b8] sm:$0xff]  ;;  %v5085_v36 = vld [vmem:[#allocation7 + $0x15a0] sm:$0xff] }
 0x89f   : > { %v10497_v38 = vpack.c.bf16 %v5088_v27, %v5084_v22 }
 0x8a0   : > { %10376 = vmatpush1.bf16.msra.mxu0 %v10375_v42  ;;  %10472 = vmatpush1.bf16.msra.mxu1 %v10471_v11  ;;  %v5066_v42 = vld [vmem:[#allocation7 + $0x1508] sm:$0xff] }
 0x8a1   : > { %10378 = vmatprep.subr.bf16.mxu0 %v10377_v33  ;;  %10474 = vmatprep.subr.bf16.mxu1 %v10473_v20  ;;  %v5070_v11 = vld [vmem:[#allocation7 + $0x1528] sm:$0xff]  ;;  %v10391_v33 = vpack.c.bf16 %v5061_v34, %v5057_v40  ;;  %v10487_v20 = vpack.c.bf16 %v5063_v8, %v5059_v48  ;;  %v5092_v40 = vld [vmem:[#allocation7 + $0x15d8] sm:$0xff]  ;;  %v5089_v48 = vld [vmem:[#allocation7 + $0x15c0] sm:$0xff] }
 0x8a2   : > { %v10393_v58 = vpack.c.bf16 %v5070_v11, %v5066_v42  ;;  %v5096_v34 = vld [vmem:[#allocation7 + $0x15f8] sm:$0xff]  ;;  %v5093_v11 = vld [vmem:[#allocation7 + $0x15e0] sm:$0xff] }
 0x8a3   : > { %v10501_v42 = vpack.c.bf16 %v5096_v34, %v5092_v40  ;;  %v5113_v40 = vld [vmem:[#allocation7 + $0x1680] sm:$0xff] }
 0x8a4   : > { %10380 = vmatpush1.bf16.msra.mxu0 %v10379_v13  ;;  %10476 = vmatpush1.bf16.msra.mxu1 %v10475_v62  ;;  %v5074_v13 = vld [vmem:[#allocation7 + $0x1548] sm:$0xff]  ;;  %v5117_v34 = vld [vmem:[#allocation7 + $0x16a0] sm:$0xff] }
 0x8a5   : > { %10382 = vmatprep.subr.bf16.mxu0 %v10381_v7  ;;  %10478 = vmatprep.subr.bf16.mxu1 %v10477_v9  ;;  %v5078_v62 = vld [vmem:[#allocation7 + $0x1568] sm:$0xff]  ;;  %v10395_v7 = vpack.c.bf16 %v5069_v57, %v5065_v56  ;;  %v10491_v9 = vpack.c.bf16 %v5071_v17, %v5067_v52  ;;  %v5104_v52 = vld [vmem:[#allocation7 + $0x1638] sm:$0xff] }
 0x8a6   : > { %v10397_v15 = vpack.c.bf16 %v5078_v62, %v5074_v13  ;;  %v5098_v56 = vld [vmem:[#allocation7 + $0x1608] sm:$0xff]  ;;  %v5097_v13 = vld [vmem:[#allocation7 + $0x1600] sm:$0xff] }
 0x8a7   : > { %v5102_v57 = vld [vmem:[#allocation7 + $0x1628] sm:$0xff]  ;;  %v5101_v62 = vld [vmem:[#allocation7 + $0x1620] sm:$0xff] }
 0x8a8   : > { %10384 = vmatpush1.bf16.msra.mxu0 %v10383_v25  ;;  %10480 = vmatpush1.bf16.msra.mxu1 %v10479_v55  ;;  %v5082_v25 = vld [vmem:[#allocation7 + $0x1588] sm:$0xff] }
 0x8a9   : > { %10386 = vmatprep.subr.bf16.mxu0 %v10385_v28  ;;  %10482 = vmatprep.subr.bf16.mxu1 %v10481_v29  ;;  %v5086_v55 = vld [vmem:[#allocation7 + $0x15a8] sm:$0xff]  ;;  %v10399_v28 = vpack.c.bf16 %v5077_v14, %v5073_v51  ;;  %v10495_v29 = vpack.c.bf16 %v5079_v23, %v5075_v21  ;;  %v5108_v51 = vld [vmem:[#allocation7 + $0x1658] sm:$0xff]  ;;  %v10507_v21 = vpack.c.bf16 %v5103_v1, %v5099_v0  ;;  %v5105_v23 = vld [vmem:[#allocation7 + $0x1640] sm:$0xff] }
 0x8aa   : > { %v10401_v37 = vpack.c.bf16 %v5086_v55, %v5082_v25  ;;  %v5112_v14 = vld [vmem:[#allocation7 + $0x1678] sm:$0xff]  ;;  %v5109_v25 = vld [vmem:[#allocation7 + $0x1660] sm:$0xff] }
 0x8ab   : > { %v5132_v0 = vld [vmem:[#allocation7 + $0x1718] sm:$0xff] }
 0x8ac   : > { %10388 = vmatpush1.bf16.msra.mxu0 %v10387_v26  ;;  %10484 = vmatpush1.bf16.msra.mxu1 %v10483_v39  ;;  %v5090_v26 = vld [vmem:[#allocation7 + $0x15c8] sm:$0xff]  ;;  %v5136_v1 = vld [vmem:[#allocation7 + $0x1738] sm:$0xff] }
 0x8ad   : > { %10390 = vmatprep.subr.bf16.mxu0 %v10389_v41  ;;  %10486 = vmatprep.subr.bf16.mxu1 %v10485_v47  ;;  %v5094_v39 = vld [vmem:[#allocation7 + $0x15e8] sm:$0xff]  ;;  %v10403_v41 = vpack.c.bf16 %v5085_v36, %v5081_v30  ;;  %v10499_v47 = vpack.c.bf16 %v5087_v35, %v5083_v10  ;;  %v5111_v30 = vld [vmem:[#allocation7 + $0x1670] sm:$0xff]  ;;  %v5116_v10 = vld [vmem:[#allocation7 + $0x1698] sm:$0xff] }
 0x8ae   : > { %v10405_v8 = vpack.c.bf16 %v5094_v39, %v5090_v26  ;;  %v5114_v36 = vld [vmem:[#allocation7 + $0x1688] sm:$0xff]  ;;  %v5120_v35 = vld [vmem:[#allocation7 + $0x16b8] sm:$0xff]  ;;  %v10415_v26 = vpack.c.bf16 %v5109_v25, %v5105_v23  ;;  %v5135_v23 = vld [vmem:[#allocation7 + $0x1730] sm:$0xff] }
 0x8af   : > { %v5138_v25 = vld [vmem:[#allocation7 + $0x1748] sm:$0xff] }
 0x8b0   : > { %10392 = vmatpush1.bf16.msra.mxu0 %v10391_v33  ;;  %10488 = vmatpush1.bf16.msra.mxu1 %v10487_v20  ;;  %v10407_v33 = vpack.c.bf16 %v5093_v11, %v5089_v48  ;;  %v10503_v20 = vpack.c.bf16 %v5095_v54, %v5091_v53  ;;  %v5115_v48 = vld [vmem:[#allocation7 + $0x1690] sm:$0xff]  ;;  %v5126_v11 = vld [vmem:[#allocation7 + $0x16e8] sm:$0xff]  ;;  %v5124_v53 = vld [vmem:[#allocation7 + $0x16d8] sm:$0xff] }
 0x8b1   : > { %10394 = vmatprep.subr.bf16.mxu0 %v10393_v58  ;;  %10490 = vmatprep.subr.bf16.mxu1 %v10489_v60  ;;  %v5100_v58 = vld [vmem:[#allocation7 + $0x1618] sm:$0xff]  ;;  %v10409_v60 = vpack.c.bf16 %v5102_v57, %v5098_v56  ;;  %v5121_v56 = vld [vmem:[#allocation7 + $0x16c0] sm:$0xff] }
 0x8b2   : > { %v10505_v17 = vpack.c.bf16 %v5104_v52, %v5100_v58  ;;  %v5128_v54 = vld [vmem:[#allocation7 + $0x16f8] sm:$0xff]  ;;  %v5125_v57 = vld [vmem:[#allocation7 + $0x16e0] sm:$0xff]  ;;  %v5123_v52 = vld [vmem:[#allocation7 + $0x16d0] sm:$0xff] }
 0x8b4   : > { %10396 = vmatpush1.bf16.msra.mxu0 %v10395_v7  ;;  %10492 = vmatpush1.bf16.msra.mxu1 %v10491_v9  ;;  %v5106_v7 = vld [vmem:[#allocation7 + $0x1648] sm:$0xff] }
 0x8b5   : > { %10398 = vmatprep.subr.bf16.mxu0 %v10397_v15  ;;  %10494 = vmatprep.subr.bf16.mxu1 %v10493_v16  ;;  %v5110_v9 = vld [vmem:[#allocation7 + $0x1668] sm:$0xff]  ;;  %v10411_v16 = vpack.c.bf16 %v5101_v62, %v5097_v13 }
 0x8b6   : > { %v10413_v27 = vpack.c.bf16 %v5110_v9, %v5106_v7  ;;  %v5130_v13 = vld [vmem:[#allocation7 + $0x1708] sm:$0xff]  ;;  %v10423_v7 = vpack.c.bf16 %v5125_v57, %v5121_v56  ;;  %v5156_v57 = vld [vmem:[#allocation7 + $0x17d8] sm:$0xff] }
 0x8b7   : > { %v5134_v62 = vld [vmem:[#allocation7 + $0x1728] sm:$0xff] }
 0x8b8   : > { %10400 = vmatpush1.bf16.msra.mxu0 %v10399_v28  ;;  %10496 = vmatpush1.bf16.msra.mxu1 %v10495_v29  ;;  %v10509_v28 = vpack.c.bf16 %v5112_v14, %v5108_v51  ;;  %v5107_v29 = vld [vmem:[#allocation7 + $0x1650] sm:$0xff]  ;;  %v5129_v51 = vld [vmem:[#allocation7 + $0x1700] sm:$0xff]  ;;  %v5158_v56 = vld [vmem:[#allocation7 + $0x17e8] sm:$0xff] }
 0x8b9   : > { %10402 = vmatprep.subr.bf16.mxu0 %v10401_v37  ;;  %10498 = vmatprep.subr.bf16.mxu1 %v10497_v38  ;;  %v5118_v38 = vld [vmem:[#allocation7 + $0x16a8] sm:$0xff]  ;;  %v10511_v39 = vpack.c.bf16 %v5111_v30, %v5107_v29  ;;  %v5133_v14 = vld [vmem:[#allocation7 + $0x1720] sm:$0xff] }
 0x8ba   : > { %v10427_v29 = vpack.c.bf16 %v5133_v14, %v5129_v51  ;;  %v5594_v14 = vld [vmem:[#allocation7 + $0x1808] sm:$0xff] }
 0x8bc   : > { %10404 = vmatpush1.bf16.msra.mxu0 %v10403_v41  ;;  %10500 = vmatpush1.bf16.msra.mxu1 %v10499_v47  ;;  %v10417_v41 = vpack.c.bf16 %v5118_v38, %v5114_v36  ;;  %v10513_v47 = vpack.c.bf16 %v5120_v35, %v5116_v10  ;;  %v5137_v36 = vld [vmem:[#allocation7 + $0x1740] sm:$0xff]  ;;  %v5139_v35 = vld [vmem:[#allocation7 + $0x1750] sm:$0xff] }
 0x8bd   : > { %10406 = vmatprep.subr.bf16.mxu0 %v10405_v8  ;;  %10502 = vmatprep.subr.bf16.mxu1 %v10501_v42  ;;  %v5119_v8 = vld [vmem:[#allocation7 + $0x16b0] sm:$0xff]  ;;  %v5122_v42 = vld [vmem:[#allocation7 + $0x16c8] sm:$0xff] }
 0x8be   : > { %v10421_v58 = vpack.c.bf16 %v5126_v11, %v5122_v42  ;;  %v5149_v42 = vld [vmem:[#allocation7 + $0x17a0] sm:$0xff] }
 0x8c0   : > { %10408 = vmatpush1.bf16.msra.mxu0 %v10407_v33  ;;  %10504 = vmatpush1.bf16.msra.mxu1 %v10503_v20  ;;  %v10419_v33 = vpack.c.bf16 %v5117_v34, %v5113_v40  ;;  %v10515_v20 = vpack.c.bf16 %v5119_v8, %v5115_v48  ;;  %v5150_v40 = vld [vmem:[#allocation7 + $0x17a8] sm:$0xff]  ;;  %v5148_v34 = vld [vmem:[#allocation7 + $0x1798] sm:$0xff]  ;;  %v5145_v8 = vld [vmem:[#allocation7 + $0x1780] sm:$0xff] }
 0x8c1   : > { %10410 = vmatprep.subr.bf16.mxu0 %v10409_v60  ;;  %10506 = vmatprep.subr.bf16.mxu1 %v10505_v17  ;;  %v10517_v60 = vpack.c.bf16 %v5128_v54, %v5124_v53  ;;  %v5127_v17 = vld [vmem:[#allocation7 + $0x16f0] sm:$0xff] }
 0x8c2   : > { %v10519_v9 = vpack.c.bf16 %v5127_v17, %v5123_v52  ;;  %v5147_v54 = vld [vmem:[#allocation7 + $0x1790] sm:$0xff]  ;;  %v5153_v17 = vld [vmem:[#allocation7 + $0x17c0] sm:$0xff] }
 0x956   : > { %v4893_v15 = vpop.f32.mrb[26].mxu0  ;;  %v12961_v55 = vpop.f32.mrb[50].mxu1 }
 0x957   : > { %v4895_v22 = vpop.f32.mrb[27].mxu0  ;;  %v9520_v37 = vpop.f32.mrb[51].mxu1 }
 0x958   : > { %5225 = vmatprep.mubr.f32.mxu0 %v4895_v22  ;;  %5367 = vmatprep.mubr.f32.mxu1 %v4895_v22  ;;  %v5142_v22 = vld [vmem:[#allocation7 + $0x1768] sm:$0xff]  ;;  %v5141_v37 = vld [vmem:[#allocation7 + $0x1760] sm:$0xff] }
 0x959   : > { %5226 = vmatmul.mubr.f32.vlgmr.msra.gmra.mrb[22].mxu0 %v4893_v15  ;;  %5368 = vmatmul.mubr.f32.vlgmr.msra.gmra.mrb[46].mxu1 %v4893_v15  ;;  %v10425_v15 = vpack.c.bf16 %v5134_v62, %v5130_v13  ;;  %v10429_v38 = vpack.c.bf16 %v5142_v22, %v5138_v25  ;;  %v5597_v25 = vld [vmem:[#allocation7 + $0x1820] sm:$0xff]  ;;  %v5595_v22 = vld [vmem:[#allocation7 + $0x1810] sm:$0xff] }
 0x95a   : > { %10412 = vmatpush1.bf16.msra.mxu0 %v10411_v16  ;;  %10508 = vmatpush1.bf16.msra.mxu1 %v10507_v21  ;;  %v10521_v16 = vpack.c.bf16 %v5136_v1, %v5132_v0  ;;  %v5131_v21 = vld [vmem:[#allocation7 + $0x1710] sm:$0xff]  ;;  %v5157_v0 = vld [vmem:[#allocation7 + $0x17e0] sm:$0xff] }
 0x95b   : > { %10414 = vmatprep.subr.bf16.mxu0 %v10413_v27  ;;  %10510 = vmatprep.subr.bf16.mxu1 %v10509_v28  ;;  %v5140_v27 = vld [vmem:[#allocation7 + $0x1758] sm:$0xff]  ;;  %v10523_v30 = vpack.c.bf16 %v5135_v23, %v5131_v21  ;;  %v5155_v1 = vld [vmem:[#allocation7 + $0x17d0] sm:$0xff]  ;;  %v5593_v23 = vld [vmem:[#allocation7 + $0x1800] sm:$0xff] }
 0x95c   : > { %5296 = vmatprep.mubr.f32.mxu0 %v12196_v3  ;;  %5438 = vmatprep.mubr.f32.mxu1 %v12196_v3  ;;  %v5144_v28 = vld [vmem:[#allocation7 + $0x1778] sm:$0xff] }
 0x95d   : > { %v10525_v10 = vpack.c.bf16 %v5144_v28, %v5140_v27  ;;  %v5600_v21 = vld [vmem:[#allocation7 + $0x1838] sm:$0xff]  ;;  %v5599_v27 = vld [vmem:[#allocation7 + $0x1830] sm:$0xff]  ;;  %v5602_v28 = vld [vmem:[#allocation7 + $0x1848] sm:$0xff] }
 0x95e   : > { %10416 = vmatpush1.bf16.msra.mxu0 %v10415_v26  ;;  %10512 = vmatpush1.bf16.msra.mxu1 %v10511_v39  ;;  %v5143_v26 = vld [vmem:[#allocation7 + $0x1770] sm:$0xff]  ;;  %v5146_v39 = vld [vmem:[#allocation7 + $0x1788] sm:$0xff] }
 0x95f   : > { %10418 = vmatprep.subr.bf16.mxu0 %v10417_v41  ;;  %10514 = vmatprep.subr.bf16.mxu1 %v10513_v47  ;;  %v5152_v41 = vld [vmem:[#allocation7 + $0x17b8] sm:$0xff]  ;;  %v10431_v47 = vpack.c.bf16 %v5141_v37, %v5137_v36  ;;  %v10527_v48 = vpack.c.bf16 %v5143_v26, %v5139_v35  ;;  %v10433_v11 = vpack.c.bf16 %v5150_v40, %v5146_v39  ;;  %v5606_v36 = vld [vmem:[#allocation7 + $0x1868] sm:$0xff]  ;;  %v5605_v35 = vld [vmem:[#allocation7 + $0x1860] sm:$0xff] }
 0x960   : > { %v10529_v53 = vpack.c.bf16 %v5152_v41, %v5148_v34  ;;  %v5604_v37 = vld [vmem:[#allocation7 + $0x1858] sm:$0xff]  ;;  %v10551_v26 = vpack.c.bf16 %v5606_v36, %v5602_v28  ;;  %v5607_v40 = vld [vmem:[#allocation7 + $0x1870] sm:$0xff]  ;;  %v5610_v34 = vld [vmem:[#allocation7 + $0x1888] sm:$0xff] }
 0x961   : > { %v5612_v41 = vld [vmem:[#allocation7 + $0x1898] sm:$0xff]  ;;  %v5634_v28 = vld [vmem:[#allocation7 + $0x1948] sm:$0xff] }
 0x962   : > { %10420 = vmatpush1.bf16.msra.mxu0 %v10419_v33  ;;  %10516 = vmatpush1.bf16.msra.mxu1 %v10515_v20  ;;  %v5151_v33 = vld [vmem:[#allocation7 + $0x17b0] sm:$0xff]  ;;  %v5154_v20 = vld [vmem:[#allocation7 + $0x17c8] sm:$0xff]  ;;  %v5640_v36 = vld [vmem:[#allocation7 + $0x1978] sm:$0xff] }
 0x963   : > { %10422 = vmatprep.subr.bf16.mxu0 %v10421_v58  ;;  %10518 = vmatprep.subr.bf16.mxu1 %v10517_v60  ;;  %v5160_v58 = vld [vmem:[#allocation7 + $0x17f8] sm:$0xff]  ;;  %v10435_v60 = vpack.c.bf16 %v5149_v42, %v5145_v8  ;;  %v10531_v52 = vpack.c.bf16 %v5151_v33, %v5147_v54  ;;  %v10437_v13 = vpack.c.bf16 %v5158_v56, %v5154_v20  ;;  %v5613_v8 = vld [vmem:[#allocation7 + $0x18a0] sm:$0xff]  ;;  %v5615_v54 = vld [vmem:[#allocation7 + $0x18b0] sm:$0xff] }
 0x964   : > { %v10533_v62 = vpack.c.bf16 %v5160_v58, %v5156_v57  ;;  %v5618_v33 = vld [vmem:[#allocation7 + $0x18c8] sm:$0xff]  ;;  %v5620_v56 = vld [vmem:[#allocation7 + $0x18d8] sm:$0xff] }
 0x965   : > { %v5622_v20 = vld [vmem:[#allocation7 + $0x18e8] sm:$0xff]  ;;  %v5624_v57 = vld [vmem:[#allocation7 + $0x18f8] sm:$0xff] }
 0x966   : > { %10424 = vmatpush1.bf16.msra.mxu0 %v10423_v7  ;;  %10520 = vmatpush1.bf16.msra.mxu1 %v10519_v9  ;;  %v5159_v7 = vld [vmem:[#allocation7 + $0x17f0] sm:$0xff]  ;;  %v10439_v9 = vpack.c.bf16 %v5157_v0, %v5153_v17  ;;  %v10559_v17 = vpack.c.bf16 %v5622_v20, %v5618_v33  ;;  %v5652_v33 = vld [vmem:[#allocation7 + $0x19d8] sm:$0xff] }
 0x967   : > { %10426 = vmatprep.subr.bf16.mxu0 %v10425_v15  ;;  %10522 = vmatprep.subr.bf16.mxu1 %v10521_v16  ;;  %v10535_v51 = vpack.c.bf16 %v5159_v7, %v5155_v1  ;;  %v5598_v15 = vld [vmem:[#allocation7 + $0x1828] sm:$0xff]  ;;  %v5596_v16 = vld [vmem:[#allocation7 + $0x1818] sm:$0xff]  ;;  %v5623_v0 = vld [vmem:[#allocation7 + $0x18f0] sm:$0xff] }
 0x968   : > { %v5626_v1 = vld [vmem:[#allocation7 + $0x1908] sm:$0xff]  ;;  %v5656_v20 = vld [vmem:[#allocation7 + $0x19f8] sm:$0xff] }
 0x969   : > { %v5630_v7 = vld [vmem:[#allocation7 + $0x1928] sm:$0xff] }
 0x96a   : > { %10428 = vmatpush1.bf16.msra.mxu0 %v10427_v29  ;;  %10524 = vmatpush1.bf16.msra.mxu1 %v10523_v30  ;;  %v10547_v29 = vpack.c.bf16 %v5598_v15, %v5594_v14  ;;  %v10643_v30 = vpack.c.bf16 %v5600_v21, %v5596_v16  ;;  %v5625_v16 = vld [vmem:[#allocation7 + $0x1900] sm:$0xff] }
 0x96b   : > { %10430 = vmatprep.subr.bf16.mxu0 %v10429_v38  ;;  %10526 = vmatprep.subr.bf16.mxu1 %v10525_v10  ;;  %v5608_v38 = vld [vmem:[#allocation7 + $0x1878] sm:$0xff]  ;;  %v5601_v10 = vld [vmem:[#allocation7 + $0x1840] sm:$0xff] }
 0x96c   : > { %v10647_v39 = vpack.c.bf16 %v5608_v38, %v5604_v37  ;;  %v5629_v21 = vld [vmem:[#allocation7 + $0x1920] sm:$0xff] }
 0x96d   : > { %v10565_v37 = vpack.c.bf16 %v5629_v21, %v5625_v16 }
 0x96e   : > { %10432 = vmatpush1.bf16.msra.mxu0 %v10431_v47  ;;  %10528 = vmatpush1.bf16.msra.mxu1 %v10527_v48  ;;  %v5609_v48 = vld [vmem:[#allocation7 + $0x1880] sm:$0xff] }
 0x96f   : > { %10434 = vmatprep.subr.bf16.mxu0 %v10433_v11  ;;  %10530 = vmatprep.subr.bf16.mxu1 %v10529_v53  ;;  %v10651_v11 = vpack.c.bf16 %v5616_v19, %v5612_v41  ;;  %v5611_v53 = vld [vmem:[#allocation7 + $0x1890] sm:$0xff]  ;;  %v10557_v58 = vpack.c.bf16 %v5613_v8, %v5609_v48 }
 0x972   : > { %10436 = vmatpush1.bf16.msra.mxu0 %v10435_v60  ;;  %10532 = vmatpush1.bf16.msra.mxu1 %v10531_v52  ;;  %v5617_v60 = vld [vmem:[#allocation7 + $0x18c0] sm:$0xff] }
 0x973   : > { %10438 = vmatprep.subr.bf16.mxu0 %v10437_v13  ;;  %10534 = vmatprep.subr.bf16.mxu1 %v10533_v62  ;;  %v5621_v52 = vld [vmem:[#allocation7 + $0x18e0] sm:$0xff]  ;;  %v10655_v13 = vpack.c.bf16 %v5624_v57, %v5620_v56  ;;  %v5619_v62 = vld [vmem:[#allocation7 + $0x18d0] sm:$0xff] }
 0x974   : > { %v10561_v14 = vpack.c.bf16 %v5621_v52, %v5617_v60  ;;  %v10657_v15 = vpack.c.bf16 %v5623_v0, %v5619_v62  ;;  %v10671_v52 = vpack.c.bf16 %v5656_v20, %v5652_v33  ;;  %v5658_v62 = vld [vmem:[#allocation7 + $0x1a08] sm:$0xff] }
 0x975   : > { %v5662_v0 = vld [vmem:[#allocation7 + $0x1a28] sm:$0xff] }
 0x976   : > { %10440 = vmatpush1.bf16.msra.mxu0 %v10439_v9  ;;  %10536 = vmatpush1.bf16.msra.mxu1 %v10535_v51  ;;  %v5628_v9 = vld [vmem:[#allocation7 + $0x1918] sm:$0xff]  ;;  %v10579_v16 = vpack.c.bf16 %v5662_v0, %v5658_v62 }
 0x977   : > { %10539 = vmatprep.subr.msk.bf16.mxu0 %vm12488_vm4, %v12867_v49  ;;  %10543 = vmatprep.subr.bf16.mxu1 %v12194_v2  ;;  %v10549_v2 = vpack.c.bf16 %v5597_v25, %v5593_v23  ;;  %v10645_v49 = vpack.c.bf16 %v5599_v27, %v5595_v22  ;;  %v5632_v51 = vld [vmem:[#allocation7 + $0x1938] sm:$0xff]  ;;  %v10563_v23 = vpack.c.bf16 %v5630_v7, %v5626_v1  ;;  %v5627_v22 = vld [vmem:[#allocation7 + $0x1910] sm:$0xff] }
 0x978   : > { %v10659_v25 = vpack.c.bf16 %v5632_v51, %v5628_v9  ;;  %v5631_v27 = vld [vmem:[#allocation7 + $0x1930] sm:$0xff]  ;;  %v5660_v1 = vld [vmem:[#allocation7 + $0x1a18] sm:$0xff] }
 0x979   : > { %5297 = vmatmul.mubr.f32.vlgmr.msra.gmra.mrb[22].mxu0 %v12961_v55  ;;  %5439 = vmatmul.mubr.f32.vlgmr.msra.gmra.mrb[46].mxu1 %v12961_v55  ;;  %v5603_v55 = vld [vmem:[#allocation7 + $0x1850] sm:$0xff]  ;;  %v10661_v38 = vpack.c.bf16 %v5631_v27, %v5627_v22  ;;  %v5664_v7 = vld [vmem:[#allocation7 + $0x1a38] sm:$0xff]  ;;  %v5666_v22 = vld [vmem:[#allocation7 + $0x1a48] sm:$0xff] }
 0x97a   : > { %10542 = vmatpush1.bf16.msk.msra.mxu0 %vm12488_vm4, %v12865_v63  ;;  %10546 = vmatpush3.bf16.msk.msra.mxu1 %vm12488_vm4, %v12875_v18  ;;  %v5614_v63 = vld [vmem:[#allocation7 + $0x18a8] sm:$0xff]  ;;  %v10553_v18 = vpack.c.bf16 %v5605_v35, %v5601_v10  ;;  %v10649_v47 = vpack.c.bf16 %v5607_v40, %v5603_v55  ;;  %v10675_v21 = vpack.c.bf16 %v5664_v7, %v5660_v1  ;;  %v5692_v62 = vld [vmem:[#allocation7 + $0x1b18] sm:$0xff] }
 0x97b   : > { %5515 = vmatprep.mubr.f32.mxu0 %v12196_v3  ;;  %9525 = vmatprep.mubr.msk.f32.mxu1 %vm12195_vm0, %v12196_v3  ;;  %v10555_v42 = vpack.c.bf16 %v5614_v63, %v5610_v34  ;;  %v5642_v55 = vld [vmem:[#allocation7 + $0x1988] sm:$0xff]  ;;  %v5644_v34 = vld [vmem:[#allocation7 + $0x1998] sm:$0xff] }
 0x97c   : > { %10548 = vmatprep.subr.bf16.mxu0 %v10547_v29  ;;  %10644 = vmatprep.subr.bf16.mxu1 %v10643_v30  ;;  %v5638_v29 = vld [vmem:[#allocation7 + $0x1968] sm:$0xff]  ;;  %v5636_v30 = vld [vmem:[#allocation7 + $0x1958] sm:$0xff] }
 0x97d   : > { %9310 = vmatmul.mubr.msk.f32.vlgmr.msra.gmra.mrb[28].mxu0 %vm2952_vm3, %v12744_v61  ;;  %9526 = vmatmul.mubr.msk.f32.vlgmr.msra.gmra.mrb[52].mxu1 %vm2952_vm3, %v12744_v61  ;;  %v10653_v61 = vpack.c.bf16 %v5615_v54, %v5611_v53  ;;  %v10567_v10 = vpack.c.bf16 %v5638_v29, %v5634_v28  ;;  %v10663_v35 = vpack.c.bf16 %v5640_v36, %v5636_v30  ;;  %v5646_v40 = vld [vmem:[#allocation7 + $0x19a8] sm:$0xff]  ;;  %v5648_v63 = vld [vmem:[#allocation7 + $0x19b8] sm:$0xff] }
 0x97e   : > { %10550 = vmatpush1.bf16.msra.mxu0 %v10549_v2  ;;  %10646 = vmatpush1.bf16.msra.mxu1 %v10645_v49  ;;  %v5633_v2 = vld [vmem:[#allocation7 + $0x1940] sm:$0xff]  ;;  %v10571_v48 = vpack.c.bf16 %v5646_v40, %v5642_v55  ;;  %v10667_v8 = vpack.c.bf16 %v5648_v63, %v5644_v34  ;;  %v5650_v53 = vld [vmem:[#allocation7 + $0x19c8] sm:$0xff]  ;;  %v5668_v28 = vld [vmem:[#allocation7 + $0x1a58] sm:$0xff] }
 0x97f   : > { %10552 = vmatprep.subr.bf16.mxu0 %v10551_v26  ;;  %10648 = vmatprep.subr.bf16.mxu1 %v10647_v39  ;;  %v5637_v49 = vld [vmem:[#allocation7 + $0x1960] sm:$0xff]  ;;  %v5635_v26 = vld [vmem:[#allocation7 + $0x1950] sm:$0xff]  ;;  %v5654_v54 = vld [vmem:[#allocation7 + $0x19e8] sm:$0xff] }
 0x980   : > { %v5639_v39 = vld [vmem:[#allocation7 + $0x1970] sm:$0xff]  ;;  %v10569_v41 = vpack.c.bf16 %v5637_v49, %v5633_v2  ;;  %v10575_v60 = vpack.c.bf16 %v5654_v54, %v5650_v53  ;;  %v5670_v27 = vld [vmem:[#allocation7 + $0x1a68] sm:$0xff]  ;;  %v5672_v29 = vld [vmem:[#allocation7 + $0x1a78] sm:$0xff] }
 0x981   : > { %v10665_v19 = vpack.c.bf16 %v5639_v39, %v5635_v26  ;;  %v10583_v2 = vpack.c.bf16 %v5670_v27, %v5666_v22  ;;  %v10679_v49 = vpack.c.bf16 %v5672_v29, %v5668_v28  ;;  %v5674_v26 = vld [vmem:[#allocation7 + $0x1a88] sm:$0xff]  ;;  %v5676_v55 = vld [vmem:[#allocation7 + $0x1a98] sm:$0xff] }
 0x982   : > { %10554 = vmatpush1.bf16.msra.mxu0 %v10553_v18  ;;  %10650 = vmatpush1.bf16.msra.mxu1 %v10649_v47  ;;  %v5641_v18 = vld [vmem:[#allocation7 + $0x1980] sm:$0xff]  ;;  %v5678_v39 = vld [vmem:[#allocation7 + $0x1aa8] sm:$0xff]  ;;  %v5680_v40 = vld [vmem:[#allocation7 + $0x1ab8] sm:$0xff] }
 0x983   : > { %10556 = vmatprep.subr.bf16.mxu0 %v10555_v42  ;;  %10652 = vmatprep.subr.bf16.mxu1 %v10651_v11  ;;  %v5645_v47 = vld [vmem:[#allocation7 + $0x19a0] sm:$0xff]  ;;  %v5643_v42 = vld [vmem:[#allocation7 + $0x1990] sm:$0xff]  ;;  %v5684_v53 = vld [vmem:[#allocation7 + $0x1ad8] sm:$0xff] }
 0x984   : > { %v5647_v11 = vld [vmem:[#allocation7 + $0x19b0] sm:$0xff]  ;;  %v10573_v56 = vpack.c.bf16 %v5645_v47, %v5641_v18  ;;  %v10587_v18 = vpack.c.bf16 %v5678_v39, %v5674_v26  ;;  %v10683_v47 = vpack.c.bf16 %v5680_v40, %v5676_v55  ;;  %v5688_v54 = vld [vmem:[#allocation7 + $0x1af8] sm:$0xff] }
 0x985   : > { %v10669_v57 = vpack.c.bf16 %v5647_v11, %v5643_v42  ;;  %v5682_v42 = vld [vmem:[#allocation7 + $0x1ac8] sm:$0xff]  ;;  %v5696_v0 = vld [vmem:[#allocation7 + $0x1b38] sm:$0xff] }
 0x986   : > { %10558 = vmatpush1.bf16.msra.mxu0 %v10557_v58  ;;  %10654 = vmatpush1.bf16.msra.mxu1 %v10653_v61  ;;  %v5649_v58 = vld [vmem:[#allocation7 + $0x19c0] sm:$0xff]  ;;  %v5686_v11 = vld [vmem:[#allocation7 + $0x1ae8] sm:$0xff]  ;;  %v5700_v22 = vld [vmem:[#allocation7 + $0x1b58] sm:$0xff] }
 0x987   : > { %10560 = vmatprep.subr.bf16.mxu0 %v10559_v17  ;;  %10656 = vmatprep.subr.bf16.mxu1 %v10655_v13  ;;  %v5653_v61 = vld [vmem:[#allocation7 + $0x19e0] sm:$0xff]  ;;  %v5651_v17 = vld [vmem:[#allocation7 + $0x19d0] sm:$0xff]  ;;  %v5704_v27 = vld [vmem:[#allocation7 + $0x1b78] sm:$0xff] }
 0x988   : > { %v5655_v13 = vld [vmem:[#allocation7 + $0x19f0] sm:$0xff]  ;;  %v10577_v9 = vpack.c.bf16 %v5653_v61, %v5649_v58  ;;  %v10591_v58 = vpack.c.bf16 %v5686_v11, %v5682_v42  ;;  %v10687_v61 = vpack.c.bf16 %v5688_v54, %v5684_v53  ;;  %v5708_v26 = vld [vmem:[#allocation7 + $0x1b98] sm:$0xff] }
 0x989   : > { %v10673_v51 = vpack.c.bf16 %v5655_v13, %v5651_v17  ;;  %v5690_v17 = vld [vmem:[#allocation7 + $0x1b08] sm:$0xff]  ;;  %v5712_v39 = vld [vmem:[#allocation7 + $0x1bb8] sm:$0xff] }
 0x98a   : > { %10562 = vmatpush1.bf16.msra.mxu0 %v10561_v14  ;;  %10658 = vmatpush1.bf16.msra.mxu1 %v10657_v15  ;;  %v5657_v14 = vld [vmem:[#allocation7 + $0x1a00] sm:$0xff]  ;;  %v5694_v13 = vld [vmem:[#allocation7 + $0x1b28] sm:$0xff]  ;;  %v5716_v42 = vld [vmem:[#allocation7 + $0x1bd8] sm:$0xff] }
 0x98b   : > { %10564 = vmatprep.subr.bf16.mxu0 %v10563_v23  ;;  %10660 = vmatprep.subr.bf16.mxu1 %v10659_v25  ;;  %v5661_v15 = vld [vmem:[#allocation7 + $0x1a20] sm:$0xff]  ;;  %v5659_v23 = vld [vmem:[#allocation7 + $0x1a10] sm:$0xff]  ;;  %v5720_v11 = vld [vmem:[#allocation7 + $0x1bf8] sm:$0xff] }
 0x98c   : > { %v5663_v25 = vld [vmem:[#allocation7 + $0x1a30] sm:$0xff]  ;;  %v10581_v30 = vpack.c.bf16 %v5661_v15, %v5657_v14  ;;  %v10595_v14 = vpack.c.bf16 %v5694_v13, %v5690_v17  ;;  %v10691_v15 = vpack.c.bf16 %v5696_v0, %v5692_v62  ;;  %v5722_v17 = vld [vmem:[#allocation7 + $0x1c08] sm:$0xff]  ;;  %v5724_v62 = vld [vmem:[#allocation7 + $0x1c18] sm:$0xff] }
 0x98d   : > { %v10677_v36 = vpack.c.bf16 %v5663_v25, %v5659_v23  ;;  %v5698_v23 = vld [vmem:[#allocation7 + $0x1b48] sm:$0xff] }
 0x98e   : > { %10566 = vmatpush1.bf16.msra.mxu0 %v10565_v37  ;;  %10662 = vmatpush1.bf16.msra.mxu1 %v10661_v38  ;;  %v5665_v37 = vld [vmem:[#allocation7 + $0x1a40] sm:$0xff]  ;;  %v5702_v25 = vld [vmem:[#allocation7 + $0x1b68] sm:$0xff] }
 0x98f   : > { %10568 = vmatprep.subr.bf16.mxu0 %v10567_v10  ;;  %10664 = vmatprep.subr.bf16.mxu1 %v10663_v35  ;;  %v5669_v38 = vld [vmem:[#allocation7 + $0x1a60] sm:$0xff]  ;;  %v5667_v10 = vld [vmem:[#allocation7 + $0x1a50] sm:$0xff]  ;;  %v5726_v13 = vld [vmem:[#allocation7 + $0x1c28] sm:$0xff] }
 0x990   : > { %v5671_v35 = vld [vmem:[#allocation7 + $0x1a70] sm:$0xff]  ;;  %v10585_v34 = vpack.c.bf16 %v5669_v38, %v5665_v37  ;;  %v10599_v37 = vpack.c.bf16 %v5702_v25, %v5698_v23  ;;  %v10695_v38 = vpack.c.bf16 %v5704_v27, %v5700_v22  ;;  %v10611_v0 = vpack.c.bf16 %v5726_v13, %v5722_v17  ;;  %v5732_v23 = vld [vmem:[#allocation7 + $0x1c58] sm:$0xff]  ;;  %v5754_v17 = vld [vmem:[#allocation7 + $0x1d08] sm:$0xff] }
 0x991   : > { %v10681_v63 = vpack.c.bf16 %v5671_v35, %v5667_v10  ;;  %v5706_v10 = vld [vmem:[#allocation7 + $0x1b88] sm:$0xff]  ;;  %v5736_v25 = vld [vmem:[#allocation7 + $0x1c78] sm:$0xff] }
 0x992   : > { %10570 = vmatpush1.bf16.msra.mxu0 %v10569_v41  ;;  %10666 = vmatpush1.bf16.msra.mxu1 %v10665_v19  ;;  %v5673_v41 = vld [vmem:[#allocation7 + $0x1a80] sm:$0xff]  ;;  %v5710_v35 = vld [vmem:[#allocation7 + $0x1ba8] sm:$0xff] }
 0x993   : > { %10572 = vmatprep.subr.bf16.mxu0 %v10571_v48  ;;  %10668 = vmatprep.subr.bf16.mxu1 %v10667_v8  ;;  %v5677_v19 = vld [vmem:[#allocation7 + $0x1aa0] sm:$0xff]  ;;  %v5675_v48 = vld [vmem:[#allocation7 + $0x1a90] sm:$0xff]  ;;  %v5758_v13 = vld [vmem:[#allocation7 + $0x1d28] sm:$0xff] }
 0x994   : > { %v5679_v8 = vld [vmem:[#allocation7 + $0x1ab0] sm:$0xff]  ;;  %v10589_v33 = vpack.c.bf16 %v5677_v19, %v5673_v41  ;;  %v10603_v41 = vpack.c.bf16 %v5710_v35, %v5706_v10  ;;  %v10699_v19 = vpack.c.bf16 %v5712_v39, %v5708_v26  ;;  %v5738_v35 = vld [vmem:[#allocation7 + $0x1c88] sm:$0xff] }
 0x995   : > { %v10685_v20 = vpack.c.bf16 %v5679_v8, %v5675_v48  ;;  %v5714_v48 = vld [vmem:[#allocation7 + $0x1bc8] sm:$0xff]  ;;  %v5735_v10 = vld [vmem:[#allocation7 + $0x1c70] sm:$0xff] }
 0x996   : > { %10574 = vmatpush1.bf16.msra.mxu0 %v10573_v56  ;;  %10670 = vmatpush1.bf16.msra.mxu1 %v10669_v57  ;;  %v5681_v56 = vld [vmem:[#allocation7 + $0x1ac0] sm:$0xff]  ;;  %v5718_v8 = vld [vmem:[#allocation7 + $0x1be8] sm:$0xff] }
 0x997   : > { %10576 = vmatprep.subr.bf16.mxu0 %v10575_v60  ;;  %10672 = vmatprep.subr.bf16.mxu1 %v10671_v52  ;;  %v5685_v57 = vld [vmem:[#allocation7 + $0x1ae0] sm:$0xff]  ;;  %v5683_v60 = vld [vmem:[#allocation7 + $0x1ad0] sm:$0xff]  ;;  %v5742_v39 = vld [vmem:[#allocation7 + $0x1ca8] sm:$0xff] }
 0x998   : > { %v5687_v52 = vld [vmem:[#allocation7 + $0x1af0] sm:$0xff]  ;;  %v10593_v1 = vpack.c.bf16 %v5685_v57, %v5681_v56  ;;  %v10703_v56 = vpack.c.bf16 %v5720_v11, %v5716_v42  ;;  %v5717_v57 = vld [vmem:[#allocation7 + $0x1be0] sm:$0xff]  ;;  %v5746_v42 = vld [vmem:[#allocation7 + $0x1cc8] sm:$0xff] }
 0x999   : > { %v10689_v7 = vpack.c.bf16 %v5687_v52, %v5683_v60  ;;  %v5750_v11 = vld [vmem:[#allocation7 + $0x1ce8] sm:$0xff] }
 0x99a   : > { %10578 = vmatpush1.bf16.msra.mxu0 %v10577_v9  ;;  %10674 = vmatpush1.bf16.msra.mxu1 %v10673_v51  ;;  %v5689_v9 = vld [vmem:[#allocation7 + $0x1b00] sm:$0xff] }
 0x99b   : > { %10580 = vmatprep.subr.bf16.mxu0 %v10579_v16  ;;  %10676 = vmatprep.subr.bf16.mxu1 %v10675_v21  ;;  %v5693_v51 = vld [vmem:[#allocation7 + $0x1b20] sm:$0xff]  ;;  %v5691_v16 = vld [vmem:[#allocation7 + $0x1b10] sm:$0xff] }
 0x99c   : > { %v5695_v21 = vld [vmem:[#allocation7 + $0x1b30] sm:$0xff]  ;;  %v10597_v28 = vpack.c.bf16 %v5693_v51, %v5689_v9  ;;  %v5721_v9 = vld [vmem:[#allocation7 + $0x1c00] sm:$0xff] }
 0x99d   : > { %v10693_v29 = vpack.c.bf16 %v5695_v21, %v5691_v16  ;;  %v5725_v51 = vld [vmem:[#allocation7 + $0x1c20] sm:$0xff]  ;;  %v5730_v16 = vld [vmem:[#allocation7 + $0x1c48] sm:$0xff] }
 0x99e   : > { %10582 = vmatpush1.bf16.msra.mxu0 %v10581_v30  ;;  %10678 = vmatpush1.bf16.msra.mxu1 %v10677_v36  ;;  %v5697_v30 = vld [vmem:[#allocation7 + $0x1b40] sm:$0xff]  ;;  %v5734_v21 = vld [vmem:[#allocation7 + $0x1c68] sm:$0xff]  ;;  %v10613_v27 = vpack.c.bf16 %v5725_v51, %v5721_v9 }
 0x99f   : > { %10584 = vmatprep.subr.bf16.mxu0 %v10583_v2  ;;  %10680 = vmatprep.subr.bf16.mxu1 %v10679_v49  ;;  %v5701_v36 = vld [vmem:[#allocation7 + $0x1b60] sm:$0xff]  ;;  %v5699_v2 = vld [vmem:[#allocation7 + $0x1b50] sm:$0xff] }
 0x9a0   : > { %v5703_v49 = vld [vmem:[#allocation7 + $0x1b70] sm:$0xff]  ;;  %v10601_v55 = vpack.c.bf16 %v5701_v36, %v5697_v30  ;;  %v5733_v30 = vld [vmem:[#allocation7 + $0x1c60] sm:$0xff] }
 0x9a1   : > { %v10697_v40 = vpack.c.bf16 %v5703_v49, %v5699_v2  ;;  %v10711_v2 = vpack.c.bf16 %v5736_v25, %v5732_v23  ;;  %v5731_v49 = vld [vmem:[#allocation7 + $0x1c50] sm:$0xff]  ;;  %v5753_v9 = vld [vmem:[#allocation7 + $0x1d00] sm:$0xff]  ;;  %v5762_v23 = vld [vmem:[#allocation7 + $0x1d48] sm:$0xff] }
 0x9a2   : > { %10586 = vmatpush1.bf16.msra.mxu0 %v10585_v34  ;;  %10682 = vmatpush1.bf16.msra.mxu1 %v10681_v63  ;;  %v5705_v34 = vld [vmem:[#allocation7 + $0x1b80] sm:$0xff]  ;;  %v5766_v25 = vld [vmem:[#allocation7 + $0x1d68] sm:$0xff] }
 0x9a3   : > { %10588 = vmatprep.subr.bf16.mxu0 %v10587_v18  ;;  %10684 = vmatprep.subr.bf16.mxu1 %v10683_v47  ;;  %v5709_v63 = vld [vmem:[#allocation7 + $0x1ba0] sm:$0xff]  ;;  %v5707_v18 = vld [vmem:[#allocation7 + $0x1b90] sm:$0xff] }
 0x9a4   : > { %v5711_v47 = vld [vmem:[#allocation7 + $0x1bb0] sm:$0xff]  ;;  %v10605_v53 = vpack.c.bf16 %v5709_v63, %v5705_v34  ;;  %v10713_v63 = vpack.c.bf16 %v5735_v10, %v5731_v49  ;;  %v5757_v51 = vld [vmem:[#allocation7 + $0x1d20] sm:$0xff] }
 0x9a5   : > { %v10701_v54 = vpack.c.bf16 %v5711_v47, %v5707_v18  ;;  %v10619_v18 = vpack.c.bf16 %v5742_v39, %v5738_v35  ;;  %v5763_v49 = vld [vmem:[#allocation7 + $0x1d50] sm:$0xff]  ;;  %v5770_v35 = vld [vmem:[#allocation7 + $0x1d88] sm:$0xff]  ;;  %v5772_v39 = vld [vmem:[#allocation7 + $0x1d98] sm:$0xff] }
 0x9a6   : > { %10590 = vmatpush1.bf16.msra.mxu0 %v10589_v33  ;;  %10686 = vmatpush1.bf16.msra.mxu1 %v10685_v20  ;;  %v5713_v33 = vld [vmem:[#allocation7 + $0x1bc0] sm:$0xff]  ;;  %v10607_v20 = vpack.c.bf16 %v5718_v8, %v5714_v48  ;;  %v5739_v48 = vld [vmem:[#allocation7 + $0x1c90] sm:$0xff] }
 0x9a7   : > { %10592 = vmatprep.subr.bf16.mxu0 %v10591_v58  ;;  %10688 = vmatprep.subr.bf16.mxu1 %v10687_v61  ;;  %v5715_v58 = vld [vmem:[#allocation7 + $0x1bd0] sm:$0xff]  ;;  %v10609_v60 = vpack.c.bf16 %v5717_v57, %v5713_v33  ;;  %v5749_v57 = vld [vmem:[#allocation7 + $0x1ce0] sm:$0xff] }
 0x9a8   : > { %v5719_v61 = vld [vmem:[#allocation7 + $0x1bf0] sm:$0xff] }
 0x9a9   : > { %v10705_v52 = vpack.c.bf16 %v5719_v61, %v5715_v58  ;;  %v5743_v8 = vld [vmem:[#allocation7 + $0x1cb0] sm:$0xff]  ;;  %v10623_v58 = vpack.c.bf16 %v5750_v11, %v5746_v42  ;;  %v5782_v42 = vld [vmem:[#allocation7 + $0x1de8] sm:$0xff]  ;;  %v5780_v11 = vld [vmem:[#allocation7 + $0x1dd8] sm:$0xff] }
 0x9aa   : > { %10594 = vmatpush1.bf16.msra.mxu0 %v10593_v1  ;;  %10690 = vmatpush1.bf16.msra.mxu1 %v10689_v7  ;;  %v5728_v1 = vld [vmem:[#allocation7 + $0x1c38] sm:$0xff]  ;;  %v5767_v10 = vld [vmem:[#allocation7 + $0x1d70] sm:$0xff] }
 0x9ab   : > { %10596 = vmatprep.subr.bf16.mxu0 %v10595_v14  ;;  %10692 = vmatprep.subr.bf16.mxu1 %v10691_v15  ;;  %v10707_v7 = vpack.c.bf16 %v5728_v1, %v5724_v62  ;;  %v5723_v14 = vld [vmem:[#allocation7 + $0x1c10] sm:$0xff]  ;;  %v5756_v62 = vld [vmem:[#allocation7 + $0x1d18] sm:$0xff] }
 0x9ac   : > { %v5727_v15 = vld [vmem:[#allocation7 + $0x1c30] sm:$0xff] }
 0x9ae   : > { %10598 = vmatpush1.bf16.msra.mxu0 %v10597_v28  ;;  %10694 = vmatpush1.bf16.msra.mxu1 %v10693_v29  ;;  %v10709_v28 = vpack.c.bf16 %v5727_v15, %v5723_v14  ;;  %v5729_v29 = vld [vmem:[#allocation7 + $0x1c40] sm:$0xff]  ;;  %v10627_v14 = vpack.c.bf16 %v5758_v13, %v5754_v17 }
 0x9af   : > { %10600 = vmatprep.subr.bf16.mxu0 %v10599_v37  ;;  %10696 = vmatprep.subr.bf16.mxu1 %v10695_v38  ;;  %v10615_v38 = vpack.c.bf16 %v5734_v21, %v5730_v16  ;;  %v10617_v34 = vpack.c.bf16 %v5733_v30, %v5729_v29  ;;  %v5755_v16 = vld [vmem:[#allocation7 + $0x1d10] sm:$0xff]  ;;  %v5761_v30 = vld [vmem:[#allocation7 + $0x1d40] sm:$0xff] }
 0x9b0   : > { %v5759_v21 = vld [vmem:[#allocation7 + $0x1d30] sm:$0xff]  ;;  %v6073_v13 = vld [vmem:[#allocation8] sm:$0xf] }
 0x9b1   : > { %v10725_v29 = vpack.c.bf16 %v5759_v21, %v5755_v16 }
 0x9b2   : > { %10602 = vmatpush1.bf16.msra.mxu0 %v10601_v55  ;;  %10698 = vmatpush1.bf16.msra.mxu1 %v10697_v40  ;;  %v5740_v55 = vld [vmem:[#allocation7 + $0x1c98] sm:$0xff] }
 0x9b3   : > { %10604 = vmatprep.subr.bf16.mxu0 %v10603_v41  ;;  %10700 = vmatprep.subr.bf16.mxu1 %v10699_v19  ;;  %v5744_v40 = vld [vmem:[#allocation7 + $0x1cb8] sm:$0xff]  ;;  %v5737_v41 = vld [vmem:[#allocation7 + $0x1c80] sm:$0xff] }
 0x9b4   : > { %v5741_v19 = vld [vmem:[#allocation7 + $0x1ca0] sm:$0xff]  ;;  %v10715_v47 = vpack.c.bf16 %v5744_v40, %v5740_v55  ;;  %v5776_v55 = vld [vmem:[#allocation7 + $0x1db8] sm:$0xff] }
 0x9b5   : > { %v10621_v33 = vpack.c.bf16 %v5741_v19, %v5737_v41  ;;  %v5773_v41 = vld [vmem:[#allocation7 + $0x1da0] sm:$0xff] }
 0x9b6   : > { %10606 = vmatpush1.bf16.msra.mxu0 %v10605_v53  ;;  %10702 = vmatpush1.bf16.msra.mxu1 %v10701_v54  ;;  %v5748_v53 = vld [vmem:[#allocation7 + $0x1cd8] sm:$0xff] }
 0x9b7   : > { %10608 = vmatprep.subr.bf16.mxu0 %v10607_v20  ;;  %10704 = vmatprep.subr.bf16.mxu1 %v10703_v56  ;;  %v5752_v54 = vld [vmem:[#allocation7 + $0x1cf8] sm:$0xff]  ;;  %v10717_v20 = vpack.c.bf16 %v5743_v8, %v5739_v48  ;;  %v5745_v56 = vld [vmem:[#allocation7 + $0x1cc0] sm:$0xff]  ;;  %v5775_v48 = vld [vmem:[#allocation7 + $0x1db0] sm:$0xff] }
 0x9b8   : > { %v10719_v61 = vpack.c.bf16 %v5752_v54, %v5748_v53  ;;  %v10625_v1 = vpack.c.bf16 %v5749_v57, %v5745_v56  ;;  %v5778_v8 = vld [vmem:[#allocation7 + $0x1dc8] sm:$0xff]  ;;  %v5784_v53 = vld [vmem:[#allocation7 + $0x1df8] sm:$0xff] }
 0x9b9   : > { %v10639_v56 = vpack.c.bf16 %v5782_v42, %v5778_v8  ;;  %v10735_v57 = vpack.c.bf16 %v5784_v53, %v5780_v11  ;;  %v6375_v8 = vld [vmem:[#allocation10 + $0x100] sm:$0xff]  ;;  %v6392_v53 = vld [vmem:[#allocation10 + $0x188] sm:$0xff] }
 0x9ba   : > { %10610 = vmatpush1.bf16.msra.mxu0 %v10609_v60  ;;  %10706 = vmatpush1.bf16.msra.mxu1 %v10705_v52  ;;  %v5747_v60 = vld [vmem:[#allocation7 + $0x1cd0] sm:$0xff]  ;;  %v6383_v42 = vld [vmem:[#allocation10 + $0x140] sm:$0xff] }
 0x9bb   : > { %10612 = vmatprep.subr.bf16.mxu0 %v10611_v0  ;;  %10708 = vmatprep.subr.bf16.mxu1 %v10707_v7  ;;  %v5751_v52 = vld [vmem:[#allocation7 + $0x1cf0] sm:$0xff]  ;;  %v5760_v0 = vld [vmem:[#allocation7 + $0x1d38] sm:$0xff]  ;;  %v10749_v11 = vpack.c.bf16 %v6383_v42, %v6375_v8 }
 0x9bc   : > { %v10721_v7 = vpack.c.bf16 %v5751_v52, %v5747_v60  ;;  %v10723_v15 = vpack.c.bf16 %v5760_v0, %v5756_v62  ;;  %v5783_v60 = vld [vmem:[#allocation7 + $0x1df0] sm:$0xff]  ;;  %v6078_v62 = vrot.slane %v6073_v13, %v12797_v24  ;;  %v6086_v0 = vrot.slane %v6073_v13, %v12803_v44 }
 0x9bd   : > { %v6528_v8 = vld [vmem:[#allocation10 + $0x5c8] sm:$0xff] }
 0xa50   : > { %v5517_v22 = vpop.f32.mrb[28].mxu0  ;;  %v12984_v36 = vpop.f32.mrb[52].mxu1 }
 0xa51   : > { %v5519_v37 = vpop.f32.mrb[29].mxu0  ;;  %v9527_v26 = vpop.f32.mrb[53].mxu1 }
 0xa52   : > { %5849 = vmatprep.mubr.f32.mxu0 %v5519_v37  ;;  %5991 = vmatprep.mubr.f32.mxu1 %v5519_v37  ;;  %v5765_v37 = vld [vmem:[#allocation7 + $0x1d60] sm:$0xff]  ;;  %v5774_v26 = vld [vmem:[#allocation7 + $0x1da8] sm:$0xff] }
 0xa53   : > { %5850 = vmatmul.mubr.f32.vlgmr.msra.gmra.mrb[22].mxu0 %v5517_v22  ;;  %5992 = vmatmul.mubr.f32.vlgmr.msra.gmra.mrb[46].mxu1 %v5517_v22  ;;  %v5764_v22 = vld [vmem:[#allocation7 + $0x1d58] sm:$0xff]  ;;  %v10633_v40 = vpack.c.bf16 %v5765_v37, %v5761_v30  ;;  %v10635_v19 = vpack.c.bf16 %v5774_v26, %v5770_v35  ;;  %v6352_v35 = vld [vmem:[#allocation10 + $0x48] sm:$0xff] }
 0xa54   : > { %10614 = vmatpush1.bf16.msra.mxu0 %v10613_v27  ;;  %10710 = vmatpush1.bf16.msra.mxu1 %v10709_v28  ;;  %v5768_v27 = vld [vmem:[#allocation7 + $0x1d78] sm:$0xff]  ;;  %v10629_v28 = vpack.c.bf16 %v5757_v51, %v5753_v9 }
 0xa55   : > { %10616 = vmatprep.subr.bf16.mxu0 %v10615_v38  ;;  %10712 = vmatprep.subr.bf16.mxu1 %v10711_v2  ;;  %v10631_v38 = vpack.c.bf16 %v5766_v25, %v5762_v23  ;;  %v10727_v2 = vpack.c.bf16 %v5768_v27, %v5764_v22 }
 0xa56   : > { %5920 = vmatprep.mubr.f32.mxu0 %v12196_v3  ;;  %6062 = vmatprep.mubr.f32.mxu1 %v12196_v3 }
 0xa58   : > { %10618 = vmatpush1.bf16.msra.mxu0 %v10617_v34  ;;  %10714 = vmatpush1.bf16.msra.mxu1 %v10713_v63  ;;  %v10729_v34 = vpack.c.bf16 %v5767_v10, %v5763_v49  ;;  %v5769_v63 = vld [vmem:[#allocation7 + $0x1d80] sm:$0xff]  ;;  %v6344_v10 = vld [vmem:[#allocation10 + $0x8] sm:$0xff] }
 0xa59   : > { %10620 = vmatprep.subr.bf16.mxu0 %v10619_v18  ;;  %10716 = vmatprep.subr.bf16.mxu1 %v10715_v47  ;;  %v10731_v18 = vpack.c.bf16 %v5776_v55, %v5772_v39  ;;  %v5771_v47 = vld [vmem:[#allocation7 + $0x1d90] sm:$0xff]  ;;  %v10637_v54 = vpack.c.bf16 %v5773_v41, %v5769_v63  ;;  %v10739_v26 = vpack.c.bf16 %v6352_v35, %v6344_v10  ;;  %v6343_v39 = vld [vmem:[#allocation10] sm:$0xff] }
 0xa5a   : > { %v6351_v55 = vld [vmem:[#allocation10 + $0x40] sm:$0xff]  ;;  %v6368_v63 = vld [vmem:[#allocation10 + $0xc8] sm:$0xff] }
 0xa5b   : > { %v6479_v10 = vld [vmem:[#allocation10 + $0x440] sm:$0xff] }
 0xa5c   : > { %10622 = vmatpush1.bf16.msra.mxu0 %v10621_v33  ;;  %10718 = vmatpush1.bf16.msra.mxu1 %v10717_v20  ;;  %v10733_v33 = vpack.c.bf16 %v5775_v48, %v5771_v47  ;;  %v5777_v20 = vld [vmem:[#allocation7 + $0x1dc0] sm:$0xff]  ;;  %v6376_v48 = vld [vmem:[#allocation10 + $0x108] sm:$0xff] }
 0xa5d   : > { %10624 = vmatprep.subr.bf16.mxu0 %v10623_v58  ;;  %10720 = vmatprep.subr.bf16.mxu1 %v10719_v61  ;;  %v5781_v58 = vld [vmem:[#allocation7 + $0x1de0] sm:$0xff]  ;;  %v5779_v61 = vld [vmem:[#allocation7 + $0x1dd0] sm:$0xff] }
 0xa5e   : > { %v10641_v52 = vpack.c.bf16 %v5781_v58, %v5777_v20  ;;  %v10737_v17 = vpack.c.bf16 %v5783_v60, %v5779_v61  ;;  %v6391_v20 = vld [vmem:[#allocation10 + $0x180] sm:$0xff]  ;;  %v6408_v58 = vld [vmem:[#allocation10 + $0x208] sm:$0xff] }
 0xa5f   : > { %v6416_v61 = vld [vmem:[#allocation10 + $0x248] sm:$0xff] }
 0xa60   : > { %10626 = vmatpush1.bf16.msra.mxu0 %v10625_v1  ;;  %10722 = vmatpush1.bf16.msra.mxu1 %v10721_v7  ;;  %v6082_v1 = vrot.slane %v6073_v13, %v12807_v46  ;;  %v6090_v7 = vrot.slane %v6073_v13, %v12800_v43  ;;  %v10755_v60 = vpack.c.bf16 %v6416_v61, %v6408_v58  ;;  %v6543_v58 = vld [vmem:[#allocation10 + $0x640] sm:$0xff] }
 0xa61   : > { %10628 = vmatprep.subr.bf16.mxu0 %v10627_v14  ;;  %10724 = vmatprep.subr.bf16.mxu1 %v10723_v15 }
 0xa64   : > { %10630 = vmatpush1.bf16.msra.mxu0 %v10629_v28  ;;  %10726 = vmatpush1.bf16.msra.mxu1 %v10725_v29 }
 0xa65   : > { %10632 = vmatprep.subr.bf16.mxu0 %v10631_v38  ;;  %10728 = vmatprep.subr.bf16.mxu1 %v10727_v2 }
 0xa68   : > { %10634 = vmatpush1.bf16.msra.mxu0 %v10633_v40  ;;  %10730 = vmatpush1.bf16.msra.mxu1 %v10729_v34  ;;  %v10741_v40 = vpack.c.bf16 %v6351_v55, %v6343_v39  ;;  %v6360_v34 = vld [vmem:[#allocation10 + $0x88] sm:$0xff] }
 0xa69   : > { %10636 = vmatprep.subr.bf16.mxu0 %v10635_v19  ;;  %10732 = vmatprep.subr.bf16.mxu1 %v10731_v18  ;;  %v10743_v41 = vpack.c.bf16 %v6368_v63, %v6360_v34  ;;  %v6359_v19 = vld [vmem:[#allocation10 + $0x80] sm:$0xff]  ;;  %v6496_v39 = vld [vmem:[#allocation10 + $0x4c8] sm:$0xff] }
 0xa6a   : > { %v6367_v18 = vld [vmem:[#allocation10 + $0xc0] sm:$0xff] }
 0xa6b   : > { %v10745_v47 = vpack.c.bf16 %v6367_v18, %v6359_v19  ;;  %v6495_v34 = vld [vmem:[#allocation10 + $0x4c0] sm:$0xff]  ;;  %v6512_v19 = vld [vmem:[#allocation10 + $0x548] sm:$0xff] }
 0xa6c   : > { %10638 = vmatpush1.bf16.msra.mxu0 %v10637_v54  ;;  %10734 = vmatpush1.bf16.msra.mxu1 %v10733_v33  ;;  %v6400_v54 = vld [vmem:[#allocation10 + $0x1c8] sm:$0xff] }
 0xa6d   : > { %10640 = vmatprep.subr.bf16.mxu0 %v10639_v56  ;;  %10736 = vmatprep.subr.bf16.mxu1 %v10735_v57  ;;  %v10751_v33 = vpack.c.bf16 %v6400_v54, %v6392_v53  ;;  %v6399_v56 = vld [vmem:[#allocation10 + $0x1c0] sm:$0xff] }
 0xa6e   : > { %v10753_v57 = vpack.c.bf16 %v6399_v56, %v6391_v20  ;;  %v6527_v53 = vld [vmem:[#allocation10 + $0x5c0] sm:$0xff]  ;;  %v6544_v20 = vld [vmem:[#allocation10 + $0x648] sm:$0xff] }
 0xa70   : > { %10642 = vmatpush1.bf16.msra.mxu0 %v10641_v52  ;;  %10738 = vmatpush1.bf16.msra.mxu1 %v10737_v17  ;;  %v6407_v52 = vld [vmem:[#allocation10 + $0x200] sm:$0xff] }
 0xa71   : > { %v6415_v17 = vld [vmem:[#allocation10 + $0x240] sm:$0xff] }
 0xa72   : > { %v10757_v13 = vpack.c.bf16 %v6415_v17, %v6407_v52  ;;  %v6560_v52 = vld [vmem:[#allocation10 + $0x6c8] sm:$0xff] }
 0xa73   : > { %5921 = vmatmul.mubr.f32.vlgmr.msra.gmra.mrb[22].mxu0 %v12984_v36  ;;  %6063 = vmatmul.mubr.f32.vlgmr.msra.gmra.mrb[46].mxu1 %v12984_v36 }
 0xa74   : > { %6180 = vmatprep.mubr.f32.mxu0 %v12196_v3  ;;  %6253 = vmatprep.mubr.f32.mxu1 %v12196_v3 }
 0xb46   : > { %v5922_v9 = vpop.f32.mrb[22].mxu0  ;;  %v6064_v51 = vpop.f32.mrb[46].mxu1 }
 0xb47   : > { %v6095_v14 = vadd.f32 %v6078_v62, %v5922_v9  ;;  %v6097_v15 = vadd.f32 %v6086_v0, %v6064_v51  ;;  %v5924_v16 = vpop.f32.mrb[23].mxu0  ;;  %v6066_v21 = vpop.f32.mrb[47].mxu1  ;;  %v6424_v62 = vld [vmem:[#allocation10 + $0x288] sm:$0xff]  ;;  %v6431_v9 = vld [vmem:[#allocation10 + $0x2c0] sm:$0xff] }
 0xb48   : > { %v6096_v36 = vadd.f32 %v6082_v1, %v5924_v16  ;;  %v6098_v23 = vadd.f32 %v6090_v7, %v6066_v21  ;;  %v6432_v0 = vld [vmem:[#allocation10 + $0x2c8] sm:$0xff]  ;;  %v6423_v7 = vld [vmem:[#allocation10 + $0x280] sm:$0xff] }
 0xb49   : > { %vm6099_vm0 = vcmp.ge.f32.partialorder %v6095_v14, 0.0  ;;  %v6103_v25 = vmul.f32 0.01, %v6095_v14  ;;  %vm6101_vm4 = vcmp.ge.f32.partialorder %v6097_v15, 0.0  ;;  %v6105_v22 = vmul.f32 0.01, %v6097_v15 }
 0xb4a   : > { %vm6100_vm5 = vcmp.ge.f32.partialorder %v6096_v36, 0.0  ;;  %v6104_v27 = vmul.f32 0.01, %v6096_v36  ;;  %vm6102_vm7 = vcmp.ge.f32.partialorder %v6098_v23, 0.0  ;;  %v6106_v28 = vmul.f32 0.01, %v6098_v23 }
 0xb4b   : > { %v6107_v29 = vsel %vm6099_vm0, %v6095_v14, %v6103_v25  ;;  %v6109_v30 = vsel %vm6101_vm4, %v6097_v15, %v6105_v22  ;;  %v10759_v1 = vpack.c.bf16 %v6432_v0, %v6424_v62  ;;  %v10761_v51 = vpack.c.bf16 %v6431_v9, %v6423_v7  ;;  %v6440_v14 = vld [vmem:[#allocation10 + $0x308] sm:$0xff]  ;;  %v6439_v21 = vld [vmem:[#allocation10 + $0x300] sm:$0xff] }
 0xb4c   : > { %v6111_v37 = vmax.f32 %v6107_v29, %v6109_v30  ;;  %v6108_v38 = vsel %vm6100_vm5, %v6096_v36, %v6104_v27  ;;  %v6110_v2 = vsel %vm6102_vm7, %v6098_v23, %v6106_v28  ;;  %v6448_v15 = vld [vmem:[#allocation10 + $0x348] sm:$0xff]  ;;  %v6447_v36 = vld [vmem:[#allocation10 + $0x340] sm:$0xff] }
 0xb4d   : > { %v6112_v49 = vmax.f32 %v6108_v38, %v6110_v2  ;;  %v10763_v16 = vpack.c.bf16 %v6448_v15, %v6440_v14  ;;  %v10765_v23 = vpack.c.bf16 %v6447_v36, %v6439_v21  ;;  %v6456_v25 = vld [vmem:[#allocation10 + $0x388] sm:$0xff]  ;;  %v6455_v28 = vld [vmem:[#allocation10 + $0x380] sm:$0xff] }
 0xb4e   : > { %v6464_v22 = vld [vmem:[#allocation10 + $0x3c8] sm:$0xff]  ;;  %v6463_v29 = vld [vmem:[#allocation10 + $0x3c0] sm:$0xff] }
 0xb4f   : > { %6116 = vmatprep.subr.mxu0 %v6112_v49  ;;  %6189 = vmatprep.subr.mxu1 %v6112_v49  ;;  %v10767_v27 = vpack.c.bf16 %v6464_v22, %v6456_v25  ;;  %v10769_v30 = vpack.c.bf16 %v6463_v29, %v6455_v28  ;;  %v6480_v38 = vld [vmem:[#allocation10 + $0x448] sm:$0xff]  ;;  %v6471_v49 = vld [vmem:[#allocation10 + $0x400] sm:$0xff]  ;;  %v6354_v28 = vld [vmem:[#allocation10 + $0x58] sm:$0xff] }
 0xb50   : > { %6117 = vmatpush1.msra.mxu0 %v6111_v37  ;;  %6190 = vmatpush1.msra.mxu1 %v6111_v37  ;;  %v6472_v37 = vld [vmem:[#allocation10 + $0x408] sm:$0xff]  ;;  %v10773_v35 = vpack.c.bf16 %v6479_v10, %v6471_v49  ;;  %v6559_v62 = vld [vmem:[#allocation10 + $0x6c0] sm:$0xff] }
 0xb51   : > { %9313 = vmatmul.mubr.msk.f32.vlgmr.msra.gmra.mrb[30].mxu0 %vm6113_vm6, %v12832_v45  ;;  %9314 = vmatmul.mubr.msk.f32.vlgmr.msra.gmra.mrb[54].mxu1 %vm6113_vm6, %v12850_v50  ;;  %v6384_v45 = vld [vmem:[#allocation10 + $0x148] sm:$0xff]  ;;  %v10771_v2 = vpack.c.bf16 %v6480_v38, %v6472_v37  ;;  %v6575_v14 = vld [vmem:[#allocation10 + $0x740] sm:$0xff]  ;;  %v6345_v37 = vld [vmem:[#allocation10 + $0x10] sm:$0xff] }
 0xb52   : > { %6336 = vmatprep.mubr.f32.mxu0 %v12196_v3  ;;  %10740 = vmatprep.subr.bf16.mxu1 %v10739_v26  ;;  %v10747_v50 = vpack.c.bf16 %v6384_v45, %v6376_v48  ;;  %v6488_v26 = vld [vmem:[#allocation10 + $0x488] sm:$0xff]  ;;  %v6511_v48 = vld [vmem:[#allocation10 + $0x540] sm:$0xff]  ;;  %v6353_v38 = vld [vmem:[#allocation10 + $0x50] sm:$0xff] }
 0xb53   : > { %10742 = vmatpush1.bf16.msra.mxu1 %v10741_v40  ;;  %v10775_v55 = vpack.c.bf16 %v6496_v39, %v6488_v26  ;;  %v6487_v40 = vld [vmem:[#allocation10 + $0x480] sm:$0xff]  ;;  %v6576_v7 = vld [vmem:[#allocation10 + $0x748] sm:$0xff]  ;;  %v6370_v26 = vld [vmem:[#allocation10 + $0xd8] sm:$0xff] }
 0xb54   : > { %10744 = vmatprep.subr.bf16.mxu1 %v10743_v41  ;;  %v10777_v63 = vpack.c.bf16 %v6495_v34, %v6487_v40  ;;  %v6504_v41 = vld [vmem:[#allocation10 + $0x508] sm:$0xff]  ;;  %v6591_v25 = vld [vmem:[#allocation10 + $0x7c0] sm:$0xff]  ;;  %v10805_v40 = vpack.c.bf16 %v6353_v38, %v6345_v37  ;;  %v6473_v37 = vld [vmem:[#allocation10 + $0x410] sm:$0xff] }
 0xb55   : > { %v10779_v18 = vpack.c.bf16 %v6512_v19, %v6504_v41  ;;  %v6592_v21 = vld [vmem:[#allocation10 + $0x7c8] sm:$0xff]  ;;  %v6369_v41 = vld [vmem:[#allocation10 + $0xd0] sm:$0xff]  ;;  %v6378_v19 = vld [vmem:[#allocation10 + $0x118] sm:$0xff] }
 0xb56   : > { %v6481_v38 = vld [vmem:[#allocation10 + $0x450] sm:$0xff] }
 0xb57   : > { %10746 = vmatpush1.bf16.msra.mxu1 %v10745_v47  ;;  %v6503_v47 = vld [vmem:[#allocation10 + $0x500] sm:$0xff] }
 0xb58   : > { %10748 = vmatprep.subr.bf16.mxu1 %v10747_v50  ;;  %v10781_v45 = vpack.c.bf16 %v6511_v48, %v6503_v47  ;;  %v6520_v50 = vld [vmem:[#allocation10 + $0x588] sm:$0xff] }
 0xb59   : > { %v10783_v42 = vpack.c.bf16 %v6528_v8, %v6520_v50  ;;  %v6385_v50 = vld [vmem:[#allocation10 + $0x150] sm:$0xff]  ;;  %v6394_v8 = vld [vmem:[#allocation10 + $0x198] sm:$0xff] }
 0xb5b   : > { %10750 = vmatpush1.bf16.msra.mxu1 %v10749_v11  ;;  %v6519_v11 = vld [vmem:[#allocation10 + $0x580] sm:$0xff] }
 0xb5c   : > { %10752 = vmatprep.subr.bf16.mxu1 %v10751_v33  ;;  %v10785_v54 = vpack.c.bf16 %v6527_v53, %v6519_v11  ;;  %v6536_v33 = vld [vmem:[#allocation10 + $0x608] sm:$0xff] }
 0xb5d   : > { %v10787_v56 = vpack.c.bf16 %v6544_v20, %v6536_v33  ;;  %v6401_v33 = vld [vmem:[#allocation10 + $0x1d0] sm:$0xff]  ;;  %v6410_v20 = vld [vmem:[#allocation10 + $0x218] sm:$0xff] }
 0xb5f   : > { %10754 = vmatpush1.bf16.msra.mxu1 %v10753_v57  ;;  %v6535_v57 = vld [vmem:[#allocation10 + $0x600] sm:$0xff] }
 0xb60   : > { %10756 = vmatprep.subr.bf16.mxu1 %v10755_v60  ;;  %v10789_v61 = vpack.c.bf16 %v6543_v58, %v6535_v57  ;;  %v6552_v60 = vld [vmem:[#allocation10 + $0x688] sm:$0xff]  ;;  %v6409_v58 = vld [vmem:[#allocation10 + $0x210] sm:$0xff] }
 0xb61   : > { %v10791_v17 = vpack.c.bf16 %v6560_v52, %v6552_v60  ;;  %v6426_v60 = vld [vmem:[#allocation10 + $0x298] sm:$0xff] }
 0xb62   : > { %v6434_v52 = vld [vmem:[#allocation10 + $0x2d8] sm:$0xff] }
 0xb63   : > { %10758 = vmatpush1.bf16.msra.mxu1 %v10757_v13  ;;  %v6551_v13 = vld [vmem:[#allocation10 + $0x680] sm:$0xff] }
 0xb64   : > { %10760 = vmatprep.subr.bf16.mxu1 %v10759_v1  ;;  %v10793_v0 = vpack.c.bf16 %v6559_v62, %v6551_v13  ;;  %v6568_v1 = vld [vmem:[#allocation10 + $0x708] sm:$0xff]  ;;  %v10823_v13 = vpack.c.bf16 %v6434_v52, %v6426_v60  ;;  %v6425_v62 = vld [vmem:[#allocation10 + $0x290] sm:$0xff] }
 0xb65   : > { %v10795_v9 = vpack.c.bf16 %v6576_v7, %v6568_v1  ;;  %v6442_v1 = vld [vmem:[#allocation10 + $0x318] sm:$0xff]  ;;  %v6553_v52 = vld [vmem:[#allocation10 + $0x690] sm:$0xff] }
 0xb66   : > { %v6450_v7 = vld [vmem:[#allocation10 + $0x358] sm:$0xff] }
 0xb67   : > { %10762 = vmatpush1.bf16.msra.mxu1 %v10761_v51  ;;  %v6567_v51 = vld [vmem:[#allocation10 + $0x700] sm:$0xff] }
 0xb68   : > { %10764 = vmatprep.subr.bf16.mxu1 %v10763_v16  ;;  %v10797_v15 = vpack.c.bf16 %v6575_v14, %v6567_v51  ;;  %v6584_v16 = vld [vmem:[#allocation10 + $0x788] sm:$0xff]  ;;  %v10827_v51 = vpack.c.bf16 %v6450_v7, %v6442_v1  ;;  %v6441_v14 = vld [vmem:[#allocation10 + $0x310] sm:$0xff] }
 0xb69   : > { %v10799_v36 = vpack.c.bf16 %v6592_v21, %v6584_v16  ;;  %v6458_v16 = vld [vmem:[#allocation10 + $0x398] sm:$0xff]  ;;  %v6569_v7 = vld [vmem:[#allocation10 + $0x710] sm:$0xff] }
 0xb6a   : > { %v6466_v21 = vld [vmem:[#allocation10 + $0x3d8] sm:$0xff] }
 0xb6b   : > { %10766 = vmatpush1.bf16.msra.mxu1 %v10765_v23  ;;  %v6583_v23 = vld [vmem:[#allocation10 + $0x780] sm:$0xff] }
 0xb6c   : > { %10768 = vmatprep.subr.bf16.mxu1 %v10767_v27  ;;  %v10801_v22 = vpack.c.bf16 %v6591_v25, %v6583_v23  ;;  %v6346_v27 = vld [vmem:[#allocation10 + $0x18] sm:$0xff]  ;;  %v10831_v23 = vpack.c.bf16 %v6466_v21, %v6458_v16  ;;  %v6457_v25 = vld [vmem:[#allocation10 + $0x390] sm:$0xff] }
 0xb6d   : > { %v6585_v21 = vld [vmem:[#allocation10 + $0x790] sm:$0xff] }
 0xb6f   : > { %10770 = vmatpush1.bf16.msra.mxu1 %v10769_v30 }
 0xb70   : > { %10772 = vmatprep.subr.bf16.mxu1 %v10771_v2 }
 0xb73   : > { %10774 = vmatpush1.bf16.msra.mxu1 %v10773_v35  ;;  %v6362_v35 = vld [vmem:[#allocation10 + $0x98] sm:$0xff] }
 0xb74   : > { %10776 = vmatprep.subr.bf16.mxu1 %v10775_v55  ;;  %v10803_v55 = vpack.c.bf16 %v6354_v28, %v6346_v27  ;;  %v10807_v34 = vpack.c.bf16 %v6370_v26, %v6362_v35  ;;  %v6474_v27 = vld [vmem:[#allocation10 + $0x418] sm:$0xff]  ;;  %v10837_v35 = vpack.c.bf16 %v6481_v38, %v6473_v37  ;;  %v6347_v37 = vld [vmem:[#allocation10 + $0x20] sm:$0xff] }
 0xb75   : > { %v6482_v28 = vld [vmem:[#allocation10 + $0x458] sm:$0xff]  ;;  %v6355_v38 = vld [vmem:[#allocation10 + $0x60] sm:$0xff] }
 0xb77   : > { %10778 = vmatpush1.bf16.msra.mxu1 %v10777_v63  ;;  %v6361_v63 = vld [vmem:[#allocation10 + $0x90] sm:$0xff] }
 0xb78   : > { %10780 = vmatprep.subr.bf16.mxu1 %v10779_v18  ;;  %v6386_v18 = vld [vmem:[#allocation10 + $0x158] sm:$0xff]  ;;  %v10809_v47 = vpack.c.bf16 %v6369_v41, %v6361_v63 }
 0xb79   : > { %v10811_v48 = vpack.c.bf16 %v6386_v18, %v6378_v19  ;;  %v6514_v63 = vld [vmem:[#allocation10 + $0x558] sm:$0xff]  ;;  %v6505_v18 = vld [vmem:[#allocation10 + $0x510] sm:$0xff] }
 0xb7b   : > { %10782 = vmatpush1.bf16.msra.mxu1 %v10781_v45  ;;  %v6377_v45 = vld [vmem:[#allocation10 + $0x110] sm:$0xff] }
 0xb7c   : > { %10784 = vmatprep.subr.bf16.mxu1 %v10783_v42  ;;  %v6402_v42 = vld [vmem:[#allocation10 + $0x1d8] sm:$0xff]  ;;  %v10813_v11 = vpack.c.bf16 %v6385_v50, %v6377_v45 }
 0xb7d   : > { %v10815_v53 = vpack.c.bf16 %v6402_v42, %v6394_v8  ;;  %v6530_v45 = vld [vmem:[#allocation10 + $0x5d8] sm:$0xff]  ;;  %v6521_v42 = vld [vmem:[#allocation10 + $0x590] sm:$0xff] }
 0xb7f   : > { %10786 = vmatpush1.bf16.msra.mxu1 %v10785_v54  ;;  %v6393_v54 = vld [vmem:[#allocation10 + $0x190] sm:$0xff] }
 0xb80   : > { %10788 = vmatprep.subr.bf16.mxu1 %v10787_v56  ;;  %v6418_v56 = vld [vmem:[#allocation10 + $0x258] sm:$0xff]  ;;  %v10817_v57 = vpack.c.bf16 %v6401_v33, %v6393_v54 }
 0xb81   : > { %v6546_v54 = vld [vmem:[#allocation10 + $0x658] sm:$0xff] }
 0xb83   : > { %10790 = vmatpush1.bf16.msra.mxu1 %v10789_v61  ;;  %v6417_v61 = vld [vmem:[#allocation10 + $0x250] sm:$0xff] }
 0xb84   : > { %10792 = vmatprep.subr.bf16.mxu1 %v10791_v17  ;;  %v10821_v17 = vpack.c.bf16 %v6417_v61, %v6409_v58  ;;  %v6562_v58 = vld [vmem:[#allocation10 + $0x6d8] sm:$0xff] }
 0xb87   : > { %10794 = vmatpush1.bf16.msra.mxu1 %v10793_v0  ;;  %v6433_v0 = vld [vmem:[#allocation10 + $0x2d0] sm:$0xff] }
 0xb88   : > { %10796 = vmatprep.subr.bf16.mxu1 %v10795_v9  ;;  %v10825_v9 = vpack.c.bf16 %v6433_v0, %v6425_v62  ;;  %v6578_v62 = vld [vmem:[#allocation10 + $0x758] sm:$0xff] }
 0xb8b   : > { %10798 = vmatpush1.bf16.msra.mxu1 %v10797_v15  ;;  %v6449_v15 = vld [vmem:[#allocation10 + $0x350] sm:$0xff] }
 0xb8c   : > { %10800 = vmatprep.subr.bf16.mxu1 %v10799_v36  ;;  %v10829_v36 = vpack.c.bf16 %v6449_v15, %v6441_v14  ;;  %v6594_v14 = vld [vmem:[#allocation10 + $0x7d8] sm:$0xff] }
 0xb8f   : > { %10802 = vmatpush1.bf16.msra.mxu1 %v10801_v22  ;;  %v6465_v22 = vld [vmem:[#allocation10 + $0x3d0] sm:$0xff] }
 0xc24   : > { %v6182_v29 = vpop.f32.mrb[30].mxu0  ;;  %v6255_v30 = vpop.f32.mrb[54].mxu1 }
 0xc25   : > { %v12999_v2 = vmax.f32 %v6182_v29, %v6255_v30  ;;  %v6184_v49 = vpop.f32.mrb[31].mxu0  ;;  %v6257_v10 = vpop.f32.mrb[55].mxu1  ;;  %v10833_v29 = vpack.c.bf16 %v6465_v22, %v6457_v25  ;;  %v10835_v30 = vpack.c.bf16 %v6482_v28, %v6474_v27  ;;  %v6348_v25 = vld [vmem:[#allocation10 + $0x28] sm:$0xff]  ;;  %v6350_v27 = vld [vmem:[#allocation10 + $0x38] sm:$0xff] }
 0xc26   : > { %v13001_v39 = vmax.f32 %v6184_v49, %v6257_v10  ;;  %v6490_v49 = vld [vmem:[#allocation10 + $0x498] sm:$0xff]  ;;  %v6356_v22 = vld [vmem:[#allocation10 + $0x68] sm:$0xff] }
 0xc27   : > { %v6498_v10 = vld [vmem:[#allocation10 + $0x4d8] sm:$0xff]  ;;  %v10867_v28 = vpack.c.bf16 %v6356_v22, %v6348_v25 }
 0xc28   : > { %9315 = vmatprep.subr.msk.mxu0 %vm454_vm1, %v13001_v39  ;;  %v10839_v26 = vpack.c.bf16 %v6498_v10, %v6490_v49  ;;  %v6349_v49 = vld [vmem:[#allocation10 + $0x30] sm:$0xff]  ;;  %v6422_v25 = vld [vmem:[#allocation10 + $0x278] sm:$0xff] }
 0xc29   : > { %9316 = vmatpush1.msk.msra.mxu0 %vm454_vm1, %v12999_v2  ;;  %10868 = vmatprep.subr.bf16.mxu1 %v10867_v28  ;;  %v6357_v10 = vld [vmem:[#allocation10 + $0x70] sm:$0xff]  ;;  %v6411_v28 = vld [vmem:[#allocation10 + $0x220] sm:$0xff] }
 0xc2a   : > { %9317 = vmatmul.mubr.msk.f32.vlgmr.msra.gmra.mrb[32].mxu0 %vm6263_vm8, %v12508_v32  ;;  %10804 = vmatprep.subr.bf16.mxu0 %v10803_v55  ;;  %v10819_v32 = vpack.c.bf16 %v6418_v56, %v6410_v20  ;;  %v6489_v55 = vld [vmem:[#allocation10 + $0x490] sm:$0xff] }
 0xc2b   : > { %10806 = vmatpush1.bf16.msra.mxu0 %v10805_v40  ;;  %v6497_v40 = vld [vmem:[#allocation10 + $0x4d0] sm:$0xff] }
 0xc2c   : > { %10808 = vmatprep.subr.bf16.mxu0 %v10807_v34  ;;  %v6506_v34 = vld [vmem:[#allocation10 + $0x518] sm:$0xff]  ;;  %v10841_v41 = vpack.c.bf16 %v6497_v40, %v6489_v55  ;;  %v6537_v56 = vld [vmem:[#allocation10 + $0x610] sm:$0xff] }
 0xc2d   : > { %v10843_v19 = vpack.c.bf16 %v6514_v63, %v6506_v34  ;;  %v6366_v55 = vld [vmem:[#allocation10 + $0xb8] sm:$0xff]  ;;  %v10869_v63 = vpack.c.bf16 %v6355_v38, %v6347_v37  ;;  %v6413_v38 = vld [vmem:[#allocation10 + $0x230] sm:$0xff] }
 0xc2e   : > { %v6374_v40 = vld [vmem:[#allocation10 + $0xf8] sm:$0xff] }
 0xc2f   : > { %10810 = vmatpush1.bf16.msra.mxu0 %v10809_v47  ;;  %v6513_v47 = vld [vmem:[#allocation10 + $0x550] sm:$0xff] }
 0xc30   : > { %10812 = vmatprep.subr.bf16.mxu0 %v10811_v48  ;;  %v6522_v48 = vld [vmem:[#allocation10 + $0x598] sm:$0xff]  ;;  %v10845_v50 = vpack.c.bf16 %v6513_v47, %v6505_v18  ;;  %v6371_v18 = vld [vmem:[#allocation10 + $0xe0] sm:$0xff] }
 0xc31   : > { %v10847_v8 = vpack.c.bf16 %v6530_v45, %v6522_v48  ;;  %v10935_v45 = vpack.c.bf16 %v6374_v40, %v6366_v55  ;;  %v6438_v55 = vld [vmem:[#allocation10 + $0x2f8] sm:$0xff] }
 0xc33   : > { %10814 = vmatpush1.bf16.msra.mxu0 %v10813_v11  ;;  %v6529_v11 = vld [vmem:[#allocation10 + $0x5d0] sm:$0xff] }
 0xc34   : > { %10816 = vmatprep.subr.bf16.mxu0 %v10815_v53  ;;  %v6538_v53 = vld [vmem:[#allocation10 + $0x618] sm:$0xff]  ;;  %v10849_v33 = vpack.c.bf16 %v6529_v11, %v6521_v42  ;;  %v6380_v42 = vld [vmem:[#allocation10 + $0x128] sm:$0xff] }
 0xc35   : > { %v10851_v20 = vpack.c.bf16 %v6546_v54, %v6538_v53  ;;  %v6388_v11 = vld [vmem:[#allocation10 + $0x168] sm:$0xff]  ;;  %v6382_v53 = vld [vmem:[#allocation10 + $0x138] sm:$0xff] }
 0xc36   : > { %v6390_v54 = vld [vmem:[#allocation10 + $0x178] sm:$0xff] }
 0xc37   : > { %10818 = vmatpush1.bf16.msra.mxu0 %v10817_v57  ;;  %v6545_v57 = vld [vmem:[#allocation10 + $0x650] sm:$0xff] }
 0xc38   : > { %10820 = vmatprep.subr.bf16.mxu0 %v10819_v32  ;;  %v6554_v32 = vld [vmem:[#allocation10 + $0x698] sm:$0xff]  ;;  %v10853_v61 = vpack.c.bf16 %v6545_v57, %v6537_v56  ;;  %v6379_v56 = vld [vmem:[#allocation10 + $0x120] sm:$0xff] }
 0xc39   : > { %v10855_v60 = vpack.c.bf16 %v6562_v58, %v6554_v32  ;;  %v6387_v57 = vld [vmem:[#allocation10 + $0x160] sm:$0xff]  ;;  %v10875_v32 = vpack.c.bf16 %v6388_v11, %v6380_v42  ;;  %v10939_v58 = vpack.c.bf16 %v6390_v54, %v6382_v53  ;;  %v6446_v42 = vld [vmem:[#allocation10 + $0x338] sm:$0xff] }
 0xc3a   : > { %v6454_v11 = vld [vmem:[#allocation10 + $0x378] sm:$0xff] }
 0xc3b   : > { %10822 = vmatpush1.bf16.msra.mxu0 %v10821_v17  ;;  %v6561_v17 = vld [vmem:[#allocation10 + $0x6d0] sm:$0xff] }
 0xc3c   : > { %10824 = vmatprep.subr.bf16.mxu0 %v10823_v13  ;;  %v6570_v13 = vld [vmem:[#allocation10 + $0x718] sm:$0xff]  ;;  %v10857_v0 = vpack.c.bf16 %v6561_v17, %v6553_v52  ;;  %v6396_v52 = vld [vmem:[#allocation10 + $0x1a8] sm:$0xff] }
 0xc3d   : > { %v10859_v1 = vpack.c.bf16 %v6578_v62, %v6570_v13  ;;  %v6404_v17 = vld [vmem:[#allocation10 + $0x1e8] sm:$0xff]  ;;  %v6398_v13 = vld [vmem:[#allocation10 + $0x1b8] sm:$0xff] }
 0xc3e   : > { %v6406_v62 = vld [vmem:[#allocation10 + $0x1f8] sm:$0xff] }
 0xc3f   : > { %10826 = vmatpush1.bf16.msra.mxu0 %v10825_v9  ;;  %v6577_v9 = vld [vmem:[#allocation10 + $0x750] sm:$0xff] }
 0xc40   : > { %10828 = vmatprep.subr.bf16.mxu0 %v10827_v51  ;;  %v6586_v51 = vld [vmem:[#allocation10 + $0x798] sm:$0xff]  ;;  %v10861_v15 = vpack.c.bf16 %v6577_v9, %v6569_v7  ;;  %v6395_v7 = vld [vmem:[#allocation10 + $0x1a0] sm:$0xff] }
 0xc41   : > { %v10863_v16 = vpack.c.bf16 %v6594_v14, %v6586_v51  ;;  %v6403_v9 = vld [vmem:[#allocation10 + $0x1e0] sm:$0xff]  ;;  %v10879_v51 = vpack.c.bf16 %v6404_v17, %v6396_v52  ;;  %v10943_v14 = vpack.c.bf16 %v6406_v62, %v6398_v13  ;;  %v6462_v52 = vld [vmem:[#allocation10 + $0x3b8] sm:$0xff] }
 0xc42   : > { %v10881_v22 = vpack.c.bf16 %v6403_v9, %v6395_v7  ;;  %v6470_v17 = vld [vmem:[#allocation10 + $0x3f8] sm:$0xff] }
 0xc43   : > { %10830 = vmatpush1.bf16.msra.mxu0 %v10829_v36  ;;  %v6593_v36 = vld [vmem:[#allocation10 + $0x7d0] sm:$0xff]  ;;  %v10959_v9 = vpack.c.bf16 %v6470_v17, %v6462_v52 }
 0xc44   : > { %10832 = vmatprep.subr.bf16.mxu0 %v10831_v23  ;;  %v10865_v23 = vpack.c.bf16 %v6593_v36, %v6585_v21  ;;  %v6412_v21 = vld [vmem:[#allocation10 + $0x228] sm:$0xff] }
 0xc45   : > { %v6420_v36 = vld [vmem:[#allocation10 + $0x268] sm:$0xff] }
 0xc47   : > { %10834 = vmatpush1.bf16.msra.mxu0 %v10833_v29  ;;  %v6358_v29 = vld [vmem:[#allocation10 + $0x78] sm:$0xff] }
 0xc48   : > { %10836 = vmatprep.subr.bf16.mxu0 %v10835_v30  ;;  %v10931_v30 = vpack.c.bf16 %v6358_v29, %v6350_v27  ;;  %v6419_v29 = vld [vmem:[#allocation10 + $0x260] sm:$0xff] }
 0xc49   : > { %v10885_v40 = vpack.c.bf16 %v6419_v29, %v6411_v28 }
 0xc4b   : > { %10838 = vmatpush1.bf16.msra.mxu0 %v10837_v35  ;;  %v6364_v35 = vld [vmem:[#allocation10 + $0xa8] sm:$0xff] }
 0xc4c   : > { %10840 = vmatprep.subr.bf16.mxu0 %v10839_v26  ;;  %v6372_v26 = vld [vmem:[#allocation10 + $0xe8] sm:$0xff] }
 0xc4d   : > { %v10871_v48 = vpack.c.bf16 %v6372_v26, %v6364_v35  ;;  %v6436_v35 = vld [vmem:[#allocation10 + $0x2e8] sm:$0xff]  ;;  %v6430_v26 = vld [vmem:[#allocation10 + $0x2b8] sm:$0xff] }
 0xc4f   : > { %10842 = vmatpush1.bf16.msra.mxu0 %v10841_v41  ;;  %v10933_v41 = vpack.c.bf16 %v6357_v10, %v6349_v49  ;;  %v6421_v49 = vld [vmem:[#allocation10 + $0x270] sm:$0xff]  ;;  %v6428_v10 = vld [vmem:[#allocation10 + $0x2a8] sm:$0xff] }
 0xc50   : > { %10844 = vmatprep.subr.bf16.mxu0 %v10843_v19  ;;  %v6363_v19 = vld [vmem:[#allocation10 + $0xa0] sm:$0xff] }
 0xc53   : > { %10846 = vmatpush1.bf16.msra.mxu0 %v10845_v50  ;;  %v6365_v50 = vld [vmem:[#allocation10 + $0xb0] sm:$0xff] }
 0xc54   : > { %10848 = vmatprep.subr.bf16.mxu0 %v10847_v8  ;;  %v6373_v8 = vld [vmem:[#allocation10 + $0xf0] sm:$0xff] }
 0xc57   : > { %10850 = vmatpush1.bf16.msra.mxu0 %v10849_v33  ;;  %v10873_v33 = vpack.c.bf16 %v6371_v18, %v6363_v19  ;;  %v6435_v19 = vld [vmem:[#allocation10 + $0x2e0] sm:$0xff]  ;;  %v10887_v18 = vpack.c.bf16 %v6436_v35, %v6428_v10  ;;  %v6494_v10 = vld [vmem:[#allocation10 + $0x4b8] sm:$0xff] }
 0xc58   : > { %10852 = vmatprep.subr.bf16.mxu0 %v10851_v20  ;;  %v10937_v20 = vpack.c.bf16 %v6373_v8, %v6365_v50  ;;  %v6444_v50 = vld [vmem:[#allocation10 + $0x328] sm:$0xff]  ;;  %v6502_v35 = vld [vmem:[#allocation10 + $0x4f8] sm:$0xff] }
 0xc59   : > { %v6452_v8 = vld [vmem:[#allocation10 + $0x368] sm:$0xff] }
 0xc5b   : > { %10854 = vmatpush1.bf16.msra.mxu0 %v10853_v61  ;;  %v6381_v61 = vld [vmem:[#allocation10 + $0x130] sm:$0xff] }
 0xc5c   : > { %10856 = vmatprep.subr.bf16.mxu0 %v10855_v60  ;;  %v6389_v60 = vld [vmem:[#allocation10 + $0x170] sm:$0xff] }
 0xc5f   : > { %10858 = vmatpush1.bf16.msra.mxu0 %v10857_v0  ;;  %v10877_v0 = vpack.c.bf16 %v6387_v57, %v6379_v56  ;;  %v10891_v56 = vpack.c.bf16 %v6452_v8, %v6444_v50  ;;  %v10955_v57 = vpack.c.bf16 %v6454_v11, %v6446_v42  ;;  %v6510_v50 = vld [vmem:[#allocation10 + $0x538] sm:$0xff] }
 0xc60   : > { %10860 = vmatprep.subr.bf16.mxu0 %v10859_v1  ;;  %v10941_v1 = vpack.c.bf16 %v6389_v60, %v6381_v61  ;;  %v6460_v61 = vld [vmem:[#allocation10 + $0x3a8] sm:$0xff]  ;;  %v6518_v8 = vld [vmem:[#allocation10 + $0x578] sm:$0xff] }
 0xc61   : > { %v6468_v60 = vld [vmem:[#allocation10 + $0x3e8] sm:$0xff] }
 0xc62   : > { %v10895_v7 = vpack.c.bf16 %v6468_v60, %v6460_v61  ;;  %v6526_v61 = vld [vmem:[#allocation10 + $0x5b8] sm:$0xff] }
 0xc63   : > { %10862 = vmatpush1.bf16.msra.mxu0 %v10861_v15  ;;  %v6397_v15 = vld [vmem:[#allocation10 + $0x1b0] sm:$0xff]  ;;  %v6534_v60 = vld [vmem:[#allocation10 + $0x5f8] sm:$0xff] }
 0xc64   : > { %10864 = vmatprep.subr.bf16.mxu0 %v10863_v16  ;;  %v6405_v16 = vld [vmem:[#allocation10 + $0x1f0] sm:$0xff] }
 0xc65   : > { %v10945_v27 = vpack.c.bf16 %v6405_v16, %v6397_v15  ;;  %v6476_v15 = vld [vmem:[#allocation10 + $0x428] sm:$0xff] }
 0xc66   : > { %v6484_v16 = vld [vmem:[#allocation10 + $0x468] sm:$0xff] }
 0xc67   : > { %10866 = vmatpush1.bf16.msra.mxu0 %v10865_v23  ;;  %v6414_v23 = vld [vmem:[#allocation10 + $0x238] sm:$0xff]  ;;  %v10899_v28 = vpack.c.bf16 %v6484_v16, %v6476_v15 }
 0xc68   : > { %10932 = vmatprep.subr.bf16.mxu0 %v10931_v30  ;;  %v10883_v30 = vpack.c.bf16 %v6420_v36, %v6412_v21  ;;  %v10947_v37 = vpack.c.bf16 %v6422_v25, %v6414_v23  ;;  %v6478_v21 = vld [vmem:[#allocation10 + $0x438] sm:$0xff] }
 0xc69   : > { %v6486_v36 = vld [vmem:[#allocation10 + $0x478] sm:$0xff] }
 0xc6a   : > { %v10963_v29 = vpack.c.bf16 %v6486_v36, %v6478_v21  ;;  %v6542_v15 = vld [vmem:[#allocation10 + $0x638] sm:$0xff] }
 0xc6b   : > { %v6550_v16 = vld [vmem:[#allocation10 + $0x678] sm:$0xff] }
 0xcfd   : > { %v13009_v34 = vpop.f32.mrb[32].mxu0 }
 0xcfe   : > { %v6340_v47 = vpop.f32.mrb[33].mxu0 }
 0xcff   : > { %6663 = vmatprep.mubr.f32.mxu1 %v6340_v47  ;;  %6734 = vmatprep.mubr.f32.mxu0 %v6340_v47 }
 0xd00   : > { %6664 = vmatmul.mubr.f32.vlgmr.msra.gmra.mrb[56].mxu1 %v13009_v34  ;;  %6735 = vmatmul.mubr.f32.vlgmr.msra.gmra.mrb[34].mxu0 %v13009_v34 }
 0xd01   : > { %10870 = vmatpush1.bf16.msra.mxu1 %v10869_v63  ;;  %10934 = vmatpush1.bf16.msra.mxu0 %v10933_v41  ;;  %v10949_v63 = vpack.c.bf16 %v6421_v49, %v6413_v38  ;;  %v6427_v41 = vld [vmem:[#allocation10 + $0x2a0] sm:$0xff]  ;;  %v6492_v38 = vld [vmem:[#allocation10 + $0x4a8] sm:$0xff] }
 0xd02   : > { %10872 = vmatprep.subr.bf16.mxu1 %v10871_v48  ;;  %10936 = vmatprep.subr.bf16.mxu0 %v10935_v45  ;;  %v6429_v48 = vld [vmem:[#allocation10 + $0x2b0] sm:$0xff]  ;;  %v10889_v53 = vpack.c.bf16 %v6435_v19, %v6427_v41  ;;  %v6500_v49 = vld [vmem:[#allocation10 + $0x4e8] sm:$0xff]  ;;  %v10967_v19 = vpack.c.bf16 %v6502_v35, %v6494_v10 }
 0xd03   : > { %6805 = vmatprep.mubr.f32.mxu1 %v6340_v47  ;;  %6876 = vmatprep.mubr.f32.mxu0 %v6340_v47  ;;  %v10951_v47 = vpack.c.bf16 %v6438_v55, %v6430_v26  ;;  %v6437_v45 = vld [vmem:[#allocation10 + $0x2f0] sm:$0xff]  ;;  %v10903_v41 = vpack.c.bf16 %v6500_v49, %v6492_v38  ;;  %v6558_v38 = vld [vmem:[#allocation10 + $0x6b8] sm:$0xff] }
 0xd04   : > { %v10953_v54 = vpack.c.bf16 %v6437_v45, %v6429_v48  ;;  %v6508_v48 = vld [vmem:[#allocation10 + $0x528] sm:$0xff]  ;;  %v6566_v49 = vld [vmem:[#allocation10 + $0x6f8] sm:$0xff] }
 0xd05   : > { %10874 = vmatpush1.bf16.msra.mxu1 %v10873_v33  ;;  %10938 = vmatpush1.bf16.msra.mxu0 %v10937_v20  ;;  %v6443_v33 = vld [vmem:[#allocation10 + $0x320] sm:$0xff]  ;;  %v6516_v45 = vld [vmem:[#allocation10 + $0x568] sm:$0xff] }
 0xd06   : > { %10876 = vmatprep.subr.bf16.mxu1 %v10875_v32  ;;  %10940 = vmatprep.subr.bf16.mxu0 %v10939_v58  ;;  %v6451_v20 = vld [vmem:[#allocation10 + $0x360] sm:$0xff]  ;;  %v6445_v32 = vld [vmem:[#allocation10 + $0x330] sm:$0xff] }
 0xd07   : > { %v6453_v58 = vld [vmem:[#allocation10 + $0x370] sm:$0xff]  ;;  %v10893_v13 = vpack.c.bf16 %v6451_v20, %v6443_v33  ;;  %v10907_v33 = vpack.c.bf16 %v6516_v45, %v6508_v48  ;;  %v10971_v20 = vpack.c.bf16 %v6518_v8, %v6510_v50  ;;  %v6574_v48 = vld [vmem:[#allocation10 + $0x738] sm:$0xff] }
 0xd08   : > { %v10957_v62 = vpack.c.bf16 %v6453_v58, %v6445_v32  ;;  %v6524_v32 = vld [vmem:[#allocation10 + $0x5a8] sm:$0xff]  ;;  %v6582_v45 = vld [vmem:[#allocation10 + $0x778] sm:$0xff] }
 0xd09   : > { %10878 = vmatpush1.bf16.msra.mxu1 %v10877_v0  ;;  %10942 = vmatpush1.bf16.msra.mxu0 %v10941_v1  ;;  %v6459_v0 = vld [vmem:[#allocation10 + $0x3a0] sm:$0xff]  ;;  %v6532_v58 = vld [vmem:[#allocation10 + $0x5e8] sm:$0xff] }
 0xd0a   : > { %10880 = vmatprep.subr.bf16.mxu1 %v10879_v51  ;;  %10944 = vmatprep.subr.bf16.mxu0 %v10943_v14  ;;  %v6467_v1 = vld [vmem:[#allocation10 + $0x3e0] sm:$0xff]  ;;  %v6461_v51 = vld [vmem:[#allocation10 + $0x3b0] sm:$0xff] }
 0xd0b   : > { %v6469_v14 = vld [vmem:[#allocation10 + $0x3f0] sm:$0xff]  ;;  %v10897_v23 = vpack.c.bf16 %v6467_v1, %v6459_v0  ;;  %v10911_v0 = vpack.c.bf16 %v6532_v58, %v6524_v32  ;;  %v10975_v1 = vpack.c.bf16 %v6534_v60, %v6526_v61  ;;  %v6590_v32 = vld [vmem:[#allocation10 + $0x7b8] sm:$0xff] }
 0xd0c   : > { %v10961_v25 = vpack.c.bf16 %v6469_v14, %v6461_v51  ;;  %v6540_v51 = vld [vmem:[#allocation10 + $0x628] sm:$0xff]  ;;  %v6598_v58 = vld [vmem:[#allocation10 + $0x7f8] sm:$0xff] }
 0xd0d   : > { %10882 = vmatpush1.bf16.msra.mxu1 %v10881_v22  ;;  %10946 = vmatpush1.bf16.msra.mxu0 %v10945_v27  ;;  %v6475_v22 = vld [vmem:[#allocation10 + $0x420] sm:$0xff]  ;;  %v6548_v14 = vld [vmem:[#allocation10 + $0x668] sm:$0xff] }
 0xd0e   : > { %10884 = vmatprep.subr.bf16.mxu1 %v10883_v30  ;;  %10948 = vmatprep.subr.bf16.mxu0 %v10947_v37  ;;  %v6483_v27 = vld [vmem:[#allocation10 + $0x460] sm:$0xff]  ;;  %v6477_v30 = vld [vmem:[#allocation10 + $0x430] sm:$0xff] }
 0xd0f   : > { %v6485_v37 = vld [vmem:[#allocation10 + $0x470] sm:$0xff]  ;;  %v10901_v26 = vpack.c.bf16 %v6483_v27, %v6475_v22  ;;  %v10915_v22 = vpack.c.bf16 %v6548_v14, %v6540_v51  ;;  %v10979_v27 = vpack.c.bf16 %v6550_v16, %v6542_v15  ;;  %v7017_v51 = vld [vmem:[#allocation10 + $0x808] sm:$0xff]  ;;  %v7019_v15 = vld [vmem:[#allocation10 + $0x818] sm:$0xff] }
 0xd10   : > { %v10965_v55 = vpack.c.bf16 %v6485_v37, %v6477_v30  ;;  %v6556_v30 = vld [vmem:[#allocation10 + $0x6a8] sm:$0xff] }
 0xd11   : > { %10886 = vmatpush1.bf16.msra.mxu1 %v10885_v40  ;;  %10950 = vmatpush1.bf16.msra.mxu0 %v10949_v63  ;;  %v6491_v40 = vld [vmem:[#allocation10 + $0x4a0] sm:$0xff]  ;;  %v6564_v37 = vld [vmem:[#allocation10 + $0x6e8] sm:$0xff] }
 0xd12   : > { %10888 = vmatprep.subr.bf16.mxu1 %v10887_v18  ;;  %10952 = vmatprep.subr.bf16.mxu0 %v10951_v47  ;;  %v6499_v63 = vld [vmem:[#allocation10 + $0x4e0] sm:$0xff]  ;;  %v6493_v18 = vld [vmem:[#allocation10 + $0x4b0] sm:$0xff]  ;;  %v7025_v14 = vld [vmem:[#allocation10 + $0x848] sm:$0xff] }
 0xd13   : > { %v6501_v47 = vld [vmem:[#allocation10 + $0x4f0] sm:$0xff]  ;;  %v10905_v42 = vpack.c.bf16 %v6499_v63, %v6491_v40  ;;  %v10919_v40 = vpack.c.bf16 %v6564_v37, %v6556_v30  ;;  %v10983_v63 = vpack.c.bf16 %v6566_v49, %v6558_v38  ;;  %v10995_v16 = vpack.c.bf16 %v7025_v14, %v7017_v51  ;;  %v7041_v30 = vld [vmem:[#allocation10 + $0x8c8] sm:$0xff]  ;;  %v7035_v37 = vld [vmem:[#allocation10 + $0x898] sm:$0xff] }
 0xd14   : > { %v10969_v11 = vpack.c.bf16 %v6501_v47, %v6493_v18  ;;  %v6572_v18 = vld [vmem:[#allocation10 + $0x728] sm:$0xff]  ;;  %v7043_v38 = vld [vmem:[#allocation10 + $0x8d8] sm:$0xff]  ;;  %v7032_v49 = vld [vmem:[#allocation10 + $0x880] sm:$0xff] }
 0xd15   : > { %10890 = vmatpush1.bf16.msra.mxu1 %v10889_v53  ;;  %10954 = vmatpush1.bf16.msra.mxu0 %v10953_v54  ;;  %v6507_v53 = vld [vmem:[#allocation10 + $0x520] sm:$0xff]  ;;  %v6580_v47 = vld [vmem:[#allocation10 + $0x768] sm:$0xff]  ;;  %v7091_v51 = vld [vmem:[#allocation10 + $0xa58] sm:$0xff] }
 0xd16   : > { %10892 = vmatprep.subr.bf16.mxu1 %v10891_v56  ;;  %10956 = vmatprep.subr.bf16.mxu0 %v10955_v57  ;;  %v6515_v54 = vld [vmem:[#allocation10 + $0x560] sm:$0xff]  ;;  %v6509_v56 = vld [vmem:[#allocation10 + $0x530] sm:$0xff] }
 0xd17   : > { %v6517_v57 = vld [vmem:[#allocation10 + $0x570] sm:$0xff]  ;;  %v10909_v52 = vpack.c.bf16 %v6515_v54, %v6507_v53  ;;  %v10923_v53 = vpack.c.bf16 %v6580_v47, %v6572_v18  ;;  %v10987_v54 = vpack.c.bf16 %v6582_v45, %v6574_v48  ;;  %v7051_v18 = vld [vmem:[#allocation10 + $0x918] sm:$0xff]  ;;  %v7080_v14 = vld [vmem:[#allocation10 + $0xa00] sm:$0xff] }
 0xd18   : > { %v10973_v17 = vpack.c.bf16 %v6517_v57, %v6509_v56  ;;  %v6588_v56 = vld [vmem:[#allocation10 + $0x7a8] sm:$0xff]  ;;  %v7059_v47 = vld [vmem:[#allocation10 + $0x958] sm:$0xff] }
 0xd19   : > { %10894 = vmatpush1.bf16.msra.mxu1 %v10893_v13  ;;  %10958 = vmatpush1.bf16.msra.mxu0 %v10957_v62  ;;  %v6523_v13 = vld [vmem:[#allocation10 + $0x5a0] sm:$0xff]  ;;  %v6596_v57 = vld [vmem:[#allocation10 + $0x7e8] sm:$0xff]  ;;  %v11067_v45 = vpack.c.bf16 %v7059_v47, %v7051_v18  ;;  %v7114_v47 = vld [vmem:[#allocation10 + $0xb10] sm:$0xff] }
 0xd1a   : > { %10896 = vmatprep.subr.bf16.mxu1 %v10895_v7  ;;  %10960 = vmatprep.subr.bf16.mxu0 %v10959_v9  ;;  %v6531_v62 = vld [vmem:[#allocation10 + $0x5e0] sm:$0xff]  ;;  %v6525_v7 = vld [vmem:[#allocation10 + $0x5b0] sm:$0xff] }
 0xd1b   : > { %v6533_v9 = vld [vmem:[#allocation10 + $0x5f0] sm:$0xff]  ;;  %v10913_v21 = vpack.c.bf16 %v6531_v62, %v6523_v13  ;;  %v10991_v13 = vpack.c.bf16 %v6598_v58, %v6590_v32  ;;  %v6595_v62 = vld [vmem:[#allocation10 + $0x7e0] sm:$0xff]  ;;  %v7075_v32 = vld [vmem:[#allocation10 + $0x9d8] sm:$0xff] }
 0xd1c   : > { %v10977_v36 = vpack.c.bf16 %v6533_v9, %v6525_v7  ;;  %v7064_v58 = vld [vmem:[#allocation10 + $0x980] sm:$0xff] }
 0xd1d   : > { %10898 = vmatpush1.bf16.msra.mxu1 %v10897_v23  ;;  %10962 = vmatpush1.bf16.msra.mxu0 %v10961_v25  ;;  %v6539_v23 = vld [vmem:[#allocation10 + $0x620] sm:$0xff] }
 0xd1e   : > { %10900 = vmatprep.subr.bf16.mxu1 %v10899_v28  ;;  %10964 = vmatprep.subr.bf16.mxu0 %v10963_v29  ;;  %v6547_v25 = vld [vmem:[#allocation10 + $0x660] sm:$0xff]  ;;  %v6541_v28 = vld [vmem:[#allocation10 + $0x630] sm:$0xff] }
 0xd1f   : > { %v6549_v29 = vld [vmem:[#allocation10 + $0x670] sm:$0xff]  ;;  %v10917_v10 = vpack.c.bf16 %v6547_v25, %v6539_v23  ;;  %v7016_v23 = vld [vmem:[#allocation10 + $0x800] sm:$0xff] }
 0xd20   : > { %v10981_v35 = vpack.c.bf16 %v6549_v29, %v6541_v28  ;;  %v7024_v25 = vld [vmem:[#allocation10 + $0x840] sm:$0xff]  ;;  %v7033_v29 = vld [vmem:[#allocation10 + $0x888] sm:$0xff] }
 0xd21   : > { %10902 = vmatpush1.bf16.msra.mxu1 %v10901_v26  ;;  %10966 = vmatpush1.bf16.msra.mxu0 %v10965_v55  ;;  %v6555_v26 = vld [vmem:[#allocation10 + $0x6a0] sm:$0xff] }
 0xd22   : > { %10904 = vmatprep.subr.bf16.mxu1 %v10903_v41  ;;  %10968 = vmatprep.subr.bf16.mxu0 %v10967_v19  ;;  %v6563_v55 = vld [vmem:[#allocation10 + $0x6e0] sm:$0xff]  ;;  %v6557_v41 = vld [vmem:[#allocation10 + $0x6b0] sm:$0xff] }
 0xd23   : > { %v6565_v19 = vld [vmem:[#allocation10 + $0x6f0] sm:$0xff]  ;;  %v10921_v50 = vpack.c.bf16 %v6563_v55, %v6555_v26  ;;  %v7120_v18 = vld [vmem:[#allocation10 + $0xb40] sm:$0xff] }
 0xd24   : > { %v10985_v8 = vpack.c.bf16 %v6565_v19, %v6557_v41  ;;  %v7034_v55 = vld [vmem:[#allocation10 + $0x890] sm:$0xff]  ;;  %v7057_v19 = vld [vmem:[#allocation10 + $0x948] sm:$0xff] }
 0xd25   : > { %10906 = vmatpush1.bf16.msra.mxu1 %v10905_v42  ;;  %10970 = vmatpush1.bf16.msra.mxu0 %v10969_v11  ;;  %v6571_v42 = vld [vmem:[#allocation10 + $0x720] sm:$0xff] }
 0xd26   : > { %10908 = vmatprep.subr.bf16.mxu1 %v10907_v33  ;;  %10972 = vmatprep.subr.bf16.mxu0 %v10971_v20  ;;  %v6579_v11 = vld [vmem:[#allocation10 + $0x760] sm:$0xff]  ;;  %v6573_v33 = vld [vmem:[#allocation10 + $0x730] sm:$0xff] }
 0xd27   : > { %v6581_v20 = vld [vmem:[#allocation10 + $0x770] sm:$0xff]  ;;  %v10925_v61 = vpack.c.bf16 %v6579_v11, %v6571_v42 }
 0xd28   : > { %v10989_v60 = vpack.c.bf16 %v6581_v20, %v6573_v33  ;;  %v7050_v42 = vld [vmem:[#allocation10 + $0x910] sm:$0xff]  ;;  %v7073_v33 = vld [vmem:[#allocation10 + $0x9c8] sm:$0xff] }
 0xd29   : > { %10910 = vmatpush1.bf16.msra.mxu1 %v10909_v52  ;;  %10974 = vmatpush1.bf16.msra.mxu0 %v10973_v17  ;;  %v6587_v52 = vld [vmem:[#allocation10 + $0x7a0] sm:$0xff]  ;;  %v10927_v17 = vpack.c.bf16 %v6596_v57, %v6588_v56  ;;  %v7067_v57 = vld [vmem:[#allocation10 + $0x998] sm:$0xff] }
 0xd2a   : > { %10912 = vmatprep.subr.bf16.mxu1 %v10911_v0  ;;  %10976 = vmatprep.subr.bf16.mxu0 %v10975_v1  ;;  %v6589_v0 = vld [vmem:[#allocation10 + $0x7b0] sm:$0xff]  ;;  %v10929_v7 = vpack.c.bf16 %v6595_v62, %v6587_v52  ;;  %v7081_v62 = vld [vmem:[#allocation10 + $0xa08] sm:$0xff] }
 0xd2b   : > { %v6597_v1 = vld [vmem:[#allocation10 + $0x7f0] sm:$0xff] }
 0xd2c   : > { %v10993_v9 = vpack.c.bf16 %v6597_v1, %v6589_v0  ;;  %v7066_v52 = vld [vmem:[#allocation10 + $0x990] sm:$0xff]  ;;  %v7089_v0 = vld [vmem:[#allocation10 + $0xa48] sm:$0xff]  ;;  %v7083_v1 = vld [vmem:[#allocation10 + $0xa18] sm:$0xff] }
 0xd2d   : > { %10914 = vmatpush1.bf16.msra.mxu1 %v10913_v21  ;;  %10978 = vmatpush1.bf16.msra.mxu0 %v10977_v36  ;;  %v7027_v21 = vld [vmem:[#allocation10 + $0x858] sm:$0xff] }
 0xd2e   : > { %10916 = vmatprep.subr.bf16.mxu1 %v10915_v22  ;;  %10980 = vmatprep.subr.bf16.mxu0 %v10979_v27  ;;  %v11059_v36 = vpack.c.bf16 %v7027_v21, %v7019_v15  ;;  %v7018_v22 = vld [vmem:[#allocation10 + $0x810] sm:$0xff]  ;;  %v7088_v15 = vld [vmem:[#allocation10 + $0xa40] sm:$0xff] }
 0xd2f   : > { %v7026_v27 = vld [vmem:[#allocation10 + $0x850] sm:$0xff] }
 0xd30   : > { %v11061_v28 = vpack.c.bf16 %v7026_v27, %v7018_v22  ;;  %v7082_v21 = vld [vmem:[#allocation10 + $0xa10] sm:$0xff]  ;;  %v7099_v22 = vld [vmem:[#allocation10 + $0xa98] sm:$0xff]  ;;  %v11013_v27 = vpack.c.bf16 %v7088_v15, %v7080_v14  ;;  %v7161_v15 = vld [vmem:[#allocation10 + $0xc88] sm:$0xff] }
 0xd31   : > { %10918 = vmatpush1.bf16.msra.mxu1 %v10917_v10  ;;  %10982 = vmatpush1.bf16.msra.mxu0 %v10981_v35  ;;  %v7040_v10 = vld [vmem:[#allocation10 + $0x8c0] sm:$0xff]  ;;  %v11063_v35 = vpack.c.bf16 %v7043_v38, %v7035_v37  ;;  %v7154_v14 = vld [vmem:[#allocation10 + $0xc50] sm:$0xff] }
 0xd32   : > { %10920 = vmatprep.subr.bf16.mxu1 %v10919_v40  ;;  %10984 = vmatprep.subr.bf16.mxu0 %v10983_v63  ;;  %v11001_v26 = vpack.c.bf16 %v7040_v10, %v7032_v49  ;;  %v7042_v40 = vld [vmem:[#allocation10 + $0x8d0] sm:$0xff]  ;;  %v7049_v63 = vld [vmem:[#allocation10 + $0x908] sm:$0xff]  ;;  %v7104_v37 = vld [vmem:[#allocation10 + $0xac0] sm:$0xff] }
 0xd33   : > { %v11065_v41 = vpack.c.bf16 %v7042_v40, %v7034_v55  ;;  %v11003_v48 = vpack.c.bf16 %v7057_v19, %v7049_v63  ;;  %v7106_v49 = vld [vmem:[#allocation10 + $0xad0] sm:$0xff]  ;;  %v7113_v10 = vld [vmem:[#allocation10 + $0xb08] sm:$0xff]  ;;  %v7123_v55 = vld [vmem:[#allocation10 + $0xb58] sm:$0xff] }
 0xd34   : > { %v7112_v19 = vld [vmem:[#allocation10 + $0xb00] sm:$0xff] }
 0xd35   : > { %10922 = vmatpush1.bf16.msra.mxu1 %v10921_v50  ;;  %10986 = vmatpush1.bf16.msra.mxu0 %v10985_v8  ;;  %v7048_v50 = vld [vmem:[#allocation10 + $0x900] sm:$0xff] }
 0xd36   : > { %10924 = vmatprep.subr.bf16.mxu1 %v10923_v53  ;;  %10988 = vmatprep.subr.bf16.mxu0 %v10987_v54  ;;  %v7056_v8 = vld [vmem:[#allocation10 + $0x940] sm:$0xff]  ;;  %v7058_v53 = vld [vmem:[#allocation10 + $0x950] sm:$0xff]  ;;  %v7065_v54 = vld [vmem:[#allocation10 + $0x988] sm:$0xff] }
 0xd37   : > { %v11005_v11 = vpack.c.bf16 %v7056_v8, %v7048_v50  ;;  %v11069_v20 = vpack.c.bf16 %v7058_v53, %v7050_v42  ;;  %v11007_v56 = vpack.c.bf16 %v7073_v33, %v7065_v54  ;;  %v7129_v50 = vld [vmem:[#allocation10 + $0xb88] sm:$0xff]  ;;  %v7131_v42 = vld [vmem:[#allocation10 + $0xb98] sm:$0xff]  ;;  %v11021_v53 = vpack.c.bf16 %v7120_v18, %v7112_v19  ;;  %v7186_v19 = vld [vmem:[#allocation10 + $0xd50] sm:$0xff] }
 0xd38   : > { %v7137_v8 = vld [vmem:[#allocation10 + $0xbc8] sm:$0xff] }
 0xd39   : > { %10926 = vmatpush1.bf16.msra.mxu1 %v10925_v61  ;;  %10990 = vmatpush1.bf16.msra.mxu0 %v10989_v60  ;;  %v11071_v61 = vpack.c.bf16 %v7075_v32, %v7067_v57  ;;  %v7072_v60 = vld [vmem:[#allocation10 + $0x9c0] sm:$0xff]  ;;  %v11023_v33 = vpack.c.bf16 %v7137_v8, %v7129_v50  ;;  %v7130_v57 = vld [vmem:[#allocation10 + $0xb90] sm:$0xff]  ;;  %v7193_v18 = vld [vmem:[#allocation10 + $0xd88] sm:$0xff] }
 0xd3a   : > { %10928 = vmatprep.subr.bf16.mxu1 %v10927_v17  ;;  %10992 = vmatprep.subr.bf16.mxu0 %v10991_v13  ;;  %v7074_v17 = vld [vmem:[#allocation10 + $0x9d0] sm:$0xff]  ;;  %v11009_v13 = vpack.c.bf16 %v7072_v60, %v7064_v58  ;;  %v7153_v60 = vld [vmem:[#allocation10 + $0xc48] sm:$0xff] }
 0xd3b   : > { %v7138_v58 = vld [vmem:[#allocation10 + $0xbd0] sm:$0xff] }
 0xd3d   : > { %10930 = vmatpush1.bf16.msra.mxu1 %v10929_v7  ;;  %10994 = vmatpush1.bf16.msra.mxu0 %v10993_v9  ;;  %v11073_v7 = vpack.c.bf16 %v7074_v17, %v7066_v52  ;;  %v11011_v9 = vpack.c.bf16 %v7089_v0, %v7081_v62  ;;  %v7147_v52 = vld [vmem:[#allocation10 + $0xc18] sm:$0xff]  ;;  %v11089_v62 = vpack.c.bf16 %v7138_v58, %v7130_v57  ;;  %v7217_v57 = vld [vmem:[#allocation10 + $0xe48] sm:$0xff] }
 0xd3e   : > { %9318 = vmatprep.subr.msk.mxu1 %vm454_vm1, %v13001_v39  ;;  %10996 = vmatprep.subr.bf16.mxu0 %v10995_v16  ;;  %v11075_v16 = vpack.c.bf16 %v7091_v51, %v7083_v1  ;;  %v7155_v17 = vld [vmem:[#allocation10 + $0xc58] sm:$0xff]  ;;  %v7144_v1 = vld [vmem:[#allocation10 + $0xc00] sm:$0xff] }
 0xd3f   : > { %v11091_v51 = vpack.c.bf16 %v7155_v17, %v7147_v52  ;;  %v7219_v58 = vld [vmem:[#allocation10 + $0xe58] sm:$0xff]  ;;  %v7208_v17 = vld [vmem:[#allocation10 + $0xe00] sm:$0xff] }
 0xd40   : > { %6806 = vmatmul.mubr.f32.vlgmr.msra.gmra.mrb[58].mxu1 %v13009_v34  ;;  %6877 = vmatmul.mubr.f32.vlgmr.msra.gmra.mrb[36].mxu0 %v13009_v34  ;;  %v10997_v34 = vpack.c.bf16 %v7024_v25, %v7016_v23  ;;  %v7097_v23 = vld [vmem:[#allocation10 + $0xa88] sm:$0xff] }
 0xd41   : > { %9319 = vmatpush1.msk.msra.mxu1 %vm454_vm1, %v12999_v2  ;;  %7008 = vmatprep.mubr.f32.mxu1 %v12196_v3  ;;  %v7105_v25 = vld [vmem:[#allocation10 + $0xac8] sm:$0xff] }
 0xd42   : > { %11060 = vmatprep.subr.bf16.mxu1 %v11059_v36  ;;  %10998 = vmatpush1.bf16.msra.mxu0 %v10997_v34  ;;  %v7090_v36 = vld [vmem:[#allocation10 + $0xa50] sm:$0xff]  ;;  %v7107_v34 = vld [vmem:[#allocation10 + $0xad8] sm:$0xff] }
 0xd43   : > { %v11079_v38 = vpack.c.bf16 %v7107_v34, %v7099_v22  ;;  %v7160_v34 = vld [vmem:[#allocation10 + $0xc80] sm:$0xff] }
 0xd44   : > { %9320 = vmatmul.mubr.msk.f32.vlgmr.msra.gmra.mrb[60].mxu1 %vm6263_vm8, %v12499_v31  ;;  %v10999_v31 = vpack.c.bf16 %v7041_v30, %v7033_v29  ;;  %v11015_v29 = vpack.c.bf16 %v7105_v25, %v7097_v23  ;;  %v7096_v30 = vld [vmem:[#allocation10 + $0xa80] sm:$0xff] }
 0xd45   : > { %11062 = vmatpush1.bf16.msra.mxu1 %v11061_v28  ;;  %v11077_v28 = vpack.c.bf16 %v7090_v36, %v7082_v21  ;;  %v11017_v40 = vpack.c.bf16 %v7104_v37, %v7096_v30  ;;  %v7163_v21 = vld [vmem:[#allocation10 + $0xc98] sm:$0xff]  ;;  %v7170_v30 = vld [vmem:[#allocation10 + $0xcd0] sm:$0xff]  ;;  %v7177_v37 = vld [vmem:[#allocation10 + $0xd08] sm:$0xff] }
 0xd46   : > { %11000 = vmatprep.subr.bf16.mxu0 %v10999_v31  ;;  %11064 = vmatprep.subr.bf16.mxu1 %v11063_v35  ;;  %v7098_v31 = vld [vmem:[#allocation10 + $0xa90] sm:$0xff]  ;;  %v7121_v35 = vld [vmem:[#allocation10 + $0xb48] sm:$0xff]  ;;  %v7171_v36 = vld [vmem:[#allocation10 + $0xcd8] sm:$0xff] }
 0xd47   : > { %11002 = vmatpush1.bf16.msra.mxu0 %v11001_v26  ;;  %v7115_v26 = vld [vmem:[#allocation10 + $0xb18] sm:$0xff]  ;;  %v11081_v63 = vpack.c.bf16 %v7106_v49, %v7098_v31  ;;  %v7185_v31 = vld [vmem:[#allocation10 + $0xd48] sm:$0xff] }
 0xd48   : > { %11004 = vmatprep.subr.bf16.mxu0 %v11003_v48  ;;  %v11083_v48 = vpack.c.bf16 %v7123_v55, %v7115_v26  ;;  %v7187_v49 = vld [vmem:[#allocation10 + $0xd58] sm:$0xff]  ;;  %v11035_v26 = vpack.c.bf16 %v7185_v31, %v7177_v37  ;;  %v7176_v55 = vld [vmem:[#allocation10 + $0xd00] sm:$0xff] }
 0xd49   : > { %11066 = vmatpush1.bf16.msra.mxu1 %v11065_v41  ;;  %v11019_v41 = vpack.c.bf16 %v7121_v35, %v7113_v10 }
 0xd4a   : > { %11068 = vmatprep.subr.bf16.mxu1 %v11067_v45  ;;  %v7122_v45 = vld [vmem:[#allocation10 + $0xb50] sm:$0xff] }
 0xd4b   : > { %11006 = vmatpush1.bf16.msra.mxu0 %v11005_v11  ;;  %v7139_v11 = vld [vmem:[#allocation10 + $0xbd8] sm:$0xff]  ;;  %v11085_v54 = vpack.c.bf16 %v7122_v45, %v7114_v47  ;;  %v7201_v47 = vld [vmem:[#allocation10 + $0xdc8] sm:$0xff] }
 0xd4c   : > { %11008 = vmatprep.subr.bf16.mxu0 %v11007_v56  ;;  %v7136_v56 = vld [vmem:[#allocation10 + $0xbc0] sm:$0xff]  ;;  %v11087_v32 = vpack.c.bf16 %v7139_v11, %v7131_v42  ;;  %v7203_v45 = vld [vmem:[#allocation10 + $0xdd8] sm:$0xff]  ;;  %v11039_v42 = vpack.c.bf16 %v7201_v47, %v7193_v18 }
 0xd4d   : > { %11070 = vmatpush1.bf16.msra.mxu1 %v11069_v20  ;;  %v7128_v20 = vld [vmem:[#allocation10 + $0xb80] sm:$0xff]  ;;  %v7259_v18 = vld [vmem:[#allocation10 + $0xf98] sm:$0xff] }
 0xd4e   : > { %11072 = vmatprep.subr.bf16.mxu1 %v11071_v61  ;;  %v7145_v61 = vld [vmem:[#allocation10 + $0xc08] sm:$0xff]  ;;  %v7192_v11 = vld [vmem:[#allocation10 + $0xd80] sm:$0xff] }
 0xd4f   : > { %11010 = vmatpush1.bf16.msra.mxu0 %v11009_v13  ;;  %v11025_v13 = vpack.c.bf16 %v7136_v56, %v7128_v20  ;;  %v11027_v0 = vpack.c.bf16 %v7153_v60, %v7145_v61  ;;  %v7202_v20 = vld [vmem:[#allocation10 + $0xdd0] sm:$0xff]  ;;  %v7209_v56 = vld [vmem:[#allocation10 + $0xe08] sm:$0xff] }
 0xd50   : > { %11012 = vmatprep.subr.bf16.mxu0 %v11011_v9  ;;  %v7146_v9 = vld [vmem:[#allocation10 + $0xc10] sm:$0xff]  ;;  %v11043_v52 = vpack.c.bf16 %v7217_v57, %v7209_v56  ;;  %v7023_v57 = vld [vmem:[#allocation10 + $0x838] sm:$0xff] }
 0xd51   : > { %11074 = vmatpush1.bf16.msra.mxu1 %v11073_v7  ;;  %v7152_v7 = vld [vmem:[#allocation10 + $0xc40] sm:$0xff]  ;;  %v11093_v25 = vpack.c.bf16 %v7154_v14, %v7146_v9  ;;  %v7233_v9 = vld [vmem:[#allocation10 + $0xec8] sm:$0xff]  ;;  %v7235_v14 = vld [vmem:[#allocation10 + $0xed8] sm:$0xff] }
 0xd52   : > { %11076 = vmatprep.subr.bf16.mxu1 %v11075_v16  ;;  %v7169_v16 = vld [vmem:[#allocation10 + $0xcc8] sm:$0xff]  ;;  %v11029_v23 = vpack.c.bf16 %v7152_v7, %v7144_v1  ;;  %v7218_v1 = vld [vmem:[#allocation10 + $0xe50] sm:$0xff] }
 0xd53   : > { %11014 = vmatpush1.bf16.msra.mxu0 %v11013_v27  ;;  %v11031_v22 = vpack.c.bf16 %v7169_v16, %v7161_v15  ;;  %v7168_v27 = vld [vmem:[#allocation10 + $0xcc0] sm:$0xff]  ;;  %v7225_v7 = vld [vmem:[#allocation10 + $0xe88] sm:$0xff] }
 0xd54   : > { %11016 = vmatprep.subr.bf16.mxu0 %v11015_v29  ;;  %v11095_v29 = vpack.c.bf16 %v7171_v36, %v7163_v21  ;;  %v11033_v10 = vpack.c.bf16 %v7168_v27, %v7160_v34  ;;  %v11047_v21 = vpack.c.bf16 %v7233_v9, %v7225_v7  ;;  %v7224_v36 = vld [vmem:[#allocation10 + $0xe80] sm:$0xff]  ;;  %v7234_v34 = vld [vmem:[#allocation10 + $0xed0] sm:$0xff]  ;;  %v7241_v27 = vld [vmem:[#allocation10 + $0xf08] sm:$0xff] }
 0xd55   : > { %11078 = vmatpush1.bf16.msra.mxu1 %v11077_v28  ;;  %v7162_v28 = vld [vmem:[#allocation10 + $0xc90] sm:$0xff] }
 0xd56   : > { %11080 = vmatprep.subr.bf16.mxu1 %v11079_v38  ;;  %v7179_v38 = vld [vmem:[#allocation10 + $0xd18] sm:$0xff]  ;;  %v11097_v35 = vpack.c.bf16 %v7170_v30, %v7162_v28  ;;  %v7249_v28 = vld [vmem:[#allocation10 + $0xf48] sm:$0xff] }
 0xd57   : > { %11018 = vmatpush1.bf16.msra.mxu0 %v11017_v40  ;;  %v7184_v40 = vld [vmem:[#allocation10 + $0xd40] sm:$0xff]  ;;  %v7251_v30 = vld [vmem:[#allocation10 + $0xf58] sm:$0xff] }
 0xd58   : > { %11020 = vmatprep.subr.bf16.mxu0 %v11019_v41  ;;  %v11099_v41 = vpack.c.bf16 %v7187_v49, %v7179_v38  ;;  %v11037_v50 = vpack.c.bf16 %v7184_v40, %v7176_v55  ;;  %v11051_v38 = vpack.c.bf16 %v7249_v28, %v7241_v27  ;;  %v7240_v49 = vld [vmem:[#allocation10 + $0xf00] sm:$0xff]  ;;  %v7250_v55 = vld [vmem:[#allocation10 + $0xf50] sm:$0xff]  ;;  %v7037_v28 = vld [vmem:[#allocation10 + $0x8a8] sm:$0xff] }
 0xd59   : > { %11082 = vmatpush1.bf16.msra.mxu1 %v11081_v63  ;;  %v7178_v63 = vld [vmem:[#allocation10 + $0xd10] sm:$0xff] }
 0xd5a   : > { %11084 = vmatprep.subr.bf16.mxu1 %v11083_v48  ;;  %v7195_v48 = vld [vmem:[#allocation10 + $0xd98] sm:$0xff]  ;;  %v11101_v8 = vpack.c.bf16 %v7186_v19, %v7178_v63  ;;  %v7265_v19 = vld [vmem:[#allocation10 + $0xfc8] sm:$0xff]  ;;  %v7030_v27 = vld [vmem:[#allocation10 + $0x870] sm:$0xff] }
 0xd5b   : > { %11022 = vmatpush1.bf16.msra.mxu0 %v11021_v53  ;;  %v7200_v53 = vld [vmem:[#allocation10 + $0xdc0] sm:$0xff] }
 0xd5c   : > { %11024 = vmatprep.subr.bf16.mxu0 %v11023_v33  ;;  %v11103_v33 = vpack.c.bf16 %v7203_v45, %v7195_v48  ;;  %v11041_v61 = vpack.c.bf16 %v7200_v53, %v7192_v11  ;;  %v7267_v48 = vld [vmem:[#allocation10 + $0xfd8] sm:$0xff]  ;;  %v7256_v45 = vld [vmem:[#allocation10 + $0xf80] sm:$0xff]  ;;  %v7258_v11 = vld [vmem:[#allocation10 + $0xf90] sm:$0xff] }
 0xd5d   : > { %11086 = vmatpush1.bf16.msra.mxu1 %v11085_v54  ;;  %v7194_v54 = vld [vmem:[#allocation10 + $0xd90] sm:$0xff] }
 0xd5e   : > { %11088 = vmatprep.subr.bf16.mxu1 %v11087_v32  ;;  %v7211_v32 = vld [vmem:[#allocation10 + $0xe18] sm:$0xff]  ;;  %v11105_v60 = vpack.c.bf16 %v7202_v20, %v7194_v54  ;;  %v7266_v53 = vld [vmem:[#allocation10 + $0xfd0] sm:$0xff]  ;;  %v7029_v20 = vld [vmem:[#allocation10 + $0x868] sm:$0xff] }
 0xd5f   : > { %11026 = vmatpush1.bf16.msra.mxu0 %v11025_v13  ;;  %v7216_v13 = vld [vmem:[#allocation10 + $0xe40] sm:$0xff]  ;;  %v11121_v54 = vpack.c.bf16 %v7266_v53, %v7258_v11  ;;  %v7063_v11 = vld [vmem:[#allocation10 + $0x978] sm:$0xff] }
 0xd60   : > { %11028 = vmatprep.subr.bf16.mxu0 %v11027_v0  ;;  %v11107_v0 = vpack.c.bf16 %v7219_v58, %v7211_v32  ;;  %v11045_v15 = vpack.c.bf16 %v7216_v13, %v7208_v17  ;;  %v7031_v32 = vld [vmem:[#allocation10 + $0x878] sm:$0xff] }
 0xd61   : > { %11090 = vmatpush1.bf16.msra.mxu1 %v11089_v62  ;;  %v7210_v62 = vld [vmem:[#allocation10 + $0xe10] sm:$0xff]  ;;  %v11187_v58 = vpack.c.bf16 %v7031_v32, %v7023_v57  ;;  %v7060_v57 = vld [vmem:[#allocation10 + $0x960] sm:$0xff] }
 0xd62   : > { %11092 = vmatprep.subr.bf16.mxu1 %v11091_v51  ;;  %v7227_v51 = vld [vmem:[#allocation10 + $0xe98] sm:$0xff]  ;;  %v11109_v16 = vpack.c.bf16 %v7218_v1, %v7210_v62 }
 0xd63   : > { %11030 = vmatpush1.bf16.msra.mxu0 %v11029_v23  ;;  %v7232_v23 = vld [vmem:[#allocation10 + $0xec0] sm:$0xff] }
 0xd64   : > { %11032 = vmatprep.subr.bf16.mxu0 %v11031_v22  ;;  %v11111_v22 = vpack.c.bf16 %v7235_v14, %v7227_v51  ;;  %v11049_v37 = vpack.c.bf16 %v7232_v23, %v7224_v36  ;;  %v7020_v36 = vld [vmem:[#allocation10 + $0x820] sm:$0xff] }
 0xd65   : > { %11094 = vmatpush1.bf16.msra.mxu1 %v11093_v25  ;;  %v7226_v25 = vld [vmem:[#allocation10 + $0xe90] sm:$0xff]  ;;  %v7028_v23 = vld [vmem:[#allocation10 + $0x860] sm:$0xff] }
 0xd66   : > { %11096 = vmatprep.subr.bf16.mxu1 %v11095_v29  ;;  %v7243_v29 = vld [vmem:[#allocation10 + $0xf18] sm:$0xff]  ;;  %v11113_v31 = vpack.c.bf16 %v7234_v34, %v7226_v25  ;;  %v7022_v34 = vld [vmem:[#allocation10 + $0x830] sm:$0xff] }
 0xd67   : > { %11034 = vmatpush1.bf16.msra.mxu0 %v11033_v10  ;;  %v7248_v10 = vld [vmem:[#allocation10 + $0xf40] sm:$0xff] }
 0xd68   : > { %11036 = vmatprep.subr.bf16.mxu0 %v11035_v26  ;;  %v7242_v26 = vld [vmem:[#allocation10 + $0xf10] sm:$0xff]  ;;  %v11053_v40 = vpack.c.bf16 %v7248_v10, %v7240_v49 }
 0xd69   : > { %11098 = vmatpush1.bf16.msra.mxu1 %v11097_v35  ;;  %v11115_v35 = vpack.c.bf16 %v7251_v30, %v7243_v29  ;;  %v11117_v63 = vpack.c.bf16 %v7250_v55, %v7242_v26  ;;  %v11125_v26 = vpack.c.bf16 %v7028_v23, %v7020_v36  ;;  %v11189_v55 = vpack.c.bf16 %v7030_v27, %v7022_v34  ;;  %v7078_v36 = vld [vmem:[#allocation10 + $0x9f0] sm:$0xff]  ;;  %v7085_v23 = vld [vmem:[#allocation10 + $0xa28] sm:$0xff]  ;;  %v7095_v34 = vld [vmem:[#allocation10 + $0xa78] sm:$0xff] }
 0xd6a   : > { %11100 = vmatprep.subr.bf16.mxu1 %v11099_v41  ;;  %v7257_v41 = vld [vmem:[#allocation10 + $0xf88] sm:$0xff] }
 0xd6b   : > { %11038 = vmatpush1.bf16.msra.mxu0 %v11037_v50  ;;  %v11055_v47 = vpack.c.bf16 %v7265_v19, %v7257_v41  ;;  %v7264_v50 = vld [vmem:[#allocation10 + $0xfc0] sm:$0xff] }
 0xd6c   : > { %11040 = vmatprep.subr.bf16.mxu0 %v11039_v42  ;;  %v11057_v42 = vpack.c.bf16 %v7264_v50, %v7256_v45  ;;  %v7053_v45 = vld [vmem:[#allocation10 + $0x928] sm:$0xff] }
 0xd6d   : > { %11102 = vmatpush1.bf16.msra.mxu1 %v11101_v8  ;;  %v11119_v8 = vpack.c.bf16 %v7267_v48, %v7259_v18  ;;  %v7046_v48 = vld [vmem:[#allocation10 + $0x8f0] sm:$0xff] }
 0xd6e   : > { %11104 = vmatprep.subr.bf16.mxu1 %v11103_v33  ;;  %v7021_v33 = vld [vmem:[#allocation10 + $0x828] sm:$0xff] }
 0xd6f   : > { %11042 = vmatpush1.bf16.msra.mxu0 %v11041_v61  ;;  %v11123_v56 = vpack.c.bf16 %v7029_v20, %v7021_v33  ;;  %v12198_v61 = vmov 1966171168  }
 0xd70   : > { %11044 = vmatprep.subr.bf16.mxu0 %v11043_v52 }
 0xd71   : > { %11106 = vmatpush1.bf16.msra.mxu1 %v11105_v60  ;;  %v6896_v60 = vunpack.c.l.s4 %v12198_v61  ;;  %v7054_v61 = vld [vmem:[#allocation10 + $0x930] sm:$0xff] }
 0xd72   : > { %11108 = vmatprep.subr.bf16.mxu1 %v11107_v0 }
 0xd73   : > { %11046 = vmatpush1.bf16.msra.mxu0 %v11045_v15  ;;  %v6897_v52 = vunpack.c.0.s8 %v6896_v60  ;;  %v7062_v60 = vld [vmem:[#allocation10 + $0x970] sm:$0xff] }
 0xd74   : > { %11048 = vmatprep.subr.bf16.mxu0 %v11047_v21 }
 0xd75   : > { %11110 = vmatpush1.bf16.msra.mxu1 %v11109_v16  ;;  %v13023_v62 = vsub.s32 %v6897_v52, %v12463_v4  ;;  %v7069_v52 = vld [vmem:[#allocation10 + $0x9a8] sm:$0xff] }
 0xd76   : > { %11112 = vmatprep.subr.bf16.mxu1 %v11111_v22 }
 0xd77   : > { %11050 = vmatpush1.bf16.msra.mxu0 %v11049_v37  ;;  %v7045_v37 = vld [vmem:[#allocation10 + $0x8e8] sm:$0xff] }
 0xd78   : > { %11052 = vmatprep.subr.bf16.mxu0 %v11051_v38  ;;  %v7047_v38 = vld [vmem:[#allocation10 + $0x8f8] sm:$0xff]  ;;  %v11127_v19 = vpack.c.bf16 %v7045_v37, %v7037_v28 }
 0xd79   : > { %11114 = vmatpush1.bf16.msra.mxu1 %v11113_v31  ;;  %v7039_v31 = vld [vmem:[#allocation10 + $0x8b8] sm:$0xff] }
 0xd7a   : > { %11116 = vmatprep.subr.bf16.mxu1 %v11115_v35  ;;  %v11191_v18 = vpack.c.bf16 %v7047_v38, %v7039_v31  ;;  %v7086_v38 = vld [vmem:[#allocation10 + $0xa30] sm:$0xff] }
 0xd7b   : > { %11054 = vmatpush1.bf16.msra.mxu0 %v11053_v40  ;;  %v7036_v40 = vld [vmem:[#allocation10 + $0x8a0] sm:$0xff] }
 0xd7c   : > { %11056 = vmatprep.subr.bf16.mxu0 %v11055_v47  ;;  %v7038_v47 = vld [vmem:[#allocation10 + $0x8b0] sm:$0xff] }
 0xd7d   : > { %11118 = vmatpush1.bf16.msra.mxu1 %v11117_v63  ;;  %v7044_v63 = vld [vmem:[#allocation10 + $0x8e0] sm:$0xff]  ;;  %v11193_v20 = vpack.c.bf16 %v7046_v48, %v7038_v47 }
 0xd7e   : > { %11120 = vmatprep.subr.bf16.mxu1 %v11119_v8  ;;  %v7061_v8 = vld [vmem:[#allocation10 + $0x968] sm:$0xff]  ;;  %v11129_v53 = vpack.c.bf16 %v7044_v63, %v7036_v40  ;;  %v7111_v40 = vld [vmem:[#allocation10 + $0xaf8] sm:$0xff] }
 0xd7f   : > { %11058 = vmatpush1.bf16.msra.mxu0 %v11057_v42  ;;  %v7055_v42 = vld [vmem:[#allocation10 + $0x938] sm:$0xff]  ;;  %v11131_v32 = vpack.c.bf16 %v7061_v8, %v7053_v45  ;;  %v7102_v45 = vld [vmem:[#allocation10 + $0xab0] sm:$0xff]  ;;  %v7117_v8 = vld [vmem:[#allocation10 + $0xb28] sm:$0xff] }
 0xd80   : > { %11124 = vmatprep.subr.bf16.mxu0 %v11123_v56  ;;  %v7052_v56 = vld [vmem:[#allocation10 + $0x920] sm:$0xff] }
 0xd81   : > { %11122 = vmatpush1.bf16.msra.mxu1 %v11121_v54 }
 0xd82   : > { %11188 = vmatprep.subr.bf16.mxu1 %v11187_v58  ;;  %v11195_v58 = vpack.c.bf16 %v7063_v11, %v7055_v42  ;;  %v7125_v42 = vld [vmem:[#allocation10 + $0xb68] sm:$0xff]  ;;  %v7119_v11 = vld [vmem:[#allocation10 + $0xb38] sm:$0xff] }
 0xdd3   : > { %v6665_v17 = vpop.f32.mrb[56].mxu1  ;;  %v6736_v13 = vpop.f32.mrb[34].mxu0 }
 0xdd4   : > { %v6667_v0 = vpop.f32.mrb[57].mxu1  ;;  %v6738_v1 = vpop.f32.mrb[35].mxu0 }
 0xdd5   : > { %v6891_v7 = vcombine.low %v6665_v17, %v6667_v0  ;;  %v6892_v9 = vcombine.low %v6736_v13, %v6738_v1  ;;  %v7077_v13 = vld [vmem:[#allocation10 + $0x9e8] sm:$0xff]  ;;  %v7071_v0 = vld [vmem:[#allocation10 + $0x9b8] sm:$0xff] }
 0xdd6   : > { %v7079_v1 = vld [vmem:[#allocation10 + $0x9f8] sm:$0xff] }
 0xdd7   : > { %v6901_v51 = vrot.slane %v6891_v7, %v13023_v62  ;;  %v6908_v14 = vrot.slane %v6892_v9, %v13023_v62  ;;  %v11133_v7 = vpack.c.bf16 %v7060_v57, %v7052_v56  ;;  %v11197_v9 = vpack.c.bf16 %v7062_v60, %v7054_v61  ;;  %v7116_v57 = vld [vmem:[#allocation10 + $0xb20] sm:$0xff]  ;;  %v7118_v60 = vld [vmem:[#allocation10 + $0xb30] sm:$0xff] }
 0xdd9   : > { %v6923_v15 = vcombine.low %v6901_v51, %v6908_v14  ;;  %v7068_v51 = vld [vmem:[#allocation10 + $0x9a0] sm:$0xff] }
 0xdda   : > { %v7076_v14 = vld [vmem:[#allocation10 + $0x9e0] sm:$0xff] }
 0xddb   : > { %v13034_v54 = vrot.slane %v6923_v15, %v13023_v62  ;;  %v11135_v15 = vpack.c.bf16 %v7077_v13, %v7069_v52  ;;  %v11137_v27 = vpack.c.bf16 %v7076_v14, %v7068_v51  ;;  %v7126_v52 = vld [vmem:[#allocation10 + $0xb70] sm:$0xff]  ;;  %v7133_v13 = vld [vmem:[#allocation10 + $0xba8] sm:$0xff]  ;;  %v7132_v14 = vld [vmem:[#allocation10 + $0xba0] sm:$0xff] }
 0xddc   : > { %v11213_v51 = vpack.c.bf16 %v7126_v52, %v7118_v60  ;;  %v7182_v52 = vld [vmem:[#allocation10 + $0xd30] sm:$0xff] }
 0xe13   : > { %v6807_v16 = vpop.f32.mrb[58].mxu1  ;;  %v6878_v21 = vpop.f32.mrb[36].mxu0 }
 0xe14   : > { %v6809_v25 = vpop.f32.mrb[59].mxu1  ;;  %v6880_v22 = vpop.f32.mrb[37].mxu0 }
 0xe15   : > { %v6893_v29 = vcombine.low %v6807_v16, %v6809_v25  ;;  %v6894_v30 = vcombine.low %v6878_v21, %v6880_v22  ;;  %v11199_v16 = vpack.c.bf16 %v7079_v1, %v7071_v0  ;;  %v7070_v21 = vld [vmem:[#allocation10 + $0x9b0] sm:$0xff]  ;;  %v7093_v25 = vld [vmem:[#allocation10 + $0xa68] sm:$0xff]  ;;  %v7087_v22 = vld [vmem:[#allocation10 + $0xa38] sm:$0xff] }
 0xe16   : > { %v11201_v28 = vpack.c.bf16 %v7078_v36, %v7070_v21  ;;  %v11139_v37 = vpack.c.bf16 %v7093_v25, %v7085_v23  ;;  %v11203_v31 = vpack.c.bf16 %v7095_v34, %v7087_v22  ;;  %v7141_v0 = vld [vmem:[#allocation10 + $0xbe8] sm:$0xff]  ;;  %v7135_v1 = vld [vmem:[#allocation10 + $0xbb8] sm:$0xff]  ;;  %v7134_v36 = vld [vmem:[#allocation10 + $0xbb0] sm:$0xff] }
 0xe17   : > { %v6915_v49 = vrot.slane %v6893_v29, %v13023_v62  ;;  %v6922_v10 = vrot.slane %v6894_v30, %v13023_v62  ;;  %v13029_v35 = vpop.f32.mrb[60].mxu1  ;;  %v7084_v29 = vld [vmem:[#allocation10 + $0xa20] sm:$0xff]  ;;  %v7142_v23 = vld [vmem:[#allocation10 + $0xbf0] sm:$0xff]  ;;  %v7149_v25 = vld [vmem:[#allocation10 + $0xc28] sm:$0xff] }
 0xe18   : > { %v7012_v41 = vpop.f32.mrb[61].mxu1  ;;  %v7092_v30 = vld [vmem:[#allocation10 + $0xa60] sm:$0xff]  ;;  %v7157_v22 = vld [vmem:[#allocation10 + $0xc68] sm:$0xff]  ;;  %v7151_v34 = vld [vmem:[#allocation10 + $0xc38] sm:$0xff] }
 0xe19   : > { %v6924_v50 = vcombine.low %v6915_v49, %v6922_v10  ;;  %7336 = vmatprep.mubr.f32.mxu0 %v7012_v41  ;;  %7407 = vmatprep.mubr.f32.mxu1 %v7012_v41  ;;  %v7094_v49 = vld [vmem:[#allocation10 + $0xa70] sm:$0xff]  ;;  %v7101_v10 = vld [vmem:[#allocation10 + $0xaa8] sm:$0xff]  ;;  %v11141_v63 = vpack.c.bf16 %v7092_v30, %v7084_v29  ;;  %v11217_v29 = vpack.c.bf16 %v7142_v23, %v7134_v36  ;;  %v7148_v30 = vld [vmem:[#allocation10 + $0xc20] sm:$0xff] }
 0xe1a   : > { %7337 = vmatmul.mubr.f32.vlgmr.msra.gmra.mrb[38].mxu0 %v13029_v35  ;;  %7408 = vmatmul.mubr.f32.vlgmr.msra.gmra.mrb[62].mxu1 %v13029_v35  ;;  %v7198_v23 = vld [vmem:[#allocation10 + $0xdb0] sm:$0xff] }
 0xe1b   : > { %v13037_v33 = vrot.slane %v6924_v50, %v13023_v62  ;;  %11126 = vmatpush1.bf16.msra.mxu0 %v11125_v26  ;;  %11190 = vmatpush1.bf16.msra.mxu1 %v11189_v55  ;;  %v7109_v26 = vld [vmem:[#allocation10 + $0xae8] sm:$0xff]  ;;  %v7103_v55 = vld [vmem:[#allocation10 + $0xab8] sm:$0xff]  ;;  %v7110_v50 = vld [vmem:[#allocation10 + $0xaf0] sm:$0xff] }
 0xe1c   : > { %11128 = vmatprep.subr.bf16.mxu0 %v11127_v19  ;;  %11192 = vmatprep.subr.bf16.mxu1 %v11191_v18  ;;  %v7100_v19 = vld [vmem:[#allocation10 + $0xaa0] sm:$0xff]  ;;  %v11143_v47 = vpack.c.bf16 %v7109_v26, %v7101_v10  ;;  %v11207_v48 = vpack.c.bf16 %v7111_v40, %v7103_v55  ;;  %v11209_v56 = vpack.c.bf16 %v7110_v50, %v7102_v45  ;;  %v7158_v10 = vld [vmem:[#allocation10 + $0xc70] sm:$0xff]  ;;  %v7165_v26 = vld [vmem:[#allocation10 + $0xca8] sm:$0xff] }
 0xe1d   : > { %v6939_v17 = vcombine.low %v13034_v54, %v13037_v33  ;;  %7478 = vmatprep.mubr.f32.mxu0 %v7012_v41  ;;  %7549 = vmatprep.mubr.f32.mxu1 %v7012_v41  ;;  %v11205_v41 = vpack.c.bf16 %v7094_v49, %v7086_v38  ;;  %v7108_v18 = vld [vmem:[#allocation10 + $0xae0] sm:$0xff]  ;;  %v7150_v49 = vld [vmem:[#allocation10 + $0xc30] sm:$0xff]  ;;  %v7173_v55 = vld [vmem:[#allocation10 + $0xce8] sm:$0xff] }
 0xe1e   : > { %v7167_v40 = vld [vmem:[#allocation10 + $0xcb8] sm:$0xff]  ;;  %v7166_v50 = vld [vmem:[#allocation10 + $0xcb0] sm:$0xff] }
 0xe1f   : > { %11130 = vmatpush1.bf16.msra.mxu0 %v11129_v53  ;;  %11194 = vmatpush1.bf16.msra.mxu1 %v11193_v20  ;;  %v7127_v53 = vld [vmem:[#allocation10 + $0xb78] sm:$0xff]  ;;  %v11145_v20 = vpack.c.bf16 %v7108_v18, %v7100_v19  ;;  %v11221_v19 = vpack.c.bf16 %v7158_v10, %v7150_v49  ;;  %v7164_v18 = vld [vmem:[#allocation10 + $0xca0] sm:$0xff]  ;;  %v7214_v10 = vld [vmem:[#allocation10 + $0xe30] sm:$0xff] }
 0xe20   : > { %11132 = vmatprep.subr.bf16.mxu0 %v11131_v32  ;;  %11196 = vmatprep.subr.bf16.mxu1 %v11195_v58  ;;  %v7124_v32 = vld [vmem:[#allocation10 + $0xb60] sm:$0xff]  ;;  %v11147_v58 = vpack.c.bf16 %v7125_v42, %v7117_v8  ;;  %v11211_v61 = vpack.c.bf16 %v7127_v53, %v7119_v11  ;;  %v7174_v8 = vld [vmem:[#allocation10 + $0xcf0] sm:$0xff]  ;;  %v7181_v42 = vld [vmem:[#allocation10 + $0xd28] sm:$0xff] }
 0xe21   : > { %v7189_v11 = vld [vmem:[#allocation10 + $0xd68] sm:$0xff]  ;;  %v7183_v53 = vld [vmem:[#allocation10 + $0xd38] sm:$0xff]  ;;  %v7743_v54 = vld [vmem:[#allocation10 + $0x11b0] sm:$0xff] }
 0xe22   : > { %v7751_v33 = vld [vmem:[#allocation10 + $0x11f0] sm:$0xff] }
 0xe23   : > { %11134 = vmatpush1.bf16.msra.mxu0 %v11133_v7  ;;  %11198 = vmatpush1.bf16.msra.mxu1 %v11197_v9  ;;  %v7143_v7 = vld [vmem:[#allocation10 + $0xbf8] sm:$0xff]  ;;  %v11149_v9 = vpack.c.bf16 %v7124_v32, %v7116_v57  ;;  %v11225_v57 = vpack.c.bf16 %v7174_v8, %v7166_v50  ;;  %v7180_v32 = vld [vmem:[#allocation10 + $0xd20] sm:$0xff]  ;;  %v7230_v8 = vld [vmem:[#allocation10 + $0xeb0] sm:$0xff] }
 0xe24   : > { %11136 = vmatprep.subr.bf16.mxu0 %v11135_v15  ;;  %11200 = vmatprep.subr.bf16.mxu1 %v11199_v16  ;;  %v7140_v15 = vld [vmem:[#allocation10 + $0xbe0] sm:$0xff]  ;;  %v11151_v16 = vpack.c.bf16 %v7141_v0, %v7133_v13  ;;  %v11215_v21 = vpack.c.bf16 %v7143_v7, %v7135_v1  ;;  %v7190_v13 = vld [vmem:[#allocation10 + $0xd70] sm:$0xff]  ;;  %v7197_v0 = vld [vmem:[#allocation10 + $0xda8] sm:$0xff] }
 0xe25   : > { %v7205_v1 = vld [vmem:[#allocation10 + $0xde8] sm:$0xff]  ;;  %v7199_v7 = vld [vmem:[#allocation10 + $0xdb8] sm:$0xff] }
 0xe27   : > { %11138 = vmatpush1.bf16.msra.mxu0 %v11137_v27  ;;  %11202 = vmatpush1.bf16.msra.mxu1 %v11201_v28  ;;  %v7159_v27 = vld [vmem:[#allocation10 + $0xc78] sm:$0xff]  ;;  %v11153_v28 = vpack.c.bf16 %v7140_v15, %v7132_v14  ;;  %v11229_v14 = vpack.c.bf16 %v7190_v13, %v7182_v52  ;;  %v7196_v15 = vld [vmem:[#allocation10 + $0xda0] sm:$0xff]  ;;  %v7246_v13 = vld [vmem:[#allocation10 + $0xf30] sm:$0xff] }
 0xe28   : > { %11140 = vmatprep.subr.bf16.mxu0 %v11139_v37  ;;  %11204 = vmatprep.subr.bf16.mxu1 %v11203_v31  ;;  %v7156_v37 = vld [vmem:[#allocation10 + $0xc60] sm:$0xff]  ;;  %v11155_v31 = vpack.c.bf16 %v7157_v22, %v7149_v25  ;;  %v11219_v38 = vpack.c.bf16 %v7159_v27, %v7151_v34  ;;  %v7206_v25 = vld [vmem:[#allocation10 + $0xdf0] sm:$0xff]  ;;  %v7213_v22 = vld [vmem:[#allocation10 + $0xe28] sm:$0xff] }
 0xe29   : > { %v7221_v34 = vld [vmem:[#allocation10 + $0xe68] sm:$0xff]  ;;  %v7215_v27 = vld [vmem:[#allocation10 + $0xe38] sm:$0xff] }
 0xe2b   : > { %11142 = vmatpush1.bf16.msra.mxu0 %v11141_v63  ;;  %11206 = vmatpush1.bf16.msra.mxu1 %v11205_v41  ;;  %v7175_v63 = vld [vmem:[#allocation10 + $0xcf8] sm:$0xff]  ;;  %v11157_v41 = vpack.c.bf16 %v7156_v37, %v7148_v30  ;;  %v11233_v30 = vpack.c.bf16 %v7206_v25, %v7198_v23  ;;  %v7212_v37 = vld [vmem:[#allocation10 + $0xe20] sm:$0xff]  ;;  %v7262_v25 = vld [vmem:[#allocation10 + $0xfb0] sm:$0xff] }
 0xe2c   : > { %11144 = vmatprep.subr.bf16.mxu0 %v11143_v47  ;;  %11208 = vmatprep.subr.bf16.mxu1 %v11207_v48  ;;  %v7172_v47 = vld [vmem:[#allocation10 + $0xce0] sm:$0xff]  ;;  %v11159_v48 = vpack.c.bf16 %v7173_v55, %v7165_v26  ;;  %v11223_v45 = vpack.c.bf16 %v7175_v63, %v7167_v40  ;;  %v7222_v26 = vld [vmem:[#allocation10 + $0xe70] sm:$0xff]  ;;  %v7229_v55 = vld [vmem:[#allocation10 + $0xea8] sm:$0xff] }
 0xe2d   : > { %v7237_v40 = vld [vmem:[#allocation10 + $0xee8] sm:$0xff]  ;;  %v7231_v63 = vld [vmem:[#allocation10 + $0xeb8] sm:$0xff]  ;;  %v7268_v23 = vld [vmem:[#allocation10 + $0xfe0] sm:$0xff] }
 0xe2f   : > { %11146 = vmatpush1.bf16.msra.mxu0 %v11145_v20  ;;  %11210 = vmatpush1.bf16.msra.mxu1 %v11209_v56  ;;  %v7191_v20 = vld [vmem:[#allocation10 + $0xd78] sm:$0xff]  ;;  %v11161_v56 = vpack.c.bf16 %v7172_v47, %v7164_v18  ;;  %v11237_v18 = vpack.c.bf16 %v7222_v26, %v7214_v10  ;;  %v7228_v47 = vld [vmem:[#allocation10 + $0xea0] sm:$0xff]  ;;  %v7691_v26 = vld [vmem:[#allocation10 + $0x1010] sm:$0xff] }
 0xe30   : > { %11148 = vmatprep.subr.bf16.mxu0 %v11147_v58  ;;  %11212 = vmatprep.subr.bf16.mxu1 %v11211_v61  ;;  %v7188_v58 = vld [vmem:[#allocation10 + $0xd60] sm:$0xff]  ;;  %v11163_v61 = vpack.c.bf16 %v7189_v11, %v7181_v42  ;;  %v11227_v60 = vpack.c.bf16 %v7191_v20, %v7183_v53  ;;  %v7238_v42 = vld [vmem:[#allocation10 + $0xef0] sm:$0xff]  ;;  %v7245_v11 = vld [vmem:[#allocation10 + $0xf28] sm:$0xff] }
 0xe31   : > { %v7253_v53 = vld [vmem:[#allocation10 + $0xf68] sm:$0xff]  ;;  %v7247_v20 = vld [vmem:[#allocation10 + $0xf38] sm:$0xff]  ;;  %v7697_v10 = vld [vmem:[#allocation10 + $0x1040] sm:$0xff] }
 0xe33   : > { %11150 = vmatpush1.bf16.msra.mxu0 %v11149_v9  ;;  %11214 = vmatpush1.bf16.msra.mxu1 %v11213_v51  ;;  %v7207_v9 = vld [vmem:[#allocation10 + $0xdf8] sm:$0xff]  ;;  %v11165_v51 = vpack.c.bf16 %v7188_v58, %v7180_v32  ;;  %v11241_v32 = vpack.c.bf16 %v7238_v42, %v7230_v8  ;;  %v7244_v58 = vld [vmem:[#allocation10 + $0xf20] sm:$0xff]  ;;  %v7707_v8 = vld [vmem:[#allocation10 + $0x1090] sm:$0xff] }
 0xe34   : > { %11152 = vmatprep.subr.bf16.mxu0 %v11151_v16  ;;  %11216 = vmatprep.subr.bf16.mxu1 %v11215_v21  ;;  %v7204_v16 = vld [vmem:[#allocation10 + $0xde0] sm:$0xff]  ;;  %v11167_v21 = vpack.c.bf16 %v7205_v1, %v7197_v0  ;;  %v11231_v36 = vpack.c.bf16 %v7207_v9, %v7199_v7  ;;  %v7254_v0 = vld [vmem:[#allocation10 + $0xf70] sm:$0xff]  ;;  %v7261_v1 = vld [vmem:[#allocation10 + $0xfa8] sm:$0xff] }
 0xe35   : > { %v7269_v7 = vld [vmem:[#allocation10 + $0xfe8] sm:$0xff]  ;;  %v7263_v9 = vld [vmem:[#allocation10 + $0xfb8] sm:$0xff]  ;;  %v7715_v42 = vld [vmem:[#allocation10 + $0x10d0] sm:$0xff] }
 0xe37   : > { %11154 = vmatpush1.bf16.msra.mxu0 %v11153_v28  ;;  %11218 = vmatpush1.bf16.msra.mxu1 %v11217_v29  ;;  %v7223_v28 = vld [vmem:[#allocation10 + $0xe78] sm:$0xff]  ;;  %v11169_v29 = vpack.c.bf16 %v7204_v16, %v7196_v15  ;;  %v11245_v15 = vpack.c.bf16 %v7254_v0, %v7246_v13  ;;  %v7260_v16 = vld [vmem:[#allocation10 + $0xfa0] sm:$0xff]  ;;  %v7731_v0 = vld [vmem:[#allocation10 + $0x1150] sm:$0xff] }
 0xe38   : > { %11156 = vmatprep.subr.bf16.mxu0 %v11155_v31  ;;  %11220 = vmatprep.subr.bf16.mxu1 %v11219_v38  ;;  %v7220_v31 = vld [vmem:[#allocation10 + $0xe60] sm:$0xff]  ;;  %v11171_v38 = vpack.c.bf16 %v7221_v34, %v7213_v22  ;;  %v11235_v49 = vpack.c.bf16 %v7223_v28, %v7215_v27  ;;  %v7270_v22 = vld [vmem:[#allocation10 + $0xff0] sm:$0xff]  ;;  %v11185_v34 = vpack.c.bf16 %v7268_v23, %v7260_v16  ;;  %v7690_v28 = vld [vmem:[#allocation10 + $0x1008] sm:$0xff] }
 0xe39   : > { %v11249_v27 = vpack.c.bf16 %v7270_v22, %v7262_v25  ;;  %v7737_v16 = vld [vmem:[#allocation10 + $0x1180] sm:$0xff]  ;;  %v7739_v23 = vld [vmem:[#allocation10 + $0x1190] sm:$0xff] }
 0xe3a   : > { %v7747_v25 = vld [vmem:[#allocation10 + $0x11d0] sm:$0xff] }
 0xe3b   : > { %11158 = vmatpush1.bf16.msra.mxu0 %v11157_v41  ;;  %11222 = vmatpush1.bf16.msra.mxu1 %v11221_v19  ;;  %v7239_v41 = vld [vmem:[#allocation10 + $0xef8] sm:$0xff]  ;;  %v11173_v19 = vpack.c.bf16 %v7220_v31, %v7212_v37 }
 0xe3c   : > { %11160 = vmatprep.subr.bf16.mxu0 %v11159_v48  ;;  %11224 = vmatprep.subr.bf16.mxu1 %v11223_v45  ;;  %v7236_v48 = vld [vmem:[#allocation10 + $0xee0] sm:$0xff]  ;;  %v11175_v45 = vpack.c.bf16 %v7237_v40, %v7229_v55  ;;  %v11239_v50 = vpack.c.bf16 %v7239_v41, %v7231_v63  ;;  %v7700_v31 = vld [vmem:[#allocation10 + $0x1058] sm:$0xff]  ;;  %v7699_v55 = vld [vmem:[#allocation10 + $0x1050] sm:$0xff] }
 0xe3d   : > { %v11317_v40 = vpack.c.bf16 %v7699_v55, %v7691_v26  ;;  %v7706_v63 = vld [vmem:[#allocation10 + $0x1088] sm:$0xff]  ;;  %v7763_v26 = vld [vmem:[#allocation10 + $0x1250] sm:$0xff] }
 0xe3e   : > { %v7714_v41 = vld [vmem:[#allocation10 + $0x10c8] sm:$0xff] }
 0xe3f   : > { %11162 = vmatpush1.bf16.msra.mxu0 %v11161_v56  ;;  %11226 = vmatpush1.bf16.msra.mxu1 %v11225_v57  ;;  %v7255_v56 = vld [vmem:[#allocation10 + $0xf78] sm:$0xff]  ;;  %v11177_v57 = vpack.c.bf16 %v7236_v48, %v7228_v47  ;;  %v7705_v47 = vld [vmem:[#allocation10 + $0x1080] sm:$0xff]  ;;  %v7778_v55 = vld [vmem:[#allocation10 + $0x12c8] sm:$0xff] }
 0xe40   : > { %11164 = vmatprep.subr.bf16.mxu0 %v11163_v61  ;;  %11228 = vmatprep.subr.bf16.mxu1 %v11227_v60  ;;  %v7252_v61 = vld [vmem:[#allocation10 + $0xf60] sm:$0xff]  ;;  %v11179_v60 = vpack.c.bf16 %v7253_v53, %v7245_v11  ;;  %v11243_v52 = vpack.c.bf16 %v7255_v56, %v7247_v20  ;;  %v7722_v11 = vld [vmem:[#allocation10 + $0x1108] sm:$0xff]  ;;  %v11321_v53 = vpack.c.bf16 %v7715_v42, %v7707_v8  ;;  %v7724_v56 = vld [vmem:[#allocation10 + $0x1118] sm:$0xff] }
 0xe41   : > { %v7713_v48 = vld [vmem:[#allocation10 + $0x10c0] sm:$0xff]  ;;  %v7730_v20 = vld [vmem:[#allocation10 + $0x1148] sm:$0xff] }
 0xe42   : > { %v7786_v8 = vld [vmem:[#allocation10 + $0x1308] sm:$0xff] }
 0xe43   : > { %11166 = vmatpush1.bf16.msra.mxu0 %v11165_v51  ;;  %11230 = vmatpush1.bf16.msra.mxu1 %v11229_v14  ;;  %v7271_v51 = vld [vmem:[#allocation10 + $0xff8] sm:$0xff]  ;;  %v11181_v14 = vpack.c.bf16 %v7252_v61, %v7244_v58  ;;  %v7721_v61 = vld [vmem:[#allocation10 + $0x1100] sm:$0xff]  ;;  %v7794_v42 = vld [vmem:[#allocation10 + $0x1348] sm:$0xff] }
 0xe44   : > { %11168 = vmatprep.subr.bf16.mxu0 %v11167_v21  ;;  %11232 = vmatprep.subr.bf16.mxu1 %v11231_v36  ;;  %v11183_v21 = vpack.c.bf16 %v7269_v7, %v7261_v1  ;;  %v11247_v36 = vpack.c.bf16 %v7271_v51, %v7263_v9  ;;  %v7738_v1 = vld [vmem:[#allocation10 + $0x1188] sm:$0xff] }
 0xe45   : > { %v7746_v7 = vld [vmem:[#allocation10 + $0x11c8] sm:$0xff] }
 0xe46   : > { %v11263_v51 = vpack.c.bf16 %v7746_v7, %v7738_v1  ;;  %v7804_v1 = vld [vmem:[#allocation10 + $0x1398] sm:$0xff] }
 0xe47   : > { %11170 = vmatpush1.bf16.msra.mxu0 %v11169_v29  ;;  %11234 = vmatpush1.bf16.msra.mxu1 %v11233_v30  ;;  %v7698_v29 = vld [vmem:[#allocation10 + $0x1048] sm:$0xff]  ;;  %v7692_v30 = vld [vmem:[#allocation10 + $0x1018] sm:$0xff] }
 0xe48   : > { %11172 = vmatprep.subr.bf16.mxu0 %v11171_v38  ;;  %11236 = vmatprep.subr.bf16.mxu1 %v11235_v49  ;;  %v11251_v37 = vpack.c.bf16 %v7698_v29, %v7690_v28  ;;  %v11315_v38 = vpack.c.bf16 %v7700_v31, %v7692_v30  ;;  %v7689_v49 = vld [vmem:[#allocation10 + $0x1000] sm:$0xff]  ;;  %v7756_v28 = vld [vmem:[#allocation10 + $0x1218] sm:$0xff]  ;;  %v11329_v29 = vpack.c.bf16 %v7747_v25, %v7739_v23  ;;  %v7811_v23 = vld [vmem:[#allocation10 + $0x13d0] sm:$0xff] }
 0xe49   : > { %v7753_v31 = vld [vmem:[#allocation10 + $0x1200] sm:$0xff]  ;;  %v7812_v7 = vld [vmem:[#allocation10 + $0x13d8] sm:$0xff]  ;;  %v7818_v25 = vld [vmem:[#allocation10 + $0x1408] sm:$0xff] }
 0xe4b   : > { %11174 = vmatpush1.bf16.msra.mxu0 %v11173_v19  ;;  %11238 = vmatpush1.bf16.msra.mxu1 %v11237_v18  ;;  %v7708_v19 = vld [vmem:[#allocation10 + $0x1098] sm:$0xff] }
 0xe4c   : > { %11176 = vmatprep.subr.bf16.mxu0 %v11175_v45  ;;  %11240 = vmatprep.subr.bf16.mxu1 %v11239_v50  ;;  %v7716_v18 = vld [vmem:[#allocation10 + $0x10d8] sm:$0xff]  ;;  %v11257_v50 = vpack.c.bf16 %v7713_v48, %v7705_v47  ;;  %v7777_v47 = vld [vmem:[#allocation10 + $0x12c0] sm:$0xff]  ;;  %v7771_v48 = vld [vmem:[#allocation10 + $0x1290] sm:$0xff] }
 0xe4d   : > { %v11319_v45 = vpack.c.bf16 %v7716_v18, %v7708_v19  ;;  %v7769_v18 = vld [vmem:[#allocation10 + $0x1280] sm:$0xff] }
 0xe4f   : > { %11178 = vmatpush1.bf16.msra.mxu0 %v11177_v57  ;;  %11242 = vmatpush1.bf16.msra.mxu1 %v11241_v32  ;;  %v7732_v57 = vld [vmem:[#allocation10 + $0x1158] sm:$0xff]  ;;  %v11259_v32 = vpack.c.bf16 %v7730_v20, %v7722_v11  ;;  %v11273_v20 = vpack.c.bf16 %v7777_v47, %v7769_v18  ;;  %v7841_v18 = vld [vmem:[#allocation10 + $0x14c0] sm:$0xff]  ;;  %v7835_v47 = vld [vmem:[#allocation10 + $0x1490] sm:$0xff] }
 0xe50   : > { %11180 = vmatprep.subr.bf16.mxu0 %v11179_v60  ;;  %11244 = vmatprep.subr.bf16.mxu1 %v11243_v52  ;;  %v11323_v58 = vpack.c.bf16 %v7732_v57, %v7724_v56  ;;  %v7729_v60 = vld [vmem:[#allocation10 + $0x1140] sm:$0xff]  ;;  %v7723_v52 = vld [vmem:[#allocation10 + $0x1110] sm:$0xff]  ;;  %v7788_v11 = vld [vmem:[#allocation10 + $0x1318] sm:$0xff]  ;;  %v11275_v57 = vpack.c.bf16 %v7794_v42, %v7786_v8 }
 0xe51   : > { %v11261_v13 = vpack.c.bf16 %v7729_v60, %v7721_v61  ;;  %v11325_v9 = vpack.c.bf16 %v7731_v0, %v7723_v52  ;;  %v7787_v61 = vld [vmem:[#allocation10 + $0x1310] sm:$0xff]  ;;  %v7810_v0 = vld [vmem:[#allocation10 + $0x13c8] sm:$0xff]  ;;  %v7852_v42 = vld [vmem:[#allocation10 + $0x1518] sm:$0xff] }
 0xe52   : > { %v7795_v52 = vld [vmem:[#allocation10 + $0x1350] sm:$0xff]  ;;  %v7858_v8 = vld [vmem:[#allocation10 + $0x1548] sm:$0xff] }
 0xe53   : > { %11182 = vmatpush1.bf16.msra.mxu0 %v11181_v14  ;;  %11246 = vmatpush1.bf16.msra.mxu1 %v11245_v15  ;;  %v7740_v14 = vld [vmem:[#allocation10 + $0x1198] sm:$0xff] }
 0xe54   : > { %11184 = vmatprep.subr.bf16.mxu0 %v11183_v21  ;;  %11248 = vmatprep.subr.bf16.mxu1 %v11247_v36  ;;  %v7748_v15 = vld [vmem:[#allocation10 + $0x11d8] sm:$0xff]  ;;  %v7745_v36 = vld [vmem:[#allocation10 + $0x11c0] sm:$0xff] }
 0xe55   : > { %v11327_v21 = vpack.c.bf16 %v7748_v15, %v7740_v14  ;;  %v11265_v22 = vpack.c.bf16 %v7745_v36, %v7737_v16  ;;  %v7801_v15 = vld [vmem:[#allocation10 + $0x1380] sm:$0xff]  ;;  %v11343_v36 = vpack.c.bf16 %v7812_v7, %v7804_v1  ;;  %v7876_v1 = vld [vmem:[#allocation10 + $0x15d8] sm:$0xff] }
 0xe56   : > { %v7809_v16 = vld [vmem:[#allocation10 + $0x13c0] sm:$0xff] }
 0xe57   : > { %11186 = vmatpush1.bf16.msra.mxu0 %v11185_v34  ;;  %11250 = vmatpush1.bf16.msra.mxu1 %v11249_v27  ;;  %v7754_v34 = vld [vmem:[#allocation10 + $0x1208] sm:$0xff] }
 0xe58   : > { %9321 = vmatprep.subr.msk.mxu0 %vm454_vm1, %v13001_v39  ;;  %11252 = vmatprep.subr.bf16.mxu1 %v11251_v37  ;;  %v7762_v27 = vld [vmem:[#allocation10 + $0x1248] sm:$0xff]  ;;  %v7764_v37 = vld [vmem:[#allocation10 + $0x1258] sm:$0xff] }
 0xe59   : > { %v11267_v30 = vpack.c.bf16 %v7762_v27, %v7754_v34  ;;  %v7820_v34 = vld [vmem:[#allocation10 + $0x1418] sm:$0xff] }
 0xe5a   : > { %7479 = vmatmul.mubr.f32.vlgmr.msra.gmra.mrb[40].mxu0 %v13029_v35  ;;  %7550 = vmatmul.mubr.f32.vlgmr.msra.gmra.mrb[64].mxu1 %v13029_v35  ;;  %v11253_v35 = vpack.c.bf16 %v7697_v10, %v7689_v49  ;;  %v11331_v49 = vpack.c.bf16 %v7764_v37, %v7756_v28  ;;  %v7755_v10 = vld [vmem:[#allocation10 + $0x1210] sm:$0xff]  ;;  %v7828_v27 = vld [vmem:[#allocation10 + $0x1458] sm:$0xff]  ;;  %v11281_v28 = vpack.c.bf16 %v7809_v16, %v7801_v15  ;;  %v7817_v37 = vld [vmem:[#allocation10 + $0x1400] sm:$0xff] }
 0xe5b   : > { %9322 = vmatpush1.msk.msra.mxu0 %vm454_vm1, %v12999_v2  ;;  %7681 = vmatprep.mubr.f32.mxu0 %v12196_v3  ;;  %v11333_v19 = vpack.c.bf16 %v7763_v26, %v7755_v10  ;;  %v7827_v10 = vld [vmem:[#allocation10 + $0x1450] sm:$0xff]  ;;  %v7834_v26 = vld [vmem:[#allocation10 + $0x1488] sm:$0xff]  ;;  %v7873_v15 = vld [vmem:[#allocation10 + $0x15c0] sm:$0xff] }
 0xe5c   : > { %11316 = vmatprep.subr.bf16.mxu0 %v11315_v38  ;;  %11254 = vmatpush1.bf16.msra.mxu1 %v11253_v35  ;;  %v7761_v38 = vld [vmem:[#allocation10 + $0x1240] sm:$0xff]  ;;  %v7770_v35 = vld [vmem:[#allocation10 + $0x1288] sm:$0xff]  ;;  %v7867_v16 = vld [vmem:[#allocation10 + $0x1590] sm:$0xff] }
 0xe5e   : > { %9323 = vmatmul.mubr.msk.f32.vlgmr.msra.gmra.mrb[42].mxu0 %vm6263_vm8, %v12608_v59  ;;  %v11255_v59 = vpack.c.bf16 %v7714_v41, %v7706_v63  ;;  %v7780_v63 = vld [vmem:[#allocation10 + $0x12d8] sm:$0xff]  ;;  %v11269_v41 = vpack.c.bf16 %v7761_v38, %v7753_v31  ;;  %v7825_v31 = vld [vmem:[#allocation10 + $0x1440] sm:$0xff]  ;;  %v7819_v38 = vld [vmem:[#allocation10 + $0x1410] sm:$0xff] }
 0xe5f   : > { %11318 = vmatpush1.bf16.msra.mxu0 %v11317_v40  ;;  %v7772_v40 = vld [vmem:[#allocation10 + $0x1298] sm:$0xff] }
 0xe60   : > { %11256 = vmatprep.subr.bf16.mxu1 %v11255_v59  ;;  %11320 = vmatprep.subr.bf16.mxu0 %v11319_v45  ;;  %v11271_v59 = vpack.c.bf16 %v7778_v55, %v7770_v35  ;;  %v11335_v45 = vpack.c.bf16 %v7780_v63, %v7772_v40  ;;  %v7842_v35 = vld [vmem:[#allocation10 + $0x14c8] sm:$0xff]  ;;  %v7836_v55 = vld [vmem:[#allocation10 + $0x1498] sm:$0xff]  ;;  %v11285_v63 = vpack.c.bf16 %v7825_v31, %v7817_v37  ;;  %v7889_v37 = vld [vmem:[#allocation10 + $0x1640] sm:$0xff] }
 0xe61   : > { %11258 = vmatpush1.bf16.msra.mxu1 %v11257_v50  ;;  %v7779_v50 = vld [vmem:[#allocation10 + $0x12d0] sm:$0xff]  ;;  %v7844_v40 = vld [vmem:[#allocation10 + $0x14d8] sm:$0xff] }
 0xe62   : > { %11260 = vmatprep.subr.bf16.mxu1 %v11259_v32  ;;  %v11337_v56 = vpack.c.bf16 %v7779_v50, %v7771_v48  ;;  %v7785_v32 = vld [vmem:[#allocation10 + $0x1300] sm:$0xff]  ;;  %v11351_v48 = vpack.c.bf16 %v7844_v40, %v7836_v55  ;;  %v7850_v50 = vld [vmem:[#allocation10 + $0x1508] sm:$0xff]  ;;  %v7883_v31 = vld [vmem:[#allocation10 + $0x1610] sm:$0xff] }
 0xe63   : > { %11322 = vmatpush1.bf16.msra.mxu0 %v11321_v53  ;;  %v7796_v53 = vld [vmem:[#allocation10 + $0x1358] sm:$0xff] }
 0xe64   : > { %11324 = vmatprep.subr.bf16.mxu0 %v11323_v58  ;;  %v7793_v58 = vld [vmem:[#allocation10 + $0x1340] sm:$0xff]  ;;  %v11339_v60 = vpack.c.bf16 %v7796_v53, %v7788_v11  ;;  %v7860_v11 = vld [vmem:[#allocation10 + $0x1558] sm:$0xff] }
 0xe65   : > { %11262 = vmatpush1.bf16.msra.mxu1 %v11261_v13  ;;  %v7802_v13 = vld [vmem:[#allocation10 + $0x1388] sm:$0xff]  ;;  %v7908_v55 = vld [vmem:[#allocation10 + $0x16d8] sm:$0xff] }
 0xe66   : > { %11264 = vmatprep.subr.bf16.mxu1 %v11263_v51  ;;  %v11341_v51 = vpack.c.bf16 %v7795_v52, %v7787_v61  ;;  %v11279_v14 = vpack.c.bf16 %v7810_v0, %v7802_v13  ;;  %v11355_v61 = vpack.c.bf16 %v7860_v11, %v7852_v42  ;;  %v7866_v52 = vld [vmem:[#allocation10 + $0x1588] sm:$0xff]  ;;  %v7868_v0 = vld [vmem:[#allocation10 + $0x1598] sm:$0xff] }
 0xe67   : > { %11326 = vmatpush1.bf16.msra.mxu0 %v11325_v9  ;;  %v11277_v9 = vpack.c.bf16 %v7793_v58, %v7785_v32  ;;  %v7857_v32 = vld [vmem:[#allocation10 + $0x1540] sm:$0xff]  ;;  %v7851_v58 = vld [vmem:[#allocation10 + $0x1510] sm:$0xff]  ;;  %v7874_v13 = vld [vmem:[#allocation10 + $0x15c8] sm:$0xff] }
 0xe68   : > { %11328 = vmatprep.subr.bf16.mxu0 %v11327_v21  ;;  %v7803_v21 = vld [vmem:[#allocation10 + $0x1390] sm:$0xff]  ;;  %v7924_v42 = vld [vmem:[#allocation10 + $0x1758] sm:$0xff] }
 0xe69   : > { %11266 = vmatpush1.bf16.msra.mxu1 %v11265_v22  ;;  %v7826_v22 = vld [vmem:[#allocation10 + $0x1448] sm:$0xff] }
 0xe6a   : > { %11268 = vmatprep.subr.bf16.mxu1 %v11267_v30  ;;  %v11283_v30 = vpack.c.bf16 %v7826_v22, %v7818_v25  ;;  %v7890_v25 = vld [vmem:[#allocation10 + $0x1648] sm:$0xff]  ;;  %v7884_v22 = vld [vmem:[#allocation10 + $0x1618] sm:$0xff] }
 0xe6b   : > { %11330 = vmatpush1.bf16.msra.mxu0 %v11329_v29  ;;  %v11345_v29 = vpack.c.bf16 %v7811_v23, %v7803_v21  ;;  %v11359_v21 = vpack.c.bf16 %v7876_v1, %v7868_v0  ;;  %v7882_v23 = vld [vmem:[#allocation10 + $0x1608] sm:$0xff]  ;;  %v7932_v1 = vld [vmem:[#allocation10 + $0x1798] sm:$0xff] }
 0xe6c   : > { %11332 = vmatprep.subr.bf16.mxu0 %v11331_v49  ;;  %v11347_v49 = vpack.c.bf16 %v7828_v27, %v7820_v34  ;;  %v7892_v34 = vld [vmem:[#allocation10 + $0x1658] sm:$0xff]  ;;  %v7938_v0 = vld [vmem:[#allocation10 + $0x17c8] sm:$0xff] }
 0xe6d   : > { %11270 = vmatpush1.bf16.msra.mxu1 %v11269_v41  ;;  %v11349_v41 = vpack.c.bf16 %v7827_v10, %v7819_v38  ;;  %v11363_v38 = vpack.c.bf16 %v7892_v34, %v7884_v22  ;;  %v7898_v10 = vld [vmem:[#allocation10 + $0x1688] sm:$0xff]  ;;  %v7696_v34 = vld [vmem:[#allocation10 + $0x1038] sm:$0xff] }
 0xe6e   : > { %11272 = vmatprep.subr.bf16.mxu1 %v11271_v59  ;;  %v7833_v59 = vld [vmem:[#allocation10 + $0x1480] sm:$0xff]  ;;  %v7702_v22 = vld [vmem:[#allocation10 + $0x1068] sm:$0xff] }
 0xe6f   : > { %11334 = vmatpush1.bf16.msra.mxu0 %v11333_v19  ;;  %v11287_v19 = vpack.c.bf16 %v7842_v35, %v7834_v26  ;;  %v11289_v53 = vpack.c.bf16 %v7841_v18, %v7833_v59  ;;  %v7906_v26 = vld [vmem:[#allocation10 + $0x16c8] sm:$0xff]  ;;  %v7900_v35 = vld [vmem:[#allocation10 + $0x1698] sm:$0xff]  ;;  %v7905_v59 = vld [vmem:[#allocation10 + $0x16c0] sm:$0xff] }
 0xe70   : > { %11336 = vmatprep.subr.bf16.mxu0 %v11335_v45  ;;  %v7843_v45 = vld [vmem:[#allocation10 + $0x14d0] sm:$0xff] }
 0xe71   : > { %11274 = vmatpush1.bf16.msra.mxu1 %v11273_v20  ;;  %v11353_v20 = vpack.c.bf16 %v7843_v45, %v7835_v47  ;;  %v7899_v18 = vld [vmem:[#allocation10 + $0x1690] sm:$0xff]  ;;  %v11367_v47 = vpack.c.bf16 %v7908_v55, %v7900_v35  ;;  %v7914_v45 = vld [vmem:[#allocation10 + $0x1708] sm:$0xff] }
 0xe72   : > { %11276 = vmatprep.subr.bf16.mxu1 %v11275_v57  ;;  %v7849_v57 = vld [vmem:[#allocation10 + $0x1500] sm:$0xff] }
 0xe73   : > { %11338 = vmatpush1.bf16.msra.mxu0 %v11337_v56  ;;  %v11291_v56 = vpack.c.bf16 %v7858_v8, %v7850_v50  ;;  %v11293_v7 = vpack.c.bf16 %v7857_v32, %v7849_v57  ;;  %v7922_v50 = vld [vmem:[#allocation10 + $0x1748] sm:$0xff]  ;;  %v7916_v8 = vld [vmem:[#allocation10 + $0x1718] sm:$0xff]  ;;  %v7921_v57 = vld [vmem:[#allocation10 + $0x1740] sm:$0xff] }
 0xe74   : > { %11340 = vmatprep.subr.bf16.mxu0 %v11339_v60  ;;  %v7859_v60 = vld [vmem:[#allocation10 + $0x1550] sm:$0xff]  ;;  %v11371_v32 = vpack.c.bf16 %v7924_v42, %v7916_v8  ;;  %v7718_v42 = vld [vmem:[#allocation10 + $0x10e8] sm:$0xff] }
 0xe75   : > { %11278 = vmatpush1.bf16.msra.mxu1 %v11277_v9  ;;  %v11357_v9 = vpack.c.bf16 %v7859_v60, %v7851_v58  ;;  %v7915_v58 = vld [vmem:[#allocation10 + $0x1710] sm:$0xff] }
 0xe76   : > { %11280 = vmatprep.subr.bf16.mxu1 %v11279_v14  ;;  %v7865_v14 = vld [vmem:[#allocation10 + $0x1580] sm:$0xff] }
 0xe77   : > { %11342 = vmatpush1.bf16.msra.mxu0 %v11341_v51  ;;  %v11295_v51 = vpack.c.bf16 %v7874_v13, %v7866_v52  ;;  %v11297_v27 = vpack.c.bf16 %v7873_v15, %v7865_v14  ;;  %v7930_v13 = vld [vmem:[#allocation10 + $0x1788] sm:$0xff]  ;;  %v7937_v14 = vld [vmem:[#allocation10 + $0x17c0] sm:$0xff] }
 0xe78   : > { %11344 = vmatprep.subr.bf16.mxu0 %v11343_v36  ;;  %v7875_v36 = vld [vmem:[#allocation10 + $0x15d0] sm:$0xff] }
 0xe79   : > { %11282 = vmatpush1.bf16.msra.mxu1 %v11281_v28  ;;  %v11361_v28 = vpack.c.bf16 %v7875_v36, %v7867_v16  ;;  %v7939_v36 = vld [vmem:[#allocation10 + $0x17d0] sm:$0xff] }
 0xe7a   : > { %11284 = vmatprep.subr.bf16.mxu1 %v11283_v30  ;;  %v7881_v30 = vld [vmem:[#allocation10 + $0x1600] sm:$0xff] }
 0xe7b   : > { %11346 = vmatpush1.bf16.msra.mxu0 %v11345_v29  ;;  %v11299_v29 = vpack.c.bf16 %v7890_v25, %v7882_v23  ;;  %v11301_v40 = vpack.c.bf16 %v7889_v37, %v7881_v30  ;;  %v7694_v25 = vld [vmem:[#allocation10 + $0x1028] sm:$0xff] }
 0xe7c   : > { %11348 = vmatprep.subr.bf16.mxu0 %v11347_v49  ;;  %v7891_v49 = vld [vmem:[#allocation10 + $0x1650] sm:$0xff] }
 0xe7d   : > { %11286 = vmatpush1.bf16.msra.mxu1 %v11285_v63  ;;  %v11365_v63 = vpack.c.bf16 %v7891_v49, %v7883_v31 }
 0xe7e   : > { %11288 = vmatprep.subr.bf16.mxu1 %v11287_v19  ;;  %v7897_v19 = vld [vmem:[#allocation10 + $0x1680] sm:$0xff] }
 0xe7f   : > { %11350 = vmatpush1.bf16.msra.mxu0 %v11349_v41  ;;  %v11303_v41 = vpack.c.bf16 %v7906_v26, %v7898_v10  ;;  %v11305_v11 = vpack.c.bf16 %v7905_v59, %v7897_v19  ;;  %v7701_v19 = vld [vmem:[#allocation10 + $0x1060] sm:$0xff] }
 0xe80   : > { %11352 = vmatprep.subr.bf16.mxu0 %v11351_v48  ;;  %v7907_v48 = vld [vmem:[#allocation10 + $0x16d0] sm:$0xff] }
 0xe81   : > { %11290 = vmatpush1.bf16.msra.mxu1 %v11289_v53  ;;  %v11369_v53 = vpack.c.bf16 %v7907_v48, %v7899_v18  ;;  %v7703_v48 = vld [vmem:[#allocation10 + $0x1070] sm:$0xff] }
 0xe82   : > { %11292 = vmatprep.subr.bf16.mxu1 %v11291_v56  ;;  %v7913_v56 = vld [vmem:[#allocation10 + $0x1700] sm:$0xff] }
 0xe83   : > { %11354 = vmatpush1.bf16.msra.mxu0 %v11353_v20  ;;  %v11307_v20 = vpack.c.bf16 %v7922_v50, %v7914_v45  ;;  %v11309_v60 = vpack.c.bf16 %v7921_v57, %v7913_v56  ;;  %v7710_v45 = vld [vmem:[#allocation10 + $0x10a8] sm:$0xff] }
 0xe84   : > { %11356 = vmatprep.subr.bf16.mxu0 %v11355_v61  ;;  %v7923_v61 = vld [vmem:[#allocation10 + $0x1750] sm:$0xff] }
 0xe85   : > { %11294 = vmatpush1.bf16.msra.mxu1 %v11293_v7  ;;  %v11373_v52 = vpack.c.bf16 %v7923_v61, %v7915_v58  ;;  %v11311_v7 = vpack.c.bf16 %v7938_v0, %v7930_v13  ;;  %v7709_v61 = vld [vmem:[#allocation10 + $0x10a0] sm:$0xff]  ;;  %v11383_v13 = vpack.c.bf16 %v7718_v42, %v7710_v45  ;;  %v7768_v45 = vld [vmem:[#allocation10 + $0x1278] sm:$0xff] }
 0xe86   : > { %11296 = vmatprep.subr.bf16.mxu1 %v11295_v51  ;;  %v7929_v51 = vld [vmem:[#allocation10 + $0x1780] sm:$0xff] }
 0xe87   : > { %11358 = vmatpush1.bf16.msra.mxu0 %v11357_v9  ;;  %v7940_v9 = vld [vmem:[#allocation10 + $0x17d8] sm:$0xff]  ;;  %v11313_v16 = vpack.c.bf16 %v7937_v14, %v7929_v51  ;;  %v7734_v14 = vld [vmem:[#allocation10 + $0x1168] sm:$0xff]  ;;  %v7757_v42 = vld [vmem:[#allocation10 + $0x1220] sm:$0xff] }
 0xe88   : > { %11360 = vmatprep.subr.bf16.mxu0 %v11359_v21  ;;  %v11375_v15 = vpack.c.bf16 %v7940_v9, %v7932_v1  ;;  %v7931_v21 = vld [vmem:[#allocation10 + $0x1790] sm:$0xff]  ;;  %v7726_v9 = vld [vmem:[#allocation10 + $0x1128] sm:$0xff] }
 0xe89   : > { %11298 = vmatpush1.bf16.msra.mxu1 %v11297_v27  ;;  %v11377_v23 = vpack.c.bf16 %v7939_v36, %v7931_v21  ;;  %v11379_v27 = vpack.c.bf16 %v7702_v22, %v7694_v25  ;;  %v7711_v1 = vld [vmem:[#allocation10 + $0x10b0] sm:$0xff]  ;;  %v6262_v21 = vld [vmem:[#allocation11] sm:$0xff] }
 0xe8a   : > { %11300 = vmatprep.subr.bf16.mxu1 %v11299_v29 }
 0xe8b   : > { %11362 = vmatpush1.bf16.msra.mxu0 %v11361_v28  ;;  %v7704_v28 = vld [vmem:[#allocation10 + $0x1078] sm:$0xff] }
 0xe8c   : > { %11364 = vmatprep.subr.bf16.mxu0 %v11363_v38  ;;  %v11443_v29 = vpack.c.bf16 %v7704_v28, %v7696_v34  ;;  %v7725_v34 = vld [vmem:[#allocation10 + $0x1120] sm:$0xff]  ;;  %v11387_v28 = vpack.c.bf16 %v7734_v14, %v7726_v9  ;;  %v7775_v14 = vld [vmem:[#allocation10 + $0x12b0] sm:$0xff] }
 0xe8d   : > { %11302 = vmatpush1.bf16.msra.mxu1 %v11301_v40 }
 0xe8e   : > { %11304 = vmatprep.subr.bf16.mxu1 %v11303_v41  ;;  %v7693_v41 = vld [vmem:[#allocation10 + $0x1020] sm:$0xff] }
 0xe8f   : > { %11366 = vmatpush1.bf16.msra.mxu0 %v11365_v63 }
 0xe90   : > { %11368 = vmatprep.subr.bf16.mxu0 %v11367_v47  ;;  %v7695_v47 = vld [vmem:[#allocation10 + $0x1030] sm:$0xff] }
 0xe91   : > { %11306 = vmatpush1.bf16.msra.mxu1 %v11305_v11  ;;  %v7712_v11 = vld [vmem:[#allocation10 + $0x10b8] sm:$0xff]  ;;  %v11445_v58 = vpack.c.bf16 %v7703_v48, %v7695_v47  ;;  %v7766_v47 = vld [vmem:[#allocation10 + $0x1268] sm:$0xff] }
 0xe92   : > { %11308 = vmatprep.subr.bf16.mxu1 %v11307_v20  ;;  %v7760_v48 = vld [vmem:[#allocation10 + $0x1238] sm:$0xff] }
 0xe93   : > { %11370 = vmatpush1.bf16.msra.mxu0 %v11369_v53  ;;  %v7720_v53 = vld [vmem:[#allocation10 + $0x10f8] sm:$0xff] }
 0xe94   : > { %11372 = vmatprep.subr.bf16.mxu0 %v11371_v32  ;;  %v11381_v32 = vpack.c.bf16 %v7701_v19, %v7693_v41  ;;  %v11447_v0 = vpack.c.bf16 %v7720_v53, %v7712_v11  ;;  %v7741_v41 = vld [vmem:[#allocation10 + $0x11a0] sm:$0xff] }
 0xe95   : > { %11310 = vmatpush1.bf16.msra.mxu1 %v11309_v60  ;;  %v7717_v60 = vld [vmem:[#allocation10 + $0x10e0] sm:$0xff] }
 0xe96   : > { %11312 = vmatprep.subr.bf16.mxu1 %v11311_v7  ;;  %v7719_v7 = vld [vmem:[#allocation10 + $0x10f0] sm:$0xff]  ;;  %v11385_v36 = vpack.c.bf16 %v7717_v60, %v7709_v61  ;;  %v7749_v19 = vld [vmem:[#allocation10 + $0x11e0] sm:$0xff]  ;;  %v7782_v61 = vld [vmem:[#allocation10 + $0x12e8] sm:$0xff] }
 0xe97   : > { %11374 = vmatpush1.bf16.msra.mxu0 %v11373_v52  ;;  %v11449_v22 = vpack.c.bf16 %v7719_v7, %v7711_v1  ;;  %v7765_v11 = vld [vmem:[#allocation10 + $0x1260] sm:$0xff]  ;;  %v7776_v60 = vld [vmem:[#allocation10 + $0x12b8] sm:$0xff] }
 0xe98   : > { %11376 = vmatprep.subr.bf16.mxu0 %v11375_v15  ;;  %v7728_v15 = vld [vmem:[#allocation10 + $0x1138] sm:$0xff]  ;;  %v7773_v1 = vld [vmem:[#allocation10 + $0x12a0] sm:$0xff] }
 0xe99   : > { %11314 = vmatpush1.bf16.msra.mxu1 %v11313_v16  ;;  %v7736_v16 = vld [vmem:[#allocation10 + $0x1178] sm:$0xff]  ;;  %v7781_v7 = vld [vmem:[#allocation10 + $0x12e0] sm:$0xff] }
 0xe9a   : > { %11380 = vmatprep.subr.bf16.mxu1 %v11379_v27  ;;  %v7733_v27 = vld [vmem:[#allocation10 + $0x1160] sm:$0xff] }
 0xe9b   : > { %11378 = vmatpush1.bf16.msra.mxu0 %v11377_v23 }
 0xe9c   : > { %11444 = vmatprep.subr.bf16.mxu0 %v11443_v29  ;;  %v11451_v29 = vpack.c.bf16 %v7736_v16, %v7728_v15  ;;  %v7783_v15 = vld [vmem:[#allocation10 + $0x12f0] sm:$0xff]  ;;  %v7790_v16 = vld [vmem:[#allocation10 + $0x1328] sm:$0xff] }
 0xeed   : > { %v7338_v30 = vpop.f32.mrb[38].mxu0  ;;  %v7409_v37 = vpop.f32.mrb[62].mxu1 }
 0xeee   : > { %v7340_v31 = vpop.f32.mrb[39].mxu0  ;;  %v7411_v38 = vpop.f32.mrb[63].mxu1 }
 0xeef   : > { %v7564_v49 = vcombine.low %v7338_v30, %v7340_v31  ;;  %v7565_v10 = vcombine.low %v7409_v37, %v7411_v38  ;;  %v7727_v30 = vld [vmem:[#allocation10 + $0x1130] sm:$0xff]  ;;  %v7742_v31 = vld [vmem:[#allocation10 + $0x11a8] sm:$0xff]  ;;  %v6941_v38 = vadd.f32 %v6939_v17, %v6262_v21 }
 0xef0   : > { %v7735_v37 = vld [vmem:[#allocation10 + $0x1170] sm:$0xff]  ;;  %v7758_v17 = vld [vmem:[#allocation10 + $0x1228] sm:$0xff] }
 0xef1   : > { %v7574_v26 = vrot.slane %v7564_v49, %v13023_v62  ;;  %v7581_v35 = vrot.slane %v7565_v10, %v13023_v62  ;;  %v7750_v10 = vld [vmem:[#allocation10 + $0x11e8] sm:$0xff]  ;;  %v11395_v53 = vpack.c.bf16 %v7766_v47, %v7758_v17  ;;  %v7824_v17 = vld [vmem:[#allocation10 + $0x1438] sm:$0xff] }
 0xef2   : > { %v7798_v21 = vld [vmem:[#allocation10 + $0x1368] sm:$0xff]  ;;  %v7832_v47 = vld [vmem:[#allocation10 + $0x1478] sm:$0xff] }
 0xef3   : > { %v7596_v55 = vcombine.low %v7574_v26, %v7581_v35  ;;  %v7744_v26 = vld [vmem:[#allocation10 + $0x11b8] sm:$0xff] }
 0xef4   : > { %v7752_v35 = vld [vmem:[#allocation10 + $0x11f8] sm:$0xff] }
 0xef5   : > { %v7604_v23 = vrot.slane %v7596_v55, %v13023_v62 }
 0xf2d   : > { %v7480_v40 = vpop.f32.mrb[40].mxu0  ;;  %v7551_v63 = vpop.f32.mrb[64].mxu1 }
 0xf2e   : > { %v7482_v59 = vpop.f32.mrb[41].mxu0  ;;  %v7553_v18 = vpop.f32.mrb[65].mxu1 }
 0xf2f   : > { %v7566_v50 = vcombine.low %v7480_v40, %v7482_v59  ;;  %v7567_v8 = vcombine.low %v7551_v63, %v7553_v18  ;;  %v11389_v40 = vpack.c.bf16 %v7733_v27, %v7725_v34  ;;  %v11453_v63 = vpack.c.bf16 %v7735_v37, %v7727_v30  ;;  %v7789_v34 = vld [vmem:[#allocation10 + $0x1320] sm:$0xff]  ;;  %v7791_v30 = vld [vmem:[#allocation10 + $0x1330] sm:$0xff] }
 0xf30   : > { %v11391_v59 = vpack.c.bf16 %v7750_v10, %v7742_v31  ;;  %v11455_v18 = vpack.c.bf16 %v7752_v35, %v7744_v26  ;;  %v7797_v27 = vld [vmem:[#allocation10 + $0x1360] sm:$0xff]  ;;  %v7799_v37 = vld [vmem:[#allocation10 + $0x1370] sm:$0xff]  ;;  %v7806_v31 = vld [vmem:[#allocation10 + $0x13a8] sm:$0xff] }
 0xf31   : > { %v7588_v20 = vrot.slane %v7566_v50, %v13023_v62  ;;  %v7595_v56 = vrot.slane %v7567_v8, %v13023_v62  ;;  %v13054_v57 = vpop.f32.mrb[42].mxu0  ;;  %v11393_v50 = vpack.c.bf16 %v7749_v19, %v7741_v41  ;;  %v11457_v8 = vpack.c.bf16 %v7751_v33, %v7743_v54  ;;  %v7816_v10 = vld [vmem:[#allocation10 + $0x13f8] sm:$0xff]  ;;  %v7822_v54 = vld [vmem:[#allocation10 + $0x1428] sm:$0xff] }
 0xf32   : > { %v7685_v52 = vpop.f32.mrb[43].mxu0  ;;  %v11405_v26 = vpack.c.bf16 %v7797_v27, %v7789_v34  ;;  %v11469_v35 = vpack.c.bf16 %v7799_v37, %v7791_v30  ;;  %v7830_v33 = vld [vmem:[#allocation10 + $0x1468] sm:$0xff] }
 0xf33   : > { %v7597_v51 = vcombine.low %v7588_v20, %v7595_v56  ;;  %8009 = vmatprep.mubr.f32.mxu1 %v7685_v52  ;;  %8080 = vmatprep.mubr.f32.mxu0 %v7685_v52  ;;  %v11459_v20 = vpack.c.bf16 %v7768_v45, %v7760_v48  ;;  %v7759_v56 = vld [vmem:[#allocation10 + $0x1230] sm:$0xff]  ;;  %v7870_v30 = vld [vmem:[#allocation10 + $0x15a8] sm:$0xff] }
 0xf34   : > { %8010 = vmatmul.mubr.f32.vlgmr.msra.gmra.mrb[66].mxu1 %v13054_v57  ;;  %8081 = vmatmul.mubr.f32.vlgmr.msra.gmra.mrb[44].mxu0 %v13054_v57  ;;  %v7878_v37 = vld [vmem:[#allocation10 + $0x15e8] sm:$0xff] }
 0xf35   : > { %v7611_v25 = vrot.slane %v7597_v51, %v13023_v62  ;;  %11382 = vmatpush1.bf16.msra.mxu1 %v11381_v32  ;;  %11446 = vmatpush1.bf16.msra.mxu0 %v11445_v58  ;;  %v7767_v32 = vld [vmem:[#allocation10 + $0x1270] sm:$0xff]  ;;  %v7774_v58 = vld [vmem:[#allocation10 + $0x12a8] sm:$0xff] }
 0xf36   : > { %11384 = vmatprep.subr.bf16.mxu1 %v11383_v13  ;;  %11448 = vmatprep.subr.bf16.mxu0 %v11447_v0  ;;  %v11397_v13 = vpack.c.bf16 %v7765_v11, %v7757_v42  ;;  %v11461_v0 = vpack.c.bf16 %v7767_v32, %v7759_v56  ;;  %v11399_v9 = vpack.c.bf16 %v7782_v61, %v7774_v58  ;;  %v7838_v56 = vld [vmem:[#allocation10 + $0x14a8] sm:$0xff]  ;;  %v7840_v58 = vld [vmem:[#allocation10 + $0x14b8] sm:$0xff] }
 0xf37   : > { %v7612_v49 = vcombine.low %v7604_v23, %v7611_v25  ;;  %8151 = vmatprep.mubr.f32.mxu1 %v7685_v52  ;;  %8222 = vmatprep.mubr.f32.mxu0 %v7685_v52  ;;  %v7784_v52 = vld [vmem:[#allocation10 + $0x12f8] sm:$0xff]  ;;  %v11401_v25 = vpack.c.bf16 %v7781_v7, %v7773_v1  ;;  %v11411_v42 = vpack.c.bf16 %v7830_v33, %v7822_v54  ;;  %v7846_v32 = vld [vmem:[#allocation10 + $0x14e8] sm:$0xff] }
 0xf38   : > { %v11463_v51 = vpack.c.bf16 %v7784_v52, %v7776_v60  ;;  %v7800_v23 = vld [vmem:[#allocation10 + $0x1378] sm:$0xff]  ;;  %v11475_v11 = vpack.c.bf16 %v7832_v47, %v7824_v17  ;;  %v11415_v1 = vpack.c.bf16 %v7846_v32, %v7838_v56 }
 0xf39   : > { %v13063_v55 = vadd.f32 %v7612_v49, %v6941_v38  ;;  %11386 = vmatpush1.bf16.msra.mxu1 %v11385_v36  ;;  %11450 = vmatpush1.bf16.msra.mxu0 %v11449_v22  ;;  %v7792_v36 = vld [vmem:[#allocation10 + $0x1338] sm:$0xff]  ;;  %v11465_v22 = vpack.c.bf16 %v7783_v15, %v7775_v14  ;;  %v7814_v38 = vld [vmem:[#allocation10 + $0x13e8] sm:$0xff] }
 0xf3a   : > { %11388 = vmatprep.subr.bf16.mxu1 %v11387_v28  ;;  %11452 = vmatprep.subr.bf16.mxu0 %v11451_v29  ;;  %v11403_v28 = vpack.c.bf16 %v7798_v21, %v7790_v16  ;;  %v11467_v29 = vpack.c.bf16 %v7800_v23, %v7792_v36  ;;  %v7808_v49 = vld [vmem:[#allocation10 + $0x13b8] sm:$0xff]  ;;  %v11407_v41 = vpack.c.bf16 %v7814_v38, %v7806_v31  ;;  %v7854_v14 = vld [vmem:[#allocation10 + $0x1528] sm:$0xff] }
 0xf3b   : > { %v11471_v19 = vpack.c.bf16 %v7816_v10, %v7808_v49  ;;  %v7848_v61 = vld [vmem:[#allocation10 + $0x14f8] sm:$0xff]  ;;  %v7862_v15 = vld [vmem:[#allocation10 + $0x1568] sm:$0xff] }
 0xf3c   : > { %v11479_v7 = vpack.c.bf16 %v7848_v61, %v7840_v58  ;;  %v7856_v16 = vld [vmem:[#allocation10 + $0x1538] sm:$0xff]  ;;  %v11419_v34 = vpack.c.bf16 %v7862_v15, %v7854_v14 }
 0xf3d   : > { %11390 = vmatpush1.bf16.msra.mxu1 %v11389_v40  ;;  %11454 = vmatpush1.bf16.msra.mxu0 %v11453_v63  ;;  %v7805_v40 = vld [vmem:[#allocation10 + $0x13a0] sm:$0xff]  ;;  %v7864_v21 = vld [vmem:[#allocation10 + $0x1578] sm:$0xff] }
 0xf3e   : > { %11392 = vmatprep.subr.bf16.mxu1 %v11391_v59  ;;  %11456 = vmatprep.subr.bf16.mxu0 %v11455_v18  ;;  %v7813_v63 = vld [vmem:[#allocation10 + $0x13e0] sm:$0xff]  ;;  %v7807_v59 = vld [vmem:[#allocation10 + $0x13b0] sm:$0xff]  ;;  %v11483_v27 = vpack.c.bf16 %v7864_v21, %v7856_v16  ;;  %v7872_v31 = vld [vmem:[#allocation10 + $0x15b8] sm:$0xff] }
 0xf3f   : > { %v7815_v18 = vld [vmem:[#allocation10 + $0x13f0] sm:$0xff]  ;;  %v11409_v48 = vpack.c.bf16 %v7813_v63, %v7805_v40  ;;  %v7880_v38 = vld [vmem:[#allocation10 + $0x15f8] sm:$0xff]  ;;  %v11423_v40 = vpack.c.bf16 %v7878_v37, %v7870_v30 }
 0xf40   : > { %v11473_v45 = vpack.c.bf16 %v7815_v18, %v7807_v59  ;;  %v11487_v63 = vpack.c.bf16 %v7880_v38, %v7872_v31  ;;  %v7886_v59 = vld [vmem:[#allocation10 + $0x1628] sm:$0xff]  ;;  %v7888_v54 = vld [vmem:[#allocation10 + $0x1638] sm:$0xff] }
 0xf41   : > { %11394 = vmatpush1.bf16.msra.mxu1 %v11393_v50  ;;  %11458 = vmatpush1.bf16.msra.mxu0 %v11457_v8  ;;  %v7821_v50 = vld [vmem:[#allocation10 + $0x1420] sm:$0xff]  ;;  %v7894_v18 = vld [vmem:[#allocation10 + $0x1668] sm:$0xff]  ;;  %v7896_v33 = vld [vmem:[#allocation10 + $0x1678] sm:$0xff] }
 0xf42   : > { %11396 = vmatprep.subr.bf16.mxu1 %v11395_v53  ;;  %11460 = vmatprep.subr.bf16.mxu0 %v11459_v20  ;;  %v7829_v8 = vld [vmem:[#allocation10 + $0x1460] sm:$0xff]  ;;  %v7823_v53 = vld [vmem:[#allocation10 + $0x1430] sm:$0xff]  ;;  %v7904_v56 = vld [vmem:[#allocation10 + $0x16b8] sm:$0xff] }
 0xf43   : > { %v7831_v20 = vld [vmem:[#allocation10 + $0x1470] sm:$0xff]  ;;  %v11413_v60 = vpack.c.bf16 %v7829_v8, %v7821_v50  ;;  %v11427_v50 = vpack.c.bf16 %v7894_v18, %v7886_v59  ;;  %v11491_v8 = vpack.c.bf16 %v7896_v33, %v7888_v54  ;;  %v7912_v32 = vld [vmem:[#allocation10 + $0x16f8] sm:$0xff]  ;;  %v8363_v59 = vld [vmem:[#allocation10 + $0x1808] sm:$0xff] }
 0xf44   : > { %v11477_v52 = vpack.c.bf16 %v7831_v20, %v7823_v53  ;;  %v7902_v53 = vld [vmem:[#allocation10 + $0x16a8] sm:$0xff]  ;;  %v7920_v14 = vld [vmem:[#allocation10 + $0x1738] sm:$0xff] }
 0xf45   : > { %11398 = vmatpush1.bf16.msra.mxu1 %v11397_v13  ;;  %11462 = vmatpush1.bf16.msra.mxu0 %v11461_v0  ;;  %v7837_v13 = vld [vmem:[#allocation10 + $0x14a0] sm:$0xff]  ;;  %v7910_v20 = vld [vmem:[#allocation10 + $0x16e8] sm:$0xff]  ;;  %v7928_v15 = vld [vmem:[#allocation10 + $0x1778] sm:$0xff] }
 0xf46   : > { %11400 = vmatprep.subr.bf16.mxu1 %v11399_v9  ;;  %11464 = vmatprep.subr.bf16.mxu0 %v11463_v51  ;;  %v7845_v0 = vld [vmem:[#allocation10 + $0x14e0] sm:$0xff]  ;;  %v7839_v9 = vld [vmem:[#allocation10 + $0x14b0] sm:$0xff]  ;;  %v7936_v30 = vld [vmem:[#allocation10 + $0x17b8] sm:$0xff] }
 0xf47   : > { %v7847_v51 = vld [vmem:[#allocation10 + $0x14f0] sm:$0xff]  ;;  %v11417_v36 = vpack.c.bf16 %v7845_v0, %v7837_v13  ;;  %v11431_v13 = vpack.c.bf16 %v7910_v20, %v7902_v53  ;;  %v11495_v0 = vpack.c.bf16 %v7912_v32, %v7904_v56  ;;  %v7944_v37 = vld [vmem:[#allocation10 + $0x17f8] sm:$0xff]  ;;  %v8371_v18 = vld [vmem:[#allocation10 + $0x1848] sm:$0xff] }
 0xf48   : > { %v11481_v23 = vpack.c.bf16 %v7847_v51, %v7839_v9  ;;  %v7918_v9 = vld [vmem:[#allocation10 + $0x1728] sm:$0xff]  ;;  %v8365_v54 = vld [vmem:[#allocation10 + $0x1818] sm:$0xff]  ;;  %v11507_v33 = vpack.c.bf16 %v8371_v18, %v8363_v59  ;;  %v8378_v53 = vld [vmem:[#allocation10 + $0x1880] sm:$0xff] }
 0xf49   : > { %11402 = vmatpush1.bf16.msra.mxu1 %v11401_v25  ;;  %11466 = vmatpush1.bf16.msra.mxu0 %v11465_v22  ;;  %v7853_v25 = vld [vmem:[#allocation10 + $0x1520] sm:$0xff]  ;;  %v7926_v51 = vld [vmem:[#allocation10 + $0x1768] sm:$0xff]  ;;  %v8428_v18 = vld [vmem:[#allocation10 + $0x1a10] sm:$0xff] }
 0xf4a   : > { %11404 = vmatprep.subr.bf16.mxu1 %v11403_v28  ;;  %11468 = vmatprep.subr.bf16.mxu0 %v11467_v29  ;;  %v7861_v22 = vld [vmem:[#allocation10 + $0x1560] sm:$0xff]  ;;  %v7855_v28 = vld [vmem:[#allocation10 + $0x1530] sm:$0xff] }
 0xf4b   : > { %v7863_v29 = vld [vmem:[#allocation10 + $0x1570] sm:$0xff]  ;;  %v11421_v49 = vpack.c.bf16 %v7861_v22, %v7853_v25  ;;  %v11435_v25 = vpack.c.bf16 %v7926_v51, %v7918_v9  ;;  %v11499_v22 = vpack.c.bf16 %v7928_v15, %v7920_v14  ;;  %v8386_v20 = vld [vmem:[#allocation10 + $0x18c0] sm:$0xff] }
 0xf4c   : > { %v11485_v10 = vpack.c.bf16 %v7863_v29, %v7855_v28  ;;  %v7934_v28 = vld [vmem:[#allocation10 + $0x17a8] sm:$0xff]  ;;  %v11513_v32 = vpack.c.bf16 %v8386_v20, %v8378_v53  ;;  %v8394_v51 = vld [vmem:[#allocation10 + $0x1900] sm:$0xff]  ;;  %v8396_v15 = vld [vmem:[#allocation10 + $0x1910] sm:$0xff] }
 0xf4d   : > { %11406 = vmatpush1.bf16.msra.mxu1 %v11405_v26  ;;  %11470 = vmatpush1.bf16.msra.mxu0 %v11469_v35  ;;  %v7869_v26 = vld [vmem:[#allocation10 + $0x15a0] sm:$0xff]  ;;  %v7942_v29 = vld [vmem:[#allocation10 + $0x17e8] sm:$0xff]  ;;  %v8461_v53 = vld [vmem:[#allocation10 + $0x1b18] sm:$0xff] }
 0xf4e   : > { %11408 = vmatprep.subr.bf16.mxu1 %v11407_v41  ;;  %11472 = vmatprep.subr.bf16.mxu0 %v11471_v19  ;;  %v7877_v35 = vld [vmem:[#allocation10 + $0x15e0] sm:$0xff]  ;;  %v7871_v41 = vld [vmem:[#allocation10 + $0x15b0] sm:$0xff]  ;;  %v8469_v20 = vld [vmem:[#allocation10 + $0x1b58] sm:$0xff] }
 0xf4f   : > { %v7879_v19 = vld [vmem:[#allocation10 + $0x15f0] sm:$0xff]  ;;  %v11425_v17 = vpack.c.bf16 %v7877_v35, %v7869_v26  ;;  %v11503_v26 = vpack.c.bf16 %v7944_v37, %v7936_v30  ;;  %v7941_v35 = vld [vmem:[#allocation10 + $0x17e0] sm:$0xff] }
 0xf50   : > { %v11489_v47 = vpack.c.bf16 %v7879_v19, %v7871_v41  ;;  %v8402_v14 = vld [vmem:[#allocation10 + $0x1940] sm:$0xff]  ;;  %v8412_v37 = vld [vmem:[#allocation10 + $0x1990] sm:$0xff] }
 0xf51   : > { %11410 = vmatpush1.bf16.msra.mxu1 %v11409_v48  ;;  %11474 = vmatpush1.bf16.msra.mxu0 %v11473_v45  ;;  %v7885_v48 = vld [vmem:[#allocation10 + $0x1620] sm:$0xff] }
 0xf52   : > { %11412 = vmatprep.subr.bf16.mxu1 %v11411_v42  ;;  %11476 = vmatprep.subr.bf16.mxu0 %v11475_v11  ;;  %v7893_v45 = vld [vmem:[#allocation10 + $0x1660] sm:$0xff]  ;;  %v7887_v42 = vld [vmem:[#allocation10 + $0x1630] sm:$0xff] }
 0xf53   : > { %v7895_v11 = vld [vmem:[#allocation10 + $0x1670] sm:$0xff]  ;;  %v11429_v58 = vpack.c.bf16 %v7893_v45, %v7885_v48  ;;  %v8370_v48 = vld [vmem:[#allocation10 + $0x1840] sm:$0xff] }
 0xf54   : > { %v11493_v61 = vpack.c.bf16 %v7895_v11, %v7887_v42  ;;  %v8364_v45 = vld [vmem:[#allocation10 + $0x1810] sm:$0xff]  ;;  %v8381_v42 = vld [vmem:[#allocation10 + $0x1898] sm:$0xff]  ;;  %v8418_v30 = vld [vmem:[#allocation10 + $0x19c0] sm:$0xff] }
 0xf55   : > { %11414 = vmatpush1.bf16.msra.mxu1 %v11413_v60  ;;  %11478 = vmatpush1.bf16.msra.mxu0 %v11477_v52  ;;  %v7901_v60 = vld [vmem:[#allocation10 + $0x16a0] sm:$0xff]  ;;  %v8389_v11 = vld [vmem:[#allocation10 + $0x18d8] sm:$0xff] }
 0xf56   : > { %11416 = vmatprep.subr.bf16.mxu1 %v11415_v1  ;;  %11480 = vmatprep.subr.bf16.mxu0 %v11479_v7  ;;  %v7909_v52 = vld [vmem:[#allocation10 + $0x16e0] sm:$0xff]  ;;  %v7903_v1 = vld [vmem:[#allocation10 + $0x16b0] sm:$0xff]  ;;  %v11575_v56 = vpack.c.bf16 %v8389_v11, %v8381_v42  ;;  %v8467_v11 = vld [vmem:[#allocation10 + $0x1b48] sm:$0xff] }
 0xf57   : > { %v7911_v7 = vld [vmem:[#allocation10 + $0x16f0] sm:$0xff]  ;;  %v11433_v16 = vpack.c.bf16 %v7909_v52, %v7901_v60  ;;  %v8395_v60 = vld [vmem:[#allocation10 + $0x1908] sm:$0xff] }
 0xf58   : > { %v11497_v21 = vpack.c.bf16 %v7911_v7, %v7903_v1  ;;  %v8405_v1 = vld [vmem:[#allocation10 + $0x1958] sm:$0xff]  ;;  %v8452_v42 = vld [vmem:[#allocation10 + $0x1ad0] sm:$0xff] }
 0xf59   : > { %11418 = vmatpush1.bf16.msra.mxu1 %v11417_v36  ;;  %11482 = vmatpush1.bf16.msra.mxu0 %v11481_v23  ;;  %v7917_v36 = vld [vmem:[#allocation10 + $0x1720] sm:$0xff] }
 0xf5a   : > { %11420 = vmatprep.subr.bf16.mxu1 %v11419_v34  ;;  %11484 = vmatprep.subr.bf16.mxu0 %v11483_v27  ;;  %v7925_v23 = vld [vmem:[#allocation10 + $0x1760] sm:$0xff]  ;;  %v7919_v34 = vld [vmem:[#allocation10 + $0x1730] sm:$0xff] }
 0xf5b   : > { %v7927_v27 = vld [vmem:[#allocation10 + $0x1770] sm:$0xff]  ;;  %v11437_v31 = vpack.c.bf16 %v7925_v23, %v7917_v36  ;;  %v8411_v36 = vld [vmem:[#allocation10 + $0x1988] sm:$0xff] }
 0xf5c   : > { %v11501_v38 = vpack.c.bf16 %v7927_v27, %v7919_v34  ;;  %v8419_v23 = vld [vmem:[#allocation10 + $0x19c8] sm:$0xff]  ;;  %v8413_v34 = vld [vmem:[#allocation10 + $0x1998] sm:$0xff] }
 0xf5d   : > { %11422 = vmatpush1.bf16.msra.mxu1 %v11421_v49  ;;  %11486 = vmatpush1.bf16.msra.mxu0 %v11485_v10  ;;  %v7933_v49 = vld [vmem:[#allocation10 + $0x17a0] sm:$0xff]  ;;  %v11439_v10 = vpack.c.bf16 %v7942_v29, %v7934_v28  ;;  %v8421_v27 = vld [vmem:[#allocation10 + $0x19d8] sm:$0xff] }
 0xf5e   : > { %11424 = vmatprep.subr.bf16.mxu1 %v11423_v40  ;;  %11488 = vmatprep.subr.bf16.mxu0 %v11487_v63  ;;  %v7935_v40 = vld [vmem:[#allocation10 + $0x17b0] sm:$0xff]  ;;  %v11441_v41 = vpack.c.bf16 %v7941_v35, %v7933_v49  ;;  %v8410_v28 = vld [vmem:[#allocation10 + $0x1980] sm:$0xff]  ;;  %v11583_v29 = vpack.c.bf16 %v8421_v27, %v8413_v34  ;;  %v8427_v49 = vld [vmem:[#allocation10 + $0x1a08] sm:$0xff] }
 0xf5f   : > { %v7943_v63 = vld [vmem:[#allocation10 + $0x17f0] sm:$0xff]  ;;  %v8491_v34 = vld [vmem:[#allocation10 + $0x1c08] sm:$0xff] }
 0xf60   : > { %v11505_v19 = vpack.c.bf16 %v7943_v63, %v7935_v40  ;;  %v8437_v63 = vld [vmem:[#allocation10 + $0x1a58] sm:$0xff]  ;;  %v8499_v27 = vld [vmem:[#allocation10 + $0x1c48] sm:$0xff] }
 0xf61   : > { %11426 = vmatpush1.bf16.msra.mxu1 %v11425_v17  ;;  %11490 = vmatpush1.bf16.msra.mxu0 %v11489_v47  ;;  %v8373_v17 = vld [vmem:[#allocation10 + $0x1858] sm:$0xff] }
 0xf62   : > { %11428 = vmatprep.subr.bf16.mxu1 %v11427_v50  ;;  %11492 = vmatprep.subr.bf16.mxu0 %v11491_v8  ;;  %v11571_v47 = vpack.c.bf16 %v8373_v17, %v8365_v54  ;;  %v8372_v50 = vld [vmem:[#allocation10 + $0x1850] sm:$0xff]  ;;  %v8451_v17 = vld [vmem:[#allocation10 + $0x1ac8] sm:$0xff] }
 0xf63   : > { %v11573_v8 = vpack.c.bf16 %v8372_v50, %v8364_v45  ;;  %v8436_v54 = vld [vmem:[#allocation10 + $0x1a50] sm:$0xff]  ;;  %v8442_v50 = vld [vmem:[#allocation10 + $0x1a80] sm:$0xff] }
 0xf64   : > { %v11589_v45 = vpack.c.bf16 %v8436_v54, %v8428_v18 }
 0xf65   : > { %11430 = vmatpush1.bf16.msra.mxu1 %v11429_v58  ;;  %11494 = vmatpush1.bf16.msra.mxu0 %v11493_v61  ;;  %v8380_v58 = vld [vmem:[#allocation10 + $0x1890] sm:$0xff] }
 0xf66   : > { %11432 = vmatprep.subr.bf16.mxu1 %v11431_v13  ;;  %11496 = vmatprep.subr.bf16.mxu0 %v11495_v0  ;;  %v8388_v61 = vld [vmem:[#allocation10 + $0x18d0] sm:$0xff]  ;;  %v8403_v13 = vld [vmem:[#allocation10 + $0x1948] sm:$0xff]  ;;  %v8397_v0 = vld [vmem:[#allocation10 + $0x1918] sm:$0xff] }
 0xf67   : > { %v11577_v52 = vpack.c.bf16 %v8388_v61, %v8380_v58  ;;  %v11515_v7 = vpack.c.bf16 %v8403_v13, %v8395_v60  ;;  %v11579_v9 = vpack.c.bf16 %v8405_v1, %v8397_v0  ;;  %v8458_v61 = vld [vmem:[#allocation10 + $0x1b00] sm:$0xff]  ;;  %v11595_v13 = vpack.c.bf16 %v8469_v20, %v8461_v53  ;;  %v8468_v0 = vld [vmem:[#allocation10 + $0x1b50] sm:$0xff]  ;;  %v8475_v1 = vld [vmem:[#allocation10 + $0x1b88] sm:$0xff] }
 0xf68   : > { %v8466_v60 = vld [vmem:[#allocation10 + $0x1b40] sm:$0xff]  ;;  %v8524_v53 = vld [vmem:[#allocation10 + $0x1d10] sm:$0xff] }
 0xf69   : > { %11434 = vmatpush1.bf16.msra.mxu1 %v11433_v16  ;;  %11498 = vmatpush1.bf16.msra.mxu0 %v11497_v21  ;;  %v11517_v16 = vpack.c.bf16 %v8402_v14, %v8394_v51  ;;  %v8404_v21 = vld [vmem:[#allocation10 + $0x1950] sm:$0xff]  ;;  %v8485_v51 = vld [vmem:[#allocation10 + $0x1bd8] sm:$0xff]  ;;  %v11533_v14 = vpack.c.bf16 %v8466_v60, %v8458_v61 }
 0xf6a   : > { %11436 = vmatprep.subr.bf16.mxu1 %v11435_v25  ;;  %11500 = vmatprep.subr.bf16.mxu0 %v11499_v22  ;;  %v11581_v25 = vpack.c.bf16 %v8404_v21, %v8396_v15  ;;  %v11519_v22 = vpack.c.bf16 %v8419_v23, %v8411_v36  ;;  %v8474_v21 = vld [vmem:[#allocation10 + $0x1b80] sm:$0xff]  ;;  %v8476_v23 = vld [vmem:[#allocation10 + $0x1b90] sm:$0xff]  ;;  %v8541_v61 = vld [vmem:[#allocation10 + $0x1d98] sm:$0xff] }
 0xf6b   : > { %v8482_v36 = vld [vmem:[#allocation10 + $0x1bc0] sm:$0xff]  ;;  %v8549_v60 = vld [vmem:[#allocation10 + $0x1dd8] sm:$0xff] }
 0xf6d   : > { %11438 = vmatpush1.bf16.msra.mxu1 %v11437_v31  ;;  %11502 = vmatpush1.bf16.msra.mxu0 %v11501_v38  ;;  %v8420_v31 = vld [vmem:[#allocation10 + $0x19d0] sm:$0xff]  ;;  %v11521_v38 = vpack.c.bf16 %v8418_v30, %v8410_v28  ;;  %v8493_v28 = vld [vmem:[#allocation10 + $0x1c18] sm:$0xff]  ;;  %v11537_v30 = vpack.c.bf16 %v8482_v36, %v8474_v21 }
 0xf6e   : > { %11440 = vmatprep.subr.bf16.mxu1 %v11439_v10  ;;  %11504 = vmatprep.subr.bf16.mxu0 %v11503_v26  ;;  %v8435_v10 = vld [vmem:[#allocation10 + $0x1a48] sm:$0xff]  ;;  %v8429_v26 = vld [vmem:[#allocation10 + $0x1a18] sm:$0xff]  ;;  %v11585_v35 = vpack.c.bf16 %v8420_v31, %v8412_v37  ;;  %v11539_v31 = vpack.c.bf16 %v8499_v27, %v8491_v34  ;;  %v8554_v34 = vld [vmem:[#allocation10 + $0x1e00] sm:$0xff] }
 0xf6f   : > { %v11523_v40 = vpack.c.bf16 %v8435_v10, %v8427_v49  ;;  %v11587_v59 = vpack.c.bf16 %v8437_v63, %v8429_v26  ;;  %v8498_v49 = vld [vmem:[#allocation10 + $0x1c40] sm:$0xff]  ;;  %v8492_v10 = vld [vmem:[#allocation10 + $0x1c10] sm:$0xff]  ;;  %v8515_v63 = vld [vmem:[#allocation10 + $0x1cc8] sm:$0xff] }
 0xf70   : > { %v8557_v21 = vld [vmem:[#allocation10 + $0x1e18] sm:$0xff]  ;;  %v8562_v27 = vld [vmem:[#allocation10 + $0x1e40] sm:$0xff] }
 0xf71   : > { %11442 = vmatpush1.bf16.msra.mxu1 %v11441_v41  ;;  %11506 = vmatpush1.bf16.msra.mxu0 %v11505_v19  ;;  %v8426_v41 = vld [vmem:[#allocation10 + $0x1a00] sm:$0xff]  ;;  %v8565_v36 = vld [vmem:[#allocation10 + $0x1e58] sm:$0xff] }
 0xf72   : > { %9324 = vmatprep.subr.msk.mxu1 %vm454_vm1, %v13001_v39  ;;  %11508 = vmatprep.subr.bf16.mxu0 %v11507_v33  ;;  %v8362_v39 = vld [vmem:[#allocation10 + $0x1800] sm:$0xff]  ;;  %v8443_v33 = vld [vmem:[#allocation10 + $0x1a88] sm:$0xff] }
 0xf73   : > { %v8434_v19 = vld [vmem:[#allocation10 + $0x1a40] sm:$0xff] }
 0xf74   : > { %8152 = vmatmul.mubr.f32.vlgmr.msra.gmra.mrb[68].mxu1 %v13054_v57  ;;  %8223 = vmatmul.mubr.f32.vlgmr.msra.gmra.mrb[46].mxu0 %v13054_v57  ;;  %v11509_v57 = vpack.c.bf16 %v8370_v48, %v8362_v39  ;;  %v8453_v39 = vld [vmem:[#allocation10 + $0x1ad8] sm:$0xff]  ;;  %v11525_v48 = vpack.c.bf16 %v8434_v19, %v8426_v41 }
 0xf75   : > { %9325 = vmatpush1.msk.msra.mxu1 %vm454_vm1, %v12999_v2  ;;  %8354 = vmatprep.mubr.f32.mxu1 %v12196_v3  ;;  %v8379_v2 = vld [vmem:[#allocation10 + $0x1888] sm:$0xff]  ;;  %v8509_v41 = vld [vmem:[#allocation10 + $0x1c98] sm:$0xff] }
 0xf76   : > { %11572 = vmatprep.subr.bf16.mxu1 %v11571_v47  ;;  %11510 = vmatpush1.bf16.msra.mxu0 %v11509_v57  ;;  %v8387_v3 = vld [vmem:[#allocation10 + $0x18c8] sm:$0xff]  ;;  %v8445_v47 = vld [vmem:[#allocation10 + $0x1a98] sm:$0xff]  ;;  %v11527_v57 = vpack.c.bf16 %v8451_v17, %v8443_v33  ;;  %v8506_v33 = vld [vmem:[#allocation10 + $0x1c80] sm:$0xff] }
 0xf77   : > { %v8517_v19 = vld [vmem:[#allocation10 + $0x1cd8] sm:$0xff]  ;;  %v8514_v17 = vld [vmem:[#allocation10 + $0x1cc0] sm:$0xff] }
 0xf78   : > { %9326 = vmatmul.mubr.msk.f32.vlgmr.msra.gmra.mrb[70].mxu1 %vm6263_vm8, %v12685_v6  ;;  %v11511_v6 = vpack.c.bf16 %v8387_v3, %v8379_v2  ;;  %v8444_v2 = vld [vmem:[#allocation10 + $0x1a90] sm:$0xff]  ;;  %v11591_v3 = vpack.c.bf16 %v8453_v39, %v8445_v47  ;;  %v11607_v39 = vpack.c.bf16 %v8517_v19, %v8509_v41 }
 0xf79   : > { %11574 = vmatpush1.bf16.msra.mxu1 %v11573_v8  ;;  %v8450_v8 = vld [vmem:[#allocation10 + $0x1ac0] sm:$0xff]  ;;  %v8508_v47 = vld [vmem:[#allocation10 + $0x1c90] sm:$0xff] }
 0xf7a   : > { %11512 = vmatprep.subr.bf16.mxu0 %v11511_v6  ;;  %11576 = vmatprep.subr.bf16.mxu1 %v11575_v56  ;;  %v8459_v6 = vld [vmem:[#allocation10 + $0x1b08] sm:$0xff]  ;;  %v11529_v56 = vpack.c.bf16 %v8450_v8, %v8442_v50  ;;  %v8525_v50 = vld [vmem:[#allocation10 + $0x1d18] sm:$0xff]  ;;  %v8572_v41 = vld [vmem:[#allocation10 + $0x1e90] sm:$0xff] }
 0xf7b   : > { %11514 = vmatpush1.bf16.msra.mxu0 %v11513_v32  ;;  %v11593_v32 = vpack.c.bf16 %v8452_v42, %v8444_v2  ;;  %v11531_v58 = vpack.c.bf16 %v8467_v11, %v8459_v6  ;;  %v8533_v8 = vld [vmem:[#allocation10 + $0x1d58] sm:$0xff]  ;;  %v11545_v2 = vpack.c.bf16 %v8514_v17, %v8506_v33  ;;  %v8522_v6 = vld [vmem:[#allocation10 + $0x1d00] sm:$0xff] }
 0xf7c   : > { %11516 = vmatprep.subr.bf16.mxu0 %v11515_v7  ;;  %v8483_v7 = vld [vmem:[#allocation10 + $0x1bc8] sm:$0xff]  ;;  %v8530_v11 = vld [vmem:[#allocation10 + $0x1d40] sm:$0xff]  ;;  %v11611_v20 = vpack.c.bf16 %v8533_v8, %v8525_v50  ;;  %v8589_v33 = vld [vmem:[#allocation10 + $0x1f18] sm:$0xff] }
 0xf7d   : > { %11578 = vmatpush1.bf16.msra.mxu1 %v11577_v52  ;;  %v8460_v52 = vld [vmem:[#allocation10 + $0x1b10] sm:$0xff]  ;;  %v8597_v17 = vld [vmem:[#allocation10 + $0x1f58] sm:$0xff] }
 0xf7e   : > { %11580 = vmatprep.subr.bf16.mxu1 %v11579_v9  ;;  %v8477_v9 = vld [vmem:[#allocation10 + $0x1b98] sm:$0xff]  ;;  %v11597_v15 = vpack.c.bf16 %v8468_v0, %v8460_v52  ;;  %v11549_v52 = vpack.c.bf16 %v8530_v11, %v8522_v6  ;;  %v11627_v50 = vpack.c.bf16 %v8597_v17, %v8589_v33  ;;  %v8588_v8 = vld [vmem:[#allocation10 + $0x1f10] sm:$0xff]  ;;  %v8603_v6 = vld [vmem:[#allocation10 + $0x1f88] sm:$0xff] }
 0xf7f   : > { %11518 = vmatpush1.bf16.msra.mxu0 %v11517_v16  ;;  %v11535_v16 = vpack.c.bf16 %v8483_v7, %v8475_v1  ;;  %v8538_v1 = vld [vmem:[#allocation10 + $0x1d80] sm:$0xff]  ;;  %v8611_v11 = vld [vmem:[#allocation10 + $0x1fc8] sm:$0xff] }
 0xf80   : > { %11520 = vmatprep.subr.bf16.mxu0 %v11519_v22  ;;  %v8484_v22 = vld [vmem:[#allocation10 + $0x1bd0] sm:$0xff]  ;;  %v8546_v7 = vld [vmem:[#allocation10 + $0x1dc0] sm:$0xff] }
 0xf81   : > { %11582 = vmatpush1.bf16.msra.mxu1 %v11581_v25  ;;  %v11599_v25 = vpack.c.bf16 %v8485_v51, %v8477_v9  ;;  %v11601_v37 = vpack.c.bf16 %v8484_v22, %v8476_v23  ;;  %v8540_v9 = vld [vmem:[#allocation10 + $0x1d90] sm:$0xff]  ;;  %v11615_v51 = vpack.c.bf16 %v8549_v60, %v8541_v61  ;;  %v11553_v23 = vpack.c.bf16 %v8546_v7, %v8538_v1  ;;  %v8367_v1 = vld [vmem:[#allocation10 + $0x1828] sm:$0xff] }
 0xf82   : > { %11584 = vmatprep.subr.bf16.mxu1 %v11583_v29  ;;  %v8501_v29 = vld [vmem:[#allocation10 + $0x1c58] sm:$0xff]  ;;  %v8375_v7 = vld [vmem:[#allocation10 + $0x1868] sm:$0xff] }
 0xf83   : > { %11522 = vmatpush1.bf16.msra.mxu0 %v11521_v38  ;;  %v8490_v38 = vld [vmem:[#allocation10 + $0x1c00] sm:$0xff]  ;;  %v11603_v26 = vpack.c.bf16 %v8501_v29, %v8493_v28  ;;  %v8556_v28 = vld [vmem:[#allocation10 + $0x1e10] sm:$0xff]  ;;  %v11619_v29 = vpack.c.bf16 %v8565_v36, %v8557_v21 }
 0xf84   : > { %11524 = vmatprep.subr.bf16.mxu0 %v11523_v40  ;;  %v8507_v40 = vld [vmem:[#allocation10 + $0x1c88] sm:$0xff] }
 0xf85   : > { %11586 = vmatpush1.bf16.msra.mxu1 %v11585_v35  ;;  %v8500_v35 = vld [vmem:[#allocation10 + $0x1c50] sm:$0xff]  ;;  %v11543_v54 = vpack.c.bf16 %v8515_v63, %v8507_v40  ;;  %v8570_v40 = vld [vmem:[#allocation10 + $0x1e80] sm:$0xff] }
 0xf86   : > { %11588 = vmatprep.subr.bf16.mxu1 %v11587_v59  ;;  %v11541_v59 = vpack.c.bf16 %v8498_v49, %v8490_v38  ;;  %v11605_v18 = vpack.c.bf16 %v8500_v35, %v8492_v10  ;;  %v8573_v38 = vld [vmem:[#allocation10 + $0x1e98] sm:$0xff]  ;;  %v11557_v10 = vpack.c.bf16 %v8562_v27, %v8554_v34  ;;  %v8578_v63 = vld [vmem:[#allocation10 + $0x1ec0] sm:$0xff] }
 0xf87   : > { %11526 = vmatpush1.bf16.msra.mxu0 %v11525_v48  ;;  %v8516_v48 = vld [vmem:[#allocation10 + $0x1cd0] sm:$0xff]  ;;  %v8581_v49 = vld [vmem:[#allocation10 + $0x1ed8] sm:$0xff] }
 0xf88   : > { %11528 = vmatprep.subr.bf16.mxu0 %v11527_v57  ;;  %v8531_v57 = vld [vmem:[#allocation10 + $0x1d48] sm:$0xff]  ;;  %v11623_v19 = vpack.c.bf16 %v8581_v49, %v8573_v38 }
 0xf89   : > { %11590 = vmatpush1.bf16.msra.mxu1 %v11589_v45  ;;  %v8523_v45 = vld [vmem:[#allocation10 + $0x1d08] sm:$0xff] }
 0xf8a   : > { %11592 = vmatprep.subr.bf16.mxu1 %v11591_v3  ;;  %v11609_v3 = vpack.c.bf16 %v8516_v48, %v8508_v47  ;;  %v11547_v42 = vpack.c.bf16 %v8531_v57, %v8523_v45  ;;  %v11561_v47 = vpack.c.bf16 %v8578_v63, %v8570_v40  ;;  %v8586_v45 = vld [vmem:[#allocation10 + $0x1f00] sm:$0xff] }
 0xf8b   : > { %11530 = vmatpush1.bf16.msra.mxu0 %v11529_v56  ;;  %v8532_v56 = vld [vmem:[#allocation10 + $0x1d50] sm:$0xff]  ;;  %v8594_v57 = vld [vmem:[#allocation10 + $0x1f40] sm:$0xff] }
 0xf8c   : > { %11532 = vmatprep.subr.bf16.mxu0 %v11531_v58  ;;  %v8547_v58 = vld [vmem:[#allocation10 + $0x1dc8] sm:$0xff] }
 0xf8d   : > { %11594 = vmatpush1.bf16.msra.mxu1 %v11593_v32  ;;  %v8539_v32 = vld [vmem:[#allocation10 + $0x1d88] sm:$0xff] }
 0xf8e   : > { %11596 = vmatprep.subr.bf16.mxu1 %v11595_v13  ;;  %v11613_v13 = vpack.c.bf16 %v8532_v56, %v8524_v53  ;;  %v11551_v0 = vpack.c.bf16 %v8547_v58, %v8539_v32  ;;  %v8605_v53 = vld [vmem:[#allocation10 + $0x1f98] sm:$0xff]  ;;  %v8602_v32 = vld [vmem:[#allocation10 + $0x1f80] sm:$0xff] }
 0xf8f   : > { %11534 = vmatpush1.bf16.msra.mxu0 %v11533_v14  ;;  %v8548_v14 = vld [vmem:[#allocation10 + $0x1dd0] sm:$0xff]  ;;  %v8613_v56 = vld [vmem:[#allocation10 + $0x1fd8] sm:$0xff]  ;;  %v8610_v58 = vld [vmem:[#allocation10 + $0x1fc0] sm:$0xff] }
 0xf90   : > { %11536 = vmatprep.subr.bf16.mxu0 %v11535_v16  ;;  %v8563_v16 = vld [vmem:[#allocation10 + $0x1e48] sm:$0xff]  ;;  %v11631_v61 = vpack.c.bf16 %v8613_v56, %v8605_v53  ;;  %v11569_v60 = vpack.c.bf16 %v8610_v58, %v8602_v32  ;;  %v8409_v53 = vld [vmem:[#allocation10 + $0x1978] sm:$0xff] }
 0xf91   : > { %11598 = vmatpush1.bf16.msra.mxu1 %v11597_v15  ;;  %v8555_v15 = vld [vmem:[#allocation10 + $0x1e08] sm:$0xff] }
 0xf92   : > { %11600 = vmatprep.subr.bf16.mxu1 %v11599_v25  ;;  %v11617_v25 = vpack.c.bf16 %v8548_v14, %v8540_v9  ;;  %v11555_v22 = vpack.c.bf16 %v8563_v16, %v8555_v15  ;;  %v8369_v9 = vld [vmem:[#allocation10 + $0x1838] sm:$0xff] }
 0xf93   : > { %11538 = vmatpush1.bf16.msra.mxu0 %v11537_v30  ;;  %v8564_v30 = vld [vmem:[#allocation10 + $0x1e50] sm:$0xff]  ;;  %v8377_v14 = vld [vmem:[#allocation10 + $0x1878] sm:$0xff] }
 0xf94   : > { %11540 = vmatprep.subr.bf16.mxu0 %v11539_v31  ;;  %v8579_v31 = vld [vmem:[#allocation10 + $0x1ec8] sm:$0xff]  ;;  %v11699_v15 = vpack.c.bf16 %v8377_v14, %v8369_v9  ;;  %v8417_v14 = vld [vmem:[#allocation10 + $0x19b8] sm:$0xff] }
 0xf95   : > { %11602 = vmatpush1.bf16.msra.mxu1 %v11601_v37  ;;  %v8571_v37 = vld [vmem:[#allocation10 + $0x1e88] sm:$0xff] }
 0xf96   : > { %11604 = vmatprep.subr.bf16.mxu1 %v11603_v26  ;;  %v11621_v26 = vpack.c.bf16 %v8564_v30, %v8556_v28  ;;  %v11559_v35 = vpack.c.bf16 %v8579_v31, %v8571_v37  ;;  %v8366_v37 = vld [vmem:[#allocation10 + $0x1820] sm:$0xff] }
 0xf97   : > { %11542 = vmatpush1.bf16.msra.mxu0 %v11541_v59  ;;  %v8580_v59 = vld [vmem:[#allocation10 + $0x1ed0] sm:$0xff]  ;;  %v8374_v31 = vld [vmem:[#allocation10 + $0x1860] sm:$0xff] }
 0xf98   : > { %11544 = vmatprep.subr.bf16.mxu0 %v11543_v54  ;;  %v8595_v54 = vld [vmem:[#allocation10 + $0x1f48] sm:$0xff]  ;;  %v11637_v17 = vpack.c.bf16 %v8374_v31, %v8366_v37  ;;  %v8433_v37 = vld [vmem:[#allocation10 + $0x1a38] sm:$0xff] }
 0xf99   : > { %11606 = vmatpush1.bf16.msra.mxu1 %v11605_v18  ;;  %v8587_v18 = vld [vmem:[#allocation10 + $0x1f08] sm:$0xff]  ;;  %v8441_v31 = vld [vmem:[#allocation10 + $0x1a78] sm:$0xff] }
 0xf9a   : > { %11608 = vmatprep.subr.bf16.mxu1 %v11607_v39  ;;  %v11625_v39 = vpack.c.bf16 %v8580_v59, %v8572_v41  ;;  %v11563_v48 = vpack.c.bf16 %v8595_v54, %v8587_v18  ;;  %v8391_v41 = vld [vmem:[#allocation10 + $0x18e8] sm:$0xff]  ;;  %v8393_v59 = vld [vmem:[#allocation10 + $0x18f8] sm:$0xff] }
 0xf9b   : > { %11546 = vmatpush1.bf16.msra.mxu0 %v11545_v2  ;;  %v8596_v2 = vld [vmem:[#allocation10 + $0x1f50] sm:$0xff] }
 0xf9c   : > { %11548 = vmatprep.subr.bf16.mxu0 %v11547_v42  ;;  %v11629_v42 = vpack.c.bf16 %v8596_v2, %v8588_v8  ;;  %v8384_v8 = vld [vmem:[#allocation10 + $0x18b0] sm:$0xff] }
 0xf9d   : > { %11610 = vmatpush1.bf16.msra.mxu1 %v11609_v3  ;;  %v11565_v3 = vpack.c.bf16 %v8594_v57, %v8586_v45  ;;  %v8392_v2 = vld [vmem:[#allocation10 + $0x18f0] sm:$0xff] }
 0xf9e   : > { %11612 = vmatprep.subr.bf16.mxu1 %v11611_v20  ;;  %v11567_v20 = vpack.c.bf16 %v8611_v11, %v8603_v6  ;;  %v8407_v6 = vld [vmem:[#allocation10 + $0x1968] sm:$0xff]  ;;  %v8401_v11 = vld [vmem:[#allocation10 + $0x1938] sm:$0xff]  ;;  %v11705_v58 = vpack.c.bf16 %v8392_v2, %v8384_v8 }
 0xf9f   : > { %11550 = vmatpush1.bf16.msra.mxu0 %v11549_v52  ;;  %v8604_v52 = vld [vmem:[#allocation10 + $0x1f90] sm:$0xff]  ;;  %v8463_v8 = vld [vmem:[#allocation10 + $0x1b28] sm:$0xff] }
 0xfa0   : > { %11552 = vmatprep.subr.bf16.mxu0 %v11551_v0  ;;  %v8471_v2 = vld [vmem:[#allocation10 + $0x1b68] sm:$0xff] }
 0xfa1   : > { %11614 = vmatpush1.bf16.msra.mxu1 %v11613_v13  ;;  %v8612_v13 = vld [vmem:[#allocation10 + $0x1fd0] sm:$0xff] }
 0xfa2   : > { %11616 = vmatprep.subr.bf16.mxu1 %v11615_v51  ;;  %v11633_v0 = vpack.c.bf16 %v8612_v13, %v8604_v52  ;;  %v11635_v51 = vpack.c.bf16 %v8375_v7, %v8367_v1  ;;  %v11707_v13 = vpack.c.bf16 %v8409_v53, %v8401_v11  ;;  %v8408_v1 = vld [vmem:[#allocation10 + $0x1970] sm:$0xff]  ;;  %v8415_v7 = vld [vmem:[#allocation10 + $0x19a8] sm:$0xff]  ;;  %v8462_v53 = vld [vmem:[#allocation10 + $0x1b20] sm:$0xff] }
 0xfa3   : > { %11554 = vmatpush1.bf16.msra.mxu0 %v11553_v23 }
 0xfa4   : > { %11556 = vmatprep.subr.bf16.mxu0 %v11555_v22 }
 0xfa5   : > { %11618 = vmatpush1.bf16.msra.mxu1 %v11617_v25 }
 0xfa6   : > { %11620 = vmatprep.subr.bf16.mxu1 %v11619_v29 }
 0xfa7   : > { %11558 = vmatpush1.bf16.msra.mxu0 %v11557_v10  ;;  %v8368_v10 = vld [vmem:[#allocation10 + $0x1830] sm:$0xff] }
 0xfa8   : > { %11560 = vmatprep.subr.bf16.mxu0 %v11559_v35  ;;  %v8383_v35 = vld [vmem:[#allocation10 + $0x18a8] sm:$0xff] }
 0xfa9   : > { %11622 = vmatpush1.bf16.msra.mxu1 %v11621_v26  ;;  %v8376_v26 = vld [vmem:[#allocation10 + $0x1870] sm:$0xff]  ;;  %v11639_v57 = vpack.c.bf16 %v8391_v41, %v8383_v35  ;;  %v11715_v35 = vpack.c.bf16 %v8441_v31, %v8433_v37  ;;  %v8447_v41 = vld [vmem:[#allocation10 + $0x1aa8] sm:$0xff] }
 0xfaa   : > { %11624 = vmatprep.subr.bf16.mxu1 %v11623_v19  ;;  %v8385_v19 = vld [vmem:[#allocation10 + $0x18b8] sm:$0xff] }
 0xfab   : > { %11562 = vmatpush1.bf16.msra.mxu0 %v11561_v47  ;;  %v11701_v47 = vpack.c.bf16 %v8376_v26, %v8368_v10  ;;  %v8438_v10 = vld [vmem:[#allocation10 + $0x1a60] sm:$0xff] }
 0xfac   : > { %11564 = vmatprep.subr.bf16.mxu0 %v11563_v48  ;;  %v8390_v48 = vld [vmem:[#allocation10 + $0x18e0] sm:$0xff] }
 0xfad   : > { %11626 = vmatpush1.bf16.msra.mxu1 %v11625_v39  ;;  %v8382_v39 = vld [vmem:[#allocation10 + $0x18a0] sm:$0xff] }
 0xfae   : > { %11628 = vmatprep.subr.bf16.mxu1 %v11627_v50  ;;  %v11703_v50 = vpack.c.bf16 %v8393_v59, %v8385_v19  ;;  %v8455_v19 = vld [vmem:[#allocation10 + $0x1ae8] sm:$0xff]  ;;  %v8449_v59 = vld [vmem:[#allocation10 + $0x1ab8] sm:$0xff] }
 0xfaf   : > { %11566 = vmatpush1.bf16.msra.mxu0 %v11565_v3  ;;  %v8399_v3 = vld [vmem:[#allocation10 + $0x1928] sm:$0xff] }
 0xfb0   : > { %11568 = vmatprep.subr.bf16.mxu0 %v11567_v20  ;;  %v11641_v20 = vpack.c.bf16 %v8390_v48, %v8382_v39  ;;  %v11643_v52 = vpack.c.bf16 %v8407_v6, %v8399_v3  ;;  %v8454_v39 = vld [vmem:[#allocation10 + $0x1ae0] sm:$0xff]  ;;  %v11655_v48 = vpack.c.bf16 %v8455_v19, %v8447_v41  ;;  %v8465_v3 = vld [vmem:[#allocation10 + $0x1b38] sm:$0xff] }
 0xfb1   : > { %11630 = vmatpush1.bf16.msra.mxu1 %v11629_v42  ;;  %v8510_v41 = vld [vmem:[#allocation10 + $0x1ca0] sm:$0xff] }
 0xfb2   : > { %11632 = vmatprep.subr.bf16.mxu1 %v11631_v61  ;;  %v8398_v61 = vld [vmem:[#allocation10 + $0x1920] sm:$0xff] }
 0xfb3   : > { %11570 = vmatpush1.bf16.msra.mxu0 %v11569_v60  ;;  %v8406_v60 = vld [vmem:[#allocation10 + $0x1960] sm:$0xff] }
 0xfb4   : > { %11636 = vmatprep.subr.bf16.mxu0 %v11635_v51  ;;  %v8423_v51 = vld [vmem:[#allocation10 + $0x19e8] sm:$0xff]  ;;  %v8518_v19 = vld [vmem:[#allocation10 + $0x1ce0] sm:$0xff] }
 0xfb5   : > { %11634 = vmatpush1.bf16.msra.mxu1 %v11633_v0  ;;  %v8400_v0 = vld [vmem:[#allocation10 + $0x1930] sm:$0xff] }
 0xfb6   : > { %11700 = vmatprep.subr.bf16.mxu1 %v11699_v15  ;;  %v8425_v15 = vld [vmem:[#allocation10 + $0x19f8] sm:$0xff] }
0x1007   : > { %v8011_v16 = vpop.f32.mrb[66].mxu1  ;;  %v8082_v21 = vpop.f32.mrb[44].mxu0 }
0x1008   : > { %v8013_v36 = vpop.f32.mrb[67].mxu1  ;;  %v8084_v23 = vpop.f32.mrb[45].mxu0 }
0x1009   : > { %v8237_v25 = vcombine.low %v8011_v16, %v8013_v36  ;;  %v8238_v22 = vcombine.low %v8082_v21, %v8084_v23  ;;  %v11645_v21 = vpack.c.bf16 %v8406_v60, %v8398_v61  ;;  %v11709_v36 = vpack.c.bf16 %v8408_v1, %v8400_v0  ;;  %v8414_v23 = vld [vmem:[#allocation10 + $0x19a0] sm:$0xff]  ;;  %v8472_v61 = vld [vmem:[#allocation10 + $0x1b70] sm:$0xff]  ;;  %v8479_v60 = vld [vmem:[#allocation10 + $0x1ba8] sm:$0xff] }
0x100a   : > { %v8489_v0 = vld [vmem:[#allocation10 + $0x1bf8] sm:$0xff] }
0x100b   : > { %v8247_v34 = vrot.slane %v8237_v25, %v13023_v62  ;;  %v8254_v27 = vrot.slane %v8238_v22, %v13023_v62  ;;  %v8422_v25 = vld [vmem:[#allocation10 + $0x19e0] sm:$0xff]  ;;  %v11647_v22 = vpack.c.bf16 %v8423_v51, %v8415_v7 }
0x100c   : > { %v8486_v51 = vld [vmem:[#allocation10 + $0x1be0] sm:$0xff] }
0x100d   : > { %v8269_v28 = vcombine.low %v8247_v34, %v8254_v27  ;;  %v11711_v34 = vpack.c.bf16 %v8425_v15, %v8417_v14  ;;  %v8416_v27 = vld [vmem:[#allocation10 + $0x19b0] sm:$0xff] }
0x100f   : > { %v8277_v56 = vrot.slane %v8269_v28, %v13023_v62  ;;  %v8424_v28 = vld [vmem:[#allocation10 + $0x19f0] sm:$0xff] }
0x1047   : > { %v8153_v29 = vpop.f32.mrb[68].mxu1  ;;  %v8224_v30 = vpop.f32.mrb[46].mxu0 }
0x1048   : > { %v8155_v38 = vpop.f32.mrb[69].mxu1  ;;  %v8226_v49 = vpop.f32.mrb[47].mxu0 }
0x1049   : > { %v8239_v40 = vcombine.low %v8153_v29, %v8155_v38  ;;  %v8240_v63 = vcombine.low %v8224_v30, %v8226_v49  ;;  %v8431_v29 = vld [vmem:[#allocation10 + $0x1a28] sm:$0xff]  ;;  %v11713_v38 = vpack.c.bf16 %v8424_v28, %v8416_v27  ;;  %v8430_v49 = vld [vmem:[#allocation10 + $0x1a20] sm:$0xff] }
0x104a   : > { %v8439_v30 = vld [vmem:[#allocation10 + $0x1a68] sm:$0xff] }
0x104b   : > { %v8261_v18 = vrot.slane %v8239_v40, %v13023_v62  ;;  %v8268_v54 = vrot.slane %v8240_v63, %v13023_v62  ;;  %v13078_v33 = vpop.f32.mrb[70].mxu1  ;;  %v11651_v26 = vpack.c.bf16 %v8439_v30, %v8431_v29  ;;  %v8432_v40 = vld [vmem:[#allocation10 + $0x1a30] sm:$0xff]  ;;  %v8494_v29 = vld [vmem:[#allocation10 + $0x1c20] sm:$0xff] }
0x104c   : > { %v8358_v45 = vpop.f32.mrb[71].mxu1  ;;  %v8440_v63 = vld [vmem:[#allocation10 + $0x1a70] sm:$0xff]  ;;  %v8502_v30 = vld [vmem:[#allocation10 + $0x1c60] sm:$0xff] }
0x104d   : > { %v8270_v42 = vcombine.low %v8261_v18, %v8268_v54  ;;  %8682 = vmatprep.mubr.f32.mxu0 %v8358_v45  ;;  %8753 = vmatprep.mubr.f32.mxu1 %v8358_v45  ;;  %v8457_v18 = vld [vmem:[#allocation10 + $0x1af8] sm:$0xff]  ;;  %v11653_v54 = vpack.c.bf16 %v8438_v10, %v8430_v49  ;;  %v8511_v49 = vld [vmem:[#allocation10 + $0x1ca8] sm:$0xff] }
0x104e   : > { %8683 = vmatmul.mubr.f32.vlgmr.msra.gmra.mrb[48].mxu0 %v13078_v33  ;;  %8754 = vmatmul.mubr.f32.vlgmr.msra.gmra.mrb[72].mxu1 %v13078_v33  ;;  %v8519_v10 = vld [vmem:[#allocation10 + $0x1ce8] sm:$0xff] }
0x104f   : > { %v8284_v32 = vrot.slane %v8270_v42, %v13023_v62  ;;  %11638 = vmatpush1.bf16.msra.mxu0 %v11637_v17  ;;  %11702 = vmatpush1.bf16.msra.mxu1 %v11701_v47  ;;  %v11717_v17 = vpack.c.bf16 %v8440_v63, %v8432_v40  ;;  %v8446_v47 = vld [vmem:[#allocation10 + $0x1aa0] sm:$0xff]  ;;  %v8473_v42 = vld [vmem:[#allocation10 + $0x1b78] sm:$0xff]  ;;  %v11669_v40 = vpack.c.bf16 %v8502_v30, %v8494_v29  ;;  %v8575_v29 = vld [vmem:[#allocation10 + $0x1ea8] sm:$0xff] }
0x1050   : > { %11640 = vmatprep.subr.bf16.mxu0 %v11639_v57  ;;  %11704 = vmatprep.subr.bf16.mxu1 %v11703_v50  ;;  %v8448_v57 = vld [vmem:[#allocation10 + $0x1ab0] sm:$0xff]  ;;  %v11657_v6 = vpack.c.bf16 %v8454_v39, %v8446_v47  ;;  %v8527_v47 = vld [vmem:[#allocation10 + $0x1d28] sm:$0xff] }
0x1051   : > { %v8285_v9 = vcombine.low %v8277_v56, %v8284_v32  ;;  %8824 = vmatprep.mubr.f32.mxu0 %v8358_v45  ;;  %8895 = vmatprep.mubr.f32.mxu1 %v8358_v45  ;;  %v11719_v45 = vpack.c.bf16 %v8457_v18, %v8449_v59  ;;  %v8456_v50 = vld [vmem:[#allocation10 + $0x1af0] sm:$0xff]  ;;  %v11659_v56 = vpack.c.bf16 %v8471_v2, %v8463_v8  ;;  %v8535_v39 = vld [vmem:[#allocation10 + $0x1d68] sm:$0xff]  ;;  %v8526_v8 = vld [vmem:[#allocation10 + $0x1d20] sm:$0xff] }
0x1052   : > { %v11721_v11 = vpack.c.bf16 %v8456_v50, %v8448_v57  ;;  %v11723_v32 = vpack.c.bf16 %v8473_v42, %v8465_v3  ;;  %v11671_v59 = vpack.c.bf16 %v8519_v10, %v8511_v49  ;;  %v11673_v57 = vpack.c.bf16 %v8518_v19, %v8510_v41  ;;  %v8534_v2 = vld [vmem:[#allocation10 + $0x1d60] sm:$0xff]  ;;  %v8583_v30 = vld [vmem:[#allocation10 + $0x1ee8] sm:$0xff] }
0x1053   : > { %v13085_v16 = vadd.f32 %v8285_v9, %v13063_v55  ;;  %11642 = vmatpush1.bf16.msra.mxu0 %v11641_v20  ;;  %11706 = vmatpush1.bf16.msra.mxu1 %v11705_v58  ;;  %v11649_v55 = vpack.c.bf16 %v8422_v25, %v8414_v23  ;;  %v8470_v20 = vld [vmem:[#allocation10 + $0x1b60] sm:$0xff]  ;;  %v8464_v58 = vld [vmem:[#allocation10 + $0x1b30] sm:$0xff]  ;;  %v8495_v23 = vld [vmem:[#allocation10 + $0x1c28] sm:$0xff]  ;;  %v11675_v3 = vpack.c.bf16 %v8535_v39, %v8527_v47 }
0x1054   : > { %11644 = vmatprep.subr.bf16.mxu0 %v11643_v52  ;;  %11708 = vmatprep.subr.bf16.mxu1 %v11707_v13  ;;  %v8487_v52 = vld [vmem:[#allocation10 + $0x1be8] sm:$0xff]  ;;  %v8481_v13 = vld [vmem:[#allocation10 + $0x1bb8] sm:$0xff]  ;;  %v11661_v1 = vpack.c.bf16 %v8470_v20, %v8462_v53  ;;  %v11725_v7 = vpack.c.bf16 %v8472_v61, %v8464_v58  ;;  %v8478_v9 = vld [vmem:[#allocation10 + $0x1ba0] sm:$0xff]  ;;  %v11677_v58 = vpack.c.bf16 %v8534_v2, %v8526_v8 }
0x1055   : > { %v11663_v14 = vpack.c.bf16 %v8487_v52, %v8479_v60  ;;  %v11727_v15 = vpack.c.bf16 %v8489_v0, %v8481_v13  ;;  %v8503_v25 = vld [vmem:[#allocation10 + $0x1c68] sm:$0xff]  ;;  %v11665_v27 = vpack.c.bf16 %v8486_v51, %v8478_v9  ;;  %v8542_v60 = vld [vmem:[#allocation10 + $0x1da0] sm:$0xff] }
0x1056   : > { %v11667_v37 = vpack.c.bf16 %v8503_v25, %v8495_v23  ;;  %v8543_v53 = vld [vmem:[#allocation10 + $0x1da8] sm:$0xff]  ;;  %v8550_v52 = vld [vmem:[#allocation10 + $0x1de0] sm:$0xff] }
0x1057   : > { %11646 = vmatpush1.bf16.msra.mxu0 %v11645_v21  ;;  %11710 = vmatpush1.bf16.msra.mxu1 %v11709_v36  ;;  %v8480_v21 = vld [vmem:[#allocation10 + $0x1bb0] sm:$0xff]  ;;  %v8551_v20 = vld [vmem:[#allocation10 + $0x1de8] sm:$0xff]  ;;  %v8558_v23 = vld [vmem:[#allocation10 + $0x1e20] sm:$0xff] }
0x1058   : > { %11648 = vmatprep.subr.bf16.mxu0 %v11647_v22  ;;  %11712 = vmatprep.subr.bf16.mxu1 %v11711_v34  ;;  %v8488_v36 = vld [vmem:[#allocation10 + $0x1bf0] sm:$0xff]  ;;  %v8497_v22 = vld [vmem:[#allocation10 + $0x1c38] sm:$0xff]  ;;  %v11679_v13 = vpack.c.bf16 %v8551_v20, %v8543_v53  ;;  %v8559_v9 = vld [vmem:[#allocation10 + $0x1e28] sm:$0xff] }
0x1059   : > { %v8505_v34 = vld [vmem:[#allocation10 + $0x1c78] sm:$0xff]  ;;  %v11729_v28 = vpack.c.bf16 %v8488_v36, %v8480_v21  ;;  %v8567_v51 = vld [vmem:[#allocation10 + $0x1e68] sm:$0xff]  ;;  %v11681_v21 = vpack.c.bf16 %v8550_v52, %v8542_v60  ;;  %v8566_v25 = vld [vmem:[#allocation10 + $0x1e60] sm:$0xff] }
0x105a   : > { %v11731_v31 = vpack.c.bf16 %v8505_v34, %v8497_v22  ;;  %v11683_v22 = vpack.c.bf16 %v8567_v51, %v8559_v9  ;;  %v8574_v49 = vld [vmem:[#allocation10 + $0x1ea0] sm:$0xff]  ;;  %v8591_v41 = vld [vmem:[#allocation10 + $0x1f28] sm:$0xff] }
0x105b   : > { %11650 = vmatpush1.bf16.msra.mxu0 %v11649_v55  ;;  %11714 = vmatpush1.bf16.msra.mxu1 %v11713_v38  ;;  %v8496_v55 = vld [vmem:[#allocation10 + $0x1c30] sm:$0xff]  ;;  %v8582_v10 = vld [vmem:[#allocation10 + $0x1ee0] sm:$0xff]  ;;  %v8599_v19 = vld [vmem:[#allocation10 + $0x1f68] sm:$0xff] }
0x105c   : > { %11652 = vmatprep.subr.bf16.mxu0 %v11651_v26  ;;  %11716 = vmatprep.subr.bf16.mxu1 %v11715_v35  ;;  %v8504_v38 = vld [vmem:[#allocation10 + $0x1c70] sm:$0xff]  ;;  %v8513_v26 = vld [vmem:[#allocation10 + $0x1cb8] sm:$0xff]  ;;  %v8590_v47 = vld [vmem:[#allocation10 + $0x1f20] sm:$0xff] }
0x105d   : > { %v8521_v35 = vld [vmem:[#allocation10 + $0x1cf8] sm:$0xff]  ;;  %v11733_v63 = vpack.c.bf16 %v8504_v38, %v8496_v55  ;;  %v11685_v55 = vpack.c.bf16 %v8566_v25, %v8558_v23  ;;  %v8598_v39 = vld [vmem:[#allocation10 + $0x1f60] sm:$0xff]  ;;  %v8607_v8 = vld [vmem:[#allocation10 + $0x1fa8] sm:$0xff] }
0x105e   : > { %v11735_v18 = vpack.c.bf16 %v8521_v35, %v8513_v26  ;;  %v11687_v26 = vpack.c.bf16 %v8583_v30, %v8575_v29  ;;  %v8615_v2 = vld [vmem:[#allocation10 + $0x1fe8] sm:$0xff]  ;;  %v8606_v53 = vld [vmem:[#allocation10 + $0x1fa0] sm:$0xff] }
0x105f   : > { %11654 = vmatpush1.bf16.msra.mxu0 %v11653_v54  ;;  %11718 = vmatpush1.bf16.msra.mxu1 %v11717_v17  ;;  %v8512_v54 = vld [vmem:[#allocation10 + $0x1cb0] sm:$0xff]  ;;  %v11695_v20 = vpack.c.bf16 %v8615_v2, %v8607_v8 }
0x1060   : > { %11656 = vmatprep.subr.bf16.mxu0 %v11655_v48  ;;  %11720 = vmatprep.subr.bf16.mxu1 %v11719_v45  ;;  %v8520_v17 = vld [vmem:[#allocation10 + $0x1cf0] sm:$0xff]  ;;  %v8529_v48 = vld [vmem:[#allocation10 + $0x1d38] sm:$0xff] }
0x1061   : > { %v8537_v45 = vld [vmem:[#allocation10 + $0x1d78] sm:$0xff]  ;;  %v11737_v50 = vpack.c.bf16 %v8520_v17, %v8512_v54  ;;  %v11689_v54 = vpack.c.bf16 %v8582_v10, %v8574_v49  ;;  %v8964_v49 = vld [vmem:[#allocation13] sm:$0xff] }
0x1062   : > { %v11739_v42 = vpack.c.bf16 %v8537_v45, %v8529_v48  ;;  %v11691_v48 = vpack.c.bf16 %v8599_v19, %v8591_v41 }
0x1063   : > { %11658 = vmatpush1.bf16.msra.mxu0 %v11657_v6  ;;  %11722 = vmatpush1.bf16.msra.mxu1 %v11721_v11  ;;  %v8528_v6 = vld [vmem:[#allocation10 + $0x1d30] sm:$0xff] }
0x1064   : > { %11660 = vmatprep.subr.bf16.mxu0 %v11659_v56  ;;  %11724 = vmatprep.subr.bf16.mxu1 %v11723_v32  ;;  %v8536_v11 = vld [vmem:[#allocation10 + $0x1d70] sm:$0xff]  ;;  %v8545_v56 = vld [vmem:[#allocation10 + $0x1db8] sm:$0xff] }
0x1065   : > { %v8553_v32 = vld [vmem:[#allocation10 + $0x1df8] sm:$0xff]  ;;  %v11741_v61 = vpack.c.bf16 %v8536_v11, %v8528_v6  ;;  %v11693_v6 = vpack.c.bf16 %v8598_v39, %v8590_v47 }
0x1066   : > { %v11743_v0 = vpack.c.bf16 %v8553_v32, %v8545_v56  ;;  %v8614_v32 = vld [vmem:[#allocation10 + $0x1fe0] sm:$0xff] }
0x1067   : > { %11662 = vmatpush1.bf16.msra.mxu0 %v11661_v1  ;;  %11726 = vmatpush1.bf16.msra.mxu1 %v11725_v7  ;;  %v8544_v1 = vld [vmem:[#allocation10 + $0x1db0] sm:$0xff]  ;;  %v11697_v60 = vpack.c.bf16 %v8614_v32, %v8606_v53 }
0x1068   : > { %11664 = vmatprep.subr.bf16.mxu0 %v11663_v14  ;;  %11728 = vmatprep.subr.bf16.mxu1 %v11727_v15  ;;  %v8552_v7 = vld [vmem:[#allocation10 + $0x1df0] sm:$0xff]  ;;  %v8561_v14 = vld [vmem:[#allocation10 + $0x1e38] sm:$0xff] }
0x1069   : > { %v8569_v15 = vld [vmem:[#allocation10 + $0x1e78] sm:$0xff]  ;;  %v11745_v36 = vpack.c.bf16 %v8552_v7, %v8544_v1 }
0x106a   : > { %v11747_v34 = vpack.c.bf16 %v8569_v15, %v8561_v14 }
0x106b   : > { %11666 = vmatpush1.bf16.msra.mxu0 %v11665_v27  ;;  %11730 = vmatpush1.bf16.msra.mxu1 %v11729_v28  ;;  %v8560_v27 = vld [vmem:[#allocation10 + $0x1e30] sm:$0xff] }
0x106c   : > { %11668 = vmatprep.subr.bf16.mxu0 %v11667_v37  ;;  %11732 = vmatprep.subr.bf16.mxu1 %v11731_v31  ;;  %v8568_v28 = vld [vmem:[#allocation10 + $0x1e70] sm:$0xff]  ;;  %v8577_v37 = vld [vmem:[#allocation10 + $0x1eb8] sm:$0xff] }
0x106d   : > { %v8585_v31 = vld [vmem:[#allocation10 + $0x1ef8] sm:$0xff]  ;;  %v11749_v38 = vpack.c.bf16 %v8568_v28, %v8560_v27 }
0x106e   : > { %v11751_v35 = vpack.c.bf16 %v8585_v31, %v8577_v37 }
0x106f   : > { %11670 = vmatpush1.bf16.msra.mxu0 %v11669_v40  ;;  %11734 = vmatpush1.bf16.msra.mxu1 %v11733_v63  ;;  %v8576_v40 = vld [vmem:[#allocation10 + $0x1eb0] sm:$0xff] }
0x1070   : > { %11672 = vmatprep.subr.bf16.mxu0 %v11671_v59  ;;  %11736 = vmatprep.subr.bf16.mxu1 %v11735_v18  ;;  %v8584_v63 = vld [vmem:[#allocation10 + $0x1ef0] sm:$0xff]  ;;  %v8593_v59 = vld [vmem:[#allocation10 + $0x1f38] sm:$0xff] }
0x1071   : > { %v8601_v18 = vld [vmem:[#allocation10 + $0x1f78] sm:$0xff]  ;;  %v11753_v17 = vpack.c.bf16 %v8584_v63, %v8576_v40 }
0x1072   : > { %v11755_v45 = vpack.c.bf16 %v8601_v18, %v8593_v59  ;;  %v8993_v18 = vsub.s32 6, %v12463_v4 }
0x1073   : > { %11674 = vmatpush1.bf16.msra.mxu0 %v11673_v57  ;;  %11738 = vmatpush1.bf16.msra.mxu1 %v11737_v50  ;;  %v8592_v57 = vld [vmem:[#allocation10 + $0x1f30] sm:$0xff] }
0x1074   : > { %11676 = vmatprep.subr.bf16.mxu0 %v11675_v3  ;;  %11740 = vmatprep.subr.bf16.mxu1 %v11739_v42  ;;  %v8600_v50 = vld [vmem:[#allocation10 + $0x1f70] sm:$0xff]  ;;  %v8609_v3 = vld [vmem:[#allocation10 + $0x1fb8] sm:$0xff] }
0x1075   : > { %v8617_v42 = vld [vmem:[#allocation10 + $0x1ff8] sm:$0xff]  ;;  %v11757_v11 = vpack.c.bf16 %v8600_v50, %v8592_v57 }
0x1076   : > { %v11759_v56 = vpack.c.bf16 %v8617_v42, %v8609_v3  ;;  %v9025_v3 = vld [vmem:[#allocation2] sm:$0x1] }
0x1077   : > { %11678 = vmatpush1.bf16.msra.mxu0 %v11677_v58  ;;  %11742 = vmatpush1.bf16.msra.mxu1 %v11741_v61  ;;  %v8608_v58 = vld [vmem:[#allocation10 + $0x1fb0] sm:$0xff] }
0x1078   : > { %11680 = vmatprep.subr.bf16.mxu0 %v11679_v13  ;;  %11744 = vmatprep.subr.bf16.mxu1 %v11743_v0  ;;  %v8616_v61 = vld [vmem:[#allocation10 + $0x1ff0] sm:$0xff] }
0x1079   : > { %v11761_v52 = vpack.c.bf16 %v8616_v61, %v8608_v58 }
0x107b   : > { %11682 = vmatpush1.bf16.msra.mxu0 %v11681_v21  ;;  %11746 = vmatpush1.bf16.msra.mxu1 %v11745_v36 }
0x107c   : > { %11684 = vmatprep.subr.bf16.mxu0 %v11683_v22  ;;  %11748 = vmatprep.subr.bf16.mxu1 %v11747_v34 }
0x107f   : > { %11686 = vmatpush1.bf16.msra.mxu0 %v11685_v55  ;;  %11750 = vmatpush1.bf16.msra.mxu1 %v11749_v38 }
0x1080   : > { %11688 = vmatprep.subr.bf16.mxu0 %v11687_v26  ;;  %11752 = vmatprep.subr.bf16.mxu1 %v11751_v35 }
0x1083   : > { %11690 = vmatpush1.bf16.msra.mxu0 %v11689_v54  ;;  %11754 = vmatpush1.bf16.msra.mxu1 %v11753_v17 }
0x1084   : > { %11692 = vmatprep.subr.bf16.mxu0 %v11691_v48  ;;  %11756 = vmatprep.subr.bf16.mxu1 %v11755_v45 }
0x1087   : > { %11694 = vmatpush1.bf16.msra.mxu0 %v11693_v6  ;;  %11758 = vmatpush1.bf16.msra.mxu1 %v11757_v11 }
0x1088   : > { %11696 = vmatprep.subr.bf16.mxu0 %v11695_v20  ;;  %11760 = vmatprep.subr.bf16.mxu1 %v11759_v56 }
0x108b   : > { %11698 = vmatpush1.bf16.msra.mxu0 %v11697_v60  ;;  %11762 = vmatpush1.bf16.msra.mxu1 %v11761_v52 }
0x108e   : > { %8825 = vmatmul.mubr.f32.vlgmr.msra.gmra.mrb[50].mxu0 %v13078_v33  ;;  %8896 = vmatmul.mubr.f32.vlgmr.msra.gmra.mrb[74].mxu1 %v13078_v33 }
0x1121   : > { %v8684_v13 = vpop.f32.mrb[48].mxu0  ;;  %v8755_v0 = vpop.f32.mrb[72].mxu1 }
0x1122   : > { %v8686_v1 = vpop.f32.mrb[49].mxu0  ;;  %v8757_v7 = vpop.f32.mrb[73].mxu1 }
0x1123   : > { %v8910_v9 = vcombine.low %v8684_v13, %v8686_v1  ;;  %v8911_v51 = vcombine.low %v8755_v0, %v8757_v7 }
0x1125   : > { %v8920_v14 = vrot.slane %v8910_v9, %v13023_v62  ;;  %v8927_v15 = vrot.slane %v8911_v51, %v13023_v62 }
0x1127   : > { %v8942_v21 = vcombine.low %v8920_v14, %v8927_v15 }
0x1129   : > { %v8950_v30 = vrot.slane %v8942_v21, %v13023_v62 }
0x1161   : > { %v8826_v36 = vpop.f32.mrb[50].mxu0  ;;  %v8897_v23 = vpop.f32.mrb[74].mxu1 }
0x1162   : > { %v8828_v25 = vpop.f32.mrb[51].mxu0  ;;  %v8899_v22 = vpop.f32.mrb[75].mxu1 }
0x1163   : > { %v8912_v34 = vcombine.low %v8826_v36, %v8828_v25  ;;  %v8913_v27 = vcombine.low %v8897_v23, %v8899_v22 }
0x1165   : > { %v8934_v28 = vrot.slane %v8912_v34, %v13023_v62  ;;  %v8941_v33 = vrot.slane %v8913_v27, %v13023_v62 }
0x1167   : > { %v8943_v29 = vcombine.low %v8934_v28, %v8941_v33 }
0x1169   : > { %v8957_v37 = vrot.slane %v8943_v29, %v13023_v62 }
0x116b   : > { %v8958_v31 = vcombine.low %v8950_v30, %v8957_v37 }
0x116d   : > { %v8960_v55 = vadd.f32 %v8958_v31, %v13085_v16 }
0x116f   : > { %vm8961_vm1 = vcmp.ge.f32.partialorder %v8960_v55, 0.0  ;;  %v8962_v38 = vmul.f32 0.01, %v8960_v55 }
0x1171   : > { %v8963_v10 = vsel %vm8961_vm1, %v8960_v55, %v8962_v38 }
0x1172   : > { %v8965_v26 = vmul.f32 %v8964_v49, %v8963_v10 }
0x1174   : > { %v8970_v35 = vrot.slane %v8965_v26, %v12797_v24  ;;  %v8974_v40 = vrot.slane %v8965_v26, %v12807_v46  ;;  %v8978_v63 = vrot.slane %v8965_v26, %v12803_v44  ;;  %v8982_v41 = vrot.slane %v8965_v26, %v12800_v43 }
0x1175   : > { %v8986_v16 = vrot.slane %v8965_v26, %v2520_v5  ;;  %v8990_v24 = vrot.slane %v8965_v26, %v2524_v12  ;;  %v8997_v44 = vsub.s32 7, %v12463_v4  ;;  %v8994_v47 = vrot.slane %v8965_v26, %v8993_v18 }
0x1176   : > { %v9008_v19 = vsel %vm9007_vm9, %v8970_v35, 0.0  ;;  %v9009_v62 = vsel %vm9007_vm9, %v8974_v40, 0.0  ;;  %v9011_v54 = vsel %vm9007_vm9, %v8978_v63, 0.0  ;;  %v9013_v43 = vsel %vm9007_vm9, %v8982_v41, 0.0 }
0x1177   : > { %v9010_v59 = vadd.f32 %v9009_v62, %v9008_v19  ;;  %v9015_v39 = vsel %vm9007_vm9, %v8986_v16, 0.0  ;;  %v8998_v45 = vrot.slane %v8965_v26, %v8997_v44  ;;  %v9017_v5 = vsel %vm9007_vm9, %v8990_v24, 0.0 }
0x1178   : > { %v9019_v50 = vsel %vm9007_vm9, %v8994_v47, 0.0 }
0x1179   : > { %v9012_v17 = vadd.f32 %v9011_v54, %v9010_v59  ;;  %v9021_v2 = vsel %vm9007_vm9, %v8998_v45, 0.0 }
0x117b   : > { %v9014_v46 = vadd.f32 %v9013_v43, %v9012_v17 }
0x117d   : > { %v9016_v48 = vadd.f32 %v9015_v39, %v9014_v46 }
0x117f   : > { %v9018_v57 = vadd.f32 %v9017_v5, %v9016_v48 }
0x1181   : > { %v9020_v8 = vadd.f32 %v9019_v50, %v9018_v57 }
0x1183   : > { %v9022_v12 = vadd.f32 %v9021_v2, %v9020_v8 }
0x1185   : > { %9023 = vadd.xlane.f32.xlu0 %v9022_v12 }
0x1212   : > { %v9024_v4 = vpop.xlane.xlu0 %9023 }
0x1213   : > { %v9026_v42 = vadd.f32 %v9025_v3, %v9024_v4 }
0x1215   : > { %9028 = vst.msk [vmem:[%s424_s21] sm:$0x1] %vm9027_vm10, %v9026_v42 }
0x1216 PF: > { %s25_s11 = sadd.s32 1, %s12179_s11  }
0x1217   : > { %p22_p11 = scmp.ge.s32.totalorder %s25_s11, 4  }
0x1219   :  { %24 = sbr.rel (!%p22_p11) target bundleno = 7 (0x7), region = 126 }
0x1220   :  { %9046 = vsyncpa [#allocation4], 1 }
0x1221   :  { %9048 = vsyncpa [#allocation4 + $0x1], 1 }
0x1222   :  { %9049 = vsyncpa [#allocation6], 1 }
0x1223   :  { %9050 = vsyncpa [#allocation9], 1 }
0x1224   :  { %9051 = vsyncpa [#allocation12], 1 }

</bundles_post_ra>
